<compile_context>
chip_gen: v7x
topology: tpu7x:2x2x1
jax: 0.10.0
libtpu: 0.0.40
codegen_flags: <defaults>
</compile_context>

<pallas_src>
import functools
import math

import jax
import jax.numpy as jnp
from jax.experimental import pallas as pl
from jax.experimental.pallas import tpu as pltpu

# ----- scaled-down ImageToLatexModel hyper-parameters -----
VOCAB = 50
VOCAB_PAD = 128    # output head padded to a full 128-lane store
HID = 32           # hidden_dim (decoder / ViT projection output)
VIT_DIM = 32       # ViT encoder hidden size (768 in the real model)
VIT_HEADS = 4
VIT_LAYERS = 2
VIT_FF = 64        # ViT intermediate size
DEC_HEADS = 8      # num_heads of ImageToLatexModel
DEC_LAYERS = 2     # num_layers (6 in the real model)
DEC_FF = 64        # TransformerDecoderLayer dim_feedforward
PATCH = 4
IMG = 16
CH = 3
MAX_LEN = 500
LN_EPS_VIT = 1e-12     # HF ViTConfig.layer_norm_eps
LN_EPS_DEC = 1e-5      # torch.nn.LayerNorm default


# ========================= in-kernel building blocks (pure jnp on VMEM values) =========================

def _layer_norm(x, g, b, eps):
    mu = jnp.mean(x, axis=-1, keepdims=True)
    xc = x - mu
    var = jnp.mean(xc * xc, axis=-1, keepdims=True)
    return xc * jax.lax.rsqrt(var + eps) * g + b


def _erf(x):
    # Abramowitz & Stegun 7.1.26 rational approximation (|err| < 1.5e-7 ~ f32 eps).
    # Keeps HF ViT's exact-GELU semantics while using only exp / div (EUP-friendly,
    # guaranteed Mosaic lowering).
    a1, a2, a3, a4, a5 = 0.254829592, -0.284496736, 1.421413741, -1.453152027, 1.061405429
    pp = 0.3275911
    ax = jnp.abs(x)
    t = 1.0 / (1.0 + pp * ax)
    poly = ((((a5 * t + a4) * t + a3) * t + a2) * t + a1) * t
    y = 1.0 - poly * jnp.exp(-ax * ax)
    return jnp.where(x < 0.0, -y, y)


def _gelu_exact(x):
    return 0.5 * x * (1.0 + _erf(x * (1.0 / math.sqrt(2.0))))


def _attention_core(q, k, v, wo, bo, num_heads, mask):
    """Per-head softmax attention + output projection; heads unrolled at trace time."""
    d = q.shape[-1]
    dh = d // num_heads
    scale = 1.0 / math.sqrt(dh)
    out = None
    for h in range(num_heads):
        sl = slice(h * dh, (h + 1) * dh)
        s = jax.lax.dot_general(q[:, sl], k[:, sl], (((1,), (1,)), ((), ())),
                                preferred_element_type=jnp.float32) * scale
        if mask is not None:
            s = s + mask
        s = s - jnp.max(s, axis=-1, keepdims=True)
        e = jnp.exp(s)
        pr = e * pl.reciprocal(jnp.sum(e, axis=-1, keepdims=True), approx=True)
        ctx = jnp.dot(pr, v[:, sl], preferred_element_type=jnp.float32)
        contrib = jnp.dot(ctx, wo[sl, :], preferred_element_type=jnp.float32)
        out = contrib if out is None else out + contrib
    return out + bo


def _self_attention(x, wqkv, bqkv, wo, bo, num_heads, mask):
    d = x.shape[-1]
    qkv = jnp.dot(x, wqkv, preferred_element_type=jnp.float32) + bqkv   # fused QKV matmul
    return _attention_core(qkv[:, :d], qkv[:, d:2 * d], qkv[:, 2 * d:], wo, bo, num_heads, mask)


def _cross_attention(x, mem, wq, bq, wkv, bkv, wo, bo, num_heads):
    d = x.shape[-1]
    q = jnp.dot(x, wq, preferred_element_type=jnp.float32) + bq
    kv = jnp.dot(mem, wkv, preferred_element_type=jnp.float32) + bkv    # fused K/V matmul
    return _attention_core(q, kv[:, :d], kv[:, d:], wo, bo, num_heads, None)


# ========================= the single fused forward kernel =========================

def _fused_forward_kernel(patches_ref, tgt_emb_ref, mask_ref, *rest, treedef):
    param_refs, out_ref = rest[:-1], rest[-1]
    p = jax.tree_util.tree_unflatten(treedef, param_refs)
    f32 = jnp.float32

    # ================= ViT encoder =================
    patches = patches_ref[0]                                    # (S, C*P*P); row 0 = zeros (CLS slot)
    S = patches.shape[0]
    pe = jnp.dot(patches, p["patch_w"][...], preferred_element_type=f32) + p["patch_b"][...]
    is_cls = jax.lax.broadcasted_iota(jnp.int32, (S, 1), 0) == 0
    h = jnp.where(jnp.broadcast_to(is_cls, pe.shape),
                  jnp.broadcast_to(p["cls_token"][...], pe.shape), pe)
    h = h + p["pos_embed"][...]

    for l in range(VIT_LAYERS):                                 # pre-LN ViT blocks (unrolled)
        x1 = _layer_norm(h, p["vit_ln1_g"][l], p["vit_ln1_b"][l], LN_EPS_VIT)
        h = h + _self_attention(x1, p["vit_wqkv"][l], p["vit_bqkv"][l],
                                p["vit_wo"][l], p["vit_bo"][l], VIT_HEADS, None)
        x2 = _layer_norm(h, p["vit_ln2_g"][l], p["vit_ln2_b"][l], LN_EPS_VIT)
        ff = jnp.dot(x2, p["vit_wff1"][l], preferred_element_type=f32) + p["vit_bff1"][l]
        ff = _gelu_exact(ff)
        h = h + (jnp.dot(ff, p["vit_wff2"][l], preferred_element_type=f32) + p["vit_bff2"][l])

    h = _layer_norm(h, p["vit_lnf_g"][...], p["vit_lnf_b"][...], LN_EPS_VIT)
    memory = jnp.dot(h, p["proj_w"][...], preferred_element_type=f32) + p["proj_b"][...]  # (S, HID)

    # ================= Transformer decoder (post-LN, eval mode) =================
    x = tgt_emb_ref[0]                                          # (T, HID): token emb + pos enc (glue)
    mask = mask_ref[...]                                        # (T, T) additive causal mask
    for l in range(DEC_LAYERS):
        sa = _self_attention(x, p["dec_sa_wqkv"][l], p["dec_sa_bqkv"][l],
                             p["dec_sa_wo"][l], p["dec_sa_bo"][l], DEC_HEADS, mask)
        x = _layer_norm(x + sa, p["dec_ln1_g"][l], p["dec_ln1_b"][l], LN_EPS_DEC)
        ca = _cross_attention(x, memory, p["dec_ca_wq"][l], p["dec_ca_bq"][l],
                              p["dec_ca_wkv"][l], p["dec_ca_bkv"][l],
                              p["dec_ca_wo"][l], p["dec_ca_bo"][l], DEC_HEADS)
        x = _layer_norm(x + ca, p["dec_ln2_g"][l], p["dec_ln2_b"][l], LN_EPS_DEC)
        ff = jnp.maximum(jnp.dot(x, p["dec_wff1"][l], preferred_element_type=f32)
                         + p["dec_bff1"][l], 0.0)
        ff = jnp.dot(ff, p["dec_wff2"][l], preferred_element_type=f32) + p["dec_bff2"][l]
        x = _layer_norm(x + ff, p["dec_ln3_g"][l], p["dec_ln3_b"][l], LN_EPS_DEC)

    logits = jnp.dot(x, p["out_w"][...], preferred_element_type=f32) + p["out_b"][...]  # (T, 128)
    out_ref[0] = logits.astype(out_ref.dtype)                   # lane-dense (128-wide) store


# ========================= parameter packing for the kernel =========================

def _pack_kernel_params(p):
    """Stack per-layer weights to (L, ...), fuse QKV / KV, pad the output head to 128 lanes."""
    def as_bias(v):                     # (N,) -> (1, N)
        return v.reshape(1, -1)

    def stack_w(layers, name):          # [(K, N)] -> (L, K, N)
        return jnp.stack([lyr[name] for lyr in layers], axis=0)

    def stack_b(layers, name):          # [(N,)] -> (L, 1, N)
        return jnp.stack([lyr[name] for lyr in layers], axis=0)[:, None, :]

    vl, dl = p["vit_layers"], p["dec_layers"]
    kp = {
        "patch_w": p["patch_w"], "patch_b": as_bias(p["patch_b"]),
        "cls_token": p["cls_token"].reshape(1, VIT_DIM),
        "pos_embed": p["pos_embed"].reshape(-1, VIT_DIM),
        # ViT encoder layers (fused QKV)
        "vit_ln1_g": stack_b(vl, "ln1_g"), "vit_ln1_b": stack_b(vl, "ln1_b"),
        "vit_wqkv": jnp.stack([jnp.concatenate([l["wq"], l["wk"], l["wv"]], axis=1) for l in vl]),
        "vit_bqkv": jnp.stack([jnp.concatenate([l["bq"], l["bk"], l["bv"]]) for l in vl])[:, None, :],
        "vit_wo": stack_w(vl, "wo"), "vit_bo": stack_b(vl, "bo"),
        "vit_ln2_g": stack_b(vl, "ln2_g"), "vit_ln2_b": stack_b(vl, "ln2_b"),
        "vit_wff1": stack_w(vl, "w_ff1"), "vit_bff1": stack_b(vl, "b_ff1"),
        "vit_wff2": stack_w(vl, "w_ff2"), "vit_bff2": stack_b(vl, "b_ff2"),
        "vit_lnf_g": as_bias(p["ln_f_g"]), "vit_lnf_b": as_bias(p["ln_f_b"]),
        "proj_w": p["proj_w"], "proj_b": as_bias(p["proj_b"]),
        # decoder layers (fused QKV self-attn, fused KV cross-attn)
        "dec_sa_wqkv": jnp.stack([jnp.concatenate([l["sa_wq"], l["sa_wk"], l["sa_wv"]], axis=1) for l in dl]),
        "dec_sa_bqkv": jnp.stack([jnp.concatenate([l["sa_bq"], l["sa_bk"], l["sa_bv"]]) for l in dl])[:, None, :],
        "dec_sa_wo": stack_w(dl, "sa_wo"), "dec_sa_bo": stack_b(dl, "sa_bo"),
        "dec_ln1_g": stack_b(dl, "ln1_g"), "dec_ln1_b": stack_b(dl, "ln1_b"),
        "dec_ca_wq": stack_w(dl, "ca_wq"), "dec_ca_bq": stack_b(dl, "ca_bq"),
        "dec_ca_wkv": jnp.stack([jnp.concatenate([l["ca_wk"], l["ca_wv"]], axis=1) for l in dl]),
        "dec_ca_bkv": jnp.stack([jnp.concatenate([l["ca_bk"], l["ca_bv"]]) for l in dl])[:, None, :],
        "dec_ca_wo": stack_w(dl, "ca_wo"), "dec_ca_bo": stack_b(dl, "ca_bo"),
        "dec_ln2_g": stack_b(dl, "ln2_g"), "dec_ln2_b": stack_b(dl, "ln2_b"),
        "dec_wff1": stack_w(dl, "ff_w1"), "dec_bff1": stack_b(dl, "ff_b1"),
        "dec_wff2": stack_w(dl, "ff_w2"), "dec_bff2": stack_b(dl, "ff_b2"),
        "dec_ln3_g": stack_b(dl, "ln3_g"), "dec_ln3_b": stack_b(dl, "ln3_b"),
        # output head padded 50 -> 128 lanes; padded columns are exactly zero, sliced off in glue
        "out_w": jnp.pad(p["out_w"], ((0, 0), (0, VOCAB_PAD - VOCAB))),
        "out_b": jnp.pad(p["out_b"], (0, VOCAB_PAD - VOCAB)).reshape(1, -1),
    }
    return kp


# ========================= model wrapper (one pallas_call) =========================

def image_to_latex_forward(params, x, tgt, tgt_mask):
    # TODO(synk): dropout layers are identity here (inference / eval mode).
    B, C, H, W = x.shape
    Hp, Wp = H // PATCH, W // PATCH
    Np = Hp * Wp
    S = Np + 1
    T = tgt.shape[1]
    CPP = C * PATCH * PATCH

    # ---- plain-JAX glue: pure layout / gather prep, no fusable compute ----
    # Conv2d(kernel=stride=PATCH) as a patch matmul; patch flattened in (C, ph, pw) order.
    patches = x.reshape(B, C, Hp, PATCH, Wp, PATCH).transpose(0, 2, 4, 1, 3, 5)
    patches = patches.reshape(B, Np, CPP)
    # Prepend a zero row per batch: the CLS slot (selected inside the kernel via iota mask).
    patches = jnp.concatenate([jnp.zeros((B, 1, CPP), jnp.float32), patches], axis=1)   # (B, S, CPP)
    # TODO(synk): token-embedding gather + sinusoidal PE add stay in XLA glue (dynamic gather).
    tgt_emb = params["tok_emb"][tgt] + params["pe_table"][:T][None, :, :]               # (B, T, HID)

    kp = _pack_kernel_params(params)
    leaves, treedef = jax.tree_util.tree_flatten(kp)

    def _const_spec(a):
        return pl.BlockSpec(a.shape, lambda b, nd=a.ndim: (0,) * nd)

    out = pl.pallas_call(
        functools.partial(_fused_forward_kernel, treedef=treedef),
        out_shape=jax.ShapeDtypeStruct((B, T, VOCAB_PAD), jnp.float32),
        grid=(B,),
        in_specs=[pl.BlockSpec((1, S, CPP), lambda b: (b, 0, 0)),
                  pl.BlockSpec((1, T, HID), lambda b: (b, 0, 0)),
                  pl.BlockSpec((T, T), lambda b: (0, 0))]
                 + [_const_spec(a) for a in leaves],
        out_specs=pl.BlockSpec((1, T, VOCAB_PAD), lambda b: (b, 0, 0)),
        compiler_params=pltpu.CompilerParams(dimension_semantics=("parallel",)),
    )(patches, tgt_emb, tgt_mask, *leaves)
    return out[:, :, :VOCAB]


# ========================= deterministic parameter init =========================

def init_params(key):
    keys = iter(jax.random.split(key, 256))

    def w(shape, scale=0.02):
        return (scale * jax.random.normal(next(keys), shape)).astype(jnp.float32)

    zeros = lambda s: jnp.zeros(s, jnp.float32)
    ones = lambda s: jnp.ones(s, jnp.float32)

    Np = (IMG // PATCH) ** 2
    p = {
        "patch_w": w((CH * PATCH * PATCH, VIT_DIM)), "patch_b": zeros((VIT_DIM,)),
        "cls_token": w((1, 1, VIT_DIM)),
        "pos_embed": w((1, Np + 1, VIT_DIM)),
        "ln_f_g": ones((VIT_DIM,)), "ln_f_b": zeros((VIT_DIM,)),
        "proj_w": w((VIT_DIM, HID)), "proj_b": zeros((HID,)),
        "tok_emb": w((VOCAB, HID), scale=1.0),
        "out_w": w((HID, VOCAB)), "out_b": zeros((VOCAB,)),
    }

    # sinusoidal PositionalEncoding buffer
    position = jnp.arange(MAX_LEN, dtype=jnp.float32)[:, None]
    div_term = jnp.exp(jnp.arange(0, HID, 2, dtype=jnp.float32) * (-math.log(10000.0) / HID))
    pe = jnp.zeros((MAX_LEN, HID), jnp.float32)
    pe = pe.at[:, 0::2].set(jnp.sin(position * div_term))
    pe = pe.at[:, 1::2].set(jnp.cos(position * div_term))
    p["pe_table"] = pe

    p["vit_layers"] = []
    for _ in range(VIT_LAYERS):
        p["vit_layers"].append(dict(
            ln1_g=ones((VIT_DIM,)), ln1_b=zeros((VIT_DIM,)),
            wq=w((VIT_DIM, VIT_DIM)), bq=zeros((VIT_DIM,)),
            wk=w((VIT_DIM, VIT_DIM)), bk=zeros((VIT_DIM,)),
            wv=w((VIT_DIM, VIT_DIM)), bv=zeros((VIT_DIM,)),
            wo=w((VIT_DIM, VIT_DIM)), bo=zeros((VIT_DIM,)),
            ln2_g=ones((VIT_DIM,)), ln2_b=zeros((VIT_DIM,)),
            w_ff1=w((VIT_DIM, VIT_FF)), b_ff1=zeros((VIT_FF,)),
            w_ff2=w((VIT_FF, VIT_DIM)), b_ff2=zeros((VIT_DIM,)),
        ))

    p["dec_layers"] = []
    for _ in range(DEC_LAYERS):
        p["dec_layers"].append(dict(
            sa_wq=w((HID, HID)), sa_bq=zeros((HID,)),
            sa_wk=w((HID, HID)), sa_bk=zeros((HID,)),
            sa_wv=w((HID, HID)), sa_bv=zeros((HID,)),
            sa_wo=w((HID, HID)), sa_bo=zeros((HID,)),
            ln1_g=ones((HID,)), ln1_b=zeros((HID,)),
            ca_wq=w((HID, HID)), ca_bq=zeros((HID,)),
            ca_wk=w((HID, HID)), ca_bk=zeros((HID,)),
            ca_wv=w((HID, HID)), ca_bv=zeros((HID,)),
            ca_wo=w((HID, HID)), ca_bo=zeros((HID,)),
            ln2_g=ones((HID,)), ln2_b=zeros((HID,)),
            ff_w1=w((HID, DEC_FF)), ff_b1=zeros((DEC_FF,)),
            ff_w2=w((DEC_FF, HID)), ff_b2=zeros((HID,)),
            ln3_g=ones((HID,)), ln3_b=zeros((HID,)),
        ))
    return p


if __name__ == "__main__":
    key = jax.random.PRNGKey(0)
    pkey, xkey, tkey = jax.random.split(key, 3)
    params = init_params(pkey)

    B, T = 2, 8
    x = jax.random.normal(xkey, (B, CH, IMG, IMG), jnp.float32)        # NCHW pixels
    tgt = jax.random.randint(tkey, (B, T), 0, VOCAB, dtype=jnp.int32)  # token ids
    # standard causal tgt_mask (0 on/below diag, -inf above), as generate_square_subsequent_mask
    tgt_mask = jnp.triu(jnp.full((T, T), -jnp.inf, jnp.float32), k=1)

    fwd = jax.jit(image_to_latex_forward)
    logits = fwd(params, x, tgt, tgt_mask)
    jax.block_until_ready(logits)

    assert logits.shape == (B, T, VOCAB), logits.shape
    assert bool(jnp.all(jnp.isfinite(logits)))
    print("KERNEL_OK")
</pallas_src>

<mosaic_0001>
module attributes {stable_mosaic.version = 11 : i64} {
  func.func @_fused_forward_kernel(%arg0: i32, %arg1: memref<1x17x48xf32, #tpu.memory_space<vmem>>, %arg2: memref<1x8x32xf32, #tpu.memory_space<vmem>>, %arg3: memref<8x8xf32, #tpu.memory_space<vmem>>, %arg4: memref<1x32xf32, #tpu.memory_space<vmem>>, %arg5: memref<2x1x64xf32, #tpu.memory_space<vmem>>, %arg6: memref<2x1x32xf32, #tpu.memory_space<vmem>>, %arg7: memref<2x1x64xf32, #tpu.memory_space<vmem>>, %arg8: memref<2x1x32xf32, #tpu.memory_space<vmem>>, %arg9: memref<2x1x32xf32, #tpu.memory_space<vmem>>, %arg10: memref<2x32x64xf32, #tpu.memory_space<vmem>>, %arg11: memref<2x32x32xf32, #tpu.memory_space<vmem>>, %arg12: memref<2x32x32xf32, #tpu.memory_space<vmem>>, %arg13: memref<2x1x32xf32, #tpu.memory_space<vmem>>, %arg14: memref<2x1x32xf32, #tpu.memory_space<vmem>>, %arg15: memref<2x1x32xf32, #tpu.memory_space<vmem>>, %arg16: memref<2x1x32xf32, #tpu.memory_space<vmem>>, %arg17: memref<2x1x32xf32, #tpu.memory_space<vmem>>, %arg18: memref<2x1x32xf32, #tpu.memory_space<vmem>>, %arg19: memref<2x1x32xf32, #tpu.memory_space<vmem>>, %arg20: memref<2x1x96xf32, #tpu.memory_space<vmem>>, %arg21: memref<2x32x32xf32, #tpu.memory_space<vmem>>, %arg22: memref<2x32x96xf32, #tpu.memory_space<vmem>>, %arg23: memref<2x32x64xf32, #tpu.memory_space<vmem>>, %arg24: memref<2x64x32xf32, #tpu.memory_space<vmem>>, %arg25: memref<1x128xf32, #tpu.memory_space<vmem>>, %arg26: memref<32x128xf32, #tpu.memory_space<vmem>>, %arg27: memref<1x32xf32, #tpu.memory_space<vmem>>, %arg28: memref<48x32xf32, #tpu.memory_space<vmem>>, %arg29: memref<17x32xf32, #tpu.memory_space<vmem>>, %arg30: memref<1x32xf32, #tpu.memory_space<vmem>>, %arg31: memref<32x32xf32, #tpu.memory_space<vmem>>, %arg32: memref<2x1x64xf32, #tpu.memory_space<vmem>>, %arg33: memref<2x1x32xf32, #tpu.memory_space<vmem>>, %arg34: memref<2x1x32xf32, #tpu.memory_space<vmem>>, %arg35: memref<2x1x96xf32, #tpu.memory_space<vmem>>, %arg36: memref<2x1x32xf32, #tpu.memory_space<vmem>>, %arg37: memref<2x1x32xf32, #tpu.memory_space<vmem>>, %arg38: memref<2x1x32xf32, #tpu.memory_space<vmem>>, %arg39: memref<2x1x32xf32, #tpu.memory_space<vmem>>, %arg40: memref<1x32xf32, #tpu.memory_space<vmem>>, %arg41: memref<1x32xf32, #tpu.memory_space<vmem>>, %arg42: memref<2x32x64xf32, #tpu.memory_space<vmem>>, %arg43: memref<2x64x32xf32, #tpu.memory_space<vmem>>, %arg44: memref<2x32x32xf32, #tpu.memory_space<vmem>>, %arg45: memref<2x32x96xf32, #tpu.memory_space<vmem>>, %arg46: memref<1x8x128xf32, #tpu.memory_space<vmem>>) attributes {dimension_semantics = [#tpu.dimension_semantics<parallel>], iteration_bounds = array<i64: 2>, scalar_prefetch = 0 : i64, scratch_operands = 0 : i64, tpu.core_type = #tpu.core_type<tc>, window_params = [{transform_indices = @transform_0, window_bounds = array<i64: 1, 17, 48>}, {transform_indices = @transform_1, window_bounds = array<i64: 1, 8, 32>}, {pipeline_mode = #tpu.pipeline_mode<synchronous>, transform_indices = @transform_2, window_bounds = array<i64: 8, 8>}, {pipeline_mode = #tpu.pipeline_mode<synchronous>, transform_indices = @transform_3, window_bounds = array<i64: 1, 32>}, {pipeline_mode = #tpu.pipeline_mode<synchronous>, transform_indices = @transform_4, window_bounds = array<i64: 2, 1, 64>}, {pipeline_mode = #tpu.pipeline_mode<synchronous>, transform_indices = @transform_5, window_bounds = array<i64: 2, 1, 32>}, {pipeline_mode = #tpu.pipeline_mode<synchronous>, transform_indices = @transform_6, window_bounds = array<i64: 2, 1, 64>}, {pipeline_mode = #tpu.pipeline_mode<synchronous>, transform_indices = @transform_7, window_bounds = array<i64: 2, 1, 32>}, {pipeline_mode = #tpu.pipeline_mode<synchronous>, transform_indices = @transform_8, window_bounds = array<i64: 2, 1, 32>}, {pipeline_mode = #tpu.pipeline_mode<synchronous>, transform_indices = @transform_9, window_bounds = array<i64: 2, 32, 64>}, {pipeline_mode = #tpu.pipeline_mode<synchronous>, transform_indices = @transform_10, window_bounds = array<i64: 2, 32, 32>}, {pipeline_mode = #tpu.pipeline_mode<synchronous>, transform_indices = @transform_11, window_bounds = array<i64: 2, 32, 32>}, {pipeline_mode = #tpu.pipeline_mode<synchronous>, transform_indices = @transform_12, window_bounds = array<i64: 2, 1, 32>}, {pipeline_mode = #tpu.pipeline_mode<synchronous>, transform_indices = @transform_13, window_bounds = array<i64: 2, 1, 32>}, {pipeline_mode = #tpu.pipeline_mode<synchronous>, transform_indices = @transform_14, window_bounds = array<i64: 2, 1, 32>}, {pipeline_mode = #tpu.pipeline_mode<synchronous>, transform_indices = @transform_15, window_bounds = array<i64: 2, 1, 32>}, {pipeline_mode = #tpu.pipeline_mode<synchronous>, transform_indices = @transform_16, window_bounds = array<i64: 2, 1, 32>}, {pipeline_mode = #tpu.pipeline_mode<synchronous>, transform_indices = @transform_17, window_bounds = array<i64: 2, 1, 32>}, {pipeline_mode = #tpu.pipeline_mode<synchronous>, transform_indices = @transform_18, window_bounds = array<i64: 2, 1, 32>}, {pipeline_mode = #tpu.pipeline_mode<synchronous>, transform_indices = @transform_19, window_bounds = array<i64: 2, 1, 96>}, {pipeline_mode = #tpu.pipeline_mode<synchronous>, transform_indices = @transform_20, window_bounds = array<i64: 2, 32, 32>}, {pipeline_mode = #tpu.pipeline_mode<synchronous>, transform_indices = @transform_21, window_bounds = array<i64: 2, 32, 96>}, {pipeline_mode = #tpu.pipeline_mode<synchronous>, transform_indices = @transform_22, window_bounds = array<i64: 2, 32, 64>}, {pipeline_mode = #tpu.pipeline_mode<synchronous>, transform_indices = @transform_23, window_bounds = array<i64: 2, 64, 32>}, {pipeline_mode = #tpu.pipeline_mode<synchronous>, transform_indices = @transform_24, window_bounds = array<i64: 1, 128>}, {pipeline_mode = #tpu.pipeline_mode<synchronous>, transform_indices = @transform_25, window_bounds = array<i64: 32, 128>}, {pipeline_mode = #tpu.pipeline_mode<synchronous>, transform_indices = @transform_26, window_bounds = array<i64: 1, 32>}, {pipeline_mode = #tpu.pipeline_mode<synchronous>, transform_indices = @transform_27, window_bounds = array<i64: 48, 32>}, {pipeline_mode = #tpu.pipeline_mode<synchronous>, transform_indices = @transform_28, window_bounds = array<i64: 17, 32>}, {pipeline_mode = #tpu.pipeline_mode<synchronous>, transform_indices = @transform_29, window_bounds = array<i64: 1, 32>}, {pipeline_mode = #tpu.pipeline_mode<synchronous>, transform_indices = @transform_30, window_bounds = array<i64: 32, 32>}, {pipeline_mode = #tpu.pipeline_mode<synchronous>, transform_indices = @transform_31, window_bounds = array<i64: 2, 1, 64>}, {pipeline_mode = #tpu.pipeline_mode<synchronous>, transform_indices = @transform_32, window_bounds = array<i64: 2, 1, 32>}, {pipeline_mode = #tpu.pipeline_mode<synchronous>, transform_indices = @transform_33, window_bounds = array<i64: 2, 1, 32>}, {pipeline_mode = #tpu.pipeline_mode<synchronous>, transform_indices = @transform_34, window_bounds = array<i64: 2, 1, 96>}, {pipeline_mode = #tpu.pipeline_mode<synchronous>, transform_indices = @transform_35, window_bounds = array<i64: 2, 1, 32>}, {pipeline_mode = #tpu.pipeline_mode<synchronous>, transform_indices = @transform_36, window_bounds = array<i64: 2, 1, 32>}, {pipeline_mode = #tpu.pipeline_mode<synchronous>, transform_indices = @transform_37, window_bounds = array<i64: 2, 1, 32>}, {pipeline_mode = #tpu.pipeline_mode<synchronous>, transform_indices = @transform_38, window_bounds = array<i64: 2, 1, 32>}, {pipeline_mode = #tpu.pipeline_mode<synchronous>, transform_indices = @transform_39, window_bounds = array<i64: 1, 32>}, {pipeline_mode = #tpu.pipeline_mode<synchronous>, transform_indices = @transform_40, window_bounds = array<i64: 1, 32>}, {pipeline_mode = #tpu.pipeline_mode<synchronous>, transform_indices = @transform_41, window_bounds = array<i64: 2, 32, 64>}, {pipeline_mode = #tpu.pipeline_mode<synchronous>, transform_indices = @transform_42, window_bounds = array<i64: 2, 64, 32>}, {pipeline_mode = #tpu.pipeline_mode<synchronous>, transform_indices = @transform_43, window_bounds = array<i64: 2, 32, 32>}, {pipeline_mode = #tpu.pipeline_mode<synchronous>, transform_indices = @transform_44, window_bounds = array<i64: 2, 32, 96>}, {transform_indices = @transform_45, window_bounds = array<i64: 1, 8, 128>}]} {
    %c0 = arith.constant 0 : index
    %c0_0 = arith.constant 0 : index
    %c0_1 = arith.constant 0 : index
    %0 = vector.load %arg1[%c0, %c0_0, %c0_1] : memref<1x17x48xf32, #tpu.memory_space<vmem>>, vector<1x17x48xf32>
    %1 = vector.shape_cast %0 : vector<1x17x48xf32> to vector<17x48xf32>
    %c0_2 = arith.constant 0 : index
    %c0_3 = arith.constant 0 : index
    %2 = vector.load %arg28[%c0_2, %c0_3] : memref<48x32xf32, #tpu.memory_space<vmem>>, vector<48x32xf32>
    %cst = arith.constant dense<0.000000e+00> : vector<17x32xf32>
    %3 = tpu.matmul %1, %2, %cst {dimension_numbers = #tpu.dot_dimension_numbers<[1], [0], [0], [1], [0, 0, 1, 1], [], []>} : vector<17x48xf32>, vector<48x32xf32>, vector<17x32xf32> -> vector<17x32xf32>
    %c0_4 = arith.constant 0 : index
    %c0_5 = arith.constant 0 : index
    %4 = vector.load %arg27[%c0_4, %c0_5] : memref<1x32xf32, #tpu.memory_space<vmem>>, vector<1x32xf32>
    %5 = vector.broadcast %4 : vector<1x32xf32> to vector<17x32xf32>
    %6 = arith.addf %3, %5 : vector<17x32xf32>
    %7 = tpu.iota {dimensions = array<i32: 0>} : vector<17x1xi32>
    %c0_i32 = arith.constant 0 : i32
    %8 = vector.broadcast %c0_i32 : i32 to vector<17x1xi32>
    %9 = arith.cmpi eq, %7, %8 : vector<17x1xi32>
    %10 = vector.shape_cast %9 : vector<17x1xi1> to vector<17x1xi1>
    %11 = vector.broadcast %10 : vector<17x1xi1> to vector<17x32xi1>
    %c0_6 = arith.constant 0 : index
    %c0_7 = arith.constant 0 : index
    %12 = vector.load %arg4[%c0_6, %c0_7] : memref<1x32xf32, #tpu.memory_space<vmem>>, vector<1x32xf32>
    %13 = vector.shape_cast %12 : vector<1x32xf32> to vector<1x32xf32>
    %14 = vector.broadcast %13 : vector<1x32xf32> to vector<17x32xf32>
    %15 = arith.select %11, %14, %6 : vector<17x32xi1>, vector<17x32xf32>
    %c0_8 = arith.constant 0 : index
    %c0_9 = arith.constant 0 : index
    %16 = vector.load %arg29[%c0_8, %c0_9] : memref<17x32xf32, #tpu.memory_space<vmem>>, vector<17x32xf32>
    %17 = arith.addf %15, %16 : vector<17x32xf32>
    %c0_10 = arith.constant 0 : index
    %c0_11 = arith.constant 0 : index
    %c0_12 = arith.constant 0 : index
    %18 = vector.load %arg37[%c0_10, %c0_11, %c0_12] : memref<2x1x32xf32, #tpu.memory_space<vmem>>, vector<1x1x32xf32>
    %19 = vector.shape_cast %18 : vector<1x1x32xf32> to vector<1x32xf32>
    %c0_13 = arith.constant 0 : index
    %c0_14 = arith.constant 0 : index
    %c0_15 = arith.constant 0 : index
    %20 = vector.load %arg36[%c0_13, %c0_14, %c0_15] : memref<2x1x32xf32, #tpu.memory_space<vmem>>, vector<1x1x32xf32>
    %21 = vector.shape_cast %20 : vector<1x1x32xf32> to vector<1x32xf32>
    %cst_16 = arith.constant dense<0.000000e+00> : vector<17xf32>
    %22 = vector.multi_reduction <add>, %17, %cst_16 [1] : vector<17x32xf32> to vector<17xf32>
    %23 = vector.shape_cast %22 : vector<17xf32> to vector<17x1xf32>
    %cst_17 = arith.constant 3.200000e+01 : f32
    %24 = vector.broadcast %cst_17 : f32 to vector<17x1xf32>
    %25 = arith.divf %23, %24 : vector<17x1xf32>
    %26 = vector.broadcast %25 : vector<17x1xf32> to vector<17x32xf32>
    %27 = arith.subf %17, %26 : vector<17x32xf32>
    %28 = arith.mulf %27, %27 : vector<17x32xf32>
    %cst_18 = arith.constant dense<0.000000e+00> : vector<17xf32>
    %29 = vector.multi_reduction <add>, %28, %cst_18 [1] : vector<17x32xf32> to vector<17xf32>
    %30 = vector.shape_cast %29 : vector<17xf32> to vector<17x1xf32>
    %cst_19 = arith.constant 3.200000e+01 : f32
    %31 = vector.broadcast %cst_19 : f32 to vector<17x1xf32>
    %32 = arith.divf %30, %31 : vector<17x1xf32>
    %cst_20 = arith.constant 9.99999996E-13 : f32
    %33 = vector.broadcast %cst_20 : f32 to vector<17x1xf32>
    %34 = arith.addf %32, %33 : vector<17x1xf32>
    %35 = math.rsqrt %34 : vector<17x1xf32>
    %36 = vector.broadcast %35 : vector<17x1xf32> to vector<17x32xf32>
    %37 = arith.mulf %27, %36 : vector<17x32xf32>
    %38 = vector.broadcast %19 : vector<1x32xf32> to vector<17x32xf32>
    %39 = arith.mulf %37, %38 : vector<17x32xf32>
    %40 = vector.broadcast %21 : vector<1x32xf32> to vector<17x32xf32>
    %41 = arith.addf %39, %40 : vector<17x32xf32>
    %c0_21 = arith.constant 0 : index
    %c0_22 = arith.constant 0 : index
    %c0_23 = arith.constant 0 : index
    %42 = vector.load %arg45[%c0_21, %c0_22, %c0_23] : memref<2x32x96xf32, #tpu.memory_space<vmem>>, vector<1x32x96xf32>
    %43 = vector.shape_cast %42 : vector<1x32x96xf32> to vector<32x96xf32>
    %c0_24 = arith.constant 0 : index
    %c0_25 = arith.constant 0 : index
    %c0_26 = arith.constant 0 : index
    %44 = vector.load %arg35[%c0_24, %c0_25, %c0_26] : memref<2x1x96xf32, #tpu.memory_space<vmem>>, vector<1x1x96xf32>
    %45 = vector.shape_cast %44 : vector<1x1x96xf32> to vector<1x96xf32>
    %c0_27 = arith.constant 0 : index
    %c0_28 = arith.constant 0 : index
    %c0_29 = arith.constant 0 : index
    %46 = vector.load %arg44[%c0_27, %c0_28, %c0_29] : memref<2x32x32xf32, #tpu.memory_space<vmem>>, vector<1x32x32xf32>
    %47 = vector.shape_cast %46 : vector<1x32x32xf32> to vector<32x32xf32>
    %c0_30 = arith.constant 0 : index
    %c0_31 = arith.constant 0 : index
    %c0_32 = arith.constant 0 : index
    %48 = vector.load %arg34[%c0_30, %c0_31, %c0_32] : memref<2x1x32xf32, #tpu.memory_space<vmem>>, vector<1x1x32xf32>
    %49 = vector.shape_cast %48 : vector<1x1x32xf32> to vector<1x32xf32>
    %cst_33 = arith.constant dense<0.000000e+00> : vector<17x96xf32>
    %50 = tpu.matmul %41, %43, %cst_33 {dimension_numbers = #tpu.dot_dimension_numbers<[1], [0], [0], [1], [0, 0, 1, 1], [], []>} : vector<17x32xf32>, vector<32x96xf32>, vector<17x96xf32> -> vector<17x96xf32>
    %51 = vector.broadcast %45 : vector<1x96xf32> to vector<17x96xf32>
    %52 = arith.addf %50, %51 : vector<17x96xf32>
    %53 = vector.extract_strided_slice %52 {offsets = [0, 0], sizes = [17, 32], strides = [1, 1]} : vector<17x96xf32> to vector<17x32xf32>
    %54 = vector.extract_strided_slice %52 {offsets = [0, 32], sizes = [17, 32], strides = [1, 1]} : vector<17x96xf32> to vector<17x32xf32>
    %55 = vector.extract_strided_slice %52 {offsets = [0, 64], sizes = [17, 32], strides = [1, 1]} : vector<17x96xf32> to vector<17x32xf32>
    %56 = vector.extract_strided_slice %53 {offsets = [0, 0], sizes = [17, 8], strides = [1, 1]} : vector<17x32xf32> to vector<17x8xf32>
    %57 = vector.extract_strided_slice %54 {offsets = [0, 0], sizes = [17, 8], strides = [1, 1]} : vector<17x32xf32> to vector<17x8xf32>
    %cst_34 = arith.constant dense<0.000000e+00> : vector<17x17xf32>
    %58 = tpu.matmul %56, %57, %cst_34 {dimension_numbers = #tpu.dot_dimension_numbers<[1], [1], [0], [0], [0, 0, 1, 0], [], []>} : vector<17x8xf32>, vector<17x8xf32>, vector<17x17xf32> -> vector<17x17xf32>
    %cst_35 = arith.constant 0.353553385 : f32
    %59 = vector.broadcast %cst_35 : f32 to vector<17x17xf32>
    %60 = arith.mulf %58, %59 : vector<17x17xf32>
    %cst_36 = arith.constant dense<0xFF800000> : vector<17xf32>
    %61 = vector.multi_reduction <maximumf>, %60, %cst_36 [1] : vector<17x17xf32> to vector<17xf32>
    %62 = vector.shape_cast %61 : vector<17xf32> to vector<17x1xf32>
    %63 = vector.broadcast %62 : vector<17x1xf32> to vector<17x17xf32>
    %64 = arith.subf %60, %63 : vector<17x17xf32>
    %65 = math.exp %64 : vector<17x17xf32>
    %cst_37 = arith.constant dense<0.000000e+00> : vector<17xf32>
    %66 = vector.multi_reduction <add>, %65, %cst_37 [1] : vector<17x17xf32> to vector<17xf32>
    %67 = vector.shape_cast %66 : vector<17xf32> to vector<17x1xf32>
    %68 = tpu.reciprocal %67 {approx = true} : vector<17x1xf32> -> vector<17x1xf32>
    %69 = vector.broadcast %68 : vector<17x1xf32> to vector<17x17xf32>
    %70 = arith.mulf %65, %69 : vector<17x17xf32>
    %71 = vector.extract_strided_slice %55 {offsets = [0, 0], sizes = [17, 8], strides = [1, 1]} : vector<17x32xf32> to vector<17x8xf32>
    %cst_38 = arith.constant dense<0.000000e+00> : vector<17x8xf32>
    %72 = tpu.matmul %70, %71, %cst_38 {dimension_numbers = #tpu.dot_dimension_numbers<[1], [0], [0], [1], [0, 0, 1, 1], [], []>} : vector<17x17xf32>, vector<17x8xf32>, vector<17x8xf32> -> vector<17x8xf32>
    %73 = vector.extract_strided_slice %47 {offsets = [0, 0], sizes = [8, 32], strides = [1, 1]} : vector<32x32xf32> to vector<8x32xf32>
    %cst_39 = arith.constant dense<0.000000e+00> : vector<17x32xf32>
    %74 = tpu.matmul %72, %73, %cst_39 {dimension_numbers = #tpu.dot_dimension_numbers<[1], [0], [0], [1], [0, 0, 1, 1], [], []>} : vector<17x8xf32>, vector<8x32xf32>, vector<17x32xf32> -> vector<17x32xf32>
    %75 = vector.extract_strided_slice %53 {offsets = [0, 8], sizes = [17, 8], strides = [1, 1]} : vector<17x32xf32> to vector<17x8xf32>
    %76 = vector.extract_strided_slice %54 {offsets = [0, 8], sizes = [17, 8], strides = [1, 1]} : vector<17x32xf32> to vector<17x8xf32>
    %cst_40 = arith.constant dense<0.000000e+00> : vector<17x17xf32>
    %77 = tpu.matmul %75, %76, %cst_40 {dimension_numbers = #tpu.dot_dimension_numbers<[1], [1], [0], [0], [0, 0, 1, 0], [], []>} : vector<17x8xf32>, vector<17x8xf32>, vector<17x17xf32> -> vector<17x17xf32>
    %cst_41 = arith.constant 0.353553385 : f32
    %78 = vector.broadcast %cst_41 : f32 to vector<17x17xf32>
    %79 = arith.mulf %77, %78 : vector<17x17xf32>
    %cst_42 = arith.constant dense<0xFF800000> : vector<17xf32>
    %80 = vector.multi_reduction <maximumf>, %79, %cst_42 [1] : vector<17x17xf32> to vector<17xf32>
    %81 = vector.shape_cast %80 : vector<17xf32> to vector<17x1xf32>
    %82 = vector.broadcast %81 : vector<17x1xf32> to vector<17x17xf32>
    %83 = arith.subf %79, %82 : vector<17x17xf32>
    %84 = math.exp %83 : vector<17x17xf32>
    %cst_43 = arith.constant dense<0.000000e+00> : vector<17xf32>
    %85 = vector.multi_reduction <add>, %84, %cst_43 [1] : vector<17x17xf32> to vector<17xf32>
    %86 = vector.shape_cast %85 : vector<17xf32> to vector<17x1xf32>
    %87 = tpu.reciprocal %86 {approx = true} : vector<17x1xf32> -> vector<17x1xf32>
    %88 = vector.broadcast %87 : vector<17x1xf32> to vector<17x17xf32>
    %89 = arith.mulf %84, %88 : vector<17x17xf32>
    %90 = vector.extract_strided_slice %55 {offsets = [0, 8], sizes = [17, 8], strides = [1, 1]} : vector<17x32xf32> to vector<17x8xf32>
    %cst_44 = arith.constant dense<0.000000e+00> : vector<17x8xf32>
    %91 = tpu.matmul %89, %90, %cst_44 {dimension_numbers = #tpu.dot_dimension_numbers<[1], [0], [0], [1], [0, 0, 1, 1], [], []>} : vector<17x17xf32>, vector<17x8xf32>, vector<17x8xf32> -> vector<17x8xf32>
    %92 = vector.extract_strided_slice %47 {offsets = [8, 0], sizes = [8, 32], strides = [1, 1]} : vector<32x32xf32> to vector<8x32xf32>
    %cst_45 = arith.constant dense<0.000000e+00> : vector<17x32xf32>
    %93 = tpu.matmul %91, %92, %cst_45 {dimension_numbers = #tpu.dot_dimension_numbers<[1], [0], [0], [1], [0, 0, 1, 1], [], []>} : vector<17x8xf32>, vector<8x32xf32>, vector<17x32xf32> -> vector<17x32xf32>
    %94 = arith.addf %74, %93 : vector<17x32xf32>
    %95 = vector.extract_strided_slice %53 {offsets = [0, 16], sizes = [17, 8], strides = [1, 1]} : vector<17x32xf32> to vector<17x8xf32>
    %96 = vector.extract_strided_slice %54 {offsets = [0, 16], sizes = [17, 8], strides = [1, 1]} : vector<17x32xf32> to vector<17x8xf32>
    %cst_46 = arith.constant dense<0.000000e+00> : vector<17x17xf32>
    %97 = tpu.matmul %95, %96, %cst_46 {dimension_numbers = #tpu.dot_dimension_numbers<[1], [1], [0], [0], [0, 0, 1, 0], [], []>} : vector<17x8xf32>, vector<17x8xf32>, vector<17x17xf32> -> vector<17x17xf32>
    %cst_47 = arith.constant 0.353553385 : f32
    %98 = vector.broadcast %cst_47 : f32 to vector<17x17xf32>
    %99 = arith.mulf %97, %98 : vector<17x17xf32>
    %cst_48 = arith.constant dense<0xFF800000> : vector<17xf32>
    %100 = vector.multi_reduction <maximumf>, %99, %cst_48 [1] : vector<17x17xf32> to vector<17xf32>
    %101 = vector.shape_cast %100 : vector<17xf32> to vector<17x1xf32>
    %102 = vector.broadcast %101 : vector<17x1xf32> to vector<17x17xf32>
    %103 = arith.subf %99, %102 : vector<17x17xf32>
    %104 = math.exp %103 : vector<17x17xf32>
    %cst_49 = arith.constant dense<0.000000e+00> : vector<17xf32>
    %105 = vector.multi_reduction <add>, %104, %cst_49 [1] : vector<17x17xf32> to vector<17xf32>
    %106 = vector.shape_cast %105 : vector<17xf32> to vector<17x1xf32>
    %107 = tpu.reciprocal %106 {approx = true} : vector<17x1xf32> -> vector<17x1xf32>
    %108 = vector.broadcast %107 : vector<17x1xf32> to vector<17x17xf32>
    %109 = arith.mulf %104, %108 : vector<17x17xf32>
    %110 = vector.extract_strided_slice %55 {offsets = [0, 16], sizes = [17, 8], strides = [1, 1]} : vector<17x32xf32> to vector<17x8xf32>
    %cst_50 = arith.constant dense<0.000000e+00> : vector<17x8xf32>
    %111 = tpu.matmul %109, %110, %cst_50 {dimension_numbers = #tpu.dot_dimension_numbers<[1], [0], [0], [1], [0, 0, 1, 1], [], []>} : vector<17x17xf32>, vector<17x8xf32>, vector<17x8xf32> -> vector<17x8xf32>
    %112 = vector.extract_strided_slice %47 {offsets = [16, 0], sizes = [8, 32], strides = [1, 1]} : vector<32x32xf32> to vector<8x32xf32>
    %cst_51 = arith.constant dense<0.000000e+00> : vector<17x32xf32>
    %113 = tpu.matmul %111, %112, %cst_51 {dimension_numbers = #tpu.dot_dimension_numbers<[1], [0], [0], [1], [0, 0, 1, 1], [], []>} : vector<17x8xf32>, vector<8x32xf32>, vector<17x32xf32> -> vector<17x32xf32>
    %114 = arith.addf %94, %113 : vector<17x32xf32>
    %115 = vector.extract_strided_slice %53 {offsets = [0, 24], sizes = [17, 8], strides = [1, 1]} : vector<17x32xf32> to vector<17x8xf32>
    %116 = vector.extract_strided_slice %54 {offsets = [0, 24], sizes = [17, 8], strides = [1, 1]} : vector<17x32xf32> to vector<17x8xf32>
    %cst_52 = arith.constant dense<0.000000e+00> : vector<17x17xf32>
    %117 = tpu.matmul %115, %116, %cst_52 {dimension_numbers = #tpu.dot_dimension_numbers<[1], [1], [0], [0], [0, 0, 1, 0], [], []>} : vector<17x8xf32>, vector<17x8xf32>, vector<17x17xf32> -> vector<17x17xf32>
    %cst_53 = arith.constant 0.353553385 : f32
    %118 = vector.broadcast %cst_53 : f32 to vector<17x17xf32>
    %119 = arith.mulf %117, %118 : vector<17x17xf32>
    %cst_54 = arith.constant dense<0xFF800000> : vector<17xf32>
    %120 = vector.multi_reduction <maximumf>, %119, %cst_54 [1] : vector<17x17xf32> to vector<17xf32>
    %121 = vector.shape_cast %120 : vector<17xf32> to vector<17x1xf32>
    %122 = vector.broadcast %121 : vector<17x1xf32> to vector<17x17xf32>
    %123 = arith.subf %119, %122 : vector<17x17xf32>
    %124 = math.exp %123 : vector<17x17xf32>
    %cst_55 = arith.constant dense<0.000000e+00> : vector<17xf32>
    %125 = vector.multi_reduction <add>, %124, %cst_55 [1] : vector<17x17xf32> to vector<17xf32>
    %126 = vector.shape_cast %125 : vector<17xf32> to vector<17x1xf32>
    %127 = tpu.reciprocal %126 {approx = true} : vector<17x1xf32> -> vector<17x1xf32>
    %128 = vector.broadcast %127 : vector<17x1xf32> to vector<17x17xf32>
    %129 = arith.mulf %124, %128 : vector<17x17xf32>
    %130 = vector.extract_strided_slice %55 {offsets = [0, 24], sizes = [17, 8], strides = [1, 1]} : vector<17x32xf32> to vector<17x8xf32>
    %cst_56 = arith.constant dense<0.000000e+00> : vector<17x8xf32>
    %131 = tpu.matmul %129, %130, %cst_56 {dimension_numbers = #tpu.dot_dimension_numbers<[1], [0], [0], [1], [0, 0, 1, 1], [], []>} : vector<17x17xf32>, vector<17x8xf32>, vector<17x8xf32> -> vector<17x8xf32>
    %132 = vector.extract_strided_slice %47 {offsets = [24, 0], sizes = [8, 32], strides = [1, 1]} : vector<32x32xf32> to vector<8x32xf32>
    %cst_57 = arith.constant dense<0.000000e+00> : vector<17x32xf32>
    %133 = tpu.matmul %131, %132, %cst_57 {dimension_numbers = #tpu.dot_dimension_numbers<[1], [0], [0], [1], [0, 0, 1, 1], [], []>} : vector<17x8xf32>, vector<8x32xf32>, vector<17x32xf32> -> vector<17x32xf32>
    %134 = arith.addf %114, %133 : vector<17x32xf32>
    %135 = vector.broadcast %49 : vector<1x32xf32> to vector<17x32xf32>
    %136 = arith.addf %134, %135 : vector<17x32xf32>
    %137 = arith.addf %17, %136 : vector<17x32xf32>
    %c0_58 = arith.constant 0 : index
    %c0_59 = arith.constant 0 : index
    %c0_60 = arith.constant 0 : index
    %138 = vector.load %arg39[%c0_58, %c0_59, %c0_60] : memref<2x1x32xf32, #tpu.memory_space<vmem>>, vector<1x1x32xf32>
    %139 = vector.shape_cast %138 : vector<1x1x32xf32> to vector<1x32xf32>
    %c0_61 = arith.constant 0 : index
    %c0_62 = arith.constant 0 : index
    %c0_63 = arith.constant 0 : index
    %140 = vector.load %arg38[%c0_61, %c0_62, %c0_63] : memref<2x1x32xf32, #tpu.memory_space<vmem>>, vector<1x1x32xf32>
    %141 = vector.shape_cast %140 : vector<1x1x32xf32> to vector<1x32xf32>
    %cst_64 = arith.constant dense<0.000000e+00> : vector<17xf32>
    %142 = vector.multi_reduction <add>, %137, %cst_64 [1] : vector<17x32xf32> to vector<17xf32>
    %143 = vector.shape_cast %142 : vector<17xf32> to vector<17x1xf32>
    %cst_65 = arith.constant 3.200000e+01 : f32
    %144 = vector.broadcast %cst_65 : f32 to vector<17x1xf32>
    %145 = arith.divf %143, %144 : vector<17x1xf32>
    %146 = vector.broadcast %145 : vector<17x1xf32> to vector<17x32xf32>
    %147 = arith.subf %137, %146 : vector<17x32xf32>
    %148 = arith.mulf %147, %147 : vector<17x32xf32>
    %cst_66 = arith.constant dense<0.000000e+00> : vector<17xf32>
    %149 = vector.multi_reduction <add>, %148, %cst_66 [1] : vector<17x32xf32> to vector<17xf32>
    %150 = vector.shape_cast %149 : vector<17xf32> to vector<17x1xf32>
    %cst_67 = arith.constant 3.200000e+01 : f32
    %151 = vector.broadcast %cst_67 : f32 to vector<17x1xf32>
    %152 = arith.divf %150, %151 : vector<17x1xf32>
    %cst_68 = arith.constant 9.99999996E-13 : f32
    %153 = vector.broadcast %cst_68 : f32 to vector<17x1xf32>
    %154 = arith.addf %152, %153 : vector<17x1xf32>
    %155 = math.rsqrt %154 : vector<17x1xf32>
    %156 = vector.broadcast %155 : vector<17x1xf32> to vector<17x32xf32>
    %157 = arith.mulf %147, %156 : vector<17x32xf32>
    %158 = vector.broadcast %139 : vector<1x32xf32> to vector<17x32xf32>
    %159 = arith.mulf %157, %158 : vector<17x32xf32>
    %160 = vector.broadcast %141 : vector<1x32xf32> to vector<17x32xf32>
    %161 = arith.addf %159, %160 : vector<17x32xf32>
    %c0_69 = arith.constant 0 : index
    %c0_70 = arith.constant 0 : index
    %c0_71 = arith.constant 0 : index
    %162 = vector.load %arg42[%c0_69, %c0_70, %c0_71] : memref<2x32x64xf32, #tpu.memory_space<vmem>>, vector<1x32x64xf32>
    %163 = vector.shape_cast %162 : vector<1x32x64xf32> to vector<32x64xf32>
    %cst_72 = arith.constant dense<0.000000e+00> : vector<17x64xf32>
    %164 = tpu.matmul %161, %163, %cst_72 {dimension_numbers = #tpu.dot_dimension_numbers<[1], [0], [0], [1], [0, 0, 1, 1], [], []>} : vector<17x32xf32>, vector<32x64xf32>, vector<17x64xf32> -> vector<17x64xf32>
    %c0_73 = arith.constant 0 : index
    %c0_74 = arith.constant 0 : index
    %c0_75 = arith.constant 0 : index
    %165 = vector.load %arg32[%c0_73, %c0_74, %c0_75] : memref<2x1x64xf32, #tpu.memory_space<vmem>>, vector<1x1x64xf32>
    %166 = vector.shape_cast %165 : vector<1x1x64xf32> to vector<1x64xf32>
    %167 = vector.broadcast %166 : vector<1x64xf32> to vector<17x64xf32>
    %168 = arith.addf %164, %167 : vector<17x64xf32>
    %cst_76 = arith.constant 5.000000e-01 : f32
    %169 = vector.broadcast %cst_76 : f32 to vector<17x64xf32>
    %170 = arith.mulf %169, %168 : vector<17x64xf32>
    %cst_77 = arith.constant 0.707106769 : f32
    %171 = vector.broadcast %cst_77 : f32 to vector<17x64xf32>
    %172 = arith.mulf %168, %171 : vector<17x64xf32>
    %173 = math.absf %172 : vector<17x64xf32>
    %cst_78 = arith.constant 0.327591091 : f32
    %174 = vector.broadcast %cst_78 : f32 to vector<17x64xf32>
    %175 = arith.mulf %174, %173 : vector<17x64xf32>
    %cst_79 = arith.constant 1.000000e+00 : f32
    %176 = vector.broadcast %cst_79 : f32 to vector<17x64xf32>
    %177 = arith.addf %176, %175 : vector<17x64xf32>
    %cst_80 = arith.constant 1.000000e+00 : f32
    %178 = vector.broadcast %cst_80 : f32 to vector<17x64xf32>
    %179 = arith.divf %178, %177 : vector<17x64xf32>
    %cst_81 = arith.constant 1.06140542 : f32
    %180 = vector.broadcast %cst_81 : f32 to vector<17x64xf32>
    %181 = arith.mulf %180, %179 : vector<17x64xf32>
    %cst_82 = arith.constant -1.45315206 : f32
    %182 = vector.broadcast %cst_82 : f32 to vector<17x64xf32>
    %183 = arith.addf %181, %182 : vector<17x64xf32>
    %184 = arith.mulf %183, %179 : vector<17x64xf32>
    %cst_83 = arith.constant 1.42141378 : f32
    %185 = vector.broadcast %cst_83 : f32 to vector<17x64xf32>
    %186 = arith.addf %184, %185 : vector<17x64xf32>
    %187 = arith.mulf %186, %179 : vector<17x64xf32>
    %cst_84 = arith.constant -0.284496725 : f32
    %188 = vector.broadcast %cst_84 : f32 to vector<17x64xf32>
    %189 = arith.addf %187, %188 : vector<17x64xf32>
    %190 = arith.mulf %189, %179 : vector<17x64xf32>
    %cst_85 = arith.constant 0.254829586 : f32
    %191 = vector.broadcast %cst_85 : f32 to vector<17x64xf32>
    %192 = arith.addf %190, %191 : vector<17x64xf32>
    %193 = arith.mulf %192, %179 : vector<17x64xf32>
    %cst_86 = arith.constant 0.000000e+00 : f32
    %194 = vector.broadcast %cst_86 : f32 to vector<17x64xf32>
    %195 = arith.subf %194, %173 : vector<17x64xf32>
    %196 = arith.mulf %195, %173 : vector<17x64xf32>
    %197 = math.exp %196 : vector<17x64xf32>
    %198 = arith.mulf %193, %197 : vector<17x64xf32>
    %cst_87 = arith.constant 1.000000e+00 : f32
    %199 = vector.broadcast %cst_87 : f32 to vector<17x64xf32>
    %200 = arith.subf %199, %198 : vector<17x64xf32>
    %cst_88 = arith.constant 0.000000e+00 : f32
    %201 = vector.broadcast %cst_88 : f32 to vector<17x64xf32>
    %202 = arith.cmpf olt, %172, %201 : vector<17x64xf32>
    %cst_89 = arith.constant 0.000000e+00 : f32
    %203 = vector.broadcast %cst_89 : f32 to vector<17x64xf32>
    %204 = arith.subf %203, %200 : vector<17x64xf32>
    %205 = arith.select %202, %204, %200 : vector<17x64xi1>, vector<17x64xf32>
    %cst_90 = arith.constant 1.000000e+00 : f32
    %206 = vector.broadcast %cst_90 : f32 to vector<17x64xf32>
    %207 = arith.addf %206, %205 : vector<17x64xf32>
    %208 = arith.mulf %170, %207 : vector<17x64xf32>
    %c0_91 = arith.constant 0 : index
    %c0_92 = arith.constant 0 : index
    %c0_93 = arith.constant 0 : index
    %209 = vector.load %arg43[%c0_91, %c0_92, %c0_93] : memref<2x64x32xf32, #tpu.memory_space<vmem>>, vector<1x64x32xf32>
    %210 = vector.shape_cast %209 : vector<1x64x32xf32> to vector<64x32xf32>
    %cst_94 = arith.constant dense<0.000000e+00> : vector<17x32xf32>
    %211 = tpu.matmul %208, %210, %cst_94 {dimension_numbers = #tpu.dot_dimension_numbers<[1], [0], [0], [1], [0, 0, 1, 1], [], []>} : vector<17x64xf32>, vector<64x32xf32>, vector<17x32xf32> -> vector<17x32xf32>
    %c0_95 = arith.constant 0 : index
    %c0_96 = arith.constant 0 : index
    %c0_97 = arith.constant 0 : index
    %212 = vector.load %arg33[%c0_95, %c0_96, %c0_97] : memref<2x1x32xf32, #tpu.memory_space<vmem>>, vector<1x1x32xf32>
    %213 = vector.shape_cast %212 : vector<1x1x32xf32> to vector<1x32xf32>
    %214 = vector.broadcast %213 : vector<1x32xf32> to vector<17x32xf32>
    %215 = arith.addf %211, %214 : vector<17x32xf32>
    %216 = arith.addf %137, %215 : vector<17x32xf32>
    %c1 = arith.constant 1 : index
    %c0_98 = arith.constant 0 : index
    %c0_99 = arith.constant 0 : index
    %217 = vector.load %arg37[%c1, %c0_98, %c0_99] : memref<2x1x32xf32, #tpu.memory_space<vmem>>, vector<1x1x32xf32>
    %218 = vector.shape_cast %217 : vector<1x1x32xf32> to vector<1x32xf32>
    %c1_100 = arith.constant 1 : index
    %c0_101 = arith.constant 0 : index
    %c0_102 = arith.constant 0 : index
    %219 = vector.load %arg36[%c1_100, %c0_101, %c0_102] : memref<2x1x32xf32, #tpu.memory_space<vmem>>, vector<1x1x32xf32>
    %220 = vector.shape_cast %219 : vector<1x1x32xf32> to vector<1x32xf32>
    %cst_103 = arith.constant dense<0.000000e+00> : vector<17xf32>
    %221 = vector.multi_reduction <add>, %216, %cst_103 [1] : vector<17x32xf32> to vector<17xf32>
    %222 = vector.shape_cast %221 : vector<17xf32> to vector<17x1xf32>
    %cst_104 = arith.constant 3.200000e+01 : f32
    %223 = vector.broadcast %cst_104 : f32 to vector<17x1xf32>
    %224 = arith.divf %222, %223 : vector<17x1xf32>
    %225 = vector.broadcast %224 : vector<17x1xf32> to vector<17x32xf32>
    %226 = arith.subf %216, %225 : vector<17x32xf32>
    %227 = arith.mulf %226, %226 : vector<17x32xf32>
    %cst_105 = arith.constant dense<0.000000e+00> : vector<17xf32>
    %228 = vector.multi_reduction <add>, %227, %cst_105 [1] : vector<17x32xf32> to vector<17xf32>
    %229 = vector.shape_cast %228 : vector<17xf32> to vector<17x1xf32>
    %cst_106 = arith.constant 3.200000e+01 : f32
    %230 = vector.broadcast %cst_106 : f32 to vector<17x1xf32>
    %231 = arith.divf %229, %230 : vector<17x1xf32>
    %cst_107 = arith.constant 9.99999996E-13 : f32
    %232 = vector.broadcast %cst_107 : f32 to vector<17x1xf32>
    %233 = arith.addf %231, %232 : vector<17x1xf32>
    %234 = math.rsqrt %233 : vector<17x1xf32>
    %235 = vector.broadcast %234 : vector<17x1xf32> to vector<17x32xf32>
    %236 = arith.mulf %226, %235 : vector<17x32xf32>
    %237 = vector.broadcast %218 : vector<1x32xf32> to vector<17x32xf32>
    %238 = arith.mulf %236, %237 : vector<17x32xf32>
    %239 = vector.broadcast %220 : vector<1x32xf32> to vector<17x32xf32>
    %240 = arith.addf %238, %239 : vector<17x32xf32>
    %c1_108 = arith.constant 1 : index
    %c0_109 = arith.constant 0 : index
    %c0_110 = arith.constant 0 : index
    %241 = vector.load %arg45[%c1_108, %c0_109, %c0_110] : memref<2x32x96xf32, #tpu.memory_space<vmem>>, vector<1x32x96xf32>
    %242 = vector.shape_cast %241 : vector<1x32x96xf32> to vector<32x96xf32>
    %c1_111 = arith.constant 1 : index
    %c0_112 = arith.constant 0 : index
    %c0_113 = arith.constant 0 : index
    %243 = vector.load %arg35[%c1_111, %c0_112, %c0_113] : memref<2x1x96xf32, #tpu.memory_space<vmem>>, vector<1x1x96xf32>
    %244 = vector.shape_cast %243 : vector<1x1x96xf32> to vector<1x96xf32>
    %c1_114 = arith.constant 1 : index
    %c0_115 = arith.constant 0 : index
    %c0_116 = arith.constant 0 : index
    %245 = vector.load %arg44[%c1_114, %c0_115, %c0_116] : memref<2x32x32xf32, #tpu.memory_space<vmem>>, vector<1x32x32xf32>
    %246 = vector.shape_cast %245 : vector<1x32x32xf32> to vector<32x32xf32>
    %c1_117 = arith.constant 1 : index
    %c0_118 = arith.constant 0 : index
    %c0_119 = arith.constant 0 : index
    %247 = vector.load %arg34[%c1_117, %c0_118, %c0_119] : memref<2x1x32xf32, #tpu.memory_space<vmem>>, vector<1x1x32xf32>
    %248 = vector.shape_cast %247 : vector<1x1x32xf32> to vector<1x32xf32>
    %cst_120 = arith.constant dense<0.000000e+00> : vector<17x96xf32>
    %249 = tpu.matmul %240, %242, %cst_120 {dimension_numbers = #tpu.dot_dimension_numbers<[1], [0], [0], [1], [0, 0, 1, 1], [], []>} : vector<17x32xf32>, vector<32x96xf32>, vector<17x96xf32> -> vector<17x96xf32>
    %250 = vector.broadcast %244 : vector<1x96xf32> to vector<17x96xf32>
    %251 = arith.addf %249, %250 : vector<17x96xf32>
    %252 = vector.extract_strided_slice %251 {offsets = [0, 0], sizes = [17, 32], strides = [1, 1]} : vector<17x96xf32> to vector<17x32xf32>
    %253 = vector.extract_strided_slice %251 {offsets = [0, 32], sizes = [17, 32], strides = [1, 1]} : vector<17x96xf32> to vector<17x32xf32>
    %254 = vector.extract_strided_slice %251 {offsets = [0, 64], sizes = [17, 32], strides = [1, 1]} : vector<17x96xf32> to vector<17x32xf32>
    %255 = vector.extract_strided_slice %252 {offsets = [0, 0], sizes = [17, 8], strides = [1, 1]} : vector<17x32xf32> to vector<17x8xf32>
    %256 = vector.extract_strided_slice %253 {offsets = [0, 0], sizes = [17, 8], strides = [1, 1]} : vector<17x32xf32> to vector<17x8xf32>
    %cst_121 = arith.constant dense<0.000000e+00> : vector<17x17xf32>
    %257 = tpu.matmul %255, %256, %cst_121 {dimension_numbers = #tpu.dot_dimension_numbers<[1], [1], [0], [0], [0, 0, 1, 0], [], []>} : vector<17x8xf32>, vector<17x8xf32>, vector<17x17xf32> -> vector<17x17xf32>
    %cst_122 = arith.constant 0.353553385 : f32
    %258 = vector.broadcast %cst_122 : f32 to vector<17x17xf32>
    %259 = arith.mulf %257, %258 : vector<17x17xf32>
    %cst_123 = arith.constant dense<0xFF800000> : vector<17xf32>
    %260 = vector.multi_reduction <maximumf>, %259, %cst_123 [1] : vector<17x17xf32> to vector<17xf32>
    %261 = vector.shape_cast %260 : vector<17xf32> to vector<17x1xf32>
    %262 = vector.broadcast %261 : vector<17x1xf32> to vector<17x17xf32>
    %263 = arith.subf %259, %262 : vector<17x17xf32>
    %264 = math.exp %263 : vector<17x17xf32>
    %cst_124 = arith.constant dense<0.000000e+00> : vector<17xf32>
    %265 = vector.multi_reduction <add>, %264, %cst_124 [1] : vector<17x17xf32> to vector<17xf32>
    %266 = vector.shape_cast %265 : vector<17xf32> to vector<17x1xf32>
    %267 = tpu.reciprocal %266 {approx = true} : vector<17x1xf32> -> vector<17x1xf32>
    %268 = vector.broadcast %267 : vector<17x1xf32> to vector<17x17xf32>
    %269 = arith.mulf %264, %268 : vector<17x17xf32>
    %270 = vector.extract_strided_slice %254 {offsets = [0, 0], sizes = [17, 8], strides = [1, 1]} : vector<17x32xf32> to vector<17x8xf32>
    %cst_125 = arith.constant dense<0.000000e+00> : vector<17x8xf32>
    %271 = tpu.matmul %269, %270, %cst_125 {dimension_numbers = #tpu.dot_dimension_numbers<[1], [0], [0], [1], [0, 0, 1, 1], [], []>} : vector<17x17xf32>, vector<17x8xf32>, vector<17x8xf32> -> vector<17x8xf32>
    %272 = vector.extract_strided_slice %246 {offsets = [0, 0], sizes = [8, 32], strides = [1, 1]} : vector<32x32xf32> to vector<8x32xf32>
    %cst_126 = arith.constant dense<0.000000e+00> : vector<17x32xf32>
    %273 = tpu.matmul %271, %272, %cst_126 {dimension_numbers = #tpu.dot_dimension_numbers<[1], [0], [0], [1], [0, 0, 1, 1], [], []>} : vector<17x8xf32>, vector<8x32xf32>, vector<17x32xf32> -> vector<17x32xf32>
    %274 = vector.extract_strided_slice %252 {offsets = [0, 8], sizes = [17, 8], strides = [1, 1]} : vector<17x32xf32> to vector<17x8xf32>
    %275 = vector.extract_strided_slice %253 {offsets = [0, 8], sizes = [17, 8], strides = [1, 1]} : vector<17x32xf32> to vector<17x8xf32>
    %cst_127 = arith.constant dense<0.000000e+00> : vector<17x17xf32>
    %276 = tpu.matmul %274, %275, %cst_127 {dimension_numbers = #tpu.dot_dimension_numbers<[1], [1], [0], [0], [0, 0, 1, 0], [], []>} : vector<17x8xf32>, vector<17x8xf32>, vector<17x17xf32> -> vector<17x17xf32>
    %cst_128 = arith.constant 0.353553385 : f32
    %277 = vector.broadcast %cst_128 : f32 to vector<17x17xf32>
    %278 = arith.mulf %276, %277 : vector<17x17xf32>
    %cst_129 = arith.constant dense<0xFF800000> : vector<17xf32>
    %279 = vector.multi_reduction <maximumf>, %278, %cst_129 [1] : vector<17x17xf32> to vector<17xf32>
    %280 = vector.shape_cast %279 : vector<17xf32> to vector<17x1xf32>
    %281 = vector.broadcast %280 : vector<17x1xf32> to vector<17x17xf32>
    %282 = arith.subf %278, %281 : vector<17x17xf32>
    %283 = math.exp %282 : vector<17x17xf32>
    %cst_130 = arith.constant dense<0.000000e+00> : vector<17xf32>
    %284 = vector.multi_reduction <add>, %283, %cst_130 [1] : vector<17x17xf32> to vector<17xf32>
    %285 = vector.shape_cast %284 : vector<17xf32> to vector<17x1xf32>
    %286 = tpu.reciprocal %285 {approx = true} : vector<17x1xf32> -> vector<17x1xf32>
    %287 = vector.broadcast %286 : vector<17x1xf32> to vector<17x17xf32>
    %288 = arith.mulf %283, %287 : vector<17x17xf32>
    %289 = vector.extract_strided_slice %254 {offsets = [0, 8], sizes = [17, 8], strides = [1, 1]} : vector<17x32xf32> to vector<17x8xf32>
    %cst_131 = arith.constant dense<0.000000e+00> : vector<17x8xf32>
    %290 = tpu.matmul %288, %289, %cst_131 {dimension_numbers = #tpu.dot_dimension_numbers<[1], [0], [0], [1], [0, 0, 1, 1], [], []>} : vector<17x17xf32>, vector<17x8xf32>, vector<17x8xf32> -> vector<17x8xf32>
    %291 = vector.extract_strided_slice %246 {offsets = [8, 0], sizes = [8, 32], strides = [1, 1]} : vector<32x32xf32> to vector<8x32xf32>
    %cst_132 = arith.constant dense<0.000000e+00> : vector<17x32xf32>
    %292 = tpu.matmul %290, %291, %cst_132 {dimension_numbers = #tpu.dot_dimension_numbers<[1], [0], [0], [1], [0, 0, 1, 1], [], []>} : vector<17x8xf32>, vector<8x32xf32>, vector<17x32xf32> -> vector<17x32xf32>
    %293 = arith.addf %273, %292 : vector<17x32xf32>
    %294 = vector.extract_strided_slice %252 {offsets = [0, 16], sizes = [17, 8], strides = [1, 1]} : vector<17x32xf32> to vector<17x8xf32>
    %295 = vector.extract_strided_slice %253 {offsets = [0, 16], sizes = [17, 8], strides = [1, 1]} : vector<17x32xf32> to vector<17x8xf32>
    %cst_133 = arith.constant dense<0.000000e+00> : vector<17x17xf32>
    %296 = tpu.matmul %294, %295, %cst_133 {dimension_numbers = #tpu.dot_dimension_numbers<[1], [1], [0], [0], [0, 0, 1, 0], [], []>} : vector<17x8xf32>, vector<17x8xf32>, vector<17x17xf32> -> vector<17x17xf32>
    %cst_134 = arith.constant 0.353553385 : f32
    %297 = vector.broadcast %cst_134 : f32 to vector<17x17xf32>
    %298 = arith.mulf %296, %297 : vector<17x17xf32>
    %cst_135 = arith.constant dense<0xFF800000> : vector<17xf32>
    %299 = vector.multi_reduction <maximumf>, %298, %cst_135 [1] : vector<17x17xf32> to vector<17xf32>
    %300 = vector.shape_cast %299 : vector<17xf32> to vector<17x1xf32>
    %301 = vector.broadcast %300 : vector<17x1xf32> to vector<17x17xf32>
    %302 = arith.subf %298, %301 : vector<17x17xf32>
    %303 = math.exp %302 : vector<17x17xf32>
    %cst_136 = arith.constant dense<0.000000e+00> : vector<17xf32>
    %304 = vector.multi_reduction <add>, %303, %cst_136 [1] : vector<17x17xf32> to vector<17xf32>
    %305 = vector.shape_cast %304 : vector<17xf32> to vector<17x1xf32>
    %306 = tpu.reciprocal %305 {approx = true} : vector<17x1xf32> -> vector<17x1xf32>
    %307 = vector.broadcast %306 : vector<17x1xf32> to vector<17x17xf32>
    %308 = arith.mulf %303, %307 : vector<17x17xf32>
    %309 = vector.extract_strided_slice %254 {offsets = [0, 16], sizes = [17, 8], strides = [1, 1]} : vector<17x32xf32> to vector<17x8xf32>
    %cst_137 = arith.constant dense<0.000000e+00> : vector<17x8xf32>
    %310 = tpu.matmul %308, %309, %cst_137 {dimension_numbers = #tpu.dot_dimension_numbers<[1], [0], [0], [1], [0, 0, 1, 1], [], []>} : vector<17x17xf32>, vector<17x8xf32>, vector<17x8xf32> -> vector<17x8xf32>
    %311 = vector.extract_strided_slice %246 {offsets = [16, 0], sizes = [8, 32], strides = [1, 1]} : vector<32x32xf32> to vector<8x32xf32>
    %cst_138 = arith.constant dense<0.000000e+00> : vector<17x32xf32>
    %312 = tpu.matmul %310, %311, %cst_138 {dimension_numbers = #tpu.dot_dimension_numbers<[1], [0], [0], [1], [0, 0, 1, 1], [], []>} : vector<17x8xf32>, vector<8x32xf32>, vector<17x32xf32> -> vector<17x32xf32>
    %313 = arith.addf %293, %312 : vector<17x32xf32>
    %314 = vector.extract_strided_slice %252 {offsets = [0, 24], sizes = [17, 8], strides = [1, 1]} : vector<17x32xf32> to vector<17x8xf32>
    %315 = vector.extract_strided_slice %253 {offsets = [0, 24], sizes = [17, 8], strides = [1, 1]} : vector<17x32xf32> to vector<17x8xf32>
    %cst_139 = arith.constant dense<0.000000e+00> : vector<17x17xf32>
    %316 = tpu.matmul %314, %315, %cst_139 {dimension_numbers = #tpu.dot_dimension_numbers<[1], [1], [0], [0], [0, 0, 1, 0], [], []>} : vector<17x8xf32>, vector<17x8xf32>, vector<17x17xf32> -> vector<17x17xf32>
    %cst_140 = arith.constant 0.353553385 : f32
    %317 = vector.broadcast %cst_140 : f32 to vector<17x17xf32>
    %318 = arith.mulf %316, %317 : vector<17x17xf32>
    %cst_141 = arith.constant dense<0xFF800000> : vector<17xf32>
    %319 = vector.multi_reduction <maximumf>, %318, %cst_141 [1] : vector<17x17xf32> to vector<17xf32>
    %320 = vector.shape_cast %319 : vector<17xf32> to vector<17x1xf32>
    %321 = vector.broadcast %320 : vector<17x1xf32> to vector<17x17xf32>
    %322 = arith.subf %318, %321 : vector<17x17xf32>
    %323 = math.exp %322 : vector<17x17xf32>
    %cst_142 = arith.constant dense<0.000000e+00> : vector<17xf32>
    %324 = vector.multi_reduction <add>, %323, %cst_142 [1] : vector<17x17xf32> to vector<17xf32>
    %325 = vector.shape_cast %324 : vector<17xf32> to vector<17x1xf32>
    %326 = tpu.reciprocal %325 {approx = true} : vector<17x1xf32> -> vector<17x1xf32>
    %327 = vector.broadcast %326 : vector<17x1xf32> to vector<17x17xf32>
    %328 = arith.mulf %323, %327 : vector<17x17xf32>
    %329 = vector.extract_strided_slice %254 {offsets = [0, 24], sizes = [17, 8], strides = [1, 1]} : vector<17x32xf32> to vector<17x8xf32>
    %cst_143 = arith.constant dense<0.000000e+00> : vector<17x8xf32>
    %330 = tpu.matmul %328, %329, %cst_143 {dimension_numbers = #tpu.dot_dimension_numbers<[1], [0], [0], [1], [0, 0, 1, 1], [], []>} : vector<17x17xf32>, vector<17x8xf32>, vector<17x8xf32> -> vector<17x8xf32>
    %331 = vector.extract_strided_slice %246 {offsets = [24, 0], sizes = [8, 32], strides = [1, 1]} : vector<32x32xf32> to vector<8x32xf32>
    %cst_144 = arith.constant dense<0.000000e+00> : vector<17x32xf32>
    %332 = tpu.matmul %330, %331, %cst_144 {dimension_numbers = #tpu.dot_dimension_numbers<[1], [0], [0], [1], [0, 0, 1, 1], [], []>} : vector<17x8xf32>, vector<8x32xf32>, vector<17x32xf32> -> vector<17x32xf32>
    %333 = arith.addf %313, %332 : vector<17x32xf32>
    %334 = vector.broadcast %248 : vector<1x32xf32> to vector<17x32xf32>
    %335 = arith.addf %333, %334 : vector<17x32xf32>
    %336 = arith.addf %216, %335 : vector<17x32xf32>
    %c1_145 = arith.constant 1 : index
    %c0_146 = arith.constant 0 : index
    %c0_147 = arith.constant 0 : index
    %337 = vector.load %arg39[%c1_145, %c0_146, %c0_147] : memref<2x1x32xf32, #tpu.memory_space<vmem>>, vector<1x1x32xf32>
    %338 = vector.shape_cast %337 : vector<1x1x32xf32> to vector<1x32xf32>
    %c1_148 = arith.constant 1 : index
    %c0_149 = arith.constant 0 : index
    %c0_150 = arith.constant 0 : index
    %339 = vector.load %arg38[%c1_148, %c0_149, %c0_150] : memref<2x1x32xf32, #tpu.memory_space<vmem>>, vector<1x1x32xf32>
    %340 = vector.shape_cast %339 : vector<1x1x32xf32> to vector<1x32xf32>
    %cst_151 = arith.constant dense<0.000000e+00> : vector<17xf32>
    %341 = vector.multi_reduction <add>, %336, %cst_151 [1] : vector<17x32xf32> to vector<17xf32>
    %342 = vector.shape_cast %341 : vector<17xf32> to vector<17x1xf32>
    %cst_152 = arith.constant 3.200000e+01 : f32
    %343 = vector.broadcast %cst_152 : f32 to vector<17x1xf32>
    %344 = arith.divf %342, %343 : vector<17x1xf32>
    %345 = vector.broadcast %344 : vector<17x1xf32> to vector<17x32xf32>
    %346 = arith.subf %336, %345 : vector<17x32xf32>
    %347 = arith.mulf %346, %346 : vector<17x32xf32>
    %cst_153 = arith.constant dense<0.000000e+00> : vector<17xf32>
    %348 = vector.multi_reduction <add>, %347, %cst_153 [1] : vector<17x32xf32> to vector<17xf32>
    %349 = vector.shape_cast %348 : vector<17xf32> to vector<17x1xf32>
    %cst_154 = arith.constant 3.200000e+01 : f32
    %350 = vector.broadcast %cst_154 : f32 to vector<17x1xf32>
    %351 = arith.divf %349, %350 : vector<17x1xf32>
    %cst_155 = arith.constant 9.99999996E-13 : f32
    %352 = vector.broadcast %cst_155 : f32 to vector<17x1xf32>
    %353 = arith.addf %351, %352 : vector<17x1xf32>
    %354 = math.rsqrt %353 : vector<17x1xf32>
    %355 = vector.broadcast %354 : vector<17x1xf32> to vector<17x32xf32>
    %356 = arith.mulf %346, %355 : vector<17x32xf32>
    %357 = vector.broadcast %338 : vector<1x32xf32> to vector<17x32xf32>
    %358 = arith.mulf %356, %357 : vector<17x32xf32>
    %359 = vector.broadcast %340 : vector<1x32xf32> to vector<17x32xf32>
    %360 = arith.addf %358, %359 : vector<17x32xf32>
    %c1_156 = arith.constant 1 : index
    %c0_157 = arith.constant 0 : index
    %c0_158 = arith.constant 0 : index
    %361 = vector.load %arg42[%c1_156, %c0_157, %c0_158] : memref<2x32x64xf32, #tpu.memory_space<vmem>>, vector<1x32x64xf32>
    %362 = vector.shape_cast %361 : vector<1x32x64xf32> to vector<32x64xf32>
    %cst_159 = arith.constant dense<0.000000e+00> : vector<17x64xf32>
    %363 = tpu.matmul %360, %362, %cst_159 {dimension_numbers = #tpu.dot_dimension_numbers<[1], [0], [0], [1], [0, 0, 1, 1], [], []>} : vector<17x32xf32>, vector<32x64xf32>, vector<17x64xf32> -> vector<17x64xf32>
    %c1_160 = arith.constant 1 : index
    %c0_161 = arith.constant 0 : index
    %c0_162 = arith.constant 0 : index
    %364 = vector.load %arg32[%c1_160, %c0_161, %c0_162] : memref<2x1x64xf32, #tpu.memory_space<vmem>>, vector<1x1x64xf32>
    %365 = vector.shape_cast %364 : vector<1x1x64xf32> to vector<1x64xf32>
    %366 = vector.broadcast %365 : vector<1x64xf32> to vector<17x64xf32>
    %367 = arith.addf %363, %366 : vector<17x64xf32>
    %cst_163 = arith.constant 5.000000e-01 : f32
    %368 = vector.broadcast %cst_163 : f32 to vector<17x64xf32>
    %369 = arith.mulf %368, %367 : vector<17x64xf32>
    %cst_164 = arith.constant 0.707106769 : f32
    %370 = vector.broadcast %cst_164 : f32 to vector<17x64xf32>
    %371 = arith.mulf %367, %370 : vector<17x64xf32>
    %372 = math.absf %371 : vector<17x64xf32>
    %cst_165 = arith.constant 0.327591091 : f32
    %373 = vector.broadcast %cst_165 : f32 to vector<17x64xf32>
    %374 = arith.mulf %373, %372 : vector<17x64xf32>
    %cst_166 = arith.constant 1.000000e+00 : f32
    %375 = vector.broadcast %cst_166 : f32 to vector<17x64xf32>
    %376 = arith.addf %375, %374 : vector<17x64xf32>
    %cst_167 = arith.constant 1.000000e+00 : f32
    %377 = vector.broadcast %cst_167 : f32 to vector<17x64xf32>
    %378 = arith.divf %377, %376 : vector<17x64xf32>
    %cst_168 = arith.constant 1.06140542 : f32
    %379 = vector.broadcast %cst_168 : f32 to vector<17x64xf32>
    %380 = arith.mulf %379, %378 : vector<17x64xf32>
    %cst_169 = arith.constant -1.45315206 : f32
    %381 = vector.broadcast %cst_169 : f32 to vector<17x64xf32>
    %382 = arith.addf %380, %381 : vector<17x64xf32>
    %383 = arith.mulf %382, %378 : vector<17x64xf32>
    %cst_170 = arith.constant 1.42141378 : f32
    %384 = vector.broadcast %cst_170 : f32 to vector<17x64xf32>
    %385 = arith.addf %383, %384 : vector<17x64xf32>
    %386 = arith.mulf %385, %378 : vector<17x64xf32>
    %cst_171 = arith.constant -0.284496725 : f32
    %387 = vector.broadcast %cst_171 : f32 to vector<17x64xf32>
    %388 = arith.addf %386, %387 : vector<17x64xf32>
    %389 = arith.mulf %388, %378 : vector<17x64xf32>
    %cst_172 = arith.constant 0.254829586 : f32
    %390 = vector.broadcast %cst_172 : f32 to vector<17x64xf32>
    %391 = arith.addf %389, %390 : vector<17x64xf32>
    %392 = arith.mulf %391, %378 : vector<17x64xf32>
    %cst_173 = arith.constant 0.000000e+00 : f32
    %393 = vector.broadcast %cst_173 : f32 to vector<17x64xf32>
    %394 = arith.subf %393, %372 : vector<17x64xf32>
    %395 = arith.mulf %394, %372 : vector<17x64xf32>
    %396 = math.exp %395 : vector<17x64xf32>
    %397 = arith.mulf %392, %396 : vector<17x64xf32>
    %cst_174 = arith.constant 1.000000e+00 : f32
    %398 = vector.broadcast %cst_174 : f32 to vector<17x64xf32>
    %399 = arith.subf %398, %397 : vector<17x64xf32>
    %cst_175 = arith.constant 0.000000e+00 : f32
    %400 = vector.broadcast %cst_175 : f32 to vector<17x64xf32>
    %401 = arith.cmpf olt, %371, %400 : vector<17x64xf32>
    %cst_176 = arith.constant 0.000000e+00 : f32
    %402 = vector.broadcast %cst_176 : f32 to vector<17x64xf32>
    %403 = arith.subf %402, %399 : vector<17x64xf32>
    %404 = arith.select %401, %403, %399 : vector<17x64xi1>, vector<17x64xf32>
    %cst_177 = arith.constant 1.000000e+00 : f32
    %405 = vector.broadcast %cst_177 : f32 to vector<17x64xf32>
    %406 = arith.addf %405, %404 : vector<17x64xf32>
    %407 = arith.mulf %369, %406 : vector<17x64xf32>
    %c1_178 = arith.constant 1 : index
    %c0_179 = arith.constant 0 : index
    %c0_180 = arith.constant 0 : index
    %408 = vector.load %arg43[%c1_178, %c0_179, %c0_180] : memref<2x64x32xf32, #tpu.memory_space<vmem>>, vector<1x64x32xf32>
    %409 = vector.shape_cast %408 : vector<1x64x32xf32> to vector<64x32xf32>
    %cst_181 = arith.constant dense<0.000000e+00> : vector<17x32xf32>
    %410 = tpu.matmul %407, %409, %cst_181 {dimension_numbers = #tpu.dot_dimension_numbers<[1], [0], [0], [1], [0, 0, 1, 1], [], []>} : vector<17x64xf32>, vector<64x32xf32>, vector<17x32xf32> -> vector<17x32xf32>
    %c1_182 = arith.constant 1 : index
    %c0_183 = arith.constant 0 : index
    %c0_184 = arith.constant 0 : index
    %411 = vector.load %arg33[%c1_182, %c0_183, %c0_184] : memref<2x1x32xf32, #tpu.memory_space<vmem>>, vector<1x1x32xf32>
    %412 = vector.shape_cast %411 : vector<1x1x32xf32> to vector<1x32xf32>
    %413 = vector.broadcast %412 : vector<1x32xf32> to vector<17x32xf32>
    %414 = arith.addf %410, %413 : vector<17x32xf32>
    %415 = arith.addf %336, %414 : vector<17x32xf32>
    %c0_185 = arith.constant 0 : index
    %c0_186 = arith.constant 0 : index
    %416 = vector.load %arg41[%c0_185, %c0_186] : memref<1x32xf32, #tpu.memory_space<vmem>>, vector<1x32xf32>
    %c0_187 = arith.constant 0 : index
    %c0_188 = arith.constant 0 : index
    %417 = vector.load %arg40[%c0_187, %c0_188] : memref<1x32xf32, #tpu.memory_space<vmem>>, vector<1x32xf32>
    %cst_189 = arith.constant dense<0.000000e+00> : vector<17xf32>
    %418 = vector.multi_reduction <add>, %415, %cst_189 [1] : vector<17x32xf32> to vector<17xf32>
    %419 = vector.shape_cast %418 : vector<17xf32> to vector<17x1xf32>
    %cst_190 = arith.constant 3.200000e+01 : f32
    %420 = vector.broadcast %cst_190 : f32 to vector<17x1xf32>
    %421 = arith.divf %419, %420 : vector<17x1xf32>
    %422 = vector.broadcast %421 : vector<17x1xf32> to vector<17x32xf32>
    %423 = arith.subf %415, %422 : vector<17x32xf32>
    %424 = arith.mulf %423, %423 : vector<17x32xf32>
    %cst_191 = arith.constant dense<0.000000e+00> : vector<17xf32>
    %425 = vector.multi_reduction <add>, %424, %cst_191 [1] : vector<17x32xf32> to vector<17xf32>
    %426 = vector.shape_cast %425 : vector<17xf32> to vector<17x1xf32>
    %cst_192 = arith.constant 3.200000e+01 : f32
    %427 = vector.broadcast %cst_192 : f32 to vector<17x1xf32>
    %428 = arith.divf %426, %427 : vector<17x1xf32>
    %cst_193 = arith.constant 9.99999996E-13 : f32
    %429 = vector.broadcast %cst_193 : f32 to vector<17x1xf32>
    %430 = arith.addf %428, %429 : vector<17x1xf32>
    %431 = math.rsqrt %430 : vector<17x1xf32>
    %432 = vector.broadcast %431 : vector<17x1xf32> to vector<17x32xf32>
    %433 = arith.mulf %423, %432 : vector<17x32xf32>
    %434 = vector.broadcast %416 : vector<1x32xf32> to vector<17x32xf32>
    %435 = arith.mulf %433, %434 : vector<17x32xf32>
    %436 = vector.broadcast %417 : vector<1x32xf32> to vector<17x32xf32>
    %437 = arith.addf %435, %436 : vector<17x32xf32>
    %c0_194 = arith.constant 0 : index
    %c0_195 = arith.constant 0 : index
    %438 = vector.load %arg31[%c0_194, %c0_195] : memref<32x32xf32, #tpu.memory_space<vmem>>, vector<32x32xf32>
    %cst_196 = arith.constant dense<0.000000e+00> : vector<17x32xf32>
    %439 = tpu.matmul %437, %438, %cst_196 {dimension_numbers = #tpu.dot_dimension_numbers<[1], [0], [0], [1], [0, 0, 1, 1], [], []>} : vector<17x32xf32>, vector<32x32xf32>, vector<17x32xf32> -> vector<17x32xf32>
    %c0_197 = arith.constant 0 : index
    %c0_198 = arith.constant 0 : index
    %440 = vector.load %arg30[%c0_197, %c0_198] : memref<1x32xf32, #tpu.memory_space<vmem>>, vector<1x32xf32>
    %441 = vector.broadcast %440 : vector<1x32xf32> to vector<17x32xf32>
    %442 = arith.addf %439, %441 : vector<17x32xf32>
    %c0_199 = arith.constant 0 : index
    %c0_200 = arith.constant 0 : index
    %c0_201 = arith.constant 0 : index
    %443 = vector.load %arg2[%c0_199, %c0_200, %c0_201] : memref<1x8x32xf32, #tpu.memory_space<vmem>>, vector<1x8x32xf32>
    %444 = vector.shape_cast %443 : vector<1x8x32xf32> to vector<8x32xf32>
    %c0_202 = arith.constant 0 : index
    %c0_203 = arith.constant 0 : index
    %445 = vector.load %arg3[%c0_202, %c0_203] : memref<8x8xf32, #tpu.memory_space<vmem>>, vector<8x8xf32>
    %c0_204 = arith.constant 0 : index
    %c0_205 = arith.constant 0 : index
    %c0_206 = arith.constant 0 : index
    %446 = vector.load %arg22[%c0_204, %c0_205, %c0_206] : memref<2x32x96xf32, #tpu.memory_space<vmem>>, vector<1x32x96xf32>
    %447 = vector.shape_cast %446 : vector<1x32x96xf32> to vector<32x96xf32>
    %c0_207 = arith.constant 0 : index
    %c0_208 = arith.constant 0 : index
    %c0_209 = arith.constant 0 : index
    %448 = vector.load %arg20[%c0_207, %c0_208, %c0_209] : memref<2x1x96xf32, #tpu.memory_space<vmem>>, vector<1x1x96xf32>
    %449 = vector.shape_cast %448 : vector<1x1x96xf32> to vector<1x96xf32>
    %c0_210 = arith.constant 0 : index
    %c0_211 = arith.constant 0 : index
    %c0_212 = arith.constant 0 : index
    %450 = vector.load %arg21[%c0_210, %c0_211, %c0_212] : memref<2x32x32xf32, #tpu.memory_space<vmem>>, vector<1x32x32xf32>
    %451 = vector.shape_cast %450 : vector<1x32x32xf32> to vector<32x32xf32>
    %c0_213 = arith.constant 0 : index
    %c0_214 = arith.constant 0 : index
    %c0_215 = arith.constant 0 : index
    %452 = vector.load %arg19[%c0_213, %c0_214, %c0_215] : memref<2x1x32xf32, #tpu.memory_space<vmem>>, vector<1x1x32xf32>
    %453 = vector.shape_cast %452 : vector<1x1x32xf32> to vector<1x32xf32>
    %cst_216 = arith.constant dense<0.000000e+00> : vector<8x96xf32>
    %454 = tpu.matmul %444, %447, %cst_216 {dimension_numbers = #tpu.dot_dimension_numbers<[1], [0], [0], [1], [0, 0, 1, 1], [], []>} : vector<8x32xf32>, vector<32x96xf32>, vector<8x96xf32> -> vector<8x96xf32>
    %455 = vector.broadcast %449 : vector<1x96xf32> to vector<8x96xf32>
    %456 = arith.addf %454, %455 : vector<8x96xf32>
    %457 = vector.extract_strided_slice %456 {offsets = [0, 0], sizes = [8, 32], strides = [1, 1]} : vector<8x96xf32> to vector<8x32xf32>
    %458 = vector.extract_strided_slice %456 {offsets = [0, 32], sizes = [8, 32], strides = [1, 1]} : vector<8x96xf32> to vector<8x32xf32>
    %459 = vector.extract_strided_slice %456 {offsets = [0, 64], sizes = [8, 32], strides = [1, 1]} : vector<8x96xf32> to vector<8x32xf32>
    %460 = vector.extract_strided_slice %457 {offsets = [0, 0], sizes = [8, 4], strides = [1, 1]} : vector<8x32xf32> to vector<8x4xf32>
    %461 = vector.extract_strided_slice %458 {offsets = [0, 0], sizes = [8, 4], strides = [1, 1]} : vector<8x32xf32> to vector<8x4xf32>
    %cst_217 = arith.constant dense<0.000000e+00> : vector<8x8xf32>
    %462 = tpu.matmul %460, %461, %cst_217 {dimension_numbers = #tpu.dot_dimension_numbers<[1], [1], [0], [0], [0, 0, 1, 0], [], []>} : vector<8x4xf32>, vector<8x4xf32>, vector<8x8xf32> -> vector<8x8xf32>
    %cst_218 = arith.constant 5.000000e-01 : f32
    %463 = vector.broadcast %cst_218 : f32 to vector<8x8xf32>
    %464 = arith.mulf %462, %463 : vector<8x8xf32>
    %465 = arith.addf %464, %445 : vector<8x8xf32>
    %cst_219 = arith.constant dense<0xFF800000> : vector<8xf32>
    %466 = vector.multi_reduction <maximumf>, %465, %cst_219 [1] : vector<8x8xf32> to vector<8xf32>
    %467 = vector.shape_cast %466 : vector<8xf32> to vector<8x1xf32>
    %468 = vector.broadcast %467 : vector<8x1xf32> to vector<8x8xf32>
    %469 = arith.subf %465, %468 : vector<8x8xf32>
    %470 = math.exp %469 : vector<8x8xf32>
    %cst_220 = arith.constant dense<0.000000e+00> : vector<8xf32>
    %471 = vector.multi_reduction <add>, %470, %cst_220 [1] : vector<8x8xf32> to vector<8xf32>
    %472 = vector.shape_cast %471 : vector<8xf32> to vector<8x1xf32>
    %473 = tpu.reciprocal %472 {approx = true} : vector<8x1xf32> -> vector<8x1xf32>
    %474 = vector.broadcast %473 : vector<8x1xf32> to vector<8x8xf32>
    %475 = arith.mulf %470, %474 : vector<8x8xf32>
    %476 = vector.extract_strided_slice %459 {offsets = [0, 0], sizes = [8, 4], strides = [1, 1]} : vector<8x32xf32> to vector<8x4xf32>
    %cst_221 = arith.constant dense<0.000000e+00> : vector<8x4xf32>
    %477 = tpu.matmul %475, %476, %cst_221 {dimension_numbers = #tpu.dot_dimension_numbers<[1], [0], [0], [1], [0, 0, 1, 1], [], []>} : vector<8x8xf32>, vector<8x4xf32>, vector<8x4xf32> -> vector<8x4xf32>
    %478 = vector.extract_strided_slice %451 {offsets = [0, 0], sizes = [4, 32], strides = [1, 1]} : vector<32x32xf32> to vector<4x32xf32>
    %cst_222 = arith.constant dense<0.000000e+00> : vector<8x32xf32>
    %479 = tpu.matmul %477, %478, %cst_222 {dimension_numbers = #tpu.dot_dimension_numbers<[1], [0], [0], [1], [0, 0, 1, 1], [], []>} : vector<8x4xf32>, vector<4x32xf32>, vector<8x32xf32> -> vector<8x32xf32>
    %480 = vector.extract_strided_slice %457 {offsets = [0, 4], sizes = [8, 4], strides = [1, 1]} : vector<8x32xf32> to vector<8x4xf32>
    %481 = vector.extract_strided_slice %458 {offsets = [0, 4], sizes = [8, 4], strides = [1, 1]} : vector<8x32xf32> to vector<8x4xf32>
    %cst_223 = arith.constant dense<0.000000e+00> : vector<8x8xf32>
    %482 = tpu.matmul %480, %481, %cst_223 {dimension_numbers = #tpu.dot_dimension_numbers<[1], [1], [0], [0], [0, 0, 1, 0], [], []>} : vector<8x4xf32>, vector<8x4xf32>, vector<8x8xf32> -> vector<8x8xf32>
    %cst_224 = arith.constant 5.000000e-01 : f32
    %483 = vector.broadcast %cst_224 : f32 to vector<8x8xf32>
    %484 = arith.mulf %482, %483 : vector<8x8xf32>
    %485 = arith.addf %484, %445 : vector<8x8xf32>
    %cst_225 = arith.constant dense<0xFF800000> : vector<8xf32>
    %486 = vector.multi_reduction <maximumf>, %485, %cst_225 [1] : vector<8x8xf32> to vector<8xf32>
    %487 = vector.shape_cast %486 : vector<8xf32> to vector<8x1xf32>
    %488 = vector.broadcast %487 : vector<8x1xf32> to vector<8x8xf32>
    %489 = arith.subf %485, %488 : vector<8x8xf32>
    %490 = math.exp %489 : vector<8x8xf32>
    %cst_226 = arith.constant dense<0.000000e+00> : vector<8xf32>
    %491 = vector.multi_reduction <add>, %490, %cst_226 [1] : vector<8x8xf32> to vector<8xf32>
    %492 = vector.shape_cast %491 : vector<8xf32> to vector<8x1xf32>
    %493 = tpu.reciprocal %492 {approx = true} : vector<8x1xf32> -> vector<8x1xf32>
    %494 = vector.broadcast %493 : vector<8x1xf32> to vector<8x8xf32>
    %495 = arith.mulf %490, %494 : vector<8x8xf32>
    %496 = vector.extract_strided_slice %459 {offsets = [0, 4], sizes = [8, 4], strides = [1, 1]} : vector<8x32xf32> to vector<8x4xf32>
    %cst_227 = arith.constant dense<0.000000e+00> : vector<8x4xf32>
    %497 = tpu.matmul %495, %496, %cst_227 {dimension_numbers = #tpu.dot_dimension_numbers<[1], [0], [0], [1], [0, 0, 1, 1], [], []>} : vector<8x8xf32>, vector<8x4xf32>, vector<8x4xf32> -> vector<8x4xf32>
    %498 = vector.extract_strided_slice %451 {offsets = [4, 0], sizes = [4, 32], strides = [1, 1]} : vector<32x32xf32> to vector<4x32xf32>
    %cst_228 = arith.constant dense<0.000000e+00> : vector<8x32xf32>
    %499 = tpu.matmul %497, %498, %cst_228 {dimension_numbers = #tpu.dot_dimension_numbers<[1], [0], [0], [1], [0, 0, 1, 1], [], []>} : vector<8x4xf32>, vector<4x32xf32>, vector<8x32xf32> -> vector<8x32xf32>
    %500 = arith.addf %479, %499 : vector<8x32xf32>
    %501 = vector.extract_strided_slice %457 {offsets = [0, 8], sizes = [8, 4], strides = [1, 1]} : vector<8x32xf32> to vector<8x4xf32>
    %502 = vector.extract_strided_slice %458 {offsets = [0, 8], sizes = [8, 4], strides = [1, 1]} : vector<8x32xf32> to vector<8x4xf32>
    %cst_229 = arith.constant dense<0.000000e+00> : vector<8x8xf32>
    %503 = tpu.matmul %501, %502, %cst_229 {dimension_numbers = #tpu.dot_dimension_numbers<[1], [1], [0], [0], [0, 0, 1, 0], [], []>} : vector<8x4xf32>, vector<8x4xf32>, vector<8x8xf32> -> vector<8x8xf32>
    %cst_230 = arith.constant 5.000000e-01 : f32
    %504 = vector.broadcast %cst_230 : f32 to vector<8x8xf32>
    %505 = arith.mulf %503, %504 : vector<8x8xf32>
    %506 = arith.addf %505, %445 : vector<8x8xf32>
    %cst_231 = arith.constant dense<0xFF800000> : vector<8xf32>
    %507 = vector.multi_reduction <maximumf>, %506, %cst_231 [1] : vector<8x8xf32> to vector<8xf32>
    %508 = vector.shape_cast %507 : vector<8xf32> to vector<8x1xf32>
    %509 = vector.broadcast %508 : vector<8x1xf32> to vector<8x8xf32>
    %510 = arith.subf %506, %509 : vector<8x8xf32>
    %511 = math.exp %510 : vector<8x8xf32>
    %cst_232 = arith.constant dense<0.000000e+00> : vector<8xf32>
    %512 = vector.multi_reduction <add>, %511, %cst_232 [1] : vector<8x8xf32> to vector<8xf32>
    %513 = vector.shape_cast %512 : vector<8xf32> to vector<8x1xf32>
    %514 = tpu.reciprocal %513 {approx = true} : vector<8x1xf32> -> vector<8x1xf32>
    %515 = vector.broadcast %514 : vector<8x1xf32> to vector<8x8xf32>
    %516 = arith.mulf %511, %515 : vector<8x8xf32>
    %517 = vector.extract_strided_slice %459 {offsets = [0, 8], sizes = [8, 4], strides = [1, 1]} : vector<8x32xf32> to vector<8x4xf32>
    %cst_233 = arith.constant dense<0.000000e+00> : vector<8x4xf32>
    %518 = tpu.matmul %516, %517, %cst_233 {dimension_numbers = #tpu.dot_dimension_numbers<[1], [0], [0], [1], [0, 0, 1, 1], [], []>} : vector<8x8xf32>, vector<8x4xf32>, vector<8x4xf32> -> vector<8x4xf32>
    %519 = vector.extract_strided_slice %451 {offsets = [8, 0], sizes = [4, 32], strides = [1, 1]} : vector<32x32xf32> to vector<4x32xf32>
    %cst_234 = arith.constant dense<0.000000e+00> : vector<8x32xf32>
    %520 = tpu.matmul %518, %519, %cst_234 {dimension_numbers = #tpu.dot_dimension_numbers<[1], [0], [0], [1], [0, 0, 1, 1], [], []>} : vector<8x4xf32>, vector<4x32xf32>, vector<8x32xf32> -> vector<8x32xf32>
    %521 = arith.addf %500, %520 : vector<8x32xf32>
    %522 = vector.extract_strided_slice %457 {offsets = [0, 12], sizes = [8, 4], strides = [1, 1]} : vector<8x32xf32> to vector<8x4xf32>
    %523 = vector.extract_strided_slice %458 {offsets = [0, 12], sizes = [8, 4], strides = [1, 1]} : vector<8x32xf32> to vector<8x4xf32>
    %cst_235 = arith.constant dense<0.000000e+00> : vector<8x8xf32>
    %524 = tpu.matmul %522, %523, %cst_235 {dimension_numbers = #tpu.dot_dimension_numbers<[1], [1], [0], [0], [0, 0, 1, 0], [], []>} : vector<8x4xf32>, vector<8x4xf32>, vector<8x8xf32> -> vector<8x8xf32>
    %cst_236 = arith.constant 5.000000e-01 : f32
    %525 = vector.broadcast %cst_236 : f32 to vector<8x8xf32>
    %526 = arith.mulf %524, %525 : vector<8x8xf32>
    %527 = arith.addf %526, %445 : vector<8x8xf32>
    %cst_237 = arith.constant dense<0xFF800000> : vector<8xf32>
    %528 = vector.multi_reduction <maximumf>, %527, %cst_237 [1] : vector<8x8xf32> to vector<8xf32>
    %529 = vector.shape_cast %528 : vector<8xf32> to vector<8x1xf32>
    %530 = vector.broadcast %529 : vector<8x1xf32> to vector<8x8xf32>
    %531 = arith.subf %527, %530 : vector<8x8xf32>
    %532 = math.exp %531 : vector<8x8xf32>
    %cst_238 = arith.constant dense<0.000000e+00> : vector<8xf32>
    %533 = vector.multi_reduction <add>, %532, %cst_238 [1] : vector<8x8xf32> to vector<8xf32>
    %534 = vector.shape_cast %533 : vector<8xf32> to vector<8x1xf32>
    %535 = tpu.reciprocal %534 {approx = true} : vector<8x1xf32> -> vector<8x1xf32>
    %536 = vector.broadcast %535 : vector<8x1xf32> to vector<8x8xf32>
    %537 = arith.mulf %532, %536 : vector<8x8xf32>
    %538 = vector.extract_strided_slice %459 {offsets = [0, 12], sizes = [8, 4], strides = [1, 1]} : vector<8x32xf32> to vector<8x4xf32>
    %cst_239 = arith.constant dense<0.000000e+00> : vector<8x4xf32>
    %539 = tpu.matmul %537, %538, %cst_239 {dimension_numbers = #tpu.dot_dimension_numbers<[1], [0], [0], [1], [0, 0, 1, 1], [], []>} : vector<8x8xf32>, vector<8x4xf32>, vector<8x4xf32> -> vector<8x4xf32>
    %540 = vector.extract_strided_slice %451 {offsets = [12, 0], sizes = [4, 32], strides = [1, 1]} : vector<32x32xf32> to vector<4x32xf32>
    %cst_240 = arith.constant dense<0.000000e+00> : vector<8x32xf32>
    %541 = tpu.matmul %539, %540, %cst_240 {dimension_numbers = #tpu.dot_dimension_numbers<[1], [0], [0], [1], [0, 0, 1, 1], [], []>} : vector<8x4xf32>, vector<4x32xf32>, vector<8x32xf32> -> vector<8x32xf32>
    %542 = arith.addf %521, %541 : vector<8x32xf32>
    %543 = vector.extract_strided_slice %457 {offsets = [0, 16], sizes = [8, 4], strides = [1, 1]} : vector<8x32xf32> to vector<8x4xf32>
    %544 = vector.extract_strided_slice %458 {offsets = [0, 16], sizes = [8, 4], strides = [1, 1]} : vector<8x32xf32> to vector<8x4xf32>
    %cst_241 = arith.constant dense<0.000000e+00> : vector<8x8xf32>
    %545 = tpu.matmul %543, %544, %cst_241 {dimension_numbers = #tpu.dot_dimension_numbers<[1], [1], [0], [0], [0, 0, 1, 0], [], []>} : vector<8x4xf32>, vector<8x4xf32>, vector<8x8xf32> -> vector<8x8xf32>
    %cst_242 = arith.constant 5.000000e-01 : f32
    %546 = vector.broadcast %cst_242 : f32 to vector<8x8xf32>
    %547 = arith.mulf %545, %546 : vector<8x8xf32>
    %548 = arith.addf %547, %445 : vector<8x8xf32>
    %cst_243 = arith.constant dense<0xFF800000> : vector<8xf32>
    %549 = vector.multi_reduction <maximumf>, %548, %cst_243 [1] : vector<8x8xf32> to vector<8xf32>
    %550 = vector.shape_cast %549 : vector<8xf32> to vector<8x1xf32>
    %551 = vector.broadcast %550 : vector<8x1xf32> to vector<8x8xf32>
    %552 = arith.subf %548, %551 : vector<8x8xf32>
    %553 = math.exp %552 : vector<8x8xf32>
    %cst_244 = arith.constant dense<0.000000e+00> : vector<8xf32>
    %554 = vector.multi_reduction <add>, %553, %cst_244 [1] : vector<8x8xf32> to vector<8xf32>
    %555 = vector.shape_cast %554 : vector<8xf32> to vector<8x1xf32>
    %556 = tpu.reciprocal %555 {approx = true} : vector<8x1xf32> -> vector<8x1xf32>
    %557 = vector.broadcast %556 : vector<8x1xf32> to vector<8x8xf32>
    %558 = arith.mulf %553, %557 : vector<8x8xf32>
    %559 = vector.extract_strided_slice %459 {offsets = [0, 16], sizes = [8, 4], strides = [1, 1]} : vector<8x32xf32> to vector<8x4xf32>
    %cst_245 = arith.constant dense<0.000000e+00> : vector<8x4xf32>
    %560 = tpu.matmul %558, %559, %cst_245 {dimension_numbers = #tpu.dot_dimension_numbers<[1], [0], [0], [1], [0, 0, 1, 1], [], []>} : vector<8x8xf32>, vector<8x4xf32>, vector<8x4xf32> -> vector<8x4xf32>
    %561 = vector.extract_strided_slice %451 {offsets = [16, 0], sizes = [4, 32], strides = [1, 1]} : vector<32x32xf32> to vector<4x32xf32>
    %cst_246 = arith.constant dense<0.000000e+00> : vector<8x32xf32>
    %562 = tpu.matmul %560, %561, %cst_246 {dimension_numbers = #tpu.dot_dimension_numbers<[1], [0], [0], [1], [0, 0, 1, 1], [], []>} : vector<8x4xf32>, vector<4x32xf32>, vector<8x32xf32> -> vector<8x32xf32>
    %563 = arith.addf %542, %562 : vector<8x32xf32>
    %564 = vector.extract_strided_slice %457 {offsets = [0, 20], sizes = [8, 4], strides = [1, 1]} : vector<8x32xf32> to vector<8x4xf32>
    %565 = vector.extract_strided_slice %458 {offsets = [0, 20], sizes = [8, 4], strides = [1, 1]} : vector<8x32xf32> to vector<8x4xf32>
    %cst_247 = arith.constant dense<0.000000e+00> : vector<8x8xf32>
    %566 = tpu.matmul %564, %565, %cst_247 {dimension_numbers = #tpu.dot_dimension_numbers<[1], [1], [0], [0], [0, 0, 1, 0], [], []>} : vector<8x4xf32>, vector<8x4xf32>, vector<8x8xf32> -> vector<8x8xf32>
    %cst_248 = arith.constant 5.000000e-01 : f32
    %567 = vector.broadcast %cst_248 : f32 to vector<8x8xf32>
    %568 = arith.mulf %566, %567 : vector<8x8xf32>
    %569 = arith.addf %568, %445 : vector<8x8xf32>
    %cst_249 = arith.constant dense<0xFF800000> : vector<8xf32>
    %570 = vector.multi_reduction <maximumf>, %569, %cst_249 [1] : vector<8x8xf32> to vector<8xf32>
    %571 = vector.shape_cast %570 : vector<8xf32> to vector<8x1xf32>
    %572 = vector.broadcast %571 : vector<8x1xf32> to vector<8x8xf32>
    %573 = arith.subf %569, %572 : vector<8x8xf32>
    %574 = math.exp %573 : vector<8x8xf32>
    %cst_250 = arith.constant dense<0.000000e+00> : vector<8xf32>
    %575 = vector.multi_reduction <add>, %574, %cst_250 [1] : vector<8x8xf32> to vector<8xf32>
    %576 = vector.shape_cast %575 : vector<8xf32> to vector<8x1xf32>
    %577 = tpu.reciprocal %576 {approx = true} : vector<8x1xf32> -> vector<8x1xf32>
    %578 = vector.broadcast %577 : vector<8x1xf32> to vector<8x8xf32>
    %579 = arith.mulf %574, %578 : vector<8x8xf32>
    %580 = vector.extract_strided_slice %459 {offsets = [0, 20], sizes = [8, 4], strides = [1, 1]} : vector<8x32xf32> to vector<8x4xf32>
    %cst_251 = arith.constant dense<0.000000e+00> : vector<8x4xf32>
    %581 = tpu.matmul %579, %580, %cst_251 {dimension_numbers = #tpu.dot_dimension_numbers<[1], [0], [0], [1], [0, 0, 1, 1], [], []>} : vector<8x8xf32>, vector<8x4xf32>, vector<8x4xf32> -> vector<8x4xf32>
    %582 = vector.extract_strided_slice %451 {offsets = [20, 0], sizes = [4, 32], strides = [1, 1]} : vector<32x32xf32> to vector<4x32xf32>
    %cst_252 = arith.constant dense<0.000000e+00> : vector<8x32xf32>
    %583 = tpu.matmul %581, %582, %cst_252 {dimension_numbers = #tpu.dot_dimension_numbers<[1], [0], [0], [1], [0, 0, 1, 1], [], []>} : vector<8x4xf32>, vector<4x32xf32>, vector<8x32xf32> -> vector<8x32xf32>
    %584 = arith.addf %563, %583 : vector<8x32xf32>
    %585 = vector.extract_strided_slice %457 {offsets = [0, 24], sizes = [8, 4], strides = [1, 1]} : vector<8x32xf32> to vector<8x4xf32>
    %586 = vector.extract_strided_slice %458 {offsets = [0, 24], sizes = [8, 4], strides = [1, 1]} : vector<8x32xf32> to vector<8x4xf32>
    %cst_253 = arith.constant dense<0.000000e+00> : vector<8x8xf32>
    %587 = tpu.matmul %585, %586, %cst_253 {dimension_numbers = #tpu.dot_dimension_numbers<[1], [1], [0], [0], [0, 0, 1, 0], [], []>} : vector<8x4xf32>, vector<8x4xf32>, vector<8x8xf32> -> vector<8x8xf32>
    %cst_254 = arith.constant 5.000000e-01 : f32
    %588 = vector.broadcast %cst_254 : f32 to vector<8x8xf32>
    %589 = arith.mulf %587, %588 : vector<8x8xf32>
    %590 = arith.addf %589, %445 : vector<8x8xf32>
    %cst_255 = arith.constant dense<0xFF800000> : vector<8xf32>
    %591 = vector.multi_reduction <maximumf>, %590, %cst_255 [1] : vector<8x8xf32> to vector<8xf32>
    %592 = vector.shape_cast %591 : vector<8xf32> to vector<8x1xf32>
    %593 = vector.broadcast %592 : vector<8x1xf32> to vector<8x8xf32>
    %594 = arith.subf %590, %593 : vector<8x8xf32>
    %595 = math.exp %594 : vector<8x8xf32>
    %cst_256 = arith.constant dense<0.000000e+00> : vector<8xf32>
    %596 = vector.multi_reduction <add>, %595, %cst_256 [1] : vector<8x8xf32> to vector<8xf32>
    %597 = vector.shape_cast %596 : vector<8xf32> to vector<8x1xf32>
    %598 = tpu.reciprocal %597 {approx = true} : vector<8x1xf32> -> vector<8x1xf32>
    %599 = vector.broadcast %598 : vector<8x1xf32> to vector<8x8xf32>
    %600 = arith.mulf %595, %599 : vector<8x8xf32>
    %601 = vector.extract_strided_slice %459 {offsets = [0, 24], sizes = [8, 4], strides = [1, 1]} : vector<8x32xf32> to vector<8x4xf32>
    %cst_257 = arith.constant dense<0.000000e+00> : vector<8x4xf32>
    %602 = tpu.matmul %600, %601, %cst_257 {dimension_numbers = #tpu.dot_dimension_numbers<[1], [0], [0], [1], [0, 0, 1, 1], [], []>} : vector<8x8xf32>, vector<8x4xf32>, vector<8x4xf32> -> vector<8x4xf32>
    %603 = vector.extract_strided_slice %451 {offsets = [24, 0], sizes = [4, 32], strides = [1, 1]} : vector<32x32xf32> to vector<4x32xf32>
    %cst_258 = arith.constant dense<0.000000e+00> : vector<8x32xf32>
    %604 = tpu.matmul %602, %603, %cst_258 {dimension_numbers = #tpu.dot_dimension_numbers<[1], [0], [0], [1], [0, 0, 1, 1], [], []>} : vector<8x4xf32>, vector<4x32xf32>, vector<8x32xf32> -> vector<8x32xf32>
    %605 = arith.addf %584, %604 : vector<8x32xf32>
    %606 = vector.extract_strided_slice %457 {offsets = [0, 28], sizes = [8, 4], strides = [1, 1]} : vector<8x32xf32> to vector<8x4xf32>
    %607 = vector.extract_strided_slice %458 {offsets = [0, 28], sizes = [8, 4], strides = [1, 1]} : vector<8x32xf32> to vector<8x4xf32>
    %cst_259 = arith.constant dense<0.000000e+00> : vector<8x8xf32>
    %608 = tpu.matmul %606, %607, %cst_259 {dimension_numbers = #tpu.dot_dimension_numbers<[1], [1], [0], [0], [0, 0, 1, 0], [], []>} : vector<8x4xf32>, vector<8x4xf32>, vector<8x8xf32> -> vector<8x8xf32>
    %cst_260 = arith.constant 5.000000e-01 : f32
    %609 = vector.broadcast %cst_260 : f32 to vector<8x8xf32>
    %610 = arith.mulf %608, %609 : vector<8x8xf32>
    %611 = arith.addf %610, %445 : vector<8x8xf32>
    %cst_261 = arith.constant dense<0xFF800000> : vector<8xf32>
    %612 = vector.multi_reduction <maximumf>, %611, %cst_261 [1] : vector<8x8xf32> to vector<8xf32>
    %613 = vector.shape_cast %612 : vector<8xf32> to vector<8x1xf32>
    %614 = vector.broadcast %613 : vector<8x1xf32> to vector<8x8xf32>
    %615 = arith.subf %611, %614 : vector<8x8xf32>
    %616 = math.exp %615 : vector<8x8xf32>
    %cst_262 = arith.constant dense<0.000000e+00> : vector<8xf32>
    %617 = vector.multi_reduction <add>, %616, %cst_262 [1] : vector<8x8xf32> to vector<8xf32>
    %618 = vector.shape_cast %617 : vector<8xf32> to vector<8x1xf32>
    %619 = tpu.reciprocal %618 {approx = true} : vector<8x1xf32> -> vector<8x1xf32>
    %620 = vector.broadcast %619 : vector<8x1xf32> to vector<8x8xf32>
    %621 = arith.mulf %616, %620 : vector<8x8xf32>
    %622 = vector.extract_strided_slice %459 {offsets = [0, 28], sizes = [8, 4], strides = [1, 1]} : vector<8x32xf32> to vector<8x4xf32>
    %cst_263 = arith.constant dense<0.000000e+00> : vector<8x4xf32>
    %623 = tpu.matmul %621, %622, %cst_263 {dimension_numbers = #tpu.dot_dimension_numbers<[1], [0], [0], [1], [0, 0, 1, 1], [], []>} : vector<8x8xf32>, vector<8x4xf32>, vector<8x4xf32> -> vector<8x4xf32>
    %624 = vector.extract_strided_slice %451 {offsets = [28, 0], sizes = [4, 32], strides = [1, 1]} : vector<32x32xf32> to vector<4x32xf32>
    %cst_264 = arith.constant dense<0.000000e+00> : vector<8x32xf32>
    %625 = tpu.matmul %623, %624, %cst_264 {dimension_numbers = #tpu.dot_dimension_numbers<[1], [0], [0], [1], [0, 0, 1, 1], [], []>} : vector<8x4xf32>, vector<4x32xf32>, vector<8x32xf32> -> vector<8x32xf32>
    %626 = arith.addf %605, %625 : vector<8x32xf32>
    %627 = vector.broadcast %453 : vector<1x32xf32> to vector<8x32xf32>
    %628 = arith.addf %626, %627 : vector<8x32xf32>
    %629 = arith.addf %444, %628 : vector<8x32xf32>
    %c0_265 = arith.constant 0 : index
    %c0_266 = arith.constant 0 : index
    %c0_267 = arith.constant 0 : index
    %630 = vector.load %arg14[%c0_265, %c0_266, %c0_267] : memref<2x1x32xf32, #tpu.memory_space<vmem>>, vector<1x1x32xf32>
    %631 = vector.shape_cast %630 : vector<1x1x32xf32> to vector<1x32xf32>
    %c0_268 = arith.constant 0 : index
    %c0_269 = arith.constant 0 : index
    %c0_270 = arith.constant 0 : index
    %632 = vector.load %arg13[%c0_268, %c0_269, %c0_270] : memref<2x1x32xf32, #tpu.memory_space<vmem>>, vector<1x1x32xf32>
    %633 = vector.shape_cast %632 : vector<1x1x32xf32> to vector<1x32xf32>
    %cst_271 = arith.constant dense<0.000000e+00> : vector<8xf32>
    %634 = vector.multi_reduction <add>, %629, %cst_271 [1] : vector<8x32xf32> to vector<8xf32>
    %635 = vector.shape_cast %634 : vector<8xf32> to vector<8x1xf32>
    %cst_272 = arith.constant 3.200000e+01 : f32
    %636 = vector.broadcast %cst_272 : f32 to vector<8x1xf32>
    %637 = arith.divf %635, %636 : vector<8x1xf32>
    %638 = vector.broadcast %637 : vector<8x1xf32> to vector<8x32xf32>
    %639 = arith.subf %629, %638 : vector<8x32xf32>
    %640 = arith.mulf %639, %639 : vector<8x32xf32>
    %cst_273 = arith.constant dense<0.000000e+00> : vector<8xf32>
    %641 = vector.multi_reduction <add>, %640, %cst_273 [1] : vector<8x32xf32> to vector<8xf32>
    %642 = vector.shape_cast %641 : vector<8xf32> to vector<8x1xf32>
    %cst_274 = arith.constant 3.200000e+01 : f32
    %643 = vector.broadcast %cst_274 : f32 to vector<8x1xf32>
    %644 = arith.divf %642, %643 : vector<8x1xf32>
    %cst_275 = arith.constant 9.99999974E-6 : f32
    %645 = vector.broadcast %cst_275 : f32 to vector<8x1xf32>
    %646 = arith.addf %644, %645 : vector<8x1xf32>
    %647 = math.rsqrt %646 : vector<8x1xf32>
    %648 = vector.broadcast %647 : vector<8x1xf32> to vector<8x32xf32>
    %649 = arith.mulf %639, %648 : vector<8x32xf32>
    %650 = vector.broadcast %631 : vector<1x32xf32> to vector<8x32xf32>
    %651 = arith.mulf %649, %650 : vector<8x32xf32>
    %652 = vector.broadcast %633 : vector<1x32xf32> to vector<8x32xf32>
    %653 = arith.addf %651, %652 : vector<8x32xf32>
    %c0_276 = arith.constant 0 : index
    %c0_277 = arith.constant 0 : index
    %c0_278 = arith.constant 0 : index
    %654 = vector.load %arg12[%c0_276, %c0_277, %c0_278] : memref<2x32x32xf32, #tpu.memory_space<vmem>>, vector<1x32x32xf32>
    %655 = vector.shape_cast %654 : vector<1x32x32xf32> to vector<32x32xf32>
    %c0_279 = arith.constant 0 : index
    %c0_280 = arith.constant 0 : index
    %c0_281 = arith.constant 0 : index
    %656 = vector.load %arg9[%c0_279, %c0_280, %c0_281] : memref<2x1x32xf32, #tpu.memory_space<vmem>>, vector<1x1x32xf32>
    %657 = vector.shape_cast %656 : vector<1x1x32xf32> to vector<1x32xf32>
    %c0_282 = arith.constant 0 : index
    %c0_283 = arith.constant 0 : index
    %c0_284 = arith.constant 0 : index
    %658 = vector.load %arg10[%c0_282, %c0_283, %c0_284] : memref<2x32x64xf32, #tpu.memory_space<vmem>>, vector<1x32x64xf32>
    %659 = vector.shape_cast %658 : vector<1x32x64xf32> to vector<32x64xf32>
    %c0_285 = arith.constant 0 : index
    %c0_286 = arith.constant 0 : index
    %c0_287 = arith.constant 0 : index
    %660 = vector.load %arg7[%c0_285, %c0_286, %c0_287] : memref<2x1x64xf32, #tpu.memory_space<vmem>>, vector<1x1x64xf32>
    %661 = vector.shape_cast %660 : vector<1x1x64xf32> to vector<1x64xf32>
    %c0_288 = arith.constant 0 : index
    %c0_289 = arith.constant 0 : index
    %c0_290 = arith.constant 0 : index
    %662 = vector.load %arg11[%c0_288, %c0_289, %c0_290] : memref<2x32x32xf32, #tpu.memory_space<vmem>>, vector<1x32x32xf32>
    %663 = vector.shape_cast %662 : vector<1x32x32xf32> to vector<32x32xf32>
    %c0_291 = arith.constant 0 : index
    %c0_292 = arith.constant 0 : index
    %c0_293 = arith.constant 0 : index
    %664 = vector.load %arg8[%c0_291, %c0_292, %c0_293] : memref<2x1x32xf32, #tpu.memory_space<vmem>>, vector<1x1x32xf32>
    %665 = vector.shape_cast %664 : vector<1x1x32xf32> to vector<1x32xf32>
    %cst_294 = arith.constant dense<0.000000e+00> : vector<8x32xf32>
    %666 = tpu.matmul %653, %655, %cst_294 {dimension_numbers = #tpu.dot_dimension_numbers<[1], [0], [0], [1], [0, 0, 1, 1], [], []>} : vector<8x32xf32>, vector<32x32xf32>, vector<8x32xf32> -> vector<8x32xf32>
    %667 = vector.broadcast %657 : vector<1x32xf32> to vector<8x32xf32>
    %668 = arith.addf %666, %667 : vector<8x32xf32>
    %cst_295 = arith.constant dense<0.000000e+00> : vector<17x64xf32>
    %669 = tpu.matmul %442, %659, %cst_295 {dimension_numbers = #tpu.dot_dimension_numbers<[1], [0], [0], [1], [0, 0, 1, 1], [], []>} : vector<17x32xf32>, vector<32x64xf32>, vector<17x64xf32> -> vector<17x64xf32>
    %670 = vector.broadcast %661 : vector<1x64xf32> to vector<17x64xf32>
    %671 = arith.addf %669, %670 : vector<17x64xf32>
    %672 = vector.extract_strided_slice %671 {offsets = [0, 0], sizes = [17, 32], strides = [1, 1]} : vector<17x64xf32> to vector<17x32xf32>
    %673 = vector.extract_strided_slice %671 {offsets = [0, 32], sizes = [17, 32], strides = [1, 1]} : vector<17x64xf32> to vector<17x32xf32>
    %674 = vector.extract_strided_slice %668 {offsets = [0, 0], sizes = [8, 4], strides = [1, 1]} : vector<8x32xf32> to vector<8x4xf32>
    %675 = vector.extract_strided_slice %672 {offsets = [0, 0], sizes = [17, 4], strides = [1, 1]} : vector<17x32xf32> to vector<17x4xf32>
    %cst_296 = arith.constant dense<0.000000e+00> : vector<8x17xf32>
    %676 = tpu.matmul %674, %675, %cst_296 {dimension_numbers = #tpu.dot_dimension_numbers<[1], [1], [0], [0], [0, 0, 1, 0], [], []>} : vector<8x4xf32>, vector<17x4xf32>, vector<8x17xf32> -> vector<8x17xf32>
    %cst_297 = arith.constant 5.000000e-01 : f32
    %677 = vector.broadcast %cst_297 : f32 to vector<8x17xf32>
    %678 = arith.mulf %676, %677 : vector<8x17xf32>
    %cst_298 = arith.constant dense<0xFF800000> : vector<8xf32>
    %679 = vector.multi_reduction <maximumf>, %678, %cst_298 [1] : vector<8x17xf32> to vector<8xf32>
    %680 = vector.shape_cast %679 : vector<8xf32> to vector<8x1xf32>
    %681 = vector.broadcast %680 : vector<8x1xf32> to vector<8x17xf32>
    %682 = arith.subf %678, %681 : vector<8x17xf32>
    %683 = math.exp %682 : vector<8x17xf32>
    %cst_299 = arith.constant dense<0.000000e+00> : vector<8xf32>
    %684 = vector.multi_reduction <add>, %683, %cst_299 [1] : vector<8x17xf32> to vector<8xf32>
    %685 = vector.shape_cast %684 : vector<8xf32> to vector<8x1xf32>
    %686 = tpu.reciprocal %685 {approx = true} : vector<8x1xf32> -> vector<8x1xf32>
    %687 = vector.broadcast %686 : vector<8x1xf32> to vector<8x17xf32>
    %688 = arith.mulf %683, %687 : vector<8x17xf32>
    %689 = vector.extract_strided_slice %673 {offsets = [0, 0], sizes = [17, 4], strides = [1, 1]} : vector<17x32xf32> to vector<17x4xf32>
    %cst_300 = arith.constant dense<0.000000e+00> : vector<8x4xf32>
    %690 = tpu.matmul %688, %689, %cst_300 {dimension_numbers = #tpu.dot_dimension_numbers<[1], [0], [0], [1], [0, 0, 1, 1], [], []>} : vector<8x17xf32>, vector<17x4xf32>, vector<8x4xf32> -> vector<8x4xf32>
    %691 = vector.extract_strided_slice %663 {offsets = [0, 0], sizes = [4, 32], strides = [1, 1]} : vector<32x32xf32> to vector<4x32xf32>
    %cst_301 = arith.constant dense<0.000000e+00> : vector<8x32xf32>
    %692 = tpu.matmul %690, %691, %cst_301 {dimension_numbers = #tpu.dot_dimension_numbers<[1], [0], [0], [1], [0, 0, 1, 1], [], []>} : vector<8x4xf32>, vector<4x32xf32>, vector<8x32xf32> -> vector<8x32xf32>
    %693 = vector.extract_strided_slice %668 {offsets = [0, 4], sizes = [8, 4], strides = [1, 1]} : vector<8x32xf32> to vector<8x4xf32>
    %694 = vector.extract_strided_slice %672 {offsets = [0, 4], sizes = [17, 4], strides = [1, 1]} : vector<17x32xf32> to vector<17x4xf32>
    %cst_302 = arith.constant dense<0.000000e+00> : vector<8x17xf32>
    %695 = tpu.matmul %693, %694, %cst_302 {dimension_numbers = #tpu.dot_dimension_numbers<[1], [1], [0], [0], [0, 0, 1, 0], [], []>} : vector<8x4xf32>, vector<17x4xf32>, vector<8x17xf32> -> vector<8x17xf32>
    %cst_303 = arith.constant 5.000000e-01 : f32
    %696 = vector.broadcast %cst_303 : f32 to vector<8x17xf32>
    %697 = arith.mulf %695, %696 : vector<8x17xf32>
    %cst_304 = arith.constant dense<0xFF800000> : vector<8xf32>
    %698 = vector.multi_reduction <maximumf>, %697, %cst_304 [1] : vector<8x17xf32> to vector<8xf32>
    %699 = vector.shape_cast %698 : vector<8xf32> to vector<8x1xf32>
    %700 = vector.broadcast %699 : vector<8x1xf32> to vector<8x17xf32>
    %701 = arith.subf %697, %700 : vector<8x17xf32>
    %702 = math.exp %701 : vector<8x17xf32>
    %cst_305 = arith.constant dense<0.000000e+00> : vector<8xf32>
    %703 = vector.multi_reduction <add>, %702, %cst_305 [1] : vector<8x17xf32> to vector<8xf32>
    %704 = vector.shape_cast %703 : vector<8xf32> to vector<8x1xf32>
    %705 = tpu.reciprocal %704 {approx = true} : vector<8x1xf32> -> vector<8x1xf32>
    %706 = vector.broadcast %705 : vector<8x1xf32> to vector<8x17xf32>
    %707 = arith.mulf %702, %706 : vector<8x17xf32>
    %708 = vector.extract_strided_slice %673 {offsets = [0, 4], sizes = [17, 4], strides = [1, 1]} : vector<17x32xf32> to vector<17x4xf32>
    %cst_306 = arith.constant dense<0.000000e+00> : vector<8x4xf32>
    %709 = tpu.matmul %707, %708, %cst_306 {dimension_numbers = #tpu.dot_dimension_numbers<[1], [0], [0], [1], [0, 0, 1, 1], [], []>} : vector<8x17xf32>, vector<17x4xf32>, vector<8x4xf32> -> vector<8x4xf32>
    %710 = vector.extract_strided_slice %663 {offsets = [4, 0], sizes = [4, 32], strides = [1, 1]} : vector<32x32xf32> to vector<4x32xf32>
    %cst_307 = arith.constant dense<0.000000e+00> : vector<8x32xf32>
    %711 = tpu.matmul %709, %710, %cst_307 {dimension_numbers = #tpu.dot_dimension_numbers<[1], [0], [0], [1], [0, 0, 1, 1], [], []>} : vector<8x4xf32>, vector<4x32xf32>, vector<8x32xf32> -> vector<8x32xf32>
    %712 = arith.addf %692, %711 : vector<8x32xf32>
    %713 = vector.extract_strided_slice %668 {offsets = [0, 8], sizes = [8, 4], strides = [1, 1]} : vector<8x32xf32> to vector<8x4xf32>
    %714 = vector.extract_strided_slice %672 {offsets = [0, 8], sizes = [17, 4], strides = [1, 1]} : vector<17x32xf32> to vector<17x4xf32>
    %cst_308 = arith.constant dense<0.000000e+00> : vector<8x17xf32>
    %715 = tpu.matmul %713, %714, %cst_308 {dimension_numbers = #tpu.dot_dimension_numbers<[1], [1], [0], [0], [0, 0, 1, 0], [], []>} : vector<8x4xf32>, vector<17x4xf32>, vector<8x17xf32> -> vector<8x17xf32>
    %cst_309 = arith.constant 5.000000e-01 : f32
    %716 = vector.broadcast %cst_309 : f32 to vector<8x17xf32>
    %717 = arith.mulf %715, %716 : vector<8x17xf32>
    %cst_310 = arith.constant dense<0xFF800000> : vector<8xf32>
    %718 = vector.multi_reduction <maximumf>, %717, %cst_310 [1] : vector<8x17xf32> to vector<8xf32>
    %719 = vector.shape_cast %718 : vector<8xf32> to vector<8x1xf32>
    %720 = vector.broadcast %719 : vector<8x1xf32> to vector<8x17xf32>
    %721 = arith.subf %717, %720 : vector<8x17xf32>
    %722 = math.exp %721 : vector<8x17xf32>
    %cst_311 = arith.constant dense<0.000000e+00> : vector<8xf32>
    %723 = vector.multi_reduction <add>, %722, %cst_311 [1] : vector<8x17xf32> to vector<8xf32>
    %724 = vector.shape_cast %723 : vector<8xf32> to vector<8x1xf32>
    %725 = tpu.reciprocal %724 {approx = true} : vector<8x1xf32> -> vector<8x1xf32>
    %726 = vector.broadcast %725 : vector<8x1xf32> to vector<8x17xf32>
    %727 = arith.mulf %722, %726 : vector<8x17xf32>
    %728 = vector.extract_strided_slice %673 {offsets = [0, 8], sizes = [17, 4], strides = [1, 1]} : vector<17x32xf32> to vector<17x4xf32>
    %cst_312 = arith.constant dense<0.000000e+00> : vector<8x4xf32>
    %729 = tpu.matmul %727, %728, %cst_312 {dimension_numbers = #tpu.dot_dimension_numbers<[1], [0], [0], [1], [0, 0, 1, 1], [], []>} : vector<8x17xf32>, vector<17x4xf32>, vector<8x4xf32> -> vector<8x4xf32>
    %730 = vector.extract_strided_slice %663 {offsets = [8, 0], sizes = [4, 32], strides = [1, 1]} : vector<32x32xf32> to vector<4x32xf32>
    %cst_313 = arith.constant dense<0.000000e+00> : vector<8x32xf32>
    %731 = tpu.matmul %729, %730, %cst_313 {dimension_numbers = #tpu.dot_dimension_numbers<[1], [0], [0], [1], [0, 0, 1, 1], [], []>} : vector<8x4xf32>, vector<4x32xf32>, vector<8x32xf32> -> vector<8x32xf32>
    %732 = arith.addf %712, %731 : vector<8x32xf32>
    %733 = vector.extract_strided_slice %668 {offsets = [0, 12], sizes = [8, 4], strides = [1, 1]} : vector<8x32xf32> to vector<8x4xf32>
    %734 = vector.extract_strided_slice %672 {offsets = [0, 12], sizes = [17, 4], strides = [1, 1]} : vector<17x32xf32> to vector<17x4xf32>
    %cst_314 = arith.constant dense<0.000000e+00> : vector<8x17xf32>
    %735 = tpu.matmul %733, %734, %cst_314 {dimension_numbers = #tpu.dot_dimension_numbers<[1], [1], [0], [0], [0, 0, 1, 0], [], []>} : vector<8x4xf32>, vector<17x4xf32>, vector<8x17xf32> -> vector<8x17xf32>
    %cst_315 = arith.constant 5.000000e-01 : f32
    %736 = vector.broadcast %cst_315 : f32 to vector<8x17xf32>
    %737 = arith.mulf %735, %736 : vector<8x17xf32>
    %cst_316 = arith.constant dense<0xFF800000> : vector<8xf32>
    %738 = vector.multi_reduction <maximumf>, %737, %cst_316 [1] : vector<8x17xf32> to vector<8xf32>
    %739 = vector.shape_cast %738 : vector<8xf32> to vector<8x1xf32>
    %740 = vector.broadcast %739 : vector<8x1xf32> to vector<8x17xf32>
    %741 = arith.subf %737, %740 : vector<8x17xf32>
    %742 = math.exp %741 : vector<8x17xf32>
    %cst_317 = arith.constant dense<0.000000e+00> : vector<8xf32>
    %743 = vector.multi_reduction <add>, %742, %cst_317 [1] : vector<8x17xf32> to vector<8xf32>
    %744 = vector.shape_cast %743 : vector<8xf32> to vector<8x1xf32>
    %745 = tpu.reciprocal %744 {approx = true} : vector<8x1xf32> -> vector<8x1xf32>
    %746 = vector.broadcast %745 : vector<8x1xf32> to vector<8x17xf32>
    %747 = arith.mulf %742, %746 : vector<8x17xf32>
    %748 = vector.extract_strided_slice %673 {offsets = [0, 12], sizes = [17, 4], strides = [1, 1]} : vector<17x32xf32> to vector<17x4xf32>
    %cst_318 = arith.constant dense<0.000000e+00> : vector<8x4xf32>
    %749 = tpu.matmul %747, %748, %cst_318 {dimension_numbers = #tpu.dot_dimension_numbers<[1], [0], [0], [1], [0, 0, 1, 1], [], []>} : vector<8x17xf32>, vector<17x4xf32>, vector<8x4xf32> -> vector<8x4xf32>
    %750 = vector.extract_strided_slice %663 {offsets = [12, 0], sizes = [4, 32], strides = [1, 1]} : vector<32x32xf32> to vector<4x32xf32>
    %cst_319 = arith.constant dense<0.000000e+00> : vector<8x32xf32>
    %751 = tpu.matmul %749, %750, %cst_319 {dimension_numbers = #tpu.dot_dimension_numbers<[1], [0], [0], [1], [0, 0, 1, 1], [], []>} : vector<8x4xf32>, vector<4x32xf32>, vector<8x32xf32> -> vector<8x32xf32>
    %752 = arith.addf %732, %751 : vector<8x32xf32>
    %753 = vector.extract_strided_slice %668 {offsets = [0, 16], sizes = [8, 4], strides = [1, 1]} : vector<8x32xf32> to vector<8x4xf32>
    %754 = vector.extract_strided_slice %672 {offsets = [0, 16], sizes = [17, 4], strides = [1, 1]} : vector<17x32xf32> to vector<17x4xf32>
    %cst_320 = arith.constant dense<0.000000e+00> : vector<8x17xf32>
    %755 = tpu.matmul %753, %754, %cst_320 {dimension_numbers = #tpu.dot_dimension_numbers<[1], [1], [0], [0], [0, 0, 1, 0], [], []>} : vector<8x4xf32>, vector<17x4xf32>, vector<8x17xf32> -> vector<8x17xf32>
    %cst_321 = arith.constant 5.000000e-01 : f32
    %756 = vector.broadcast %cst_321 : f32 to vector<8x17xf32>
    %757 = arith.mulf %755, %756 : vector<8x17xf32>
    %cst_322 = arith.constant dense<0xFF800000> : vector<8xf32>
    %758 = vector.multi_reduction <maximumf>, %757, %cst_322 [1] : vector<8x17xf32> to vector<8xf32>
    %759 = vector.shape_cast %758 : vector<8xf32> to vector<8x1xf32>
    %760 = vector.broadcast %759 : vector<8x1xf32> to vector<8x17xf32>
    %761 = arith.subf %757, %760 : vector<8x17xf32>
    %762 = math.exp %761 : vector<8x17xf32>
    %cst_323 = arith.constant dense<0.000000e+00> : vector<8xf32>
    %763 = vector.multi_reduction <add>, %762, %cst_323 [1] : vector<8x17xf32> to vector<8xf32>
    %764 = vector.shape_cast %763 : vector<8xf32> to vector<8x1xf32>
    %765 = tpu.reciprocal %764 {approx = true} : vector<8x1xf32> -> vector<8x1xf32>
    %766 = vector.broadcast %765 : vector<8x1xf32> to vector<8x17xf32>
    %767 = arith.mulf %762, %766 : vector<8x17xf32>
    %768 = vector.extract_strided_slice %673 {offsets = [0, 16], sizes = [17, 4], strides = [1, 1]} : vector<17x32xf32> to vector<17x4xf32>
    %cst_324 = arith.constant dense<0.000000e+00> : vector<8x4xf32>
    %769 = tpu.matmul %767, %768, %cst_324 {dimension_numbers = #tpu.dot_dimension_numbers<[1], [0], [0], [1], [0, 0, 1, 1], [], []>} : vector<8x17xf32>, vector<17x4xf32>, vector<8x4xf32> -> vector<8x4xf32>
    %770 = vector.extract_strided_slice %663 {offsets = [16, 0], sizes = [4, 32], strides = [1, 1]} : vector<32x32xf32> to vector<4x32xf32>
    %cst_325 = arith.constant dense<0.000000e+00> : vector<8x32xf32>
    %771 = tpu.matmul %769, %770, %cst_325 {dimension_numbers = #tpu.dot_dimension_numbers<[1], [0], [0], [1], [0, 0, 1, 1], [], []>} : vector<8x4xf32>, vector<4x32xf32>, vector<8x32xf32> -> vector<8x32xf32>
    %772 = arith.addf %752, %771 : vector<8x32xf32>
    %773 = vector.extract_strided_slice %668 {offsets = [0, 20], sizes = [8, 4], strides = [1, 1]} : vector<8x32xf32> to vector<8x4xf32>
    %774 = vector.extract_strided_slice %672 {offsets = [0, 20], sizes = [17, 4], strides = [1, 1]} : vector<17x32xf32> to vector<17x4xf32>
    %cst_326 = arith.constant dense<0.000000e+00> : vector<8x17xf32>
    %775 = tpu.matmul %773, %774, %cst_326 {dimension_numbers = #tpu.dot_dimension_numbers<[1], [1], [0], [0], [0, 0, 1, 0], [], []>} : vector<8x4xf32>, vector<17x4xf32>, vector<8x17xf32> -> vector<8x17xf32>
    %cst_327 = arith.constant 5.000000e-01 : f32
    %776 = vector.broadcast %cst_327 : f32 to vector<8x17xf32>
    %777 = arith.mulf %775, %776 : vector<8x17xf32>
    %cst_328 = arith.constant dense<0xFF800000> : vector<8xf32>
    %778 = vector.multi_reduction <maximumf>, %777, %cst_328 [1] : vector<8x17xf32> to vector<8xf32>
    %779 = vector.shape_cast %778 : vector<8xf32> to vector<8x1xf32>
    %780 = vector.broadcast %779 : vector<8x1xf32> to vector<8x17xf32>
    %781 = arith.subf %777, %780 : vector<8x17xf32>
    %782 = math.exp %781 : vector<8x17xf32>
    %cst_329 = arith.constant dense<0.000000e+00> : vector<8xf32>
    %783 = vector.multi_reduction <add>, %782, %cst_329 [1] : vector<8x17xf32> to vector<8xf32>
    %784 = vector.shape_cast %783 : vector<8xf32> to vector<8x1xf32>
    %785 = tpu.reciprocal %784 {approx = true} : vector<8x1xf32> -> vector<8x1xf32>
    %786 = vector.broadcast %785 : vector<8x1xf32> to vector<8x17xf32>
    %787 = arith.mulf %782, %786 : vector<8x17xf32>
    %788 = vector.extract_strided_slice %673 {offsets = [0, 20], sizes = [17, 4], strides = [1, 1]} : vector<17x32xf32> to vector<17x4xf32>
    %cst_330 = arith.constant dense<0.000000e+00> : vector<8x4xf32>
    %789 = tpu.matmul %787, %788, %cst_330 {dimension_numbers = #tpu.dot_dimension_numbers<[1], [0], [0], [1], [0, 0, 1, 1], [], []>} : vector<8x17xf32>, vector<17x4xf32>, vector<8x4xf32> -> vector<8x4xf32>
    %790 = vector.extract_strided_slice %663 {offsets = [20, 0], sizes = [4, 32], strides = [1, 1]} : vector<32x32xf32> to vector<4x32xf32>
    %cst_331 = arith.constant dense<0.000000e+00> : vector<8x32xf32>
    %791 = tpu.matmul %789, %790, %cst_331 {dimension_numbers = #tpu.dot_dimension_numbers<[1], [0], [0], [1], [0, 0, 1, 1], [], []>} : vector<8x4xf32>, vector<4x32xf32>, vector<8x32xf32> -> vector<8x32xf32>
    %792 = arith.addf %772, %791 : vector<8x32xf32>
    %793 = vector.extract_strided_slice %668 {offsets = [0, 24], sizes = [8, 4], strides = [1, 1]} : vector<8x32xf32> to vector<8x4xf32>
    %794 = vector.extract_strided_slice %672 {offsets = [0, 24], sizes = [17, 4], strides = [1, 1]} : vector<17x32xf32> to vector<17x4xf32>
    %cst_332 = arith.constant dense<0.000000e+00> : vector<8x17xf32>
    %795 = tpu.matmul %793, %794, %cst_332 {dimension_numbers = #tpu.dot_dimension_numbers<[1], [1], [0], [0], [0, 0, 1, 0], [], []>} : vector<8x4xf32>, vector<17x4xf32>, vector<8x17xf32> -> vector<8x17xf32>
    %cst_333 = arith.constant 5.000000e-01 : f32
    %796 = vector.broadcast %cst_333 : f32 to vector<8x17xf32>
    %797 = arith.mulf %795, %796 : vector<8x17xf32>
    %cst_334 = arith.constant dense<0xFF800000> : vector<8xf32>
    %798 = vector.multi_reduction <maximumf>, %797, %cst_334 [1] : vector<8x17xf32> to vector<8xf32>
    %799 = vector.shape_cast %798 : vector<8xf32> to vector<8x1xf32>
    %800 = vector.broadcast %799 : vector<8x1xf32> to vector<8x17xf32>
    %801 = arith.subf %797, %800 : vector<8x17xf32>
    %802 = math.exp %801 : vector<8x17xf32>
    %cst_335 = arith.constant dense<0.000000e+00> : vector<8xf32>
    %803 = vector.multi_reduction <add>, %802, %cst_335 [1] : vector<8x17xf32> to vector<8xf32>
    %804 = vector.shape_cast %803 : vector<8xf32> to vector<8x1xf32>
    %805 = tpu.reciprocal %804 {approx = true} : vector<8x1xf32> -> vector<8x1xf32>
    %806 = vector.broadcast %805 : vector<8x1xf32> to vector<8x17xf32>
    %807 = arith.mulf %802, %806 : vector<8x17xf32>
    %808 = vector.extract_strided_slice %673 {offsets = [0, 24], sizes = [17, 4], strides = [1, 1]} : vector<17x32xf32> to vector<17x4xf32>
    %cst_336 = arith.constant dense<0.000000e+00> : vector<8x4xf32>
    %809 = tpu.matmul %807, %808, %cst_336 {dimension_numbers = #tpu.dot_dimension_numbers<[1], [0], [0], [1], [0, 0, 1, 1], [], []>} : vector<8x17xf32>, vector<17x4xf32>, vector<8x4xf32> -> vector<8x4xf32>
    %810 = vector.extract_strided_slice %663 {offsets = [24, 0], sizes = [4, 32], strides = [1, 1]} : vector<32x32xf32> to vector<4x32xf32>
    %cst_337 = arith.constant dense<0.000000e+00> : vector<8x32xf32>
    %811 = tpu.matmul %809, %810, %cst_337 {dimension_numbers = #tpu.dot_dimension_numbers<[1], [0], [0], [1], [0, 0, 1, 1], [], []>} : vector<8x4xf32>, vector<4x32xf32>, vector<8x32xf32> -> vector<8x32xf32>
    %812 = arith.addf %792, %811 : vector<8x32xf32>
    %813 = vector.extract_strided_slice %668 {offsets = [0, 28], sizes = [8, 4], strides = [1, 1]} : vector<8x32xf32> to vector<8x4xf32>
    %814 = vector.extract_strided_slice %672 {offsets = [0, 28], sizes = [17, 4], strides = [1, 1]} : vector<17x32xf32> to vector<17x4xf32>
    %cst_338 = arith.constant dense<0.000000e+00> : vector<8x17xf32>
    %815 = tpu.matmul %813, %814, %cst_338 {dimension_numbers = #tpu.dot_dimension_numbers<[1], [1], [0], [0], [0, 0, 1, 0], [], []>} : vector<8x4xf32>, vector<17x4xf32>, vector<8x17xf32> -> vector<8x17xf32>
    %cst_339 = arith.constant 5.000000e-01 : f32
    %816 = vector.broadcast %cst_339 : f32 to vector<8x17xf32>
    %817 = arith.mulf %815, %816 : vector<8x17xf32>
    %cst_340 = arith.constant dense<0xFF800000> : vector<8xf32>
    %818 = vector.multi_reduction <maximumf>, %817, %cst_340 [1] : vector<8x17xf32> to vector<8xf32>
    %819 = vector.shape_cast %818 : vector<8xf32> to vector<8x1xf32>
    %820 = vector.broadcast %819 : vector<8x1xf32> to vector<8x17xf32>
    %821 = arith.subf %817, %820 : vector<8x17xf32>
    %822 = math.exp %821 : vector<8x17xf32>
    %cst_341 = arith.constant dense<0.000000e+00> : vector<8xf32>
    %823 = vector.multi_reduction <add>, %822, %cst_341 [1] : vector<8x17xf32> to vector<8xf32>
    %824 = vector.shape_cast %823 : vector<8xf32> to vector<8x1xf32>
    %825 = tpu.reciprocal %824 {approx = true} : vector<8x1xf32> -> vector<8x1xf32>
    %826 = vector.broadcast %825 : vector<8x1xf32> to vector<8x17xf32>
    %827 = arith.mulf %822, %826 : vector<8x17xf32>
    %828 = vector.extract_strided_slice %673 {offsets = [0, 28], sizes = [17, 4], strides = [1, 1]} : vector<17x32xf32> to vector<17x4xf32>
    %cst_342 = arith.constant dense<0.000000e+00> : vector<8x4xf32>
    %829 = tpu.matmul %827, %828, %cst_342 {dimension_numbers = #tpu.dot_dimension_numbers<[1], [0], [0], [1], [0, 0, 1, 1], [], []>} : vector<8x17xf32>, vector<17x4xf32>, vector<8x4xf32> -> vector<8x4xf32>
    %830 = vector.extract_strided_slice %663 {offsets = [28, 0], sizes = [4, 32], strides = [1, 1]} : vector<32x32xf32> to vector<4x32xf32>
    %cst_343 = arith.constant dense<0.000000e+00> : vector<8x32xf32>
    %831 = tpu.matmul %829, %830, %cst_343 {dimension_numbers = #tpu.dot_dimension_numbers<[1], [0], [0], [1], [0, 0, 1, 1], [], []>} : vector<8x4xf32>, vector<4x32xf32>, vector<8x32xf32> -> vector<8x32xf32>
    %832 = arith.addf %812, %831 : vector<8x32xf32>
    %833 = vector.broadcast %665 : vector<1x32xf32> to vector<8x32xf32>
    %834 = arith.addf %832, %833 : vector<8x32xf32>
    %835 = arith.addf %653, %834 : vector<8x32xf32>
    %c0_344 = arith.constant 0 : index
    %c0_345 = arith.constant 0 : index
    %c0_346 = arith.constant 0 : index
    %836 = vector.load %arg16[%c0_344, %c0_345, %c0_346] : memref<2x1x32xf32, #tpu.memory_space<vmem>>, vector<1x1x32xf32>
    %837 = vector.shape_cast %836 : vector<1x1x32xf32> to vector<1x32xf32>
    %c0_347 = arith.constant 0 : index
    %c0_348 = arith.constant 0 : index
    %c0_349 = arith.constant 0 : index
    %838 = vector.load %arg15[%c0_347, %c0_348, %c0_349] : memref<2x1x32xf32, #tpu.memory_space<vmem>>, vector<1x1x32xf32>
    %839 = vector.shape_cast %838 : vector<1x1x32xf32> to vector<1x32xf32>
    %cst_350 = arith.constant dense<0.000000e+00> : vector<8xf32>
    %840 = vector.multi_reduction <add>, %835, %cst_350 [1] : vector<8x32xf32> to vector<8xf32>
    %841 = vector.shape_cast %840 : vector<8xf32> to vector<8x1xf32>
    %cst_351 = arith.constant 3.200000e+01 : f32
    %842 = vector.broadcast %cst_351 : f32 to vector<8x1xf32>
    %843 = arith.divf %841, %842 : vector<8x1xf32>
    %844 = vector.broadcast %843 : vector<8x1xf32> to vector<8x32xf32>
    %845 = arith.subf %835, %844 : vector<8x32xf32>
    %846 = arith.mulf %845, %845 : vector<8x32xf32>
    %cst_352 = arith.constant dense<0.000000e+00> : vector<8xf32>
    %847 = vector.multi_reduction <add>, %846, %cst_352 [1] : vector<8x32xf32> to vector<8xf32>
    %848 = vector.shape_cast %847 : vector<8xf32> to vector<8x1xf32>
    %cst_353 = arith.constant 3.200000e+01 : f32
    %849 = vector.broadcast %cst_353 : f32 to vector<8x1xf32>
    %850 = arith.divf %848, %849 : vector<8x1xf32>
    %cst_354 = arith.constant 9.99999974E-6 : f32
    %851 = vector.broadcast %cst_354 : f32 to vector<8x1xf32>
    %852 = arith.addf %850, %851 : vector<8x1xf32>
    %853 = math.rsqrt %852 : vector<8x1xf32>
    %854 = vector.broadcast %853 : vector<8x1xf32> to vector<8x32xf32>
    %855 = arith.mulf %845, %854 : vector<8x32xf32>
    %856 = vector.broadcast %837 : vector<1x32xf32> to vector<8x32xf32>
    %857 = arith.mulf %855, %856 : vector<8x32xf32>
    %858 = vector.broadcast %839 : vector<1x32xf32> to vector<8x32xf32>
    %859 = arith.addf %857, %858 : vector<8x32xf32>
    %c0_355 = arith.constant 0 : index
    %c0_356 = arith.constant 0 : index
    %c0_357 = arith.constant 0 : index
    %860 = vector.load %arg23[%c0_355, %c0_356, %c0_357] : memref<2x32x64xf32, #tpu.memory_space<vmem>>, vector<1x32x64xf32>
    %861 = vector.shape_cast %860 : vector<1x32x64xf32> to vector<32x64xf32>
    %cst_358 = arith.constant dense<0.000000e+00> : vector<8x64xf32>
    %862 = tpu.matmul %859, %861, %cst_358 {dimension_numbers = #tpu.dot_dimension_numbers<[1], [0], [0], [1], [0, 0, 1, 1], [], []>} : vector<8x32xf32>, vector<32x64xf32>, vector<8x64xf32> -> vector<8x64xf32>
    %c0_359 = arith.constant 0 : index
    %c0_360 = arith.constant 0 : index
    %c0_361 = arith.constant 0 : index
    %863 = vector.load %arg5[%c0_359, %c0_360, %c0_361] : memref<2x1x64xf32, #tpu.memory_space<vmem>>, vector<1x1x64xf32>
    %864 = vector.shape_cast %863 : vector<1x1x64xf32> to vector<1x64xf32>
    %865 = vector.broadcast %864 : vector<1x64xf32> to vector<8x64xf32>
    %866 = arith.addf %862, %865 : vector<8x64xf32>
    %cst_362 = arith.constant 0.000000e+00 : f32
    %867 = vector.broadcast %cst_362 : f32 to vector<8x64xf32>
    %868 = arith.maximumf %866, %867 : vector<8x64xf32>
    %c0_363 = arith.constant 0 : index
    %c0_364 = arith.constant 0 : index
    %c0_365 = arith.constant 0 : index
    %869 = vector.load %arg24[%c0_363, %c0_364, %c0_365] : memref<2x64x32xf32, #tpu.memory_space<vmem>>, vector<1x64x32xf32>
    %870 = vector.shape_cast %869 : vector<1x64x32xf32> to vector<64x32xf32>
    %cst_366 = arith.constant dense<0.000000e+00> : vector<8x32xf32>
    %871 = tpu.matmul %868, %870, %cst_366 {dimension_numbers = #tpu.dot_dimension_numbers<[1], [0], [0], [1], [0, 0, 1, 1], [], []>} : vector<8x64xf32>, vector<64x32xf32>, vector<8x32xf32> -> vector<8x32xf32>
    %c0_367 = arith.constant 0 : index
    %c0_368 = arith.constant 0 : index
    %c0_369 = arith.constant 0 : index
    %872 = vector.load %arg6[%c0_367, %c0_368, %c0_369] : memref<2x1x32xf32, #tpu.memory_space<vmem>>, vector<1x1x32xf32>
    %873 = vector.shape_cast %872 : vector<1x1x32xf32> to vector<1x32xf32>
    %874 = vector.broadcast %873 : vector<1x32xf32> to vector<8x32xf32>
    %875 = arith.addf %871, %874 : vector<8x32xf32>
    %876 = arith.addf %859, %875 : vector<8x32xf32>
    %c0_370 = arith.constant 0 : index
    %c0_371 = arith.constant 0 : index
    %c0_372 = arith.constant 0 : index
    %877 = vector.load %arg18[%c0_370, %c0_371, %c0_372] : memref<2x1x32xf32, #tpu.memory_space<vmem>>, vector<1x1x32xf32>
    %878 = vector.shape_cast %877 : vector<1x1x32xf32> to vector<1x32xf32>
    %c0_373 = arith.constant 0 : index
    %c0_374 = arith.constant 0 : index
    %c0_375 = arith.constant 0 : index
    %879 = vector.load %arg17[%c0_373, %c0_374, %c0_375] : memref<2x1x32xf32, #tpu.memory_space<vmem>>, vector<1x1x32xf32>
    %880 = vector.shape_cast %879 : vector<1x1x32xf32> to vector<1x32xf32>
    %cst_376 = arith.constant dense<0.000000e+00> : vector<8xf32>
    %881 = vector.multi_reduction <add>, %876, %cst_376 [1] : vector<8x32xf32> to vector<8xf32>
    %882 = vector.shape_cast %881 : vector<8xf32> to vector<8x1xf32>
    %cst_377 = arith.constant 3.200000e+01 : f32
    %883 = vector.broadcast %cst_377 : f32 to vector<8x1xf32>
    %884 = arith.divf %882, %883 : vector<8x1xf32>
    %885 = vector.broadcast %884 : vector<8x1xf32> to vector<8x32xf32>
    %886 = arith.subf %876, %885 : vector<8x32xf32>
    %887 = arith.mulf %886, %886 : vector<8x32xf32>
    %cst_378 = arith.constant dense<0.000000e+00> : vector<8xf32>
    %888 = vector.multi_reduction <add>, %887, %cst_378 [1] : vector<8x32xf32> to vector<8xf32>
    %889 = vector.shape_cast %888 : vector<8xf32> to vector<8x1xf32>
    %cst_379 = arith.constant 3.200000e+01 : f32
    %890 = vector.broadcast %cst_379 : f32 to vector<8x1xf32>
    %891 = arith.divf %889, %890 : vector<8x1xf32>
    %cst_380 = arith.constant 9.99999974E-6 : f32
    %892 = vector.broadcast %cst_380 : f32 to vector<8x1xf32>
    %893 = arith.addf %891, %892 : vector<8x1xf32>
    %894 = math.rsqrt %893 : vector<8x1xf32>
    %895 = vector.broadcast %894 : vector<8x1xf32> to vector<8x32xf32>
    %896 = arith.mulf %886, %895 : vector<8x32xf32>
    %897 = vector.broadcast %878 : vector<1x32xf32> to vector<8x32xf32>
    %898 = arith.mulf %896, %897 : vector<8x32xf32>
    %899 = vector.broadcast %880 : vector<1x32xf32> to vector<8x32xf32>
    %900 = arith.addf %898, %899 : vector<8x32xf32>
    %c1_381 = arith.constant 1 : index
    %c0_382 = arith.constant 0 : index
    %c0_383 = arith.constant 0 : index
    %901 = vector.load %arg22[%c1_381, %c0_382, %c0_383] : memref<2x32x96xf32, #tpu.memory_space<vmem>>, vector<1x32x96xf32>
    %902 = vector.shape_cast %901 : vector<1x32x96xf32> to vector<32x96xf32>
    %c1_384 = arith.constant 1 : index
    %c0_385 = arith.constant 0 : index
    %c0_386 = arith.constant 0 : index
    %903 = vector.load %arg20[%c1_384, %c0_385, %c0_386] : memref<2x1x96xf32, #tpu.memory_space<vmem>>, vector<1x1x96xf32>
    %904 = vector.shape_cast %903 : vector<1x1x96xf32> to vector<1x96xf32>
    %c1_387 = arith.constant 1 : index
    %c0_388 = arith.constant 0 : index
    %c0_389 = arith.constant 0 : index
    %905 = vector.load %arg21[%c1_387, %c0_388, %c0_389] : memref<2x32x32xf32, #tpu.memory_space<vmem>>, vector<1x32x32xf32>
    %906 = vector.shape_cast %905 : vector<1x32x32xf32> to vector<32x32xf32>
    %c1_390 = arith.constant 1 : index
    %c0_391 = arith.constant 0 : index
    %c0_392 = arith.constant 0 : index
    %907 = vector.load %arg19[%c1_390, %c0_391, %c0_392] : memref<2x1x32xf32, #tpu.memory_space<vmem>>, vector<1x1x32xf32>
    %908 = vector.shape_cast %907 : vector<1x1x32xf32> to vector<1x32xf32>
    %cst_393 = arith.constant dense<0.000000e+00> : vector<8x96xf32>
    %909 = tpu.matmul %900, %902, %cst_393 {dimension_numbers = #tpu.dot_dimension_numbers<[1], [0], [0], [1], [0, 0, 1, 1], [], []>} : vector<8x32xf32>, vector<32x96xf32>, vector<8x96xf32> -> vector<8x96xf32>
    %910 = vector.broadcast %904 : vector<1x96xf32> to vector<8x96xf32>
    %911 = arith.addf %909, %910 : vector<8x96xf32>
    %912 = vector.extract_strided_slice %911 {offsets = [0, 0], sizes = [8, 32], strides = [1, 1]} : vector<8x96xf32> to vector<8x32xf32>
    %913 = vector.extract_strided_slice %911 {offsets = [0, 32], sizes = [8, 32], strides = [1, 1]} : vector<8x96xf32> to vector<8x32xf32>
    %914 = vector.extract_strided_slice %911 {offsets = [0, 64], sizes = [8, 32], strides = [1, 1]} : vector<8x96xf32> to vector<8x32xf32>
    %915 = vector.extract_strided_slice %912 {offsets = [0, 0], sizes = [8, 4], strides = [1, 1]} : vector<8x32xf32> to vector<8x4xf32>
    %916 = vector.extract_strided_slice %913 {offsets = [0, 0], sizes = [8, 4], strides = [1, 1]} : vector<8x32xf32> to vector<8x4xf32>
    %cst_394 = arith.constant dense<0.000000e+00> : vector<8x8xf32>
    %917 = tpu.matmul %915, %916, %cst_394 {dimension_numbers = #tpu.dot_dimension_numbers<[1], [1], [0], [0], [0, 0, 1, 0], [], []>} : vector<8x4xf32>, vector<8x4xf32>, vector<8x8xf32> -> vector<8x8xf32>
    %cst_395 = arith.constant 5.000000e-01 : f32
    %918 = vector.broadcast %cst_395 : f32 to vector<8x8xf32>
    %919 = arith.mulf %917, %918 : vector<8x8xf32>
    %920 = arith.addf %919, %445 : vector<8x8xf32>
    %cst_396 = arith.constant dense<0xFF800000> : vector<8xf32>
    %921 = vector.multi_reduction <maximumf>, %920, %cst_396 [1] : vector<8x8xf32> to vector<8xf32>
    %922 = vector.shape_cast %921 : vector<8xf32> to vector<8x1xf32>
    %923 = vector.broadcast %922 : vector<8x1xf32> to vector<8x8xf32>
    %924 = arith.subf %920, %923 : vector<8x8xf32>
    %925 = math.exp %924 : vector<8x8xf32>
    %cst_397 = arith.constant dense<0.000000e+00> : vector<8xf32>
    %926 = vector.multi_reduction <add>, %925, %cst_397 [1] : vector<8x8xf32> to vector<8xf32>
    %927 = vector.shape_cast %926 : vector<8xf32> to vector<8x1xf32>
    %928 = tpu.reciprocal %927 {approx = true} : vector<8x1xf32> -> vector<8x1xf32>
    %929 = vector.broadcast %928 : vector<8x1xf32> to vector<8x8xf32>
    %930 = arith.mulf %925, %929 : vector<8x8xf32>
    %931 = vector.extract_strided_slice %914 {offsets = [0, 0], sizes = [8, 4], strides = [1, 1]} : vector<8x32xf32> to vector<8x4xf32>
    %cst_398 = arith.constant dense<0.000000e+00> : vector<8x4xf32>
    %932 = tpu.matmul %930, %931, %cst_398 {dimension_numbers = #tpu.dot_dimension_numbers<[1], [0], [0], [1], [0, 0, 1, 1], [], []>} : vector<8x8xf32>, vector<8x4xf32>, vector<8x4xf32> -> vector<8x4xf32>
    %933 = vector.extract_strided_slice %906 {offsets = [0, 0], sizes = [4, 32], strides = [1, 1]} : vector<32x32xf32> to vector<4x32xf32>
    %cst_399 = arith.constant dense<0.000000e+00> : vector<8x32xf32>
    %934 = tpu.matmul %932, %933, %cst_399 {dimension_numbers = #tpu.dot_dimension_numbers<[1], [0], [0], [1], [0, 0, 1, 1], [], []>} : vector<8x4xf32>, vector<4x32xf32>, vector<8x32xf32> -> vector<8x32xf32>
    %935 = vector.extract_strided_slice %912 {offsets = [0, 4], sizes = [8, 4], strides = [1, 1]} : vector<8x32xf32> to vector<8x4xf32>
    %936 = vector.extract_strided_slice %913 {offsets = [0, 4], sizes = [8, 4], strides = [1, 1]} : vector<8x32xf32> to vector<8x4xf32>
    %cst_400 = arith.constant dense<0.000000e+00> : vector<8x8xf32>
    %937 = tpu.matmul %935, %936, %cst_400 {dimension_numbers = #tpu.dot_dimension_numbers<[1], [1], [0], [0], [0, 0, 1, 0], [], []>} : vector<8x4xf32>, vector<8x4xf32>, vector<8x8xf32> -> vector<8x8xf32>
    %cst_401 = arith.constant 5.000000e-01 : f32
    %938 = vector.broadcast %cst_401 : f32 to vector<8x8xf32>
    %939 = arith.mulf %937, %938 : vector<8x8xf32>
    %940 = arith.addf %939, %445 : vector<8x8xf32>
    %cst_402 = arith.constant dense<0xFF800000> : vector<8xf32>
    %941 = vector.multi_reduction <maximumf>, %940, %cst_402 [1] : vector<8x8xf32> to vector<8xf32>
    %942 = vector.shape_cast %941 : vector<8xf32> to vector<8x1xf32>
    %943 = vector.broadcast %942 : vector<8x1xf32> to vector<8x8xf32>
    %944 = arith.subf %940, %943 : vector<8x8xf32>
    %945 = math.exp %944 : vector<8x8xf32>
    %cst_403 = arith.constant dense<0.000000e+00> : vector<8xf32>
    %946 = vector.multi_reduction <add>, %945, %cst_403 [1] : vector<8x8xf32> to vector<8xf32>
    %947 = vector.shape_cast %946 : vector<8xf32> to vector<8x1xf32>
    %948 = tpu.reciprocal %947 {approx = true} : vector<8x1xf32> -> vector<8x1xf32>
    %949 = vector.broadcast %948 : vector<8x1xf32> to vector<8x8xf32>
    %950 = arith.mulf %945, %949 : vector<8x8xf32>
    %951 = vector.extract_strided_slice %914 {offsets = [0, 4], sizes = [8, 4], strides = [1, 1]} : vector<8x32xf32> to vector<8x4xf32>
    %cst_404 = arith.constant dense<0.000000e+00> : vector<8x4xf32>
    %952 = tpu.matmul %950, %951, %cst_404 {dimension_numbers = #tpu.dot_dimension_numbers<[1], [0], [0], [1], [0, 0, 1, 1], [], []>} : vector<8x8xf32>, vector<8x4xf32>, vector<8x4xf32> -> vector<8x4xf32>
    %953 = vector.extract_strided_slice %906 {offsets = [4, 0], sizes = [4, 32], strides = [1, 1]} : vector<32x32xf32> to vector<4x32xf32>
    %cst_405 = arith.constant dense<0.000000e+00> : vector<8x32xf32>
    %954 = tpu.matmul %952, %953, %cst_405 {dimension_numbers = #tpu.dot_dimension_numbers<[1], [0], [0], [1], [0, 0, 1, 1], [], []>} : vector<8x4xf32>, vector<4x32xf32>, vector<8x32xf32> -> vector<8x32xf32>
    %955 = arith.addf %934, %954 : vector<8x32xf32>
    %956 = vector.extract_strided_slice %912 {offsets = [0, 8], sizes = [8, 4], strides = [1, 1]} : vector<8x32xf32> to vector<8x4xf32>
    %957 = vector.extract_strided_slice %913 {offsets = [0, 8], sizes = [8, 4], strides = [1, 1]} : vector<8x32xf32> to vector<8x4xf32>
    %cst_406 = arith.constant dense<0.000000e+00> : vector<8x8xf32>
    %958 = tpu.matmul %956, %957, %cst_406 {dimension_numbers = #tpu.dot_dimension_numbers<[1], [1], [0], [0], [0, 0, 1, 0], [], []>} : vector<8x4xf32>, vector<8x4xf32>, vector<8x8xf32> -> vector<8x8xf32>
    %cst_407 = arith.constant 5.000000e-01 : f32
    %959 = vector.broadcast %cst_407 : f32 to vector<8x8xf32>
    %960 = arith.mulf %958, %959 : vector<8x8xf32>
    %961 = arith.addf %960, %445 : vector<8x8xf32>
    %cst_408 = arith.constant dense<0xFF800000> : vector<8xf32>
    %962 = vector.multi_reduction <maximumf>, %961, %cst_408 [1] : vector<8x8xf32> to vector<8xf32>
    %963 = vector.shape_cast %962 : vector<8xf32> to vector<8x1xf32>
    %964 = vector.broadcast %963 : vector<8x1xf32> to vector<8x8xf32>
    %965 = arith.subf %961, %964 : vector<8x8xf32>
    %966 = math.exp %965 : vector<8x8xf32>
    %cst_409 = arith.constant dense<0.000000e+00> : vector<8xf32>
    %967 = vector.multi_reduction <add>, %966, %cst_409 [1] : vector<8x8xf32> to vector<8xf32>
    %968 = vector.shape_cast %967 : vector<8xf32> to vector<8x1xf32>
    %969 = tpu.reciprocal %968 {approx = true} : vector<8x1xf32> -> vector<8x1xf32>
    %970 = vector.broadcast %969 : vector<8x1xf32> to vector<8x8xf32>
    %971 = arith.mulf %966, %970 : vector<8x8xf32>
    %972 = vector.extract_strided_slice %914 {offsets = [0, 8], sizes = [8, 4], strides = [1, 1]} : vector<8x32xf32> to vector<8x4xf32>
    %cst_410 = arith.constant dense<0.000000e+00> : vector<8x4xf32>
    %973 = tpu.matmul %971, %972, %cst_410 {dimension_numbers = #tpu.dot_dimension_numbers<[1], [0], [0], [1], [0, 0, 1, 1], [], []>} : vector<8x8xf32>, vector<8x4xf32>, vector<8x4xf32> -> vector<8x4xf32>
    %974 = vector.extract_strided_slice %906 {offsets = [8, 0], sizes = [4, 32], strides = [1, 1]} : vector<32x32xf32> to vector<4x32xf32>
    %cst_411 = arith.constant dense<0.000000e+00> : vector<8x32xf32>
    %975 = tpu.matmul %973, %974, %cst_411 {dimension_numbers = #tpu.dot_dimension_numbers<[1], [0], [0], [1], [0, 0, 1, 1], [], []>} : vector<8x4xf32>, vector<4x32xf32>, vector<8x32xf32> -> vector<8x32xf32>
    %976 = arith.addf %955, %975 : vector<8x32xf32>
    %977 = vector.extract_strided_slice %912 {offsets = [0, 12], sizes = [8, 4], strides = [1, 1]} : vector<8x32xf32> to vector<8x4xf32>
    %978 = vector.extract_strided_slice %913 {offsets = [0, 12], sizes = [8, 4], strides = [1, 1]} : vector<8x32xf32> to vector<8x4xf32>
    %cst_412 = arith.constant dense<0.000000e+00> : vector<8x8xf32>
    %979 = tpu.matmul %977, %978, %cst_412 {dimension_numbers = #tpu.dot_dimension_numbers<[1], [1], [0], [0], [0, 0, 1, 0], [], []>} : vector<8x4xf32>, vector<8x4xf32>, vector<8x8xf32> -> vector<8x8xf32>
    %cst_413 = arith.constant 5.000000e-01 : f32
    %980 = vector.broadcast %cst_413 : f32 to vector<8x8xf32>
    %981 = arith.mulf %979, %980 : vector<8x8xf32>
    %982 = arith.addf %981, %445 : vector<8x8xf32>
    %cst_414 = arith.constant dense<0xFF800000> : vector<8xf32>
    %983 = vector.multi_reduction <maximumf>, %982, %cst_414 [1] : vector<8x8xf32> to vector<8xf32>
    %984 = vector.shape_cast %983 : vector<8xf32> to vector<8x1xf32>
    %985 = vector.broadcast %984 : vector<8x1xf32> to vector<8x8xf32>
    %986 = arith.subf %982, %985 : vector<8x8xf32>
    %987 = math.exp %986 : vector<8x8xf32>
    %cst_415 = arith.constant dense<0.000000e+00> : vector<8xf32>
    %988 = vector.multi_reduction <add>, %987, %cst_415 [1] : vector<8x8xf32> to vector<8xf32>
    %989 = vector.shape_cast %988 : vector<8xf32> to vector<8x1xf32>
    %990 = tpu.reciprocal %989 {approx = true} : vector<8x1xf32> -> vector<8x1xf32>
    %991 = vector.broadcast %990 : vector<8x1xf32> to vector<8x8xf32>
    %992 = arith.mulf %987, %991 : vector<8x8xf32>
    %993 = vector.extract_strided_slice %914 {offsets = [0, 12], sizes = [8, 4], strides = [1, 1]} : vector<8x32xf32> to vector<8x4xf32>
    %cst_416 = arith.constant dense<0.000000e+00> : vector<8x4xf32>
    %994 = tpu.matmul %992, %993, %cst_416 {dimension_numbers = #tpu.dot_dimension_numbers<[1], [0], [0], [1], [0, 0, 1, 1], [], []>} : vector<8x8xf32>, vector<8x4xf32>, vector<8x4xf32> -> vector<8x4xf32>
    %995 = vector.extract_strided_slice %906 {offsets = [12, 0], sizes = [4, 32], strides = [1, 1]} : vector<32x32xf32> to vector<4x32xf32>
    %cst_417 = arith.constant dense<0.000000e+00> : vector<8x32xf32>
    %996 = tpu.matmul %994, %995, %cst_417 {dimension_numbers = #tpu.dot_dimension_numbers<[1], [0], [0], [1], [0, 0, 1, 1], [], []>} : vector<8x4xf32>, vector<4x32xf32>, vector<8x32xf32> -> vector<8x32xf32>
    %997 = arith.addf %976, %996 : vector<8x32xf32>
    %998 = vector.extract_strided_slice %912 {offsets = [0, 16], sizes = [8, 4], strides = [1, 1]} : vector<8x32xf32> to vector<8x4xf32>
    %999 = vector.extract_strided_slice %913 {offsets = [0, 16], sizes = [8, 4], strides = [1, 1]} : vector<8x32xf32> to vector<8x4xf32>
    %cst_418 = arith.constant dense<0.000000e+00> : vector<8x8xf32>
    %1000 = tpu.matmul %998, %999, %cst_418 {dimension_numbers = #tpu.dot_dimension_numbers<[1], [1], [0], [0], [0, 0, 1, 0], [], []>} : vector<8x4xf32>, vector<8x4xf32>, vector<8x8xf32> -> vector<8x8xf32>
    %cst_419 = arith.constant 5.000000e-01 : f32
    %1001 = vector.broadcast %cst_419 : f32 to vector<8x8xf32>
    %1002 = arith.mulf %1000, %1001 : vector<8x8xf32>
    %1003 = arith.addf %1002, %445 : vector<8x8xf32>
    %cst_420 = arith.constant dense<0xFF800000> : vector<8xf32>
    %1004 = vector.multi_reduction <maximumf>, %1003, %cst_420 [1] : vector<8x8xf32> to vector<8xf32>
    %1005 = vector.shape_cast %1004 : vector<8xf32> to vector<8x1xf32>
    %1006 = vector.broadcast %1005 : vector<8x1xf32> to vector<8x8xf32>
    %1007 = arith.subf %1003, %1006 : vector<8x8xf32>
    %1008 = math.exp %1007 : vector<8x8xf32>
    %cst_421 = arith.constant dense<0.000000e+00> : vector<8xf32>
    %1009 = vector.multi_reduction <add>, %1008, %cst_421 [1] : vector<8x8xf32> to vector<8xf32>
    %1010 = vector.shape_cast %1009 : vector<8xf32> to vector<8x1xf32>
    %1011 = tpu.reciprocal %1010 {approx = true} : vector<8x1xf32> -> vector<8x1xf32>
    %1012 = vector.broadcast %1011 : vector<8x1xf32> to vector<8x8xf32>
    %1013 = arith.mulf %1008, %1012 : vector<8x8xf32>
    %1014 = vector.extract_strided_slice %914 {offsets = [0, 16], sizes = [8, 4], strides = [1, 1]} : vector<8x32xf32> to vector<8x4xf32>
    %cst_422 = arith.constant dense<0.000000e+00> : vector<8x4xf32>
    %1015 = tpu.matmul %1013, %1014, %cst_422 {dimension_numbers = #tpu.dot_dimension_numbers<[1], [0], [0], [1], [0, 0, 1, 1], [], []>} : vector<8x8xf32>, vector<8x4xf32>, vector<8x4xf32> -> vector<8x4xf32>
    %1016 = vector.extract_strided_slice %906 {offsets = [16, 0], sizes = [4, 32], strides = [1, 1]} : vector<32x32xf32> to vector<4x32xf32>
    %cst_423 = arith.constant dense<0.000000e+00> : vector<8x32xf32>
    %1017 = tpu.matmul %1015, %1016, %cst_423 {dimension_numbers = #tpu.dot_dimension_numbers<[1], [0], [0], [1], [0, 0, 1, 1], [], []>} : vector<8x4xf32>, vector<4x32xf32>, vector<8x32xf32> -> vector<8x32xf32>
    %1018 = arith.addf %997, %1017 : vector<8x32xf32>
    %1019 = vector.extract_strided_slice %912 {offsets = [0, 20], sizes = [8, 4], strides = [1, 1]} : vector<8x32xf32> to vector<8x4xf32>
    %1020 = vector.extract_strided_slice %913 {offsets = [0, 20], sizes = [8, 4], strides = [1, 1]} : vector<8x32xf32> to vector<8x4xf32>
    %cst_424 = arith.constant dense<0.000000e+00> : vector<8x8xf32>
    %1021 = tpu.matmul %1019, %1020, %cst_424 {dimension_numbers = #tpu.dot_dimension_numbers<[1], [1], [0], [0], [0, 0, 1, 0], [], []>} : vector<8x4xf32>, vector<8x4xf32>, vector<8x8xf32> -> vector<8x8xf32>
    %cst_425 = arith.constant 5.000000e-01 : f32
    %1022 = vector.broadcast %cst_425 : f32 to vector<8x8xf32>
    %1023 = arith.mulf %1021, %1022 : vector<8x8xf32>
    %1024 = arith.addf %1023, %445 : vector<8x8xf32>
    %cst_426 = arith.constant dense<0xFF800000> : vector<8xf32>
    %1025 = vector.multi_reduction <maximumf>, %1024, %cst_426 [1] : vector<8x8xf32> to vector<8xf32>
    %1026 = vector.shape_cast %1025 : vector<8xf32> to vector<8x1xf32>
    %1027 = vector.broadcast %1026 : vector<8x1xf32> to vector<8x8xf32>
    %1028 = arith.subf %1024, %1027 : vector<8x8xf32>
    %1029 = math.exp %1028 : vector<8x8xf32>
    %cst_427 = arith.constant dense<0.000000e+00> : vector<8xf32>
    %1030 = vector.multi_reduction <add>, %1029, %cst_427 [1] : vector<8x8xf32> to vector<8xf32>
    %1031 = vector.shape_cast %1030 : vector<8xf32> to vector<8x1xf32>
    %1032 = tpu.reciprocal %1031 {approx = true} : vector<8x1xf32> -> vector<8x1xf32>
    %1033 = vector.broadcast %1032 : vector<8x1xf32> to vector<8x8xf32>
    %1034 = arith.mulf %1029, %1033 : vector<8x8xf32>
    %1035 = vector.extract_strided_slice %914 {offsets = [0, 20], sizes = [8, 4], strides = [1, 1]} : vector<8x32xf32> to vector<8x4xf32>
    %cst_428 = arith.constant dense<0.000000e+00> : vector<8x4xf32>
    %1036 = tpu.matmul %1034, %1035, %cst_428 {dimension_numbers = #tpu.dot_dimension_numbers<[1], [0], [0], [1], [0, 0, 1, 1], [], []>} : vector<8x8xf32>, vector<8x4xf32>, vector<8x4xf32> -> vector<8x4xf32>
    %1037 = vector.extract_strided_slice %906 {offsets = [20, 0], sizes = [4, 32], strides = [1, 1]} : vector<32x32xf32> to vector<4x32xf32>
    %cst_429 = arith.constant dense<0.000000e+00> : vector<8x32xf32>
    %1038 = tpu.matmul %1036, %1037, %cst_429 {dimension_numbers = #tpu.dot_dimension_numbers<[1], [0], [0], [1], [0, 0, 1, 1], [], []>} : vector<8x4xf32>, vector<4x32xf32>, vector<8x32xf32> -> vector<8x32xf32>
    %1039 = arith.addf %1018, %1038 : vector<8x32xf32>
    %1040 = vector.extract_strided_slice %912 {offsets = [0, 24], sizes = [8, 4], strides = [1, 1]} : vector<8x32xf32> to vector<8x4xf32>
    %1041 = vector.extract_strided_slice %913 {offsets = [0, 24], sizes = [8, 4], strides = [1, 1]} : vector<8x32xf32> to vector<8x4xf32>
    %cst_430 = arith.constant dense<0.000000e+00> : vector<8x8xf32>
    %1042 = tpu.matmul %1040, %1041, %cst_430 {dimension_numbers = #tpu.dot_dimension_numbers<[1], [1], [0], [0], [0, 0, 1, 0], [], []>} : vector<8x4xf32>, vector<8x4xf32>, vector<8x8xf32> -> vector<8x8xf32>
    %cst_431 = arith.constant 5.000000e-01 : f32
    %1043 = vector.broadcast %cst_431 : f32 to vector<8x8xf32>
    %1044 = arith.mulf %1042, %1043 : vector<8x8xf32>
    %1045 = arith.addf %1044, %445 : vector<8x8xf32>
    %cst_432 = arith.constant dense<0xFF800000> : vector<8xf32>
    %1046 = vector.multi_reduction <maximumf>, %1045, %cst_432 [1] : vector<8x8xf32> to vector<8xf32>
    %1047 = vector.shape_cast %1046 : vector<8xf32> to vector<8x1xf32>
    %1048 = vector.broadcast %1047 : vector<8x1xf32> to vector<8x8xf32>
    %1049 = arith.subf %1045, %1048 : vector<8x8xf32>
    %1050 = math.exp %1049 : vector<8x8xf32>
    %cst_433 = arith.constant dense<0.000000e+00> : vector<8xf32>
    %1051 = vector.multi_reduction <add>, %1050, %cst_433 [1] : vector<8x8xf32> to vector<8xf32>
    %1052 = vector.shape_cast %1051 : vector<8xf32> to vector<8x1xf32>
    %1053 = tpu.reciprocal %1052 {approx = true} : vector<8x1xf32> -> vector<8x1xf32>
    %1054 = vector.broadcast %1053 : vector<8x1xf32> to vector<8x8xf32>
    %1055 = arith.mulf %1050, %1054 : vector<8x8xf32>
    %1056 = vector.extract_strided_slice %914 {offsets = [0, 24], sizes = [8, 4], strides = [1, 1]} : vector<8x32xf32> to vector<8x4xf32>
    %cst_434 = arith.constant dense<0.000000e+00> : vector<8x4xf32>
    %1057 = tpu.matmul %1055, %1056, %cst_434 {dimension_numbers = #tpu.dot_dimension_numbers<[1], [0], [0], [1], [0, 0, 1, 1], [], []>} : vector<8x8xf32>, vector<8x4xf32>, vector<8x4xf32> -> vector<8x4xf32>
    %1058 = vector.extract_strided_slice %906 {offsets = [24, 0], sizes = [4, 32], strides = [1, 1]} : vector<32x32xf32> to vector<4x32xf32>
    %cst_435 = arith.constant dense<0.000000e+00> : vector<8x32xf32>
    %1059 = tpu.matmul %1057, %1058, %cst_435 {dimension_numbers = #tpu.dot_dimension_numbers<[1], [0], [0], [1], [0, 0, 1, 1], [], []>} : vector<8x4xf32>, vector<4x32xf32>, vector<8x32xf32> -> vector<8x32xf32>
    %1060 = arith.addf %1039, %1059 : vector<8x32xf32>
    %1061 = vector.extract_strided_slice %912 {offsets = [0, 28], sizes = [8, 4], strides = [1, 1]} : vector<8x32xf32> to vector<8x4xf32>
    %1062 = vector.extract_strided_slice %913 {offsets = [0, 28], sizes = [8, 4], strides = [1, 1]} : vector<8x32xf32> to vector<8x4xf32>
    %cst_436 = arith.constant dense<0.000000e+00> : vector<8x8xf32>
    %1063 = tpu.matmul %1061, %1062, %cst_436 {dimension_numbers = #tpu.dot_dimension_numbers<[1], [1], [0], [0], [0, 0, 1, 0], [], []>} : vector<8x4xf32>, vector<8x4xf32>, vector<8x8xf32> -> vector<8x8xf32>
    %cst_437 = arith.constant 5.000000e-01 : f32
    %1064 = vector.broadcast %cst_437 : f32 to vector<8x8xf32>
    %1065 = arith.mulf %1063, %1064 : vector<8x8xf32>
    %1066 = arith.addf %1065, %445 : vector<8x8xf32>
    %cst_438 = arith.constant dense<0xFF800000> : vector<8xf32>
    %1067 = vector.multi_reduction <maximumf>, %1066, %cst_438 [1] : vector<8x8xf32> to vector<8xf32>
    %1068 = vector.shape_cast %1067 : vector<8xf32> to vector<8x1xf32>
    %1069 = vector.broadcast %1068 : vector<8x1xf32> to vector<8x8xf32>
    %1070 = arith.subf %1066, %1069 : vector<8x8xf32>
    %1071 = math.exp %1070 : vector<8x8xf32>
    %cst_439 = arith.constant dense<0.000000e+00> : vector<8xf32>
    %1072 = vector.multi_reduction <add>, %1071, %cst_439 [1] : vector<8x8xf32> to vector<8xf32>
    %1073 = vector.shape_cast %1072 : vector<8xf32> to vector<8x1xf32>
    %1074 = tpu.reciprocal %1073 {approx = true} : vector<8x1xf32> -> vector<8x1xf32>
    %1075 = vector.broadcast %1074 : vector<8x1xf32> to vector<8x8xf32>
    %1076 = arith.mulf %1071, %1075 : vector<8x8xf32>
    %1077 = vector.extract_strided_slice %914 {offsets = [0, 28], sizes = [8, 4], strides = [1, 1]} : vector<8x32xf32> to vector<8x4xf32>
    %cst_440 = arith.constant dense<0.000000e+00> : vector<8x4xf32>
    %1078 = tpu.matmul %1076, %1077, %cst_440 {dimension_numbers = #tpu.dot_dimension_numbers<[1], [0], [0], [1], [0, 0, 1, 1], [], []>} : vector<8x8xf32>, vector<8x4xf32>, vector<8x4xf32> -> vector<8x4xf32>
    %1079 = vector.extract_strided_slice %906 {offsets = [28, 0], sizes = [4, 32], strides = [1, 1]} : vector<32x32xf32> to vector<4x32xf32>
    %cst_441 = arith.constant dense<0.000000e+00> : vector<8x32xf32>
    %1080 = tpu.matmul %1078, %1079, %cst_441 {dimension_numbers = #tpu.dot_dimension_numbers<[1], [0], [0], [1], [0, 0, 1, 1], [], []>} : vector<8x4xf32>, vector<4x32xf32>, vector<8x32xf32> -> vector<8x32xf32>
    %1081 = arith.addf %1060, %1080 : vector<8x32xf32>
    %1082 = vector.broadcast %908 : vector<1x32xf32> to vector<8x32xf32>
    %1083 = arith.addf %1081, %1082 : vector<8x32xf32>
    %1084 = arith.addf %900, %1083 : vector<8x32xf32>
    %c1_442 = arith.constant 1 : index
    %c0_443 = arith.constant 0 : index
    %c0_444 = arith.constant 0 : index
    %1085 = vector.load %arg14[%c1_442, %c0_443, %c0_444] : memref<2x1x32xf32, #tpu.memory_space<vmem>>, vector<1x1x32xf32>
    %1086 = vector.shape_cast %1085 : vector<1x1x32xf32> to vector<1x32xf32>
    %c1_445 = arith.constant 1 : index
    %c0_446 = arith.constant 0 : index
    %c0_447 = arith.constant 0 : index
    %1087 = vector.load %arg13[%c1_445, %c0_446, %c0_447] : memref<2x1x32xf32, #tpu.memory_space<vmem>>, vector<1x1x32xf32>
    %1088 = vector.shape_cast %1087 : vector<1x1x32xf32> to vector<1x32xf32>
    %cst_448 = arith.constant dense<0.000000e+00> : vector<8xf32>
    %1089 = vector.multi_reduction <add>, %1084, %cst_448 [1] : vector<8x32xf32> to vector<8xf32>
    %1090 = vector.shape_cast %1089 : vector<8xf32> to vector<8x1xf32>
    %cst_449 = arith.constant 3.200000e+01 : f32
    %1091 = vector.broadcast %cst_449 : f32 to vector<8x1xf32>
    %1092 = arith.divf %1090, %1091 : vector<8x1xf32>
    %1093 = vector.broadcast %1092 : vector<8x1xf32> to vector<8x32xf32>
    %1094 = arith.subf %1084, %1093 : vector<8x32xf32>
    %1095 = arith.mulf %1094, %1094 : vector<8x32xf32>
    %cst_450 = arith.constant dense<0.000000e+00> : vector<8xf32>
    %1096 = vector.multi_reduction <add>, %1095, %cst_450 [1] : vector<8x32xf32> to vector<8xf32>
    %1097 = vector.shape_cast %1096 : vector<8xf32> to vector<8x1xf32>
    %cst_451 = arith.constant 3.200000e+01 : f32
    %1098 = vector.broadcast %cst_451 : f32 to vector<8x1xf32>
    %1099 = arith.divf %1097, %1098 : vector<8x1xf32>
    %cst_452 = arith.constant 9.99999974E-6 : f32
    %1100 = vector.broadcast %cst_452 : f32 to vector<8x1xf32>
    %1101 = arith.addf %1099, %1100 : vector<8x1xf32>
    %1102 = math.rsqrt %1101 : vector<8x1xf32>
    %1103 = vector.broadcast %1102 : vector<8x1xf32> to vector<8x32xf32>
    %1104 = arith.mulf %1094, %1103 : vector<8x32xf32>
    %1105 = vector.broadcast %1086 : vector<1x32xf32> to vector<8x32xf32>
    %1106 = arith.mulf %1104, %1105 : vector<8x32xf32>
    %1107 = vector.broadcast %1088 : vector<1x32xf32> to vector<8x32xf32>
    %1108 = arith.addf %1106, %1107 : vector<8x32xf32>
    %c1_453 = arith.constant 1 : index
    %c0_454 = arith.constant 0 : index
    %c0_455 = arith.constant 0 : index
    %1109 = vector.load %arg12[%c1_453, %c0_454, %c0_455] : memref<2x32x32xf32, #tpu.memory_space<vmem>>, vector<1x32x32xf32>
    %1110 = vector.shape_cast %1109 : vector<1x32x32xf32> to vector<32x32xf32>
    %c1_456 = arith.constant 1 : index
    %c0_457 = arith.constant 0 : index
    %c0_458 = arith.constant 0 : index
    %1111 = vector.load %arg9[%c1_456, %c0_457, %c0_458] : memref<2x1x32xf32, #tpu.memory_space<vmem>>, vector<1x1x32xf32>
    %1112 = vector.shape_cast %1111 : vector<1x1x32xf32> to vector<1x32xf32>
    %c1_459 = arith.constant 1 : index
    %c0_460 = arith.constant 0 : index
    %c0_461 = arith.constant 0 : index
    %1113 = vector.load %arg10[%c1_459, %c0_460, %c0_461] : memref<2x32x64xf32, #tpu.memory_space<vmem>>, vector<1x32x64xf32>
    %1114 = vector.shape_cast %1113 : vector<1x32x64xf32> to vector<32x64xf32>
    %c1_462 = arith.constant 1 : index
    %c0_463 = arith.constant 0 : index
    %c0_464 = arith.constant 0 : index
    %1115 = vector.load %arg7[%c1_462, %c0_463, %c0_464] : memref<2x1x64xf32, #tpu.memory_space<vmem>>, vector<1x1x64xf32>
    %1116 = vector.shape_cast %1115 : vector<1x1x64xf32> to vector<1x64xf32>
    %c1_465 = arith.constant 1 : index
    %c0_466 = arith.constant 0 : index
    %c0_467 = arith.constant 0 : index
    %1117 = vector.load %arg11[%c1_465, %c0_466, %c0_467] : memref<2x32x32xf32, #tpu.memory_space<vmem>>, vector<1x32x32xf32>
    %1118 = vector.shape_cast %1117 : vector<1x32x32xf32> to vector<32x32xf32>
    %c1_468 = arith.constant 1 : index
    %c0_469 = arith.constant 0 : index
    %c0_470 = arith.constant 0 : index
    %1119 = vector.load %arg8[%c1_468, %c0_469, %c0_470] : memref<2x1x32xf32, #tpu.memory_space<vmem>>, vector<1x1x32xf32>
    %1120 = vector.shape_cast %1119 : vector<1x1x32xf32> to vector<1x32xf32>
    %cst_471 = arith.constant dense<0.000000e+00> : vector<8x32xf32>
    %1121 = tpu.matmul %1108, %1110, %cst_471 {dimension_numbers = #tpu.dot_dimension_numbers<[1], [0], [0], [1], [0, 0, 1, 1], [], []>} : vector<8x32xf32>, vector<32x32xf32>, vector<8x32xf32> -> vector<8x32xf32>
    %1122 = vector.broadcast %1112 : vector<1x32xf32> to vector<8x32xf32>
    %1123 = arith.addf %1121, %1122 : vector<8x32xf32>
    %cst_472 = arith.constant dense<0.000000e+00> : vector<17x64xf32>
    %1124 = tpu.matmul %442, %1114, %cst_472 {dimension_numbers = #tpu.dot_dimension_numbers<[1], [0], [0], [1], [0, 0, 1, 1], [], []>} : vector<17x32xf32>, vector<32x64xf32>, vector<17x64xf32> -> vector<17x64xf32>
    %1125 = vector.broadcast %1116 : vector<1x64xf32> to vector<17x64xf32>
    %1126 = arith.addf %1124, %1125 : vector<17x64xf32>
    %1127 = vector.extract_strided_slice %1126 {offsets = [0, 0], sizes = [17, 32], strides = [1, 1]} : vector<17x64xf32> to vector<17x32xf32>
    %1128 = vector.extract_strided_slice %1126 {offsets = [0, 32], sizes = [17, 32], strides = [1, 1]} : vector<17x64xf32> to vector<17x32xf32>
    %1129 = vector.extract_strided_slice %1123 {offsets = [0, 0], sizes = [8, 4], strides = [1, 1]} : vector<8x32xf32> to vector<8x4xf32>
    %1130 = vector.extract_strided_slice %1127 {offsets = [0, 0], sizes = [17, 4], strides = [1, 1]} : vector<17x32xf32> to vector<17x4xf32>
    %cst_473 = arith.constant dense<0.000000e+00> : vector<8x17xf32>
    %1131 = tpu.matmul %1129, %1130, %cst_473 {dimension_numbers = #tpu.dot_dimension_numbers<[1], [1], [0], [0], [0, 0, 1, 0], [], []>} : vector<8x4xf32>, vector<17x4xf32>, vector<8x17xf32> -> vector<8x17xf32>
    %cst_474 = arith.constant 5.000000e-01 : f32
    %1132 = vector.broadcast %cst_474 : f32 to vector<8x17xf32>
    %1133 = arith.mulf %1131, %1132 : vector<8x17xf32>
    %cst_475 = arith.constant dense<0xFF800000> : vector<8xf32>
    %1134 = vector.multi_reduction <maximumf>, %1133, %cst_475 [1] : vector<8x17xf32> to vector<8xf32>
    %1135 = vector.shape_cast %1134 : vector<8xf32> to vector<8x1xf32>
    %1136 = vector.broadcast %1135 : vector<8x1xf32> to vector<8x17xf32>
    %1137 = arith.subf %1133, %1136 : vector<8x17xf32>
    %1138 = math.exp %1137 : vector<8x17xf32>
    %cst_476 = arith.constant dense<0.000000e+00> : vector<8xf32>
    %1139 = vector.multi_reduction <add>, %1138, %cst_476 [1] : vector<8x17xf32> to vector<8xf32>
    %1140 = vector.shape_cast %1139 : vector<8xf32> to vector<8x1xf32>
    %1141 = tpu.reciprocal %1140 {approx = true} : vector<8x1xf32> -> vector<8x1xf32>
    %1142 = vector.broadcast %1141 : vector<8x1xf32> to vector<8x17xf32>
    %1143 = arith.mulf %1138, %1142 : vector<8x17xf32>
    %1144 = vector.extract_strided_slice %1128 {offsets = [0, 0], sizes = [17, 4], strides = [1, 1]} : vector<17x32xf32> to vector<17x4xf32>
    %cst_477 = arith.constant dense<0.000000e+00> : vector<8x4xf32>
    %1145 = tpu.matmul %1143, %1144, %cst_477 {dimension_numbers = #tpu.dot_dimension_numbers<[1], [0], [0], [1], [0, 0, 1, 1], [], []>} : vector<8x17xf32>, vector<17x4xf32>, vector<8x4xf32> -> vector<8x4xf32>
    %1146 = vector.extract_strided_slice %1118 {offsets = [0, 0], sizes = [4, 32], strides = [1, 1]} : vector<32x32xf32> to vector<4x32xf32>
    %cst_478 = arith.constant dense<0.000000e+00> : vector<8x32xf32>
    %1147 = tpu.matmul %1145, %1146, %cst_478 {dimension_numbers = #tpu.dot_dimension_numbers<[1], [0], [0], [1], [0, 0, 1, 1], [], []>} : vector<8x4xf32>, vector<4x32xf32>, vector<8x32xf32> -> vector<8x32xf32>
    %1148 = vector.extract_strided_slice %1123 {offsets = [0, 4], sizes = [8, 4], strides = [1, 1]} : vector<8x32xf32> to vector<8x4xf32>
    %1149 = vector.extract_strided_slice %1127 {offsets = [0, 4], sizes = [17, 4], strides = [1, 1]} : vector<17x32xf32> to vector<17x4xf32>
    %cst_479 = arith.constant dense<0.000000e+00> : vector<8x17xf32>
    %1150 = tpu.matmul %1148, %1149, %cst_479 {dimension_numbers = #tpu.dot_dimension_numbers<[1], [1], [0], [0], [0, 0, 1, 0], [], []>} : vector<8x4xf32>, vector<17x4xf32>, vector<8x17xf32> -> vector<8x17xf32>
    %cst_480 = arith.constant 5.000000e-01 : f32
    %1151 = vector.broadcast %cst_480 : f32 to vector<8x17xf32>
    %1152 = arith.mulf %1150, %1151 : vector<8x17xf32>
    %cst_481 = arith.constant dense<0xFF800000> : vector<8xf32>
    %1153 = vector.multi_reduction <maximumf>, %1152, %cst_481 [1] : vector<8x17xf32> to vector<8xf32>
    %1154 = vector.shape_cast %1153 : vector<8xf32> to vector<8x1xf32>
    %1155 = vector.broadcast %1154 : vector<8x1xf32> to vector<8x17xf32>
    %1156 = arith.subf %1152, %1155 : vector<8x17xf32>
    %1157 = math.exp %1156 : vector<8x17xf32>
    %cst_482 = arith.constant dense<0.000000e+00> : vector<8xf32>
    %1158 = vector.multi_reduction <add>, %1157, %cst_482 [1] : vector<8x17xf32> to vector<8xf32>
    %1159 = vector.shape_cast %1158 : vector<8xf32> to vector<8x1xf32>
    %1160 = tpu.reciprocal %1159 {approx = true} : vector<8x1xf32> -> vector<8x1xf32>
    %1161 = vector.broadcast %1160 : vector<8x1xf32> to vector<8x17xf32>
    %1162 = arith.mulf %1157, %1161 : vector<8x17xf32>
    %1163 = vector.extract_strided_slice %1128 {offsets = [0, 4], sizes = [17, 4], strides = [1, 1]} : vector<17x32xf32> to vector<17x4xf32>
    %cst_483 = arith.constant dense<0.000000e+00> : vector<8x4xf32>
    %1164 = tpu.matmul %1162, %1163, %cst_483 {dimension_numbers = #tpu.dot_dimension_numbers<[1], [0], [0], [1], [0, 0, 1, 1], [], []>} : vector<8x17xf32>, vector<17x4xf32>, vector<8x4xf32> -> vector<8x4xf32>
    %1165 = vector.extract_strided_slice %1118 {offsets = [4, 0], sizes = [4, 32], strides = [1, 1]} : vector<32x32xf32> to vector<4x32xf32>
    %cst_484 = arith.constant dense<0.000000e+00> : vector<8x32xf32>
    %1166 = tpu.matmul %1164, %1165, %cst_484 {dimension_numbers = #tpu.dot_dimension_numbers<[1], [0], [0], [1], [0, 0, 1, 1], [], []>} : vector<8x4xf32>, vector<4x32xf32>, vector<8x32xf32> -> vector<8x32xf32>
    %1167 = arith.addf %1147, %1166 : vector<8x32xf32>
    %1168 = vector.extract_strided_slice %1123 {offsets = [0, 8], sizes = [8, 4], strides = [1, 1]} : vector<8x32xf32> to vector<8x4xf32>
    %1169 = vector.extract_strided_slice %1127 {offsets = [0, 8], sizes = [17, 4], strides = [1, 1]} : vector<17x32xf32> to vector<17x4xf32>
    %cst_485 = arith.constant dense<0.000000e+00> : vector<8x17xf32>
    %1170 = tpu.matmul %1168, %1169, %cst_485 {dimension_numbers = #tpu.dot_dimension_numbers<[1], [1], [0], [0], [0, 0, 1, 0], [], []>} : vector<8x4xf32>, vector<17x4xf32>, vector<8x17xf32> -> vector<8x17xf32>
    %cst_486 = arith.constant 5.000000e-01 : f32
    %1171 = vector.broadcast %cst_486 : f32 to vector<8x17xf32>
    %1172 = arith.mulf %1170, %1171 : vector<8x17xf32>
    %cst_487 = arith.constant dense<0xFF800000> : vector<8xf32>
    %1173 = vector.multi_reduction <maximumf>, %1172, %cst_487 [1] : vector<8x17xf32> to vector<8xf32>
    %1174 = vector.shape_cast %1173 : vector<8xf32> to vector<8x1xf32>
    %1175 = vector.broadcast %1174 : vector<8x1xf32> to vector<8x17xf32>
    %1176 = arith.subf %1172, %1175 : vector<8x17xf32>
    %1177 = math.exp %1176 : vector<8x17xf32>
    %cst_488 = arith.constant dense<0.000000e+00> : vector<8xf32>
    %1178 = vector.multi_reduction <add>, %1177, %cst_488 [1] : vector<8x17xf32> to vector<8xf32>
    %1179 = vector.shape_cast %1178 : vector<8xf32> to vector<8x1xf32>
    %1180 = tpu.reciprocal %1179 {approx = true} : vector<8x1xf32> -> vector<8x1xf32>
    %1181 = vector.broadcast %1180 : vector<8x1xf32> to vector<8x17xf32>
    %1182 = arith.mulf %1177, %1181 : vector<8x17xf32>
    %1183 = vector.extract_strided_slice %1128 {offsets = [0, 8], sizes = [17, 4], strides = [1, 1]} : vector<17x32xf32> to vector<17x4xf32>
    %cst_489 = arith.constant dense<0.000000e+00> : vector<8x4xf32>
    %1184 = tpu.matmul %1182, %1183, %cst_489 {dimension_numbers = #tpu.dot_dimension_numbers<[1], [0], [0], [1], [0, 0, 1, 1], [], []>} : vector<8x17xf32>, vector<17x4xf32>, vector<8x4xf32> -> vector<8x4xf32>
    %1185 = vector.extract_strided_slice %1118 {offsets = [8, 0], sizes = [4, 32], strides = [1, 1]} : vector<32x32xf32> to vector<4x32xf32>
    %cst_490 = arith.constant dense<0.000000e+00> : vector<8x32xf32>
    %1186 = tpu.matmul %1184, %1185, %cst_490 {dimension_numbers = #tpu.dot_dimension_numbers<[1], [0], [0], [1], [0, 0, 1, 1], [], []>} : vector<8x4xf32>, vector<4x32xf32>, vector<8x32xf32> -> vector<8x32xf32>
    %1187 = arith.addf %1167, %1186 : vector<8x32xf32>
    %1188 = vector.extract_strided_slice %1123 {offsets = [0, 12], sizes = [8, 4], strides = [1, 1]} : vector<8x32xf32> to vector<8x4xf32>
    %1189 = vector.extract_strided_slice %1127 {offsets = [0, 12], sizes = [17, 4], strides = [1, 1]} : vector<17x32xf32> to vector<17x4xf32>
    %cst_491 = arith.constant dense<0.000000e+00> : vector<8x17xf32>
    %1190 = tpu.matmul %1188, %1189, %cst_491 {dimension_numbers = #tpu.dot_dimension_numbers<[1], [1], [0], [0], [0, 0, 1, 0], [], []>} : vector<8x4xf32>, vector<17x4xf32>, vector<8x17xf32> -> vector<8x17xf32>
    %cst_492 = arith.constant 5.000000e-01 : f32
    %1191 = vector.broadcast %cst_492 : f32 to vector<8x17xf32>
    %1192 = arith.mulf %1190, %1191 : vector<8x17xf32>
    %cst_493 = arith.constant dense<0xFF800000> : vector<8xf32>
    %1193 = vector.multi_reduction <maximumf>, %1192, %cst_493 [1] : vector<8x17xf32> to vector<8xf32>
    %1194 = vector.shape_cast %1193 : vector<8xf32> to vector<8x1xf32>
    %1195 = vector.broadcast %1194 : vector<8x1xf32> to vector<8x17xf32>
    %1196 = arith.subf %1192, %1195 : vector<8x17xf32>
    %1197 = math.exp %1196 : vector<8x17xf32>
    %cst_494 = arith.constant dense<0.000000e+00> : vector<8xf32>
    %1198 = vector.multi_reduction <add>, %1197, %cst_494 [1] : vector<8x17xf32> to vector<8xf32>
    %1199 = vector.shape_cast %1198 : vector<8xf32> to vector<8x1xf32>
    %1200 = tpu.reciprocal %1199 {approx = true} : vector<8x1xf32> -> vector<8x1xf32>
    %1201 = vector.broadcast %1200 : vector<8x1xf32> to vector<8x17xf32>
    %1202 = arith.mulf %1197, %1201 : vector<8x17xf32>
    %1203 = vector.extract_strided_slice %1128 {offsets = [0, 12], sizes = [17, 4], strides = [1, 1]} : vector<17x32xf32> to vector<17x4xf32>
    %cst_495 = arith.constant dense<0.000000e+00> : vector<8x4xf32>
    %1204 = tpu.matmul %1202, %1203, %cst_495 {dimension_numbers = #tpu.dot_dimension_numbers<[1], [0], [0], [1], [0, 0, 1, 1], [], []>} : vector<8x17xf32>, vector<17x4xf32>, vector<8x4xf32> -> vector<8x4xf32>
    %1205 = vector.extract_strided_slice %1118 {offsets = [12, 0], sizes = [4, 32], strides = [1, 1]} : vector<32x32xf32> to vector<4x32xf32>
    %cst_496 = arith.constant dense<0.000000e+00> : vector<8x32xf32>
    %1206 = tpu.matmul %1204, %1205, %cst_496 {dimension_numbers = #tpu.dot_dimension_numbers<[1], [0], [0], [1], [0, 0, 1, 1], [], []>} : vector<8x4xf32>, vector<4x32xf32>, vector<8x32xf32> -> vector<8x32xf32>
    %1207 = arith.addf %1187, %1206 : vector<8x32xf32>
    %1208 = vector.extract_strided_slice %1123 {offsets = [0, 16], sizes = [8, 4], strides = [1, 1]} : vector<8x32xf32> to vector<8x4xf32>
    %1209 = vector.extract_strided_slice %1127 {offsets = [0, 16], sizes = [17, 4], strides = [1, 1]} : vector<17x32xf32> to vector<17x4xf32>
    %cst_497 = arith.constant dense<0.000000e+00> : vector<8x17xf32>
    %1210 = tpu.matmul %1208, %1209, %cst_497 {dimension_numbers = #tpu.dot_dimension_numbers<[1], [1], [0], [0], [0, 0, 1, 0], [], []>} : vector<8x4xf32>, vector<17x4xf32>, vector<8x17xf32> -> vector<8x17xf32>
    %cst_498 = arith.constant 5.000000e-01 : f32
    %1211 = vector.broadcast %cst_498 : f32 to vector<8x17xf32>
    %1212 = arith.mulf %1210, %1211 : vector<8x17xf32>
    %cst_499 = arith.constant dense<0xFF800000> : vector<8xf32>
    %1213 = vector.multi_reduction <maximumf>, %1212, %cst_499 [1] : vector<8x17xf32> to vector<8xf32>
    %1214 = vector.shape_cast %1213 : vector<8xf32> to vector<8x1xf32>
    %1215 = vector.broadcast %1214 : vector<8x1xf32> to vector<8x17xf32>
    %1216 = arith.subf %1212, %1215 : vector<8x17xf32>
    %1217 = math.exp %1216 : vector<8x17xf32>
    %cst_500 = arith.constant dense<0.000000e+00> : vector<8xf32>
    %1218 = vector.multi_reduction <add>, %1217, %cst_500 [1] : vector<8x17xf32> to vector<8xf32>
    %1219 = vector.shape_cast %1218 : vector<8xf32> to vector<8x1xf32>
    %1220 = tpu.reciprocal %1219 {approx = true} : vector<8x1xf32> -> vector<8x1xf32>
    %1221 = vector.broadcast %1220 : vector<8x1xf32> to vector<8x17xf32>
    %1222 = arith.mulf %1217, %1221 : vector<8x17xf32>
    %1223 = vector.extract_strided_slice %1128 {offsets = [0, 16], sizes = [17, 4], strides = [1, 1]} : vector<17x32xf32> to vector<17x4xf32>
    %cst_501 = arith.constant dense<0.000000e+00> : vector<8x4xf32>
    %1224 = tpu.matmul %1222, %1223, %cst_501 {dimension_numbers = #tpu.dot_dimension_numbers<[1], [0], [0], [1], [0, 0, 1, 1], [], []>} : vector<8x17xf32>, vector<17x4xf32>, vector<8x4xf32> -> vector<8x4xf32>
    %1225 = vector.extract_strided_slice %1118 {offsets = [16, 0], sizes = [4, 32], strides = [1, 1]} : vector<32x32xf32> to vector<4x32xf32>
    %cst_502 = arith.constant dense<0.000000e+00> : vector<8x32xf32>
    %1226 = tpu.matmul %1224, %1225, %cst_502 {dimension_numbers = #tpu.dot_dimension_numbers<[1], [0], [0], [1], [0, 0, 1, 1], [], []>} : vector<8x4xf32>, vector<4x32xf32>, vector<8x32xf32> -> vector<8x32xf32>
    %1227 = arith.addf %1207, %1226 : vector<8x32xf32>
    %1228 = vector.extract_strided_slice %1123 {offsets = [0, 20], sizes = [8, 4], strides = [1, 1]} : vector<8x32xf32> to vector<8x4xf32>
    %1229 = vector.extract_strided_slice %1127 {offsets = [0, 20], sizes = [17, 4], strides = [1, 1]} : vector<17x32xf32> to vector<17x4xf32>
    %cst_503 = arith.constant dense<0.000000e+00> : vector<8x17xf32>
    %1230 = tpu.matmul %1228, %1229, %cst_503 {dimension_numbers = #tpu.dot_dimension_numbers<[1], [1], [0], [0], [0, 0, 1, 0], [], []>} : vector<8x4xf32>, vector<17x4xf32>, vector<8x17xf32> -> vector<8x17xf32>
    %cst_504 = arith.constant 5.000000e-01 : f32
    %1231 = vector.broadcast %cst_504 : f32 to vector<8x17xf32>
    %1232 = arith.mulf %1230, %1231 : vector<8x17xf32>
    %cst_505 = arith.constant dense<0xFF800000> : vector<8xf32>
    %1233 = vector.multi_reduction <maximumf>, %1232, %cst_505 [1] : vector<8x17xf32> to vector<8xf32>
    %1234 = vector.shape_cast %1233 : vector<8xf32> to vector<8x1xf32>
    %1235 = vector.broadcast %1234 : vector<8x1xf32> to vector<8x17xf32>
    %1236 = arith.subf %1232, %1235 : vector<8x17xf32>
    %1237 = math.exp %1236 : vector<8x17xf32>
    %cst_506 = arith.constant dense<0.000000e+00> : vector<8xf32>
    %1238 = vector.multi_reduction <add>, %1237, %cst_506 [1] : vector<8x17xf32> to vector<8xf32>
    %1239 = vector.shape_cast %1238 : vector<8xf32> to vector<8x1xf32>
    %1240 = tpu.reciprocal %1239 {approx = true} : vector<8x1xf32> -> vector<8x1xf32>
    %1241 = vector.broadcast %1240 : vector<8x1xf32> to vector<8x17xf32>
    %1242 = arith.mulf %1237, %1241 : vector<8x17xf32>
    %1243 = vector.extract_strided_slice %1128 {offsets = [0, 20], sizes = [17, 4], strides = [1, 1]} : vector<17x32xf32> to vector<17x4xf32>
    %cst_507 = arith.constant dense<0.000000e+00> : vector<8x4xf32>
    %1244 = tpu.matmul %1242, %1243, %cst_507 {dimension_numbers = #tpu.dot_dimension_numbers<[1], [0], [0], [1], [0, 0, 1, 1], [], []>} : vector<8x17xf32>, vector<17x4xf32>, vector<8x4xf32> -> vector<8x4xf32>
    %1245 = vector.extract_strided_slice %1118 {offsets = [20, 0], sizes = [4, 32], strides = [1, 1]} : vector<32x32xf32> to vector<4x32xf32>
    %cst_508 = arith.constant dense<0.000000e+00> : vector<8x32xf32>
    %1246 = tpu.matmul %1244, %1245, %cst_508 {dimension_numbers = #tpu.dot_dimension_numbers<[1], [0], [0], [1], [0, 0, 1, 1], [], []>} : vector<8x4xf32>, vector<4x32xf32>, vector<8x32xf32> -> vector<8x32xf32>
    %1247 = arith.addf %1227, %1246 : vector<8x32xf32>
    %1248 = vector.extract_strided_slice %1123 {offsets = [0, 24], sizes = [8, 4], strides = [1, 1]} : vector<8x32xf32> to vector<8x4xf32>
    %1249 = vector.extract_strided_slice %1127 {offsets = [0, 24], sizes = [17, 4], strides = [1, 1]} : vector<17x32xf32> to vector<17x4xf32>
    %cst_509 = arith.constant dense<0.000000e+00> : vector<8x17xf32>
    %1250 = tpu.matmul %1248, %1249, %cst_509 {dimension_numbers = #tpu.dot_dimension_numbers<[1], [1], [0], [0], [0, 0, 1, 0], [], []>} : vector<8x4xf32>, vector<17x4xf32>, vector<8x17xf32> -> vector<8x17xf32>
    %cst_510 = arith.constant 5.000000e-01 : f32
    %1251 = vector.broadcast %cst_510 : f32 to vector<8x17xf32>
    %1252 = arith.mulf %1250, %1251 : vector<8x17xf32>
    %cst_511 = arith.constant dense<0xFF800000> : vector<8xf32>
    %1253 = vector.multi_reduction <maximumf>, %1252, %cst_511 [1] : vector<8x17xf32> to vector<8xf32>
    %1254 = vector.shape_cast %1253 : vector<8xf32> to vector<8x1xf32>
    %1255 = vector.broadcast %1254 : vector<8x1xf32> to vector<8x17xf32>
    %1256 = arith.subf %1252, %1255 : vector<8x17xf32>
    %1257 = math.exp %1256 : vector<8x17xf32>
    %cst_512 = arith.constant dense<0.000000e+00> : vector<8xf32>
    %1258 = vector.multi_reduction <add>, %1257, %cst_512 [1] : vector<8x17xf32> to vector<8xf32>
    %1259 = vector.shape_cast %1258 : vector<8xf32> to vector<8x1xf32>
    %1260 = tpu.reciprocal %1259 {approx = true} : vector<8x1xf32> -> vector<8x1xf32>
    %1261 = vector.broadcast %1260 : vector<8x1xf32> to vector<8x17xf32>
    %1262 = arith.mulf %1257, %1261 : vector<8x17xf32>
    %1263 = vector.extract_strided_slice %1128 {offsets = [0, 24], sizes = [17, 4], strides = [1, 1]} : vector<17x32xf32> to vector<17x4xf32>
    %cst_513 = arith.constant dense<0.000000e+00> : vector<8x4xf32>
    %1264 = tpu.matmul %1262, %1263, %cst_513 {dimension_numbers = #tpu.dot_dimension_numbers<[1], [0], [0], [1], [0, 0, 1, 1], [], []>} : vector<8x17xf32>, vector<17x4xf32>, vector<8x4xf32> -> vector<8x4xf32>
    %1265 = vector.extract_strided_slice %1118 {offsets = [24, 0], sizes = [4, 32], strides = [1, 1]} : vector<32x32xf32> to vector<4x32xf32>
    %cst_514 = arith.constant dense<0.000000e+00> : vector<8x32xf32>
    %1266 = tpu.matmul %1264, %1265, %cst_514 {dimension_numbers = #tpu.dot_dimension_numbers<[1], [0], [0], [1], [0, 0, 1, 1], [], []>} : vector<8x4xf32>, vector<4x32xf32>, vector<8x32xf32> -> vector<8x32xf32>
    %1267 = arith.addf %1247, %1266 : vector<8x32xf32>
    %1268 = vector.extract_strided_slice %1123 {offsets = [0, 28], sizes = [8, 4], strides = [1, 1]} : vector<8x32xf32> to vector<8x4xf32>
    %1269 = vector.extract_strided_slice %1127 {offsets = [0, 28], sizes = [17, 4], strides = [1, 1]} : vector<17x32xf32> to vector<17x4xf32>
    %cst_515 = arith.constant dense<0.000000e+00> : vector<8x17xf32>
    %1270 = tpu.matmul %1268, %1269, %cst_515 {dimension_numbers = #tpu.dot_dimension_numbers<[1], [1], [0], [0], [0, 0, 1, 0], [], []>} : vector<8x4xf32>, vector<17x4xf32>, vector<8x17xf32> -> vector<8x17xf32>
    %cst_516 = arith.constant 5.000000e-01 : f32
    %1271 = vector.broadcast %cst_516 : f32 to vector<8x17xf32>
    %1272 = arith.mulf %1270, %1271 : vector<8x17xf32>
    %cst_517 = arith.constant dense<0xFF800000> : vector<8xf32>
    %1273 = vector.multi_reduction <maximumf>, %1272, %cst_517 [1] : vector<8x17xf32> to vector<8xf32>
    %1274 = vector.shape_cast %1273 : vector<8xf32> to vector<8x1xf32>
    %1275 = vector.broadcast %1274 : vector<8x1xf32> to vector<8x17xf32>
    %1276 = arith.subf %1272, %1275 : vector<8x17xf32>
    %1277 = math.exp %1276 : vector<8x17xf32>
    %cst_518 = arith.constant dense<0.000000e+00> : vector<8xf32>
    %1278 = vector.multi_reduction <add>, %1277, %cst_518 [1] : vector<8x17xf32> to vector<8xf32>
    %1279 = vector.shape_cast %1278 : vector<8xf32> to vector<8x1xf32>
    %1280 = tpu.reciprocal %1279 {approx = true} : vector<8x1xf32> -> vector<8x1xf32>
    %1281 = vector.broadcast %1280 : vector<8x1xf32> to vector<8x17xf32>
    %1282 = arith.mulf %1277, %1281 : vector<8x17xf32>
    %1283 = vector.extract_strided_slice %1128 {offsets = [0, 28], sizes = [17, 4], strides = [1, 1]} : vector<17x32xf32> to vector<17x4xf32>
    %cst_519 = arith.constant dense<0.000000e+00> : vector<8x4xf32>
    %1284 = tpu.matmul %1282, %1283, %cst_519 {dimension_numbers = #tpu.dot_dimension_numbers<[1], [0], [0], [1], [0, 0, 1, 1], [], []>} : vector<8x17xf32>, vector<17x4xf32>, vector<8x4xf32> -> vector<8x4xf32>
    %1285 = vector.extract_strided_slice %1118 {offsets = [28, 0], sizes = [4, 32], strides = [1, 1]} : vector<32x32xf32> to vector<4x32xf32>
    %cst_520 = arith.constant dense<0.000000e+00> : vector<8x32xf32>
    %1286 = tpu.matmul %1284, %1285, %cst_520 {dimension_numbers = #tpu.dot_dimension_numbers<[1], [0], [0], [1], [0, 0, 1, 1], [], []>} : vector<8x4xf32>, vector<4x32xf32>, vector<8x32xf32> -> vector<8x32xf32>
    %1287 = arith.addf %1267, %1286 : vector<8x32xf32>
    %1288 = vector.broadcast %1120 : vector<1x32xf32> to vector<8x32xf32>
    %1289 = arith.addf %1287, %1288 : vector<8x32xf32>
    %1290 = arith.addf %1108, %1289 : vector<8x32xf32>
    %c1_521 = arith.constant 1 : index
    %c0_522 = arith.constant 0 : index
    %c0_523 = arith.constant 0 : index
    %1291 = vector.load %arg16[%c1_521, %c0_522, %c0_523] : memref<2x1x32xf32, #tpu.memory_space<vmem>>, vector<1x1x32xf32>
    %1292 = vector.shape_cast %1291 : vector<1x1x32xf32> to vector<1x32xf32>
    %c1_524 = arith.constant 1 : index
    %c0_525 = arith.constant 0 : index
    %c0_526 = arith.constant 0 : index
    %1293 = vector.load %arg15[%c1_524, %c0_525, %c0_526] : memref<2x1x32xf32, #tpu.memory_space<vmem>>, vector<1x1x32xf32>
    %1294 = vector.shape_cast %1293 : vector<1x1x32xf32> to vector<1x32xf32>
    %cst_527 = arith.constant dense<0.000000e+00> : vector<8xf32>
    %1295 = vector.multi_reduction <add>, %1290, %cst_527 [1] : vector<8x32xf32> to vector<8xf32>
    %1296 = vector.shape_cast %1295 : vector<8xf32> to vector<8x1xf32>
    %cst_528 = arith.constant 3.200000e+01 : f32
    %1297 = vector.broadcast %cst_528 : f32 to vector<8x1xf32>
    %1298 = arith.divf %1296, %1297 : vector<8x1xf32>
    %1299 = vector.broadcast %1298 : vector<8x1xf32> to vector<8x32xf32>
    %1300 = arith.subf %1290, %1299 : vector<8x32xf32>
    %1301 = arith.mulf %1300, %1300 : vector<8x32xf32>
    %cst_529 = arith.constant dense<0.000000e+00> : vector<8xf32>
    %1302 = vector.multi_reduction <add>, %1301, %cst_529 [1] : vector<8x32xf32> to vector<8xf32>
    %1303 = vector.shape_cast %1302 : vector<8xf32> to vector<8x1xf32>
    %cst_530 = arith.constant 3.200000e+01 : f32
    %1304 = vector.broadcast %cst_530 : f32 to vector<8x1xf32>
    %1305 = arith.divf %1303, %1304 : vector<8x1xf32>
    %cst_531 = arith.constant 9.99999974E-6 : f32
    %1306 = vector.broadcast %cst_531 : f32 to vector<8x1xf32>
    %1307 = arith.addf %1305, %1306 : vector<8x1xf32>
    %1308 = math.rsqrt %1307 : vector<8x1xf32>
    %1309 = vector.broadcast %1308 : vector<8x1xf32> to vector<8x32xf32>
    %1310 = arith.mulf %1300, %1309 : vector<8x32xf32>
    %1311 = vector.broadcast %1292 : vector<1x32xf32> to vector<8x32xf32>
    %1312 = arith.mulf %1310, %1311 : vector<8x32xf32>
    %1313 = vector.broadcast %1294 : vector<1x32xf32> to vector<8x32xf32>
    %1314 = arith.addf %1312, %1313 : vector<8x32xf32>
    %c1_532 = arith.constant 1 : index
    %c0_533 = arith.constant 0 : index
    %c0_534 = arith.constant 0 : index
    %1315 = vector.load %arg23[%c1_532, %c0_533, %c0_534] : memref<2x32x64xf32, #tpu.memory_space<vmem>>, vector<1x32x64xf32>
    %1316 = vector.shape_cast %1315 : vector<1x32x64xf32> to vector<32x64xf32>
    %cst_535 = arith.constant dense<0.000000e+00> : vector<8x64xf32>
    %1317 = tpu.matmul %1314, %1316, %cst_535 {dimension_numbers = #tpu.dot_dimension_numbers<[1], [0], [0], [1], [0, 0, 1, 1], [], []>} : vector<8x32xf32>, vector<32x64xf32>, vector<8x64xf32> -> vector<8x64xf32>
    %c1_536 = arith.constant 1 : index
    %c0_537 = arith.constant 0 : index
    %c0_538 = arith.constant 0 : index
    %1318 = vector.load %arg5[%c1_536, %c0_537, %c0_538] : memref<2x1x64xf32, #tpu.memory_space<vmem>>, vector<1x1x64xf32>
    %1319 = vector.shape_cast %1318 : vector<1x1x64xf32> to vector<1x64xf32>
    %1320 = vector.broadcast %1319 : vector<1x64xf32> to vector<8x64xf32>
    %1321 = arith.addf %1317, %1320 : vector<8x64xf32>
    %cst_539 = arith.constant 0.000000e+00 : f32
    %1322 = vector.broadcast %cst_539 : f32 to vector<8x64xf32>
    %1323 = arith.maximumf %1321, %1322 : vector<8x64xf32>
    %c1_540 = arith.constant 1 : index
    %c0_541 = arith.constant 0 : index
    %c0_542 = arith.constant 0 : index
    %1324 = vector.load %arg24[%c1_540, %c0_541, %c0_542] : memref<2x64x32xf32, #tpu.memory_space<vmem>>, vector<1x64x32xf32>
    %1325 = vector.shape_cast %1324 : vector<1x64x32xf32> to vector<64x32xf32>
    %cst_543 = arith.constant dense<0.000000e+00> : vector<8x32xf32>
    %1326 = tpu.matmul %1323, %1325, %cst_543 {dimension_numbers = #tpu.dot_dimension_numbers<[1], [0], [0], [1], [0, 0, 1, 1], [], []>} : vector<8x64xf32>, vector<64x32xf32>, vector<8x32xf32> -> vector<8x32xf32>
    %c1_544 = arith.constant 1 : index
    %c0_545 = arith.constant 0 : index
    %c0_546 = arith.constant 0 : index
    %1327 = vector.load %arg6[%c1_544, %c0_545, %c0_546] : memref<2x1x32xf32, #tpu.memory_space<vmem>>, vector<1x1x32xf32>
    %1328 = vector.shape_cast %1327 : vector<1x1x32xf32> to vector<1x32xf32>
    %1329 = vector.broadcast %1328 : vector<1x32xf32> to vector<8x32xf32>
    %1330 = arith.addf %1326, %1329 : vector<8x32xf32>
    %1331 = arith.addf %1314, %1330 : vector<8x32xf32>
    %c1_547 = arith.constant 1 : index
    %c0_548 = arith.constant 0 : index
    %c0_549 = arith.constant 0 : index
    %1332 = vector.load %arg18[%c1_547, %c0_548, %c0_549] : memref<2x1x32xf32, #tpu.memory_space<vmem>>, vector<1x1x32xf32>
    %1333 = vector.shape_cast %1332 : vector<1x1x32xf32> to vector<1x32xf32>
    %c1_550 = arith.constant 1 : index
    %c0_551 = arith.constant 0 : index
    %c0_552 = arith.constant 0 : index
    %1334 = vector.load %arg17[%c1_550, %c0_551, %c0_552] : memref<2x1x32xf32, #tpu.memory_space<vmem>>, vector<1x1x32xf32>
    %1335 = vector.shape_cast %1334 : vector<1x1x32xf32> to vector<1x32xf32>
    %cst_553 = arith.constant dense<0.000000e+00> : vector<8xf32>
    %1336 = vector.multi_reduction <add>, %1331, %cst_553 [1] : vector<8x32xf32> to vector<8xf32>
    %1337 = vector.shape_cast %1336 : vector<8xf32> to vector<8x1xf32>
    %cst_554 = arith.constant 3.200000e+01 : f32
    %1338 = vector.broadcast %cst_554 : f32 to vector<8x1xf32>
    %1339 = arith.divf %1337, %1338 : vector<8x1xf32>
    %1340 = vector.broadcast %1339 : vector<8x1xf32> to vector<8x32xf32>
    %1341 = arith.subf %1331, %1340 : vector<8x32xf32>
    %1342 = arith.mulf %1341, %1341 : vector<8x32xf32>
    %cst_555 = arith.constant dense<0.000000e+00> : vector<8xf32>
    %1343 = vector.multi_reduction <add>, %1342, %cst_555 [1] : vector<8x32xf32> to vector<8xf32>
    %1344 = vector.shape_cast %1343 : vector<8xf32> to vector<8x1xf32>
    %cst_556 = arith.constant 3.200000e+01 : f32
    %1345 = vector.broadcast %cst_556 : f32 to vector<8x1xf32>
    %1346 = arith.divf %1344, %1345 : vector<8x1xf32>
    %cst_557 = arith.constant 9.99999974E-6 : f32
    %1347 = vector.broadcast %cst_557 : f32 to vector<8x1xf32>
    %1348 = arith.addf %1346, %1347 : vector<8x1xf32>
    %1349 = math.rsqrt %1348 : vector<8x1xf32>
    %1350 = vector.broadcast %1349 : vector<8x1xf32> to vector<8x32xf32>
    %1351 = arith.mulf %1341, %1350 : vector<8x32xf32>
    %1352 = vector.broadcast %1333 : vector<1x32xf32> to vector<8x32xf32>
    %1353 = arith.mulf %1351, %1352 : vector<8x32xf32>
    %1354 = vector.broadcast %1335 : vector<1x32xf32> to vector<8x32xf32>
    %1355 = arith.addf %1353, %1354 : vector<8x32xf32>
    %c0_558 = arith.constant 0 : index
    %c0_559 = arith.constant 0 : index
    %1356 = vector.load %arg26[%c0_558, %c0_559] : memref<32x128xf32, #tpu.memory_space<vmem>>, vector<32x128xf32>
    %cst_560 = arith.constant dense<0.000000e+00> : vector<8x128xf32>
    %1357 = tpu.matmul %1355, %1356, %cst_560 {dimension_numbers = #tpu.dot_dimension_numbers<[1], [0], [0], [1], [0, 0, 1, 1], [], []>} : vector<8x32xf32>, vector<32x128xf32>, vector<8x128xf32> -> vector<8x128xf32>
    %c0_561 = arith.constant 0 : index
    %c0_562 = arith.constant 0 : index
    %1358 = vector.load %arg25[%c0_561, %c0_562] : memref<1x128xf32, #tpu.memory_space<vmem>>, vector<1x128xf32>
    %1359 = vector.broadcast %1358 : vector<1x128xf32> to vector<8x128xf32>
    %1360 = arith.addf %1357, %1359 : vector<8x128xf32>
    %c0_563 = arith.constant 0 : index
    %c0_564 = arith.constant 0 : index
    %c0_565 = arith.constant 0 : index
    %1361 = vector.load %arg46[%c0_563, %c0_564, %c0_565] : memref<1x8x128xf32, #tpu.memory_space<vmem>>, vector<1x8x128xf32>
    %1362 = vector.shape_cast %1361 : vector<1x8x128xf32> to vector<8x128xf32>
    %1363 = vector.shape_cast %1360 : vector<8x128xf32> to vector<1x8x128xf32>
    tpu.vector_store %arg46[%c0_563, %c0_564, %c0_565], %1363 {strides = array<i32>} : memref<1x8x128xf32, #tpu.memory_space<vmem>>, vector<1x8x128xf32>,
    return
  }
  func.func @transform_0(%arg0: i32) -> (i32, i32, i32) {
    %c0_i32 = arith.constant 0 : i32
    %c0_i32_0 = arith.constant 0 : i32
    %c0_i32_1 = arith.constant 0 : i32
    return %arg0, %c0_i32, %c0_i32_0 : i32, i32, i32
  }
  func.func @transform_1(%arg0: i32) -> (i32, i32, i32) {
    %c0_i32 = arith.constant 0 : i32
    %c0_i32_0 = arith.constant 0 : i32
    %c0_i32_1 = arith.constant 0 : i32
    return %arg0, %c0_i32, %c0_i32_0 : i32, i32, i32
  }
  func.func @transform_2(%arg0: i32) -> (i32, i32) {
    %c0_i32 = arith.constant 0 : i32
    %c0_i32_0 = arith.constant 0 : i32
    %c0_i32_1 = arith.constant 0 : i32
    return %c0_i32, %c0_i32_0 : i32, i32
  }
  func.func @transform_3(%arg0: i32) -> (i32, i32) {
    %c0_i32 = arith.constant 0 : i32
    %c0_i32_0 = arith.constant 0 : i32
    %c0_i32_1 = arith.constant 0 : i32
    return %c0_i32, %c0_i32_0 : i32, i32
  }
  func.func @transform_4(%arg0: i32) -> (i32, i32, i32) {
    %c0_i32 = arith.constant 0 : i32
    %c0_i32_0 = arith.constant 0 : i32
    %c0_i32_1 = arith.constant 0 : i32
    %c0_i32_2 = arith.constant 0 : i32
    return %c0_i32, %c0_i32_0, %c0_i32_1 : i32, i32, i32
  }
  func.func @transform_5(%arg0: i32) -> (i32, i32, i32) {
    %c0_i32 = arith.constant 0 : i32
    %c0_i32_0 = arith.constant 0 : i32
    %c0_i32_1 = arith.constant 0 : i32
    %c0_i32_2 = arith.constant 0 : i32
    return %c0_i32, %c0_i32_0, %c0_i32_1 : i32, i32, i32
  }
  func.func @transform_6(%arg0: i32) -> (i32, i32, i32) {
    %c0_i32 = arith.constant 0 : i32
    %c0_i32_0 = arith.constant 0 : i32
    %c0_i32_1 = arith.constant 0 : i32
    %c0_i32_2 = arith.constant 0 : i32
    return %c0_i32, %c0_i32_0, %c0_i32_1 : i32, i32, i32
  }
  func.func @transform_7(%arg0: i32) -> (i32, i32, i32) {
    %c0_i32 = arith.constant 0 : i32
    %c0_i32_0 = arith.constant 0 : i32
    %c0_i32_1 = arith.constant 0 : i32
    %c0_i32_2 = arith.constant 0 : i32
    return %c0_i32, %c0_i32_0, %c0_i32_1 : i32, i32, i32
  }
  func.func @transform_8(%arg0: i32) -> (i32, i32, i32) {
    %c0_i32 = arith.constant 0 : i32
    %c0_i32_0 = arith.constant 0 : i32
    %c0_i32_1 = arith.constant 0 : i32
    %c0_i32_2 = arith.constant 0 : i32
    return %c0_i32, %c0_i32_0, %c0_i32_1 : i32, i32, i32
  }
  func.func @transform_9(%arg0: i32) -> (i32, i32, i32) {
    %c0_i32 = arith.constant 0 : i32
    %c0_i32_0 = arith.constant 0 : i32
    %c0_i32_1 = arith.constant 0 : i32
    %c0_i32_2 = arith.constant 0 : i32
    return %c0_i32, %c0_i32_0, %c0_i32_1 : i32, i32, i32
  }
  func.func @transform_10(%arg0: i32) -> (i32, i32, i32) {
    %c0_i32 = arith.constant 0 : i32
    %c0_i32_0 = arith.constant 0 : i32
    %c0_i32_1 = arith.constant 0 : i32
    %c0_i32_2 = arith.constant 0 : i32
    return %c0_i32, %c0_i32_0, %c0_i32_1 : i32, i32, i32
  }
  func.func @transform_11(%arg0: i32) -> (i32, i32, i32) {
    %c0_i32 = arith.constant 0 : i32
    %c0_i32_0 = arith.constant 0 : i32
    %c0_i32_1 = arith.constant 0 : i32
    %c0_i32_2 = arith.constant 0 : i32
    return %c0_i32, %c0_i32_0, %c0_i32_1 : i32, i32, i32
  }
  func.func @transform_12(%arg0: i32) -> (i32, i32, i32) {
    %c0_i32 = arith.constant 0 : i32
    %c0_i32_0 = arith.constant 0 : i32
    %c0_i32_1 = arith.constant 0 : i32
    %c0_i32_2 = arith.constant 0 : i32
    return %c0_i32, %c0_i32_0, %c0_i32_1 : i32, i32, i32
  }
  func.func @transform_13(%arg0: i32) -> (i32, i32, i32) {
    %c0_i32 = arith.constant 0 : i32
    %c0_i32_0 = arith.constant 0 : i32
    %c0_i32_1 = arith.constant 0 : i32
    %c0_i32_2 = arith.constant 0 : i32
    return %c0_i32, %c0_i32_0, %c0_i32_1 : i32, i32, i32
  }
  func.func @transform_14(%arg0: i32) -> (i32, i32, i32) {
    %c0_i32 = arith.constant 0 : i32
    %c0_i32_0 = arith.constant 0 : i32
    %c0_i32_1 = arith.constant 0 : i32
    %c0_i32_2 = arith.constant 0 : i32
    return %c0_i32, %c0_i32_0, %c0_i32_1 : i32, i32, i32
  }
  func.func @transform_15(%arg0: i32) -> (i32, i32, i32) {
    %c0_i32 = arith.constant 0 : i32
    %c0_i32_0 = arith.constant 0 : i32
    %c0_i32_1 = arith.constant 0 : i32
    %c0_i32_2 = arith.constant 0 : i32
    return %c0_i32, %c0_i32_0, %c0_i32_1 : i32, i32, i32
  }
  func.func @transform_16(%arg0: i32) -> (i32, i32, i32) {
    %c0_i32 = arith.constant 0 : i32
    %c0_i32_0 = arith.constant 0 : i32
    %c0_i32_1 = arith.constant 0 : i32
    %c0_i32_2 = arith.constant 0 : i32
    return %c0_i32, %c0_i32_0, %c0_i32_1 : i32, i32, i32
  }
  func.func @transform_17(%arg0: i32) -> (i32, i32, i32) {
    %c0_i32 = arith.constant 0 : i32
    %c0_i32_0 = arith.constant 0 : i32
    %c0_i32_1 = arith.constant 0 : i32
    %c0_i32_2 = arith.constant 0 : i32
    return %c0_i32, %c0_i32_0, %c0_i32_1 : i32, i32, i32
  }
  func.func @transform_18(%arg0: i32) -> (i32, i32, i32) {
    %c0_i32 = arith.constant 0 : i32
    %c0_i32_0 = arith.constant 0 : i32
    %c0_i32_1 = arith.constant 0 : i32
    %c0_i32_2 = arith.constant 0 : i32
    return %c0_i32, %c0_i32_0, %c0_i32_1 : i32, i32, i32
  }
  func.func @transform_19(%arg0: i32) -> (i32, i32, i32) {
    %c0_i32 = arith.constant 0 : i32
    %c0_i32_0 = arith.constant 0 : i32
    %c0_i32_1 = arith.constant 0 : i32
    %c0_i32_2 = arith.constant 0 : i32
    return %c0_i32, %c0_i32_0, %c0_i32_1 : i32, i32, i32
  }
  func.func @transform_20(%arg0: i32) -> (i32, i32, i32) {
    %c0_i32 = arith.constant 0 : i32
    %c0_i32_0 = arith.constant 0 : i32
    %c0_i32_1 = arith.constant 0 : i32
    %c0_i32_2 = arith.constant 0 : i32
    return %c0_i32, %c0_i32_0, %c0_i32_1 : i32, i32, i32
  }
  func.func @transform_21(%arg0: i32) -> (i32, i32, i32) {
    %c0_i32 = arith.constant 0 : i32
    %c0_i32_0 = arith.constant 0 : i32
    %c0_i32_1 = arith.constant 0 : i32
    %c0_i32_2 = arith.constant 0 : i32
    return %c0_i32, %c0_i32_0, %c0_i32_1 : i32, i32, i32
  }
  func.func @transform_22(%arg0: i32) -> (i32, i32, i32) {
    %c0_i32 = arith.constant 0 : i32
    %c0_i32_0 = arith.constant 0 : i32
    %c0_i32_1 = arith.constant 0 : i32
    %c0_i32_2 = arith.constant 0 : i32
    return %c0_i32, %c0_i32_0, %c0_i32_1 : i32, i32, i32
  }
  func.func @transform_23(%arg0: i32) -> (i32, i32, i32) {
    %c0_i32 = arith.constant 0 : i32
    %c0_i32_0 = arith.constant 0 : i32
    %c0_i32_1 = arith.constant 0 : i32
    %c0_i32_2 = arith.constant 0 : i32
    return %c0_i32, %c0_i32_0, %c0_i32_1 : i32, i32, i32
  }
  func.func @transform_24(%arg0: i32) -> (i32, i32) {
    %c0_i32 = arith.constant 0 : i32
    %c0_i32_0 = arith.constant 0 : i32
    %c0_i32_1 = arith.constant 0 : i32
    return %c0_i32, %c0_i32_0 : i32, i32
  }
  func.func @transform_25(%arg0: i32) -> (i32, i32) {
    %c0_i32 = arith.constant 0 : i32
    %c0_i32_0 = arith.constant 0 : i32
    %c0_i32_1 = arith.constant 0 : i32
    return %c0_i32, %c0_i32_0 : i32, i32
  }
  func.func @transform_26(%arg0: i32) -> (i32, i32) {
    %c0_i32 = arith.constant 0 : i32
    %c0_i32_0 = arith.constant 0 : i32
    %c0_i32_1 = arith.constant 0 : i32
    return %c0_i32, %c0_i32_0 : i32, i32
  }
  func.func @transform_27(%arg0: i32) -> (i32, i32) {
    %c0_i32 = arith.constant 0 : i32
    %c0_i32_0 = arith.constant 0 : i32
    %c0_i32_1 = arith.constant 0 : i32
    return %c0_i32, %c0_i32_0 : i32, i32
  }
  func.func @transform_28(%arg0: i32) -> (i32, i32) {
    %c0_i32 = arith.constant 0 : i32
    %c0_i32_0 = arith.constant 0 : i32
    %c0_i32_1 = arith.constant 0 : i32
    return %c0_i32, %c0_i32_0 : i32, i32
  }
  func.func @transform_29(%arg0: i32) -> (i32, i32) {
    %c0_i32 = arith.constant 0 : i32
    %c0_i32_0 = arith.constant 0 : i32
    %c0_i32_1 = arith.constant 0 : i32
    return %c0_i32, %c0_i32_0 : i32, i32
  }
  func.func @transform_30(%arg0: i32) -> (i32, i32) {
    %c0_i32 = arith.constant 0 : i32
    %c0_i32_0 = arith.constant 0 : i32
    %c0_i32_1 = arith.constant 0 : i32
    return %c0_i32, %c0_i32_0 : i32, i32
  }
  func.func @transform_31(%arg0: i32) -> (i32, i32, i32) {
    %c0_i32 = arith.constant 0 : i32
    %c0_i32_0 = arith.constant 0 : i32
    %c0_i32_1 = arith.constant 0 : i32
    %c0_i32_2 = arith.constant 0 : i32
    return %c0_i32, %c0_i32_0, %c0_i32_1 : i32, i32, i32
  }
  func.func @transform_32(%arg0: i32) -> (i32, i32, i32) {
    %c0_i32 = arith.constant 0 : i32
    %c0_i32_0 = arith.constant 0 : i32
    %c0_i32_1 = arith.constant 0 : i32
    %c0_i32_2 = arith.constant 0 : i32
    return %c0_i32, %c0_i32_0, %c0_i32_1 : i32, i32, i32
  }
  func.func @transform_33(%arg0: i32) -> (i32, i32, i32) {
    %c0_i32 = arith.constant 0 : i32
    %c0_i32_0 = arith.constant 0 : i32
    %c0_i32_1 = arith.constant 0 : i32
    %c0_i32_2 = arith.constant 0 : i32
    return %c0_i32, %c0_i32_0, %c0_i32_1 : i32, i32, i32
  }
  func.func @transform_34(%arg0: i32) -> (i32, i32, i32) {
    %c0_i32 = arith.constant 0 : i32
    %c0_i32_0 = arith.constant 0 : i32
    %c0_i32_1 = arith.constant 0 : i32
    %c0_i32_2 = arith.constant 0 : i32
    return %c0_i32, %c0_i32_0, %c0_i32_1 : i32, i32, i32
  }
  func.func @transform_35(%arg0: i32) -> (i32, i32, i32) {
    %c0_i32 = arith.constant 0 : i32
    %c0_i32_0 = arith.constant 0 : i32
    %c0_i32_1 = arith.constant 0 : i32
    %c0_i32_2 = arith.constant 0 : i32
    return %c0_i32, %c0_i32_0, %c0_i32_1 : i32, i32, i32
  }
  func.func @transform_36(%arg0: i32) -> (i32, i32, i32) {
    %c0_i32 = arith.constant 0 : i32
    %c0_i32_0 = arith.constant 0 : i32
    %c0_i32_1 = arith.constant 0 : i32
    %c0_i32_2 = arith.constant 0 : i32
    return %c0_i32, %c0_i32_0, %c0_i32_1 : i32, i32, i32
  }
  func.func @transform_37(%arg0: i32) -> (i32, i32, i32) {
    %c0_i32 = arith.constant 0 : i32
    %c0_i32_0 = arith.constant 0 : i32
    %c0_i32_1 = arith.constant 0 : i32
    %c0_i32_2 = arith.constant 0 : i32
    return %c0_i32, %c0_i32_0, %c0_i32_1 : i32, i32, i32
  }
  func.func @transform_38(%arg0: i32) -> (i32, i32, i32) {
    %c0_i32 = arith.constant 0 : i32
    %c0_i32_0 = arith.constant 0 : i32
    %c0_i32_1 = arith.constant 0 : i32
    %c0_i32_2 = arith.constant 0 : i32
    return %c0_i32, %c0_i32_0, %c0_i32_1 : i32, i32, i32
  }
  func.func @transform_39(%arg0: i32) -> (i32, i32) {
    %c0_i32 = arith.constant 0 : i32
    %c0_i32_0 = arith.constant 0 : i32
    %c0_i32_1 = arith.constant 0 : i32
    return %c0_i32, %c0_i32_0 : i32, i32
  }
  func.func @transform_40(%arg0: i32) -> (i32, i32) {
    %c0_i32 = arith.constant 0 : i32
    %c0_i32_0 = arith.constant 0 : i32
    %c0_i32_1 = arith.constant 0 : i32
    return %c0_i32, %c0_i32_0 : i32, i32
  }
  func.func @transform_41(%arg0: i32) -> (i32, i32, i32) {
    %c0_i32 = arith.constant 0 : i32
    %c0_i32_0 = arith.constant 0 : i32
    %c0_i32_1 = arith.constant 0 : i32
    %c0_i32_2 = arith.constant 0 : i32
    return %c0_i32, %c0_i32_0, %c0_i32_1 : i32, i32, i32
  }
  func.func @transform_42(%arg0: i32) -> (i32, i32, i32) {
    %c0_i32 = arith.constant 0 : i32
    %c0_i32_0 = arith.constant 0 : i32
    %c0_i32_1 = arith.constant 0 : i32
    %c0_i32_2 = arith.constant 0 : i32
    return %c0_i32, %c0_i32_0, %c0_i32_1 : i32, i32, i32
  }
  func.func @transform_43(%arg0: i32) -> (i32, i32, i32) {
    %c0_i32 = arith.constant 0 : i32
    %c0_i32_0 = arith.constant 0 : i32
    %c0_i32_1 = arith.constant 0 : i32
    %c0_i32_2 = arith.constant 0 : i32
    return %c0_i32, %c0_i32_0, %c0_i32_1 : i32, i32, i32
  }
  func.func @transform_44(%arg0: i32) -> (i32, i32, i32) {
    %c0_i32 = arith.constant 0 : i32
    %c0_i32_0 = arith.constant 0 : i32
    %c0_i32_1 = arith.constant 0 : i32
    %c0_i32_2 = arith.constant 0 : i32
    return %c0_i32, %c0_i32_0, %c0_i32_1 : i32, i32, i32
  }
  func.func @transform_45(%arg0: i32) -> (i32, i32, i32) {
    %c0_i32 = arith.constant 0 : i32
    %c0_i32_0 = arith.constant 0 : i32
    %c0_i32_1 = arith.constant 0 : i32
    return %arg0, %c0_i32, %c0_i32_0 : i32, i32, i32
  }
}

</mosaic_0001>

<bundles_post_ra>
// kernel: image_to_latex_forward.1
= control target key start
LH: loop header
LB: loop body
LE: loop exit
PB: predicated region body
PF: predicated region fallthrough
CT: control target
= control target key end

     0   :  { %s17956_s6 = smov 1   ;;  %s17957_s10 = smov 2   ;;  %s20251_s0 = inlined_call_operand.smem [shape: u32[46], index: -1, kind: input, shape index: {}] }
   0x1   :  { %s18036_s5 = sld [smem:[%s20251_s0]]   ;;  %s17958_s14 = smov 3  }
   0x2   :  { %s18041_s9 = sld [smem:[%s20251_s0 + %s17956_s6]]   ;;  %s17959_s18 = smov 4  }
   0x3   :  { %s18046_s13 = sld [smem:[%s20251_s0 + %s17957_s10]]   ;;  %s17960_s22 = smov 5  }
   0x4   :  { %s18051_s17 = sld [smem:[%s20251_s0 + %s17958_s14]]   ;;  %s17961_s26 = smov 6  }
   0x5   :  { %s18056_s21 = sld [smem:[%s20251_s0 + %s17959_s18]]   ;;  %s17962_s30 = smov 7  }
   0x6   :  { %s18061_s25 = sld [smem:[%s20251_s0 + %s17960_s22]]   ;;  %s17963_s4 = smov 8  }
   0x7   :  { %20346 = sst [smem:[#allocation5_spill]] %s18036_s5  ;;  %s17964_s10 = smov 9  }
   0x8   :  { %20347 = sst [smem:[#allocation6_spill]] %s18041_s9  ;;  %s17965_s15 = smov 10  }
   0x9   :  { %20348 = sst [smem:[#allocation7_spill]] %s18046_s13  ;;  %s17966_s20 = smov 11  }
   0xa   :  { %20349 = sst [smem:[#allocation8_spill]] %s18051_s17  ;;  %s17968_s1 = smov 13  }
   0xb   :  { %20350 = sst [smem:[#allocation9_spill]] %s18056_s21  ;;  %s17969_s7 = smov 14  }
   0xc   :  { %20351 = sst [smem:[#allocation10_spill]] %s18061_s25  ;;  %s17971_s22 = smov 16  }
   0xd   :  { %s18066_s29 = sld [smem:[%s20251_s0 + %s17961_s26]]   ;;  %s17967_s26 = smov 12  }
   0xe   :  { %s18071_s3 = sld [smem:[%s20251_s0 + %s17962_s30]]   ;;  %s17972_s28 = smov 17  }
   0xf   :  { %s18076_s8 = sld [smem:[%s20251_s0 + %s17963_s4]]  }
  0x10   :  { %s18081_s14 = sld [smem:[%s20251_s0 + %s17964_s10]]  }
  0x11   :  { %s18086_s19 = sld [smem:[%s20251_s0 + %s17965_s15]]   ;;  %s17970_s15 = smov 15  }
  0x12   :  { %s18091_s24 = sld [smem:[%s20251_s0 + %s17966_s20]]  }
  0x13   :  { %20352 = sst [smem:[#allocation11_spill]] %s18066_s29 }
  0x14   :  { %20353 = sst [smem:[#allocation12_spill]] %s18071_s3 }
  0x15   :  { %20354 = sst [smem:[#allocation13_spill]] %s18076_s8 }
  0x16   :  { %20355 = sst [smem:[#allocation14_spill]] %s18081_s14 }
  0x17   :  { %20356 = sst [smem:[#allocation15_spill]] %s18086_s19 }
  0x18   :  { %20357 = sst [smem:[#allocation16_spill]] %s18091_s24 }
  0x19   :  { %s18096_s30 = sld [smem:[%s20251_s0 + %s17967_s26]]  }
  0x1a   :  { %s18101_s6 = sld [smem:[%s20251_s0 + %s17968_s1]]  }
  0x1b   :  { %s18106_s12 = sld [smem:[%s20251_s0 + %s17969_s7]]   ;;  %s17973_s7 = smov 18  }
  0x1c   :  { %s18111_s20 = sld [smem:[%s20251_s0 + %s17970_s15]]   ;;  %s17974_s15 = smov 19  }
  0x1d   :  { %s18116_s27 = sld [smem:[%s20251_s0 + %s17971_s22]]   ;;  %s17975_s22 = smov 20  }
  0x1e   :  { %s18121_s4 = sld [smem:[%s20251_s0 + %s17972_s28]]   ;;  %s17976_s28 = smov 21  }
  0x1f   :  { %20358 = sst [smem:[#allocation17_spill]] %s18096_s30 }
  0x20   :  { %20359 = sst [smem:[#allocation18_spill]] %s18101_s6 }
  0x21   :  { %20360 = sst [smem:[#allocation19_spill]] %s18106_s12 }
  0x22   :  { %20361 = sst [smem:[#allocation20_spill]] %s18111_s20 }
  0x23   :  { %20362 = sst [smem:[#allocation21_spill]] %s18116_s27 }
  0x24   :  { %20363 = sst [smem:[#allocation22_spill]] %s18121_s4 }
  0x25   :  { %s18126_s25 = sld [smem:[%s20251_s0 + %s17973_s7]]   ;;  %s17977_s7 = smov 22  }
  0x26   :  { %s18131_s21 = sld [smem:[%s20251_s0 + %s17974_s15]]   ;;  %s17978_s15 = smov 23  }
  0x27   :  { %s18136_s27 = sld [smem:[%s20251_s0 + %s17975_s22]]   ;;  %s17979_s22 = smov 24  }
  0x28   :  { %s18141_s4 = sld [smem:[%s20251_s0 + %s17976_s28]]   ;;  %s17980_s28 = smov 25  }
  0x29   :  { %s18146_s12 = sld [smem:[%s20251_s0 + %s17977_s7]]   ;;  %s17981_s7 = smov 26  }
  0x2a   :  { %s18151_s20 = sld [smem:[%s20251_s0 + %s17978_s15]]   ;;  %s17982_s15 = smov 27  }
  0x2b   :  { %20364 = sst [smem:[#allocation23_spill]] %s18126_s25 }
  0x2c   :  { %20365 = sst [smem:[#allocation24_spill]] %s18131_s21 }
  0x2d   :  { %20366 = sst [smem:[#allocation25_spill]] %s18136_s27 }
  0x2e   :  { %20367 = sst [smem:[#allocation26_spill]] %s18141_s4 }
  0x2f   :  { %20368 = sst [smem:[#allocation27_spill]] %s18146_s12 }
  0x30   :  { %20369 = sst [smem:[#allocation28_spill]] %s18151_s20 }
  0x31   :  { %s18156_s3 = sld [smem:[%s20251_s0 + %s17979_s22]]   ;;  %s17983_s22 = smov 28  }
  0x32   :  { %s18161_s19 = sld [smem:[%s20251_s0 + %s17980_s28]]   ;;  %s17984_s28 = smov 29  }
  0x33   :  { %s18166_s12 = sld [smem:[%s20251_s0 + %s17981_s7]]   ;;  %s17985_s7 = smov 30  }
  0x34   :  { %s18171_s20 = sld [smem:[%s20251_s0 + %s17982_s15]]   ;;  %s17986_s15 = smov 31  }
  0x35   :  { %s18186_s8 = sld [smem:[%s20251_s0 + %s17985_s7]]   ;;  %s17989_s7 = smov 34  }
  0x36   :  { %s18191_s30 = sld [smem:[%s20251_s0 + %s17986_s15]]   ;;  %s17990_s15 = smov 35  }
  0x37   :  { %20370 = sst [smem:[#allocation29_spill]] %s18156_s3 }
  0x38   :  { %20371 = sst [smem:[#allocation30_spill]] %s18161_s19 }
  0x39   :  { %20372 = sst [smem:[#allocation31_spill]] %s18166_s12 }
  0x3a   :  { %20373 = sst [smem:[#allocation32_spill]] %s18171_s20 }
  0x3b   :  { %s18176_s3 = sld [smem:[%s20251_s0 + %s17983_s22]]   ;;  %s17987_s22 = smov 32  }
  0x3c   :  { %s18181_s19 = sld [smem:[%s20251_s0 + %s17984_s28]]   ;;  %s17988_s28 = smov 33  }
  0x3d   :  { %20376 = sst [smem:[#allocation35_spill]] %s18186_s8 }
  0x3e   :  { %20377 = sst [smem:[#allocation36_spill]] %s18191_s30 }
  0x3f   :  { %s18196_s6 = sld [smem:[%s20251_s0 + %s17987_s22]]   ;;  %s17991_s22 = smov 36  }
  0x40   :  { %s18201_s24 = sld [smem:[%s20251_s0 + %s17988_s28]]   ;;  %s17992_s28 = smov 37  }
  0x41   :  { %20374 = sst [smem:[#allocation33_spill]] %s18176_s3 }
  0x42   :  { %20375 = sst [smem:[#allocation34_spill]] %s18181_s19 }
  0x43   :  { %s18206_s29 = sld [smem:[%s20251_s0 + %s17989_s7]]   ;;  %s17993_s7 = smov 38  }
  0x44   :  { %s18211_s25 = sld [smem:[%s20251_s0 + %s17990_s15]]   ;;  %s17994_s15 = smov 39  }
  0x45   :  { %20378 = sst [smem:[#allocation37_spill]] %s18196_s6 }
  0x46   :  { %20379 = sst [smem:[#allocation38_spill]] %s18201_s24 }
  0x47   :  { %s18216_s19 = sld [smem:[%s20251_s0 + %s17991_s22]]   ;;  %s17995_s22 = smov 40  }
  0x48   :  { %s18221_s14 = sld [smem:[%s20251_s0 + %s17992_s28]]   ;;  %s17996_s28 = smov 41  }
  0x49   :  { %20380 = sst [smem:[#allocation39_spill]] %s18206_s29 }
  0x4a   :  { %20381 = sst [smem:[#allocation40_spill]] %s18211_s25 }
  0x4b   :  { %s18226_s27 = sld [smem:[%s20251_s0 + %s17993_s7]]   ;;  %s17997_s7 = smov 42  }
  0x4c   :  { %s18231_s13 = sld [smem:[%s20251_s0 + %s17994_s15]]   ;;  %s17998_s15 = smov 43  }
  0x4d   :  { %20382 = sst [smem:[#allocation41_spill]] %s18216_s19 }
  0x4e   :  { %20383 = sst [smem:[#allocation42_spill]] %s18221_s14 }
  0x4f   :  { %s18236_s8 = sld [smem:[%s20251_s0 + %s17995_s22]]   ;;  %s17999_s22 = smov 44  }
  0x50   :  { %s18241_s21 = sld [smem:[%s20251_s0 + %s17996_s28]]   ;;  %s18000_s28 = smov 45  }
  0x51   :  { %20384 = sst [smem:[#allocation43_spill]] %s18226_s27 }
  0x52   :  { %20385 = sst [smem:[#allocation44_spill]] %s18231_s13 }
  0x53   :  { %s18246_s9 = sld [smem:[%s20251_s0 + %s17997_s7]]  }
  0x54   :  { %s18251_s13 = sld [smem:[%s20251_s0 + %s17998_s15]]  }
  0x55   :  { %20386 = sst [smem:[#allocation45_spill]] %s18236_s8 }
  0x56   :  { %20387 = sst [smem:[#allocation46_spill]] %s18241_s21 }
  0x57   :  { %s18256_s8 = sld [smem:[%s20251_s0 + %s17999_s22]]  }
  0x58   :  { %s18261_s4 = sld [smem:[%s20251_s0 + %s18000_s28]]  }
  0x59   :  { %20388 = sst [smem:[#allocation47_spill]] %s18246_s9 }
  0x5a   :  { %20389 = sst [smem:[#allocation48_spill]] %s18251_s13 }
  0x5d   :  { %20390 = sst [smem:[#allocation49_spill]] %s18256_s8 }
  0x5e   :  { %20391 = sst [smem:[#allocation50_spill]] %s18261_s4 }
  0x5f   :  { %96 = vsyncpa [#allocation3], 0 }
  0x60   :  { %98 = vsyncpa [#allocation3 + $0x1], 0  ;;  %s18263_s7 = smov 0   ;;  %s18265_s10 = smov 0  }
  0x61   :  { %s18267_s11 = smov 0   ;;  %s18269_s15 = smov 0  }
  0x62 LB: > { %s20392_s30 = sld [smem:[#allocation36_spill]]  ;;  %s20393_s29 = sld [smem:[#allocation39_spill]]  ;;  %s17946_s10 = sphi %s18265_s10, %s20494_s10   ;;  %s17942_s7 = sphi %s18263_s7, %s20493_s7   ;;  %s17954_s15 = sphi %s18269_s15, %s20492_s15   ;;  %s17950_s11 = sphi %s18267_s11, %s20495_s11  }
  0x63   : > { %s20394_s27 = sld [smem:[#allocation43_spill]]  ;;  %s20395_s24 = sld [smem:[#allocation38_spill]] }
  0x64   : > { %s20396_s6 = sld [smem:[#allocation37_spill]]  ;;  %s20397_s21 = sld [smem:[#allocation46_spill]] }
  0x65   : > { %s20398_s14 = sld [smem:[#allocation42_spill]]  ;;  %s20399_s13 = sld [smem:[#allocation48_spill]] }
  0x66   : > { %s20400_s9 = sld [smem:[#allocation47_spill]]  ;;  %s20401_s25 = sld [smem:[#allocation40_spill]] }
  0x67   : > { %s20402_s20 = sld [smem:[#allocation32_spill]]  ;;  %s20403_s19 = sld [smem:[#allocation41_spill]] }
  0x68   : > { %s20404_s8 = sld [smem:[#allocation49_spill]]  ;;  %20406 = sst [smem:[#allocation51_spill]] %s17942_s7 }
  0x69   : > { %s20405_s3 = sld [smem:[#allocation33_spill]]  ;;  %20407 = sst [smem:[#allocation52_spill]] %s17946_s10 }
  0x6a   : > { %20408 = sst [smem:[#allocation53_spill]] %s17950_s11  ;;  %s18284_s0 = sadd.s32 4294967295, %s17954_s15  }
  0x6b   : > { %20409 = sst [smem:[#allocation54_spill]] %s17954_s15  ;;  %s14710_s16 = sadd.s32 4294967294, %s17954_s15  }
  0x6c   : > { %20410 = sst [smem:[#allocation55_spill]] %s18284_s0  ;;  %s18288_s18 = sadd.s32 1, %s17954_s15  }
  0x6d   : > { %20411 = sst [smem:[#allocation56_spill]] %s18288_s18  ;;  %s1066_s22 = sadd.s32 1, %s17950_s11 }
  0x6e   : > { %s1063_s23 = ssub.s32 %s17954_s15, %s18288_s18  ;;  %p1076_p0 = scmp.ne.s32.totalorder %s17950_s11, %s17946_s10 }
  0x6f   : > { %p1064_p1 = scmp.eq.s32.totalorder %s1063_s23, 0  ;;  %p1077_p2 = scmp.eq.s32.totalorder %s18284_s0, 1 }
  0x70   : > { %p1082_p3 = scmp.ne.s32.totalorder %s17946_s10, %s17942_s7  ;;  %p1083_p4 = scmp.eq.s32.totalorder %s14710_s16, 1 }
  0x71   : > { %s18299_s26 = scalar_select %p1064_p1, %s17950_s11, %s1066_s22  }
  0x72   : > { %p18301_p5 = por %p1077_p2, %p1076_p0  ;;  %p18305_p6 = por %p1083_p4, %p1082_p3 }
  0x73   : > { %20412 = sst [smem:[#allocation57_spill]] %s18299_s26  ;;  %p14713_p7 = scmp.ge.s32.totalorder %s17954_s15, 1 }
  0x74   : > { %s20413_s28 = scalar_select %p18301_p5, 1, 0 }
  0x75   : > { %s20415_s1 = scalar_select %p18305_p6, 1, 0 }
  0x76   : > { %20414 = sst [smem:[#allocation58_spill]] %s20413_s28  ;;  %p1245_p8 = scmp.lt.s32.totalorder %s17954_s15, 3 }
  0x77   : > { %20416 = sst [smem:[#allocation59_spill]] %s20415_s1 }
  0x78   : > { %p1246_p9 = pnand %p14713_p7, %p1245_p8 }
  0x79   : > { %v1369_v0 = vld [vmem:[%s20402_s20] sm:$0xff] (!%p1246_p9)  ;;  %v1370_v1 = vld [vmem:[%s20402_s20 + $0x8] sm:$0xff] (!%p1246_p9)  ;;  %v1371_v2 = vld [vmem:[%s20402_s20 + $0x10] sm:$0xff] (!%p1246_p9)  ;;  %v18001_v3 = vmov (!%p1246_p9), 0.0|0.0   ;;  %vm18002_vm0 = vmmov (!%p1246_p9), 0   ;;  %s20417_s5 = sld [smem:[#allocation5_spill]] (!%p1246_p9)  ;;  %v1472_v14 = vlaneseq (!%p1246_p9) }
  0x7a   : > { %1249 = sbr.rel (%p1246_p9) target bundleno = 29855 (0x749f), region = 200  ;;  %16951 = vmatprep.subr.bf16.mxu0 (!%p1246_p9), %v18001_v3  ;;  %v16952_v4 = vpack.c.bf16 (!%p1246_p9), %v1370_v1, %v1369_v0  ;;  %v1372_v5 = vld [vmem:[%s20402_s20 + $0x18] sm:$0xff] (!%p1246_p9)  ;;  %v18003_v6 = vmov (!%p1246_p9), 0.0   ;;  %p1357_p10 = scmp.lt.s32.totalorder (!%p1246_p9), %s18284_s0, 1  ;;  %16960 = vmatprep.subr.bf16.mxu1 (!%p1246_p9), %v18001_v3  ;;  %v1373_v8 = vld [vmem:[%s20402_s20 + $0x20] sm:$0xff] (!%p1246_p9)  ;;  %v1374_v9 = vld [vmem:[%s20402_s20 + $0x28] sm:$0xff] (!%p1246_p9) }
  0x7b   : > { %15722 = vmatprep.mubr.msk.f32.mxu0 (!%p1246_p9), %vm18002_vm0, %v18003_v6  ;;  %15739 = vmatprep.mubr.msk.f32.mxu1 (!%p1246_p9), %vm18002_vm0, %v18003_v6  ;;  %v16955_v7 = vpack.c.bf16 (!%p1246_p9), %v1372_v5, %v1371_v2  ;;  %v16958_v10 = vpack.c.bf16 (!%p1246_p9), %v1374_v9, %v1373_v8  ;;  %s20418_s12 = sld [smem:[#allocation31_spill]] (!%p1246_p9)  ;;  %s20419_s17 = sld [smem:[#allocation8_spill]] (!%p1246_p9)  ;;  %vm1382_vm1 = vcmask (!%p1246_p9), 392192   ;;  %v1473_v15 = vshrl.u32 (!%p1246_p9), %v1472_v14, 7  ;;  %v1495_v21 = vld [vmem:[%s20405_s3] sm:$0xff] (!%p1246_p9)  ;;  %v1496_v24 = vld [vmem:[%s20405_s3 + $0x8] sm:$0xff] (!%p1246_p9) }
  0x7c   : > { %16953 = vmatpush3.bf16.msra.mxu0 (!%p1246_p9), %v16952_v4  ;;  %vm1503_vm3 = vcmask (!%p1246_p9), 261120   ;;  %v1497_v31 = vld [vmem:[%s20405_s3 + $0x10] sm:$0x1] (!%p1246_p9)  ;;  %vm1510_vm4 = vcmask (!%p1246_p9), 253952   ;;  %v1563_v52 = vld [vmem:[%s20404_s8] sm:$0xff] (!%p1246_p9)  ;;  %v1564_v53 = vld [vmem:[%s20404_s8 + $0x8] sm:$0xff] (!%p1246_p9) }
  0x7d   : > { %16954 = vmatprep.subr.bf16.mxu0 (!%p1246_p9), %v18001_v3  ;;  %vm1476_vm2 = vcmp.eq.s32.totalorder (!%p1246_p9), %v1473_v15, 0  ;;  %v1565_v54 = vld [vmem:[%s20404_s8 + $0x10] sm:$0xff] (!%p1246_p9)  ;;  %v16961_v55 = vpack.c.bf16 (!%p1246_p9), %v1564_v53, %v1563_v52  ;;  %v1566_v56 = vld [vmem:[%s20404_s8 + $0x18] sm:$0xff] (!%p1246_p9)  ;;  %v14722_v5 = vld [vmem:[%s20403_s19] ss:$0 sm:$0xff] (!%p1246_p9)  ;;  %s20281_s23 = smov (!%p1246_p9), 96  }
  0x7e   : > { %v16964_v57 = vpack.c.bf16 (!%p1246_p9), %v1566_v56, %v1565_v54  ;;  %v14723_v8 = vld [vmem:[%s20401_s25] ss:$0 sm:$0xff] (!%p1246_p9)  ;;  %vm1677_vm5 = vcmask (!%p1246_p9), 64512   ;;  %vm1773_vm7 = vcmask (!%p1246_p9), 138240   ;;  %vm1780_vm8 = vcmask (!%p1246_p9), 131072   ;;  %s20425_s3 = smov (!%p1246_p9), 64  }
  0x7f   : > { %16962 = vmatpush3.bf16.msra.mxu1 (!%p1246_p9), %v16961_v55  ;;  %vm18405_vm6 = vmpackc.low (!%p1246_p9), %vm1677_vm5, %vm1677_vm5  ;;  %vm1825_vm9 = vcmask (!%p1246_p9), 1040384   ;;  %vm3254_vm11 = vcmask (!%p1246_p9), 523264   ;;  %s20431_s20 = smov (!%p1246_p9), 104   ;;  %s20448_s26 = sld [smem:[#allocation17_spill]] (!%p1246_p9) }
  0x80   : > { %16956 = vmatpush3.bf16.msra.mxu0 (!%p1246_p9), %v16955_v7  ;;  %16963 = vmatprep.subr.bf16.mxu1 (!%p1246_p9), %v18001_v3  ;;  %s20449_s11 = sld [smem:[#allocation13_spill]] (!%p1246_p9)  ;;  %s20453_s1 = smov (!%p1246_p9), 116  }
  0x81   : > { %s18323_s2 = scalar_select %p1357_p10, %s18284_s0, 1  ;;  %16957 = vmatprep.subr.bf16.mxu0 %v18001_v3  ;;  %v14717_v16 = vld [vmem:[%s20418_s12] ss:$0 sm:$0xff] }
  0x82   : > { %v14721_v18 = vld [vmem:[%s20419_s17] ss:$0 sm:$0xff]  ;;  %s20428_s12 = smov 112   ;;  %s20429_s17 = smov 48  }
  0x83   : > { %s17260_s16 = smul.u32 24, %s18323_s2  ;;  %16965 = vmatpush3.bf16.msra.mxu1 %v16964_v57  ;;  %s20454_s7 = sld [smem:[#allocation15_spill]] }
  0x84   : > { %16959 = vmatpush3.bf16.msra.mxu0 %v16958_v10  ;;  %16966 = vmatprep.subr.bf16.mxu1 %v18001_v3  ;;  %s20457_s15 = smov 108   ;;  %s20458_s4 = smov 76  }
  0x85   : > { %s1361_s22 = scalar_lea.vmem %s20417_s5, %s17260_s16  ;;  %16970 = vmatprep.subr.bf16.mxu0 %v18001_v3  ;;  %s20275_s16 = smov 120  }
  0x86   : > { %v1366_v11 = vld [vmem:[%s1361_s22] sm:$0xff]  ;;  %v1367_v12 = vld [vmem:[%s1361_s22 + $0x8] sm:$0xff]  ;;  %v1368_v13 = vld [vmem:[%s1361_s22 + $0x10] sm:$0x1]  ;;  %s20279_s22 = smov 88   ;;  %s20426_s5 = smov 56  }
  0x87   : > { %15723 = vmatmul.mubr.msk.f32.vlgmr.msra.gmra.mrb[0].mxu0 %vm1382_vm1, %v1366_v11  ;;  %s20459_s0 = smov 100   ;;  %s20460_s10 = smov 68  }
  0x88   : > { %15725 = vmatprep.mubr.msk.f32.mxu0 %vm18002_vm0, %v18003_v6  ;;  %s20462_s18 = sld [smem:[#allocation27_spill]] }
  0x89   : > { %s20455_s28 = smov %s20454_s7 }
  0x8b   : > { %15726 = vmatmul.mubr.msk.f32.gmra.mrb[2].mxu0 %vm1382_vm1, %v1367_v12 }
  0x8c   : > { %15728 = vmatprep.mubr.msk.f32.mxu0 %vm18002_vm0, %v18003_v6 }
  0x8f   : > { %15729 = vmatmul.mubr.msk.f32.gmra.mrb[4].mxu0 %vm1382_vm1, %v1368_v13 }
  0x90   : > { %15769 = vmatprep.mubr.msk.f32.mxu0 %vm18002_vm0, %v18003_v6 }
 0x15a   : > { %v1458_v17 = vpop.f32.mrb[0].mxu0 }
 0x15b   : > { %v1459_v19 = vadd.f32 %v14717_v16, %v1458_v17  ;;  %v15724_v20 = vpop.f32.mrb[1].mxu0 }
 0x15d   : > { %v1492_v22 = vsel %vm1476_vm2, %v14721_v18, %v1459_v19  ;;  %vm5450_vm2 = vcmask 31744  }
 0x15e   : > { %v1463_v23 = vpop.f32.mrb[2].mxu0  ;;  %v18342_v25 = vadd.f32 %v1495_v21, %v1492_v22  ;;  %v14724_v21 = vld [vmem:[%s20393_s29] ss:$0 sm:$0xff] }
 0x15f   : > { %v1464_v26 = vadd.f32 %v14717_v16, %v1463_v23  ;;  %v15727_v27 = vpop.f32.mrb[3].mxu0 }
 0x160   : > { %v1504_v28 = vsel %vm1503_vm3, %v18342_v25, 0.0 }
 0x161   : > { %v18346_v29 = vadd.f32 %v1496_v24, %v1464_v26  ;;  %1505 = vadd.xlane.f32.xlu0 %v1504_v28 }
 0x162   : > { %v1468_v30 = vpop.f32.mrb[4].mxu0 }
 0x163   : > { %v1469_v32 = vadd.f32 %v14717_v16, %v1468_v30  ;;  %v1507_v33 = vsel %vm1503_vm3, %v18346_v29, 0.0  ;;  %v15730_v34 = vpop.f32.mrb[5].mxu0 }
 0x165   : > { %v18351_v35 = vadd.f32 %v1497_v31, %v1469_v32  ;;  %1508 = vadd.xlane.f32.xlu0 %v1507_v33 }
 0x167   : > { %v1511_v36 = vsel %vm1510_vm4, %v18351_v35, 0.0 }
 0x168   : > { %1512 = vadd.xlane.f32.xlu1 %v1511_v36 }
 0x1ee   : > { %v1506_v37 = vpop.xlane.xlu0 %1505 }
 0x1ef   : > { %v1515_v38 = vmul.f32 0.03125, %v1506_v37 }
 0x1f1   : > { %v1518_v39 = vsub.f32 %v18342_v25, %v1515_v38 }
 0x1f2   : > { %v1509_v40 = vpop.xlane.xlu0 %1508 }
 0x1f3   : > { %v1516_v41 = vmul.f32 0.03125, %v1509_v40  ;;  %v1521_v42 = vmul.f32 %v1518_v39, %v1518_v39 }
 0x1f5   : > { %v1519_v43 = vsub.f32 %v18346_v29, %v1516_v41  ;;  %v1513_v44 = vpop.xlane.xlu1 %1512  ;;  %v1524_v45 = vsel %vm1503_vm3, %v1521_v42, 0.0 }
 0x1f6   : > { %v1517_v46 = vmul.f32 0.03125, %v1513_v44  ;;  %1525 = vadd.xlane.f32.xlu1 %v1524_v45 }
 0x1f7   : > { %v1522_v47 = vmul.f32 %v1519_v43, %v1519_v43 }
 0x1f8   : > { %v1520_v48 = vsub.f32 %v18351_v35, %v1517_v46 }
 0x1f9   : > { %v1527_v49 = vsel %vm1503_vm3, %v1522_v47, 0.0 }
 0x1fa   : > { %1528 = vadd.xlane.f32.xlu0 %v1527_v49  ;;  %v1523_v50 = vmul.f32 %v1520_v48, %v1520_v48 }
 0x1fc   : > { %v1530_v51 = vsel %vm1510_vm4, %v1523_v50, 0.0 }
 0x1fd   : > { %1531 = vadd.xlane.f32.xlu1 %v1530_v51 }
 0x283   : > { %v1526_v58 = vpop.xlane.xlu1 %1525 }
 0x284   : > { %v1533_v59 = vmul.f32 0.03125, %v1526_v58 }
 0x286   : > { %v1536_v60 = vadd.f32 1e-12, %v1533_v59 }
 0x287   : > { %v1529_v61 = vpop.xlane.xlu0 %1528 }
 0x288   : > { %17601 = vrsqrt.f32 %v1536_v60  ;;  %v1534_v62 = vmul.f32 0.03125, %v1529_v61 }
 0x28a   : > { %v1537_v63 = vadd.f32 1e-12, %v1534_v62  ;;  %v1532_v0 = vpop.xlane.xlu1 %1531 }
 0x28b   : > { %v1535_v1 = vmul.f32 0.03125, %v1532_v0 }
 0x28c   : > { %17603 = vrsqrt.f32 %v1537_v63 }
 0x28d   : > { %v1538_v2 = vadd.f32 1e-12, %v1535_v1 }
 0x28f   : > { %17605 = vrsqrt.f32 %v1538_v2 }
 0x292   : > { %v17602_v4 = vpop.eup %17601 }
 0x293   : > { %v1542_v7 = vmul.f32 %v17602_v4, %v1518_v39 }
 0x295   : > { %v1551_v9 = vmul.f32 %v14722_v5, %v1542_v7 }
 0x296   : > { %v17604_v10 = vpop.eup %17603 }
 0x297   : > { %v1560_v11 = vadd.f32 %v14723_v8, %v1551_v9  ;;  %v1543_v12 = vmul.f32 %v17604_v10, %v1519_v43 }
 0x299   : > { %v17606_v13 = vpop.eup %17605  ;;  %15740 = vmatmul.mubr.msk.f32.vlgmr.msra.gmra.mrb[0].mxu1 %vm1503_vm3, %v1560_v11  ;;  %v1552_v14 = vmul.f32 %v14722_v5, %v1543_v12 }
 0x29a   : > { %15742 = vmatprep.mubr.msk.f32.mxu1 %vm18002_vm0, %v18003_v6  ;;  %v1544_v15 = vmul.f32 %v17606_v13, %v1520_v48 }
 0x29b   : > { %v1561_v16 = vadd.f32 %v14723_v8, %v1552_v14 }
 0x29c   : > { %v1553_v17 = vmul.f32 %v14722_v5, %v1544_v15 }
 0x29d   : > { %15743 = vmatmul.mubr.msk.f32.gmra.mrb[2].mxu1 %vm1503_vm3, %v1561_v16 }
 0x29e   : > { %15745 = vmatprep.mubr.msk.f32.mxu1 %vm18002_vm0, %v18003_v6  ;;  %v1562_v18 = vadd.f32 %v14723_v8, %v1553_v17 }
 0x2a1   : > { %15746 = vmatmul.mubr.msk.f32.gmra.mrb[4].mxu1 %vm1503_vm3, %v1562_v18 }
 0x2a2   : > { %15754 = vmatprep.mubr.msk.f32.mxu1 %vm18002_vm0, %v18003_v6 }
 0x36c   : > { %v1654_v19 = vpop.f32.mrb[0].mxu1 }
 0x36d   : > { %v15741_v20 = vpop.f32.mrb[1].mxu1  ;;  %v18379_v23 = vadd.f32 %v14724_v21, %v1654_v19 }
 0x370   : > { %v1659_v22 = vpop.f32.mrb[2].mxu1 }
 0x371   : > { %v18381_v24 = vadd.f32 %v14724_v21, %v1659_v22  ;;  %v15744_v26 = vpop.f32.mrb[3].mxu1 }
 0x373   : > { %v18385_v27 = vpack.i.bf16 %v18381_v24, %v18379_v23 }
 0x374   : > { %v1664_v28 = vpop.f32.mrb[4].mxu1 }
 0x375   : > { %v18387_v30 = vadd.f32 %v14724_v21, %v1664_v28  ;;  %17372 = vrot.lane.b32.xlu0 %v18385_v27, %s20281_s23  ;;  %v15747_v31 = vpop.f32.mrb[5].mxu1 }
 0x377   : > { %1675 = vrot.lane.b32.xlu1 %v18387_v30, %s20281_s23  ;;  %s20283_s23 = smov 112  }
 0x379   : > { %1908 = vrot.lane.b32.xlu0 %v18379_v23, %s20275_s16 }
 0x37b   : > { %17377 = vrot.lane.b32.xlu1 %v18385_v27, %s20279_s22 }
 0x37d   : > { %1912 = vrot.lane.b32.xlu0 %v18387_v30, %s20275_s16 }
 0x37f   : > { %1918 = vrot.lane.b32.xlu1 %v18387_v30, %s20279_s22  ;;  %s20285_s22 = smov 80  }
 0x383   : > { %1910 = vrot.lane.b32.xlu1 %v18381_v24, %s20275_s16  ;;  %s20277_s16 = smov 64  }
 0x3e7   : > { %v17373_v32 = vpop.permute.xlu0 %17372 }
 0x3e8   : > { %v17375_v33 = vunpack.i.h.bf16 %v17373_v32  ;;  %v17374_v34 = vunpack.i.l.bf16 %v17373_v32 }
 0x3e9   : > { %v1676_v36 = vpop.permute.xlu1 %1675 }
 0x3ea   : > { %v16967_v38 = vpack.c.bf16 %v17375_v33, %v17374_v34 }
 0x3eb   : > { %v1909_v44 = vpop.permute.xlu0 %1908 }
 0x3ec   : > { %16969 = vmatpush3.bf16.xpose.msk.msra.mxu1 %vm18405_vm6, %v16967_v38 }
 0x3ed   : > { %15752 = vmatprep.subr.mxu1 %v18003_v6  ;;  %v17378_v39 = vpop.permute.xlu1 %17377 }
 0x3ee   : > { %v17380_v40 = vunpack.i.h.bf16 %v17378_v39  ;;  %v17379_v41 = vunpack.i.l.bf16 %v17378_v39 }
 0x3ef   : > { %v1913_v46 = vpop.permute.xlu0 %1912 }
 0x3f0   : > { %v16974_v42 = vpack.c.bf16 %v17380_v40, %v17379_v41 }
 0x3f1   : > { %v1919_v43 = vpop.permute.xlu1 %1918 }
 0x3f4   : > { %15753 = vmatpush3.xpose.msk.msra.mxu1 %vm1677_vm5, %v1676_v36 }
 0x3f5   : > { %16973 = vmatprep.subr.bf16.mxu1 %v18001_v3  ;;  %v1911_v45 = vpop.permute.xlu1 %1910 }
 0x3f7   : > { %15755 = vmatmul.mubr.msk.f32.vlgmr.msra.gmra.mrb[6].mxu1 %vm1677_vm5, %v18379_v23 }
 0x3f8   : > { %16976 = vmatpush3.bf16.xpose.msk.msra.mxu1 %vm18405_vm6, %v16974_v42  ;;  %15757 = vmatprep.mubr.msk.f32.mxu1 %vm18002_vm0, %v18003_v6 }
 0x3f9   : > { %15782 = vmatprep.subr.mxu1 %v18003_v6 }
 0x3fb   : > { %15758 = vmatmul.mubr.msk.f32.gmra.mrb[8].mxu1 %vm1677_vm5, %v18381_v24 }
 0x3fc   : > { %15760 = vmatprep.mubr.msk.f32.mxu1 %vm18002_vm0, %v18003_v6 }
 0x3ff   : > { %15761 = vmatmul.mubr.msk.f32.gmra.mrb[10].mxu1 %vm1677_vm5, %v18387_v30 }
 0x400   : > { %15783 = vmatpush3.xpose.msk.msra.mxu1 %vm1677_vm5, %v1919_v43  ;;  %15784 = vmatprep.mubr.msk.f32.mxu1 %vm18002_vm0, %v18003_v6 }
 0x401   : > { %15808 = vmatprep.subr.mxu1 %v18003_v6 }
 0x403   : > { %15785 = vmatmul.mubr.msk.f32.vlgmr.msra.gmra.mrb[12].mxu1 %vm1677_vm5, %v1909_v44 }
 0x404   : > { %15787 = vmatprep.mubr.msk.f32.mxu1 %vm18002_vm0, %v18003_v6 }
 0x407   : > { %15788 = vmatmul.mubr.msk.f32.gmra.mrb[14].mxu1 %vm1677_vm5, %v1911_v45 }
 0x408   : > { %15790 = vmatprep.mubr.msk.f32.mxu1 %vm18002_vm0, %v18003_v6 }
 0x40b   : > { %15791 = vmatmul.mubr.msk.f32.gmra.mrb[16].mxu1 %vm1677_vm5, %v1913_v46 }
 0x40c   : > { %15810 = vmatprep.mubr.msk.f32.mxu1 %vm18002_vm0, %v18003_v6 }
 0x4ca   : > { %v1756_v47 = vpop.f32.mrb[6].mxu1 }
 0x4cb   : > { %v1770_v48 = vmul.f32 0.35355338, %v1756_v47  ;;  %v15756_v49 = vpop.f32.mrb[7].mxu1 }
 0x4cd   : > { %v1774_v50 = vsel %vm1773_vm7, %v1770_v48, -inf }
 0x4ce   : > { %1775 = vmax.xlane.f32.xlu1 %v1774_v50  ;;  %v1761_v51 = vpop.f32.mrb[8].mxu1 }
 0x4cf   : > { %v1771_v52 = vmul.f32 0.35355338, %v1761_v51  ;;  %v15759_v53 = vpop.f32.mrb[9].mxu1 }
 0x4d1   : > { %v1777_v54 = vsel %vm1773_vm7, %v1771_v52, -inf }
 0x4d2   : > { %1778 = vmax.xlane.f32.xlu0 %v1777_v54  ;;  %v1766_v55 = vpop.f32.mrb[10].mxu1 }
 0x4d3   : > { %v1772_v56 = vmul.f32 0.35355338, %v1766_v55  ;;  %v15762_v57 = vpop.f32.mrb[11].mxu1 }
 0x4d5   : > { %v1781_v58 = vsel %vm1780_vm8, %v1772_v56, -inf }
 0x4d6   : > { %1782 = vmax.xlane.f32.xlu0 %v1781_v58  ;;  %v1998_v59 = vpop.f32.mrb[12].mxu1 }
 0x4d7   : > { %v2012_v60 = vmul.f32 0.35355338, %v1998_v59  ;;  %v15786_v61 = vpop.f32.mrb[13].mxu1 }
 0x4d9   : > { %v2015_v62 = vsel %vm1773_vm7, %v2012_v60, -inf }
 0x4da   : > { %2016 = vmax.xlane.f32.xlu0 %v2015_v62  ;;  %v2003_v63 = vpop.f32.mrb[14].mxu1 }
 0x4db   : > { %v2013_v0 = vmul.f32 0.35355338, %v2003_v63  ;;  %v15789_v1 = vpop.f32.mrb[15].mxu1 }
 0x4dd   : > { %v2018_v2 = vsel %vm1773_vm7, %v2013_v0, -inf }
 0x4de   : > { %2019 = vmax.xlane.f32.xlu1 %v2018_v2  ;;  %v2008_v4 = vpop.f32.mrb[16].mxu1 }
 0x4df   : > { %v2014_v5 = vmul.f32 0.35355338, %v2008_v4  ;;  %v15792_v7 = vpop.f32.mrb[17].mxu1 }
 0x4e1   : > { %v2021_v8 = vsel %vm1780_vm8, %v2014_v5, -inf }
 0x4e2   : > { %2022 = vmax.xlane.f32.xlu0 %v2021_v8 }
 0x4ef   : > { %1812 = vrot.lane.b32.xlu1 %v18387_v30, %s20277_s16 }
 0x4f8   : > { %17382 = vrot.lane.b32.xlu0 %v18385_v27, %s20277_s16  ;;  %s20295_s16 = smov 56  }
 0x55b   : > { %v1776_v9 = vpop.xlane.xlu1 %1775 }
 0x55c   : > { %v1784_v10 = vsub.f32 %v1770_v48, %v1776_v9 }
 0x55e   : > { %v1787_v11 = vmul.f32 1.442695, %v1784_v10 }
 0x55f   : > { %v1779_v12 = vpop.xlane.xlu0 %1778 }
 0x560   : > { %17607 = vpow2.f32 %v1787_v11  ;;  %v1785_v13 = vsub.f32 %v1771_v52, %v1779_v12 }
 0x562   : > { %v1789_v14 = vmul.f32 1.442695, %v1785_v13  ;;  %v1568_v13 = vld [vmem:[%s20399_s13] sm:$0xff] }
 0x563   : > { %v1783_v15 = vpop.xlane.xlu0 %1782 }
 0x564   : > { %17609 = vpow2.f32 %v1789_v14  ;;  %v1786_v16 = vsub.f32 %v1772_v56, %v1783_v15  ;;  %v1569_v14 = vld [vmem:[%s20399_s13 + $0x8] sm:$0xff] }
 0x565   : > { %15809 = vmatpush3.msra.mxu1 %v1569_v14 }
 0x566   : > { %v1791_v17 = vmul.f32 1.442695, %v1786_v16  ;;  %16980 = vmatprep.subr.bf16.mxu1 %v18001_v3 }
 0x567   : > { %v2017_v18 = vpop.xlane.xlu0 %2016 }
 0x568   : > { %17611 = vpow2.f32 %v1791_v17  ;;  %v2024_v19 = vsub.f32 %v2012_v60, %v2017_v18 }
 0x56a   : > { %v17608_v20 = vpop.eup %17607  ;;  %v2027_v21 = vmul.f32 1.442695, %v2024_v19 }
 0x56b   : > { %v2020_v22 = vpop.xlane.xlu1 %2019  ;;  %v1793_v26 = vsel %vm1773_vm7, %v17608_v20, 0.0 }
 0x56c   : > { %17613 = vpow2.f32 %v2027_v21  ;;  %v2025_v28 = vsub.f32 %v2013_v0, %v2020_v22  ;;  %1794 = vadd.xlane.f32.xlu1 %v1793_v26 }
 0x56e   : > { %v17610_v31 = vpop.eup %17609  ;;  %v2029_v32 = vmul.f32 1.442695, %v2025_v28 }
 0x56f   : > { %v2023_v33 = vpop.xlane.xlu0 %2022  ;;  %v1796_v34 = vsel %vm1773_vm7, %v17610_v31, 0.0  ;;  %v1813_v48 = vpop.permute.xlu1 %1812 }
 0x570   : > { %17615 = vpow2.f32 %v2029_v32  ;;  %v2026_v36 = vsub.f32 %v2014_v5, %v2023_v33  ;;  %1797 = vadd.xlane.f32.xlu0 %v1796_v34 }
 0x572   : > { %v17612_v38 = vpop.eup %17611  ;;  %v2031_v39 = vmul.f32 1.442695, %v2026_v36 }
 0x573   : > { %v17383_v40 = vpop.permute.xlu0 %17382  ;;  %v1799_v41 = vsel %vm1780_vm8, %v17612_v38, 0.0 }
 0x574   : > { %17617 = vpow2.f32 %v2031_v39  ;;  %v17385_v42 = vunpack.i.h.bf16 %v17383_v40  ;;  %v17384_v43 = vunpack.i.l.bf16 %v17383_v40  ;;  %1800 = vadd.xlane.f32.xlu1 %v1799_v41 }
 0x576   : > { %v17614_v44 = vpop.eup %17613  ;;  %v16971_v45 = vpack.c.bf16 %v17385_v42, %v17384_v43 }
 0x577   : > { %v2033_v46 = vsel %vm1773_vm7, %v17614_v44, 0.0 }
 0x578   : > { %2034 = vadd.xlane.f32.xlu0 %v2033_v46  ;;  %16972 = vmatpush3.bf16.msra.mxu0 %v16971_v45 }
 0x579   : > { %15767 = vmatprep.subr.mxu0 %v18003_v6 }
 0x57a   : > { %v17616_v47 = vpop.eup %17615 }
 0x57b   : > { %v2036_v49 = vsel %vm1773_vm7, %v17616_v47, 0.0 }
 0x57c   : > { %2037 = vadd.xlane.f32.xlu1 %v2036_v49  ;;  %15768 = vmatpush3.msk.msra.mxu0 %vm1825_vm9, %v1813_v48 }
 0x57d   : > { %16977 = vmatprep.subr.bf16.mxu0 %v18001_v3 }
 0x57e   : > { %v17618_v50 = vpop.eup %17617 }
 0x57f   : > { %v2039_v51 = vsel %vm1780_vm8, %v17618_v50, 0.0 }
 0x580   : > { %2040 = vadd.xlane.f32.xlu1 %v2039_v51 }
 0x58e   : > { %2052 = vrot.lane.b32.xlu0 %v18387_v30, %s20295_s16 }
 0x591   : > { %17387 = vrot.lane.b32.xlu1 %v18385_v27, %s20295_s16  ;;  %s20424_s16 = smov 120  }
 0x592   : > { %2335 = vrot.lane.b32.xlu0 %v18387_v30, %s20285_s22 }
 0x595   : > { %17392 = vrot.lane.b32.xlu1 %v18385_v27, %s20285_s22  ;;  %s20287_s22 = smov 72  }
 0x596   : > { %2327 = vrot.lane.b32.xlu0 %v18381_v24, %s20283_s23 }
 0x599   : > { %2325 = vrot.lane.b32.xlu1 %v18379_v23, %s20283_s23 }
 0x59d   : > { %2329 = vrot.lane.b32.xlu1 %v18387_v30, %s20283_s23  ;;  %s20293_s23 = smov 48  }
 0x5f9   : > { %v1795_v52 = vpop.xlane.xlu1 %1794 }
 0x5fa   : > { %17619 = vrcp.f32 %v1795_v52 }
 0x5fd   : > { %v1798_v53 = vpop.xlane.xlu0 %1797 }
 0x5fe   : > { %17621 = vrcp.f32 %v1798_v53 }
 0x601   : > { %v1801_v54 = vpop.xlane.xlu1 %1800 }
 0x602   : > { %17623 = vrcp.f32 %v1801_v54 }
 0x604   : > { %v17620_v55 = vpop.eup %17619 }
 0x605   : > { %v1805_v56 = vmul.f32 %v17620_v55, %v17608_v20  ;;  %v2035_v58 = vpop.xlane.xlu0 %2034 }
 0x606   : > { %17625 = vrcp.f32 %v2035_v58 }
 0x607   : > { %15770 = vmatmul.mubr.msk.f32.vlgmr.msra.gmra.mrb[6].mxu0 %vm1773_vm7, %v1805_v56 }
 0x608   : > { %v17622_v57 = vpop.eup %17621  ;;  %15772 = vmatprep.mubr.msk.f32.mxu0 %vm18002_vm0, %v18003_v6 }
 0x609   : > { %v2038_v59 = vpop.xlane.xlu1 %2037  ;;  %v1806_v60 = vmul.f32 %v17622_v57, %v17610_v31  ;;  %v2053_v8 = vpop.permute.xlu0 %2052 }
 0x60a   : > { %17627 = vrcp.f32 %v2038_v59 }
 0x60b   : > { %15773 = vmatmul.mubr.msk.f32.gmra.mrb[8].mxu0 %vm1773_vm7, %v1806_v60 }
 0x60c   : > { %v17624_v61 = vpop.eup %17623  ;;  %15775 = vmatprep.mubr.msk.f32.mxu0 %vm18002_vm0, %v18003_v6 }
 0x60d   : > { %v2041_v62 = vpop.xlane.xlu1 %2040  ;;  %v1807_v63 = vmul.f32 %v17624_v61, %v17612_v38  ;;  %v2336_v38 = vpop.permute.xlu0 %2335 }
 0x60e   : > { %17629 = vrcp.f32 %v2041_v62 }
 0x60f   : > { %15776 = vmatmul.mubr.msk.f32.gmra.mrb[10].mxu0 %vm1773_vm7, %v1807_v63 }
 0x610   : > { %15799 = vmatprep.mubr.msk.f32.mxu0 %vm18002_vm0, %v18003_v6  ;;  %v17626_v5 = vpop.eup %17625 }
 0x611   : > { %v17388_v0 = vpop.permute.xlu1 %17387  ;;  %v2045_v7 = vmul.f32 %v17626_v5, %v17614_v44  ;;  %v2328_v41 = vpop.permute.xlu0 %2327 }
 0x612   : > { %v17390_v1 = vunpack.i.h.bf16 %v17388_v0  ;;  %v17389_v2 = vunpack.i.l.bf16 %v17388_v0 }
 0x614   : > { %v16978_v4 = vpack.c.bf16 %v17390_v1, %v17389_v2  ;;  %v17628_v9 = vpop.eup %17627 }
 0x615   : > { %v2046_v10 = vmul.f32 %v17628_v9, %v17616_v47  ;;  %v17393_v21 = vpop.permute.xlu1 %17392 }
 0x616   : > { %16979 = vmatpush3.bf16.msra.mxu0 %v16978_v4  ;;  %v17395_v22 = vunpack.i.h.bf16 %v17393_v21  ;;  %v17394_v26 = vunpack.i.l.bf16 %v17393_v21 }
 0x617   : > { %15797 = vmatprep.subr.mxu0 %v18003_v6 }
 0x618   : > { %v17630_v11 = vpop.eup %17629  ;;  %v16981_v28 = vpack.c.bf16 %v17395_v22, %v17394_v26 }
 0x619   : > { %v2047_v12 = vmul.f32 %v17630_v11, %v17618_v50  ;;  %v2326_v40 = vpop.permute.xlu1 %2325 }
 0x61a   : > { %15798 = vmatpush3.msk.msra.mxu0 %vm1825_vm9, %v2053_v8 }
 0x61b   : > { %15800 = vmatmul.mubr.msk.f32.vlgmr.msra.gmra.mrb[12].mxu0 %vm1773_vm7, %v2045_v7  ;;  %15819 = vmatprep.subr.mxu0 %v18003_v6 }
 0x61c   : > { %15802 = vmatprep.mubr.msk.f32.mxu0 %vm18002_vm0, %v18003_v6  ;;  %15820 = vmatpush3.msra.mxu0 %v1568_v13 }
 0x61d   : > { %16984 = vmatprep.subr.bf16.mxu0 %v18001_v3  ;;  %v2330_v42 = vpop.permute.xlu1 %2329 }
 0x61f   : > { %15803 = vmatmul.mubr.msk.f32.gmra.mrb[14].mxu0 %vm1773_vm7, %v2046_v10 }
 0x620   : > { %15805 = vmatprep.mubr.msk.f32.mxu0 %vm18002_vm0, %v18003_v6 }
 0x623   : > { %15806 = vmatmul.mubr.msk.f32.gmra.mrb[16].mxu0 %vm1773_vm7, %v2047_v12 }
 0x624   : > { %15821 = vmatprep.mubr.msk.f32.mxu0 %vm18002_vm0, %v18003_v6 }
 0x6da   : > { %v1894_v15 = vpop.f32.mrb[6].mxu0 }
 0x6db   : > { %v15771_v16 = vpop.f32.mrb[7].mxu0  ;;  %15822 = vmatmul.mubr.msk.f32.vlgmr.msra.gmra.mrb[18].mxu0 %vm1677_vm5, %v1894_v15 }
 0x6dc   : > { %15824 = vmatprep.mubr.msk.f32.mxu0 %vm18002_vm0, %v18003_v6 }
 0x6de   : > { %v1899_v17 = vpop.f32.mrb[8].mxu0 }
 0x6df   : > { %v15774_v18 = vpop.f32.mrb[9].mxu0  ;;  %15825 = vmatmul.mubr.msk.f32.gmra.mrb[20].mxu0 %vm1677_vm5, %v1899_v17 }
 0x6e0   : > { %15827 = vmatprep.mubr.msk.f32.mxu0 %vm18002_vm0, %v18003_v6 }
 0x6e2   : > { %v1904_v19 = vpop.f32.mrb[10].mxu0 }
 0x6e3   : > { %v15777_v20 = vpop.f32.mrb[11].mxu0  ;;  %15828 = vmatmul.mubr.msk.f32.gmra.mrb[22].mxu0 %vm1677_vm5, %v1904_v19 }
 0x6e4   : > { %15851 = vmatprep.mubr.msk.f32.mxu0 %vm18002_vm0, %v18003_v6 }
 0x6ee   : > { %v2133_v31 = vpop.f32.mrb[12].mxu0 }
 0x6ef   : > { %v15801_v32 = vpop.f32.mrb[13].mxu0  ;;  %15811 = vmatmul.mubr.msk.f32.vlgmr.msra.gmra.mrb[18].mxu1 %vm1677_vm5, %v2133_v31 }
 0x6f0   : > { %16983 = vmatpush3.bf16.xpose.msk.msra.mxu1 %vm18405_vm6, %v16981_v28  ;;  %15813 = vmatprep.mubr.msk.f32.mxu1 %vm18002_vm0, %v18003_v6 }
 0x6f1   : > { %15834 = vmatprep.subr.mxu1 %v18003_v6 }
 0x6f2   : > { %v2138_v33 = vpop.f32.mrb[14].mxu0 }
 0x6f3   : > { %v15804_v34 = vpop.f32.mrb[15].mxu0  ;;  %15814 = vmatmul.mubr.msk.f32.gmra.mrb[20].mxu1 %vm1677_vm5, %v2138_v33 }
 0x6f4   : > { %15816 = vmatprep.mubr.msk.f32.mxu1 %vm18002_vm0, %v18003_v6 }
 0x6f6   : > { %v2143_v36 = vpop.f32.mrb[16].mxu0 }
 0x6f7   : > { %v15807_v39 = vpop.f32.mrb[17].mxu0  ;;  %15817 = vmatmul.mubr.msk.f32.gmra.mrb[22].mxu1 %vm1677_vm5, %v2143_v36 }
 0x6f8   : > { %15835 = vmatpush3.xpose.msk.msra.mxu1 %vm1677_vm5, %v2336_v38  ;;  %15836 = vmatprep.mubr.msk.f32.mxu1 %vm18002_vm0, %v18003_v6 }
 0x6f9   : > { %15860 = vmatprep.subr.mxu1 %v18003_v6 }
 0x6fb   : > { %15837 = vmatmul.mubr.msk.f32.vlgmr.msra.gmra.mrb[24].mxu1 %vm1677_vm5, %v2326_v40 }
 0x6fc   : > { %15839 = vmatprep.mubr.msk.f32.mxu1 %vm18002_vm0, %v18003_v6 }
 0x6ff   : > { %15840 = vmatmul.mubr.msk.f32.gmra.mrb[26].mxu1 %vm1677_vm5, %v2328_v41 }
 0x700   : > { %15842 = vmatprep.mubr.msk.f32.mxu1 %vm18002_vm0, %v18003_v6 }
 0x703   : > { %15843 = vmatmul.mubr.msk.f32.gmra.mrb[28].mxu1 %vm1677_vm5, %v2330_v42 }
 0x704   : > { %15862 = vmatprep.mubr.msk.f32.mxu1 %vm18002_vm0, %v18003_v6 }
 0x7ae   : > { %v2311_v43 = vpop.f32.mrb[18].mxu0 }
 0x7af   : > { %v15823_v44 = vpop.f32.mrb[19].mxu0 }
 0x7b2   : > { %v2316_v45 = vpop.f32.mrb[20].mxu0 }
 0x7b3   : > { %v15826_v46 = vpop.f32.mrb[21].mxu0 }
 0x7b6   : > { %v2321_v47 = vpop.f32.mrb[22].mxu0 }
 0x7b7   : > { %v15829_v48 = vpop.f32.mrb[23].mxu0 }
 0x7c2   : > { %v2222_v49 = vpop.f32.mrb[18].mxu1 }
 0x7c3   : > { %v18530_v50 = vadd.f32 %v2311_v43, %v2222_v49  ;;  %v15812_v51 = vpop.f32.mrb[19].mxu1 }
 0x7c6   : > { %v2227_v52 = vpop.f32.mrb[20].mxu1 }
 0x7c7   : > { %v18532_v53 = vadd.f32 %v2316_v45, %v2227_v52  ;;  %v15815_v54 = vpop.f32.mrb[21].mxu1  ;;  %v1570_v52 = vld [vmem:[%s20399_s13 + $0x10] sm:$0xff] }
 0x7c8   : > { %15861 = vmatpush3.msra.mxu1 %v1570_v52 }
 0x7c9   : > { %16991 = vmatprep.subr.bf16.mxu1 %v18001_v3 }
 0x7ca   : > { %v2232_v55 = vpop.f32.mrb[22].mxu1 }
 0x7cb   : > { %v18534_v56 = vadd.f32 %v2321_v47, %v2232_v55  ;;  %v15818_v57 = vpop.f32.mrb[23].mxu1 }
 0x7ce   : > { %v2415_v58 = vpop.f32.mrb[24].mxu1 }
 0x7cf   : > { %v2429_v59 = vmul.f32 0.35355338, %v2415_v58  ;;  %v15838_v60 = vpop.f32.mrb[25].mxu1 }
 0x7d1   : > { %v2432_v61 = vsel %vm1773_vm7, %v2429_v59, -inf }
 0x7d2   : > { %2433 = vmax.xlane.f32.xlu0 %v2432_v61  ;;  %v2420_v62 = vpop.f32.mrb[26].mxu1 }
 0x7d3   : > { %v2430_v63 = vmul.f32 0.35355338, %v2420_v62  ;;  %v15841_v0 = vpop.f32.mrb[27].mxu1 }
 0x7d5   : > { %v2435_v1 = vsel %vm1773_vm7, %v2430_v63, -inf }
 0x7d6   : > { %2436 = vmax.xlane.f32.xlu1 %v2435_v1  ;;  %v2425_v2 = vpop.f32.mrb[28].mxu1 }
 0x7d7   : > { %v2431_v4 = vmul.f32 0.35355338, %v2425_v2  ;;  %v15844_v5 = vpop.f32.mrb[29].mxu1 }
 0x7d9   : > { %v2438_v7 = vsel %vm1780_vm8, %v2431_v4, -inf }
 0x7da   : > { %2439 = vmax.xlane.f32.xlu0 %v2438_v7 }
 0x7e7   : > { %2469 = vrot.lane.b32.xlu1 %v18387_v30, %s20293_s23 }
 0x7eb   : > { %17402 = vrot.lane.b32.xlu1 %v18385_v27, %s20287_s22 }
 0x7ef   : > { %2666 = vrot.lane.b32.xlu1 %v18387_v30, %s20287_s22  ;;  %s20289_s22 = smov 104  }
 0x85f   : > { %v2434_v8 = vpop.xlane.xlu0 %2433 }
 0x860   : > { %v2441_v9 = vsub.f32 %v2429_v59, %v2434_v8 }
 0x862   : > { %v2444_v10 = vmul.f32 1.442695, %v2441_v9 }
 0x863   : > { %v2437_v11 = vpop.xlane.xlu1 %2436 }
 0x864   : > { %17631 = vpow2.f32 %v2444_v10  ;;  %v2442_v12 = vsub.f32 %v2430_v63, %v2437_v11 }
 0x866   : > { %v2446_v13 = vmul.f32 1.442695, %v2442_v12 }
 0x867   : > { %v2440_v14 = vpop.xlane.xlu0 %2439  ;;  %v2470_v26 = vpop.permute.xlu1 %2469 }
 0x868   : > { %17633 = vpow2.f32 %v2446_v13  ;;  %v2443_v15 = vsub.f32 %v2431_v4, %v2440_v14 }
 0x86a   : > { %v2448_v16 = vmul.f32 1.442695, %v2443_v15 }
 0x86b   : > { %v17403_v28 = vpop.permute.xlu1 %17402 }
 0x86c   : > { %17635 = vpow2.f32 %v2448_v16  ;;  %v17405_v42 = vunpack.i.h.bf16 %v17403_v28  ;;  %v17404_v43 = vunpack.i.l.bf16 %v17403_v28 }
 0x86e   : > { %v17632_v17 = vpop.eup %17631  ;;  %v16988_v46 = vpack.c.bf16 %v17405_v42, %v17404_v43 }
 0x86f   : > { %v2450_v18 = vsel %vm1773_vm7, %v17632_v17, 0.0  ;;  %v2667_v32 = vpop.permute.xlu1 %2666 }
 0x870   : > { %2451 = vadd.xlane.f32.xlu0 %v2450_v18 }
 0x872   : > { %v17634_v19 = vpop.eup %17633 }
 0x873   : > { %v2453_v20 = vsel %vm1773_vm7, %v17634_v19, 0.0 }
 0x874   : > { %2454 = vadd.xlane.f32.xlu0 %v2453_v20 }
 0x876   : > { %v17636_v21 = vpop.eup %17635 }
 0x877   : > { %v2456_v22 = vsel %vm1780_vm8, %v17636_v21, 0.0 }
 0x878   : > { %2457 = vadd.xlane.f32.xlu1 %v2456_v22 }
 0x889   : > { %2658 = vrot.lane.b32.xlu1 %v18381_v24, %s20289_s22 }
 0x88a   : > { %17397 = vrot.lane.b32.xlu0 %v18385_v27, %s20293_s23  ;;  %s20423_s23 = smov 88  }
 0x88e   : > { %2656 = vrot.lane.b32.xlu0 %v18379_v23, %s20289_s22 }
 0x892   : > { %2660 = vrot.lane.b32.xlu0 %v18387_v30, %s20289_s22  ;;  %s20291_s22 = smov 40  }
 0x8fd   : > { %v2452_v31 = vpop.xlane.xlu0 %2451 }
 0x8fe   : > { %17637 = vrcp.f32 %v2452_v31 }
 0x901   : > { %v2455_v33 = vpop.xlane.xlu0 %2454 }
 0x902   : > { %17639 = vrcp.f32 %v2455_v33 }
 0x905   : > { %v2458_v34 = vpop.xlane.xlu1 %2457  ;;  %v17398_v36 = vpop.permute.xlu0 %17397 }
 0x906   : > { %v17400_v38 = vunpack.i.h.bf16 %v17398_v36  ;;  %v17399_v24 = vunpack.i.l.bf16 %v17398_v36  ;;  %17641 = vrcp.f32 %v2458_v34 }
 0x908   : > { %v16985_v39 = vpack.c.bf16 %v17400_v38, %v17399_v24  ;;  %v17638_v40 = vpop.eup %17637 }
 0x909   : > { %v2462_v23 = vmul.f32 %v17638_v40, %v17632_v17  ;;  %v2657_v48 = vpop.permute.xlu0 %2656  ;;  %v2659_v49 = vpop.permute.xlu1 %2658 }
 0x90a   : > { %16986 = vmatpush3.bf16.msra.mxu0 %v16985_v39  ;;  %v1571_v39 = vld [vmem:[%s20399_s13 + $0x18] sm:$0xff] }
 0x90b   : > { %15849 = vmatprep.subr.mxu0 %v18003_v6 }
 0x90c   : > { %v17640_v41 = vpop.eup %17639 }
 0x90d   : > { %v2463_v44 = vmul.f32 %v17640_v41, %v17634_v19  ;;  %v2661_v51 = vpop.permute.xlu0 %2660 }
 0x90e   : > { %15850 = vmatpush3.msk.msra.mxu0 %vm1825_vm9, %v2470_v26 }
 0x90f   : > { %15852 = vmatmul.mubr.msk.f32.vlgmr.msra.gmra.mrb[24].mxu0 %vm1773_vm7, %v2462_v23  ;;  %16987 = vmatprep.subr.bf16.mxu0 %v18001_v3 }
 0x910   : > { %15854 = vmatprep.mubr.msk.f32.mxu0 %vm18002_vm0, %v18003_v6  ;;  %v17642_v45 = vpop.eup %17641 }
 0x911   : > { %v2464_v47 = vmul.f32 %v17642_v45, %v17636_v21 }
 0x913   : > { %15855 = vmatmul.mubr.msk.f32.gmra.mrb[26].mxu0 %vm1773_vm7, %v2463_v44 }
 0x914   : > { %15857 = vmatprep.mubr.msk.f32.mxu0 %vm18002_vm0, %v18003_v6 }
 0x915   : > { %16990 = vmatpush3.bf16.xpose.msk.msra.mxu0 %vm18405_vm6, %v16988_v46 }
 0x916   : > { %15875 = vmatprep.subr.mxu0 %v18003_v6 }
 0x917   : > { %15858 = vmatmul.mubr.msk.f32.gmra.mrb[28].mxu0 %vm1773_vm7, %v2464_v47 }
 0x918   : > { %15877 = vmatprep.mubr.msk.f32.mxu0 %vm18002_vm0, %v18003_v6 }
 0x91d   : > { %15876 = vmatpush3.xpose.msk.msra.mxu0 %vm1677_vm5, %v2667_v32 }
 0x91e   : > { %15901 = vmatprep.subr.mxu0 %v18003_v6 }
 0x920   : > { %15878 = vmatmul.mubr.msk.f32.vlgmr.msra.gmra.mrb[30].mxu0 %vm1677_vm5, %v2657_v48 }
 0x921   : > { %15880 = vmatprep.mubr.msk.f32.mxu0 %vm18002_vm0, %v18003_v6  ;;  %15902 = vmatpush3.msra.mxu0 %v1571_v39  ;;  %v3060_v39 = vld [vmem:[%s20397_s21 + $0x10] sm:$0xff] }
 0x922   : > { %17000 = vmatprep.subr.bf16.mxu0 %v18001_v3 }
 0x924   : > { %15881 = vmatmul.mubr.msk.f32.gmra.mrb[32].mxu0 %vm1677_vm5, %v2659_v49 }
 0x925   : > { %15883 = vmatprep.mubr.msk.f32.mxu0 %vm18002_vm0, %v18003_v6 }
 0x928   : > { %15884 = vmatmul.mubr.msk.f32.gmra.mrb[34].mxu0 %vm1677_vm5, %v2661_v51 }
 0x929   : > { %15903 = vmatprep.mubr.msk.f32.mxu0 %vm18002_vm0, %v18003_v6 }
 0x9e2   : > { %v2550_v54 = vpop.f32.mrb[24].mxu0 }
 0x9e3   : > { %v15853_v55 = vpop.f32.mrb[25].mxu0  ;;  %15863 = vmatmul.mubr.msk.f32.vlgmr.msra.gmra.mrb[30].mxu1 %vm1677_vm5, %v2550_v54 }
 0x9e4   : > { %15865 = vmatprep.mubr.msk.f32.mxu1 %vm18002_vm0, %v18003_v6 }
 0x9e6   : > { %v2555_v57 = vpop.f32.mrb[26].mxu0 }
 0x9e7   : > { %v15856_v58 = vpop.f32.mrb[27].mxu0  ;;  %15866 = vmatmul.mubr.msk.f32.gmra.mrb[32].mxu1 %vm1677_vm5, %v2555_v57 }
 0x9e8   : > { %15868 = vmatprep.mubr.msk.f32.mxu1 %vm18002_vm0, %v18003_v6 }
 0x9ea   : > { %v2560_v59 = vpop.f32.mrb[28].mxu0 }
 0x9eb   : > { %v15859_v60 = vpop.f32.mrb[29].mxu0  ;;  %15869 = vmatmul.mubr.msk.f32.gmra.mrb[34].mxu1 %vm1677_vm5, %v2560_v59 }
 0x9ec   : > { %15892 = vmatprep.mubr.msk.f32.mxu1 %vm18002_vm0, %v18003_v6  ;;  %v14780_v60 = vld [vmem:[%s20395_s24] ss:$0 sm:$0xff] }
 0x9f3   : > { %v2746_v61 = vpop.f32.mrb[30].mxu0 }
 0x9f4   : > { %v2760_v62 = vmul.f32 0.35355338, %v2746_v61  ;;  %v15879_v63 = vpop.f32.mrb[31].mxu0 }
 0x9f6   : > { %v2763_v0 = vsel %vm1773_vm7, %v2760_v62, -inf }
 0x9f7   : > { %2764 = vmax.xlane.f32.xlu1 %v2763_v0  ;;  %v2751_v1 = vpop.f32.mrb[32].mxu0 }
 0x9f8   : > { %v2761_v2 = vmul.f32 0.35355338, %v2751_v1  ;;  %v15882_v4 = vpop.f32.mrb[33].mxu0 }
 0x9fa   : > { %v2766_v5 = vsel %vm1773_vm7, %v2761_v2, -inf }
 0x9fb   : > { %2767 = vmax.xlane.f32.xlu0 %v2766_v5  ;;  %v2756_v7 = vpop.f32.mrb[34].mxu0 }
 0x9fc   : > { %v2762_v8 = vmul.f32 0.35355338, %v2756_v7  ;;  %v15885_v9 = vpop.f32.mrb[35].mxu0 }
 0x9fe   : > { %v2769_v10 = vsel %vm1780_vm8, %v2762_v8, -inf }
 0x9ff   : > { %2770 = vmax.xlane.f32.xlu0 %v2769_v10 }
 0xa84   : > { %v2765_v11 = vpop.xlane.xlu1 %2764 }
 0xa85   : > { %v2772_v12 = vsub.f32 %v2760_v62, %v2765_v11 }
 0xa87   : > { %v2775_v13 = vmul.f32 1.442695, %v2772_v12 }
 0xa88   : > { %v2768_v14 = vpop.xlane.xlu0 %2767 }
 0xa89   : > { %17643 = vpow2.f32 %v2775_v13  ;;  %v2773_v15 = vsub.f32 %v2761_v2, %v2768_v14 }
 0xa8b   : > { %v2777_v16 = vmul.f32 1.442695, %v2773_v15 }
 0xa8c   : > { %v2771_v17 = vpop.xlane.xlu0 %2770 }
 0xa8d   : > { %17645 = vpow2.f32 %v2777_v16  ;;  %v2774_v18 = vsub.f32 %v2762_v8, %v2771_v17 }
 0xa8f   : > { %v2779_v19 = vmul.f32 1.442695, %v2774_v18 }
 0xa91   : > { %17647 = vpow2.f32 %v2779_v19 }
 0xa93   : > { %v17644_v20 = vpop.eup %17643 }
 0xa94   : > { %v2781_v21 = vsel %vm1773_vm7, %v17644_v20, 0.0 }
 0xa95   : > { %2782 = vadd.xlane.f32.xlu0 %v2781_v21 }
 0xa97   : > { %v17646_v22 = vpop.eup %17645 }
 0xa98   : > { %v2784_v26 = vsel %vm1773_vm7, %v17646_v22, 0.0 }
 0xa99   : > { %2785 = vadd.xlane.f32.xlu1 %v2784_v26 }
 0xa9b   : > { %v17648_v28 = vpop.eup %17647 }
 0xa9c   : > { %v2787_v31 = vsel %vm1780_vm8, %v17648_v28, 0.0 }
 0xa9d   : > { %2788 = vadd.xlane.f32.xlu0 %v2787_v31 }
 0xaaa   : > { %17407 = vrot.lane.b32.xlu1 %v18385_v27, %s20291_s22 }
 0xab3   : > { %2800 = vrot.lane.b32.xlu0 %v18387_v30, %s20291_s22  ;;  %s20422_s22 = smov 96  }
 0xab6   : > { %v2639_v32 = vpop.f32.mrb[30].mxu1 }
 0xab7   : > { %v2653_v33 = vadd.f32 %v2639_v32, %v18530_v50  ;;  %v15864_v34 = vpop.f32.mrb[31].mxu1 }
 0xaba   : > { %v2644_v36 = vpop.f32.mrb[32].mxu1 }
 0xabb   : > { %v2654_v38 = vadd.f32 %v2644_v36, %v18532_v53  ;;  %v15867_v24 = vpop.f32.mrb[33].mxu1  ;;  %v3058_v36 = vld [vmem:[%s20397_s21] sm:$0xff] }
 0xabe   : > { %v2649_v40 = vpop.f32.mrb[34].mxu1 }
 0xabf   : > { %v2655_v23 = vadd.f32 %v2649_v40, %v18534_v56  ;;  %v15870_v41 = vpop.f32.mrb[35].mxu1  ;;  %v3061_v40 = vld [vmem:[%s20397_s21 + $0x18] sm:$0xff] }
 0xb22   : > { %v2783_v27 = vpop.xlane.xlu0 %2782 }
 0xb23   : > { %17649 = vrcp.f32 %v2783_v27 }
 0xb26   : > { %v2786_v42 = vpop.xlane.xlu1 %2785 }
 0xb27   : > { %17651 = vrcp.f32 %v2786_v42 }
 0xb2a   : > { %v17408_v30 = vpop.permute.xlu1 %17407  ;;  %v2789_v43 = vpop.xlane.xlu0 %2788 }
 0xb2b   : > { %v17410_v50 = vunpack.i.h.bf16 %v17408_v30  ;;  %v17409_v44 = vunpack.i.l.bf16 %v17408_v30  ;;  %17653 = vrcp.f32 %v2789_v43 }
 0xb2d   : > { %v16992_v45 = vpack.c.bf16 %v17410_v50, %v17409_v44  ;;  %v17650_v53 = vpop.eup %17649 }
 0xb2e   : > { %v2793_v46 = vmul.f32 %v17650_v53, %v17644_v20  ;;  %v2801_v47 = vpop.permute.xlu0 %2800 }
 0xb2f   : > { %16993 = vmatpush3.bf16.msra.mxu1 %v16992_v45 }
 0xb30   : > { %15890 = vmatprep.subr.mxu1 %v18003_v6 }
 0xb31   : > { %v17652_v48 = vpop.eup %17651 }
 0xb32   : > { %v2794_v56 = vmul.f32 %v17652_v48, %v17646_v22 }
 0xb33   : > { %15891 = vmatpush3.msk.msra.mxu1 %vm1825_vm9, %v2801_v47  ;;  %v14781_v47 = vld [vmem:[%s20394_s27] ss:$0 sm:$0xff] }
 0xb34   : > { %15893 = vmatmul.mubr.msk.f32.vlgmr.msra.gmra.mrb[36].mxu1 %vm1773_vm7, %v2793_v46  ;;  %16994 = vmatprep.subr.bf16.mxu1 %v18001_v3 }
 0xb35   : > { %15895 = vmatprep.mubr.msk.f32.mxu1 %vm18002_vm0, %v18003_v6  ;;  %v17654_v49 = vpop.eup %17653 }
 0xb36   : > { %v2795_v51 = vmul.f32 %v17654_v49, %v17648_v28 }
 0xb38   : > { %15896 = vmatmul.mubr.msk.f32.gmra.mrb[38].mxu1 %vm1773_vm7, %v2794_v56  ;;  %v14782_v56 = vld [vmem:[%s20398_s14] ss:$0 sm:$0xff] }
 0xb39   : > { %15898 = vmatprep.mubr.msk.f32.mxu1 %vm18002_vm0, %v18003_v6 }
 0xb3c   : > { %15899 = vmatmul.mubr.msk.f32.gmra.mrb[40].mxu1 %vm1773_vm7, %v2795_v51 }
 0xb3d   : > { %15920 = vmatprep.mubr.msk.f32.mxu1 %vm18002_vm0, %v18003_v6 }
 0xc07   : > { %v2881_v52 = vpop.f32.mrb[36].mxu1 }
 0xc08   : > { %v15894_v54 = vpop.f32.mrb[37].mxu1  ;;  %15904 = vmatmul.mubr.msk.f32.vlgmr.msra.gmra.mrb[36].mxu0 %vm1677_vm5, %v2881_v52 }
 0xc09   : > { %15906 = vmatprep.mubr.msk.f32.mxu0 %vm18002_vm0, %v18003_v6 }
 0xc0b   : > { %v2886_v55 = vpop.f32.mrb[38].mxu1 }
 0xc0c   : > { %v15897_v57 = vpop.f32.mrb[39].mxu1  ;;  %15907 = vmatmul.mubr.msk.f32.gmra.mrb[38].mxu0 %vm1677_vm5, %v2886_v55 }
 0xc0d   : > { %15909 = vmatprep.mubr.msk.f32.mxu0 %vm18002_vm0, %v18003_v6 }
 0xc0f   : > { %v2891_v58 = vpop.f32.mrb[40].mxu1 }
 0xc10   : > { %v15900_v59 = vpop.f32.mrb[41].mxu1  ;;  %15910 = vmatmul.mubr.msk.f32.gmra.mrb[40].mxu0 %vm1677_vm5, %v2891_v58 }
 0xc11   : > { %15945 = vmatprep.mubr.msk.f32.mxu0 %vm18002_vm0, %v18003_v6 }
 0xcdb   : > { %v2970_v61 = vpop.f32.mrb[36].mxu0 }
 0xcdc   : > { %v2984_v62 = vadd.f32 %v2970_v61, %v2653_v33  ;;  %v15905_v63 = vpop.f32.mrb[37].mxu0 }
 0xcdd   : > { %v3240_v63 = vld [vmem:[%s20400_s9 + $0x8] sm:$0xff] }
 0xcde   : > { %v2993_v0 = vadd.f32 %v14780_v60, %v2984_v62  ;;  %v3239_v62 = vld [vmem:[%s20400_s9] sm:$0xff] }
 0xcdf   : > { %v2975_v1 = vpop.f32.mrb[38].mxu0 }
 0xce0   : > { %v18631_v2 = vadd.f32 %v2993_v0, %v18342_v25  ;;  %v2985_v4 = vadd.f32 %v2975_v1, %v2654_v38  ;;  %v15908_v5 = vpop.f32.mrb[39].mxu0  ;;  %v3059_v38 = vld [vmem:[%s20397_s21 + $0x8] sm:$0xff]  ;;  %v17001_v0 = vpack.c.bf16 %v3240_v63, %v3239_v62  ;;  %v3241_v1 = vld [vmem:[%s20400_s9 + $0x10] sm:$0xff] }
 0xce1   : > { %v16995_v24 = vpack.c.bf16 %v3059_v38, %v3058_v36 }
 0xce2   : > { %v2994_v7 = vadd.f32 %v14780_v60, %v2985_v4  ;;  %v3001_v8 = vsel %vm1503_vm3, %v18631_v2, 0.0  ;;  %17002 = vmatpush3.bf16.msra.mxu0 %v17001_v0  ;;  %v3242_v4 = vld [vmem:[%s20400_s9 + $0x18] sm:$0xff] }
 0xce3   : > { %3002 = vadd.xlane.f32.xlu1 %v3001_v8  ;;  %v2980_v9 = vpop.f32.mrb[40].mxu0  ;;  %16996 = vmatpush3.bf16.msra.mxu1 %v16995_v24  ;;  %v17004_v5 = vpack.c.bf16 %v3242_v4, %v3241_v1  ;;  %v3244_v8 = vld [vmem:[%s20400_s9 + $0x28] sm:$0xff] }
 0xce4   : > { %v18636_v10 = vadd.f32 %v2994_v7, %v18346_v29  ;;  %v2986_v11 = vadd.f32 %v2980_v9, %v2655_v23  ;;  %v15911_v12 = vpop.f32.mrb[41].mxu0  ;;  %16997 = vmatprep.subr.bf16.mxu1 %v18001_v3  ;;  %v16998_v23 = vpack.c.bf16 %v3061_v40, %v3060_v39  ;;  %17003 = vmatprep.subr.bf16.mxu0 %v18001_v3  ;;  %v3243_v7 = vld [vmem:[%s20400_s9 + $0x20] sm:$0xff] }
 0xce5   : > { %v17007_v9 = vpack.c.bf16 %v3244_v8, %v3243_v7  ;;  %v3246_v12 = vld [vmem:[%s20400_s9 + $0x38] sm:$0xff] }
 0xce6   : > { %v2995_v13 = vadd.f32 %v14780_v60, %v2986_v11  ;;  %v3004_v14 = vsel %vm1503_vm3, %v18636_v10, 0.0  ;;  %17005 = vmatpush3.bf16.msra.mxu0 %v17004_v5  ;;  %v3245_v11 = vld [vmem:[%s20400_s9 + $0x30] sm:$0xff] }
 0xce7   : > { %3005 = vadd.xlane.f32.xlu0 %v3004_v14  ;;  %16999 = vmatpush3.bf16.msra.mxu1 %v16998_v23  ;;  %v14783_v14 = vld [vmem:[%s20392_s30] ss:$0 sm:$0xff] }
 0xce8   : > { %v18641_v25 = vadd.f32 %v2995_v13, %v18351_v35  ;;  %17012 = vmatprep.subr.bf16.mxu1 %v18001_v3  ;;  %17006 = vmatprep.subr.bf16.mxu0 %v18001_v3  ;;  %v17010_v13 = vpack.c.bf16 %v3246_v12, %v3245_v11 }
 0xcea   : > { %v3007_v15 = vsel %vm1510_vm4, %v18641_v25, 0.0  ;;  %17008 = vmatpush3.bf16.msra.mxu0 %v17007_v9 }
 0xceb   : > { %3008 = vadd.xlane.f32.xlu1 %v3007_v15  ;;  %17009 = vmatprep.subr.bf16.mxu0 %v18001_v3 }
 0xcee   : > { %17011 = vmatpush3.bf16.msra.mxu0 %v17010_v13 }
 0xcef   : > { %17018 = vmatprep.subr.bf16.mxu0 %v18001_v3 }
 0xd70   : > { %v3003_v16 = vpop.xlane.xlu1 %3002 }
 0xd71   : > { %v3010_v17 = vmul.f32 0.03125, %v3003_v16 }
 0xd73   : > { %v3013_v18 = vsub.f32 %v18631_v2, %v3010_v17 }
 0xd74   : > { %v3006_v29 = vpop.xlane.xlu0 %3005 }
 0xd75   : > { %v3011_v19 = vmul.f32 0.03125, %v3006_v29  ;;  %v3016_v20 = vmul.f32 %v3013_v18, %v3013_v18 }
 0xd77   : > { %v3014_v21 = vsub.f32 %v18636_v10, %v3011_v19  ;;  %v3019_v22 = vsel %vm1503_vm3, %v3016_v20, 0.0 }
 0xd78   : > { %3020 = vadd.xlane.f32.xlu0 %v3019_v22  ;;  %v3009_v35 = vpop.xlane.xlu1 %3008 }
 0xd79   : > { %v3012_v26 = vmul.f32 0.03125, %v3009_v35  ;;  %v3017_v28 = vmul.f32 %v3014_v21, %v3014_v21 }
 0xd7b   : > { %v3015_v31 = vsub.f32 %v18641_v25, %v3012_v26  ;;  %v3022_v32 = vsel %vm1503_vm3, %v3017_v28, 0.0 }
 0xd7c   : > { %3023 = vadd.xlane.f32.xlu1 %v3022_v32 }
 0xd7d   : > { %v3018_v33 = vmul.f32 %v3015_v31, %v3015_v31 }
 0xd7f   : > { %v3025_v34 = vsel %vm1510_vm4, %v3018_v33, 0.0 }
 0xd80   : > { %3026 = vadd.xlane.f32.xlu0 %v3025_v34 }
 0xe05   : > { %v3021_v41 = vpop.xlane.xlu0 %3020 }
 0xe06   : > { %v3028_v27 = vmul.f32 0.03125, %v3021_v41 }
 0xe08   : > { %v3031_v42 = vadd.f32 1e-12, %v3028_v27 }
 0xe09   : > { %v3024_v30 = vpop.xlane.xlu1 %3023 }
 0xe0a   : > { %17655 = vrsqrt.f32 %v3031_v42  ;;  %v3029_v43 = vmul.f32 0.03125, %v3024_v30 }
 0xe0c   : > { %v3032_v50 = vadd.f32 1e-12, %v3029_v43 }
 0xe0d   : > { %v3027_v44 = vpop.xlane.xlu0 %3026 }
 0xe0e   : > { %17657 = vrsqrt.f32 %v3032_v50  ;;  %v3030_v45 = vmul.f32 0.03125, %v3027_v44 }
 0xe10   : > { %v3033_v53 = vadd.f32 1e-12, %v3030_v45 }
 0xe12   : > { %17659 = vrsqrt.f32 %v3033_v53 }
 0xe14   : > { %v17656_v46 = vpop.eup %17655 }
 0xe15   : > { %v3037_v48 = vmul.f32 %v17656_v46, %v3013_v18 }
 0xe17   : > { %v3046_v49 = vmul.f32 %v14781_v47, %v3037_v48 }
 0xe18   : > { %v17658_v51 = vpop.eup %17657 }
 0xe19   : > { %v3055_v52 = vadd.f32 %v14782_v56, %v3046_v49  ;;  %v3038_v54 = vmul.f32 %v17658_v51, %v3014_v21 }
 0xe1b   : > { %15921 = vmatmul.mubr.msk.f32.vlgmr.msra.gmra.mrb[42].mxu1 %vm1503_vm3, %v3055_v52  ;;  %v3047_v55 = vmul.f32 %v14781_v47, %v3038_v54 }
 0xe1c   : > { %v17660_v57 = vpop.eup %17659  ;;  %15923 = vmatprep.mubr.msk.f32.mxu1 %vm18002_vm0, %v18003_v6 }
 0xe1d   : > { %v3056_v58 = vadd.f32 %v14782_v56, %v3047_v55  ;;  %v3039_v59 = vmul.f32 %v17660_v57, %v3015_v31 }
 0xe1f   : > { %15924 = vmatmul.mubr.msk.f32.gmra.mrb[44].mxu1 %vm1503_vm3, %v3056_v58  ;;  %v3048_v60 = vmul.f32 %v14781_v47, %v3039_v59 }
 0xe20   : > { %15926 = vmatprep.mubr.msk.f32.mxu1 %vm18002_vm0, %v18003_v6 }
 0xe21   : > { %v3057_v61 = vadd.f32 %v14782_v56, %v3048_v60 }
 0xe23   : > { %15927 = vmatmul.mubr.msk.f32.gmra.mrb[46].mxu1 %vm1503_vm3, %v3057_v61 }
 0xe24   : > { %15962 = vmatprep.mubr.msk.f32.mxu1 %vm18002_vm0, %v18003_v6 }
 0xeee   : > { %v3144_v15 = vpop.f32.mrb[42].mxu1 }
 0xeef   : > { %v18681_v16 = vadd.f32 %v14783_v14, %v3144_v15  ;;  %v15922_v17 = vpop.f32.mrb[43].mxu1 }
 0xef1   : > { %v18684_v18 = vmul.f32 0.70710677, %v18681_v16 }
 0xef2   : > { %v3149_v29 = vpop.f32.mrb[44].mxu1 }
 0xef3   : > { %v3164_v19 = vand.u32 2147483647, %v18684_v18  ;;  %v18687_v20 = vadd.f32 %v14783_v14, %v3149_v29  ;;  %v15925_v21 = vpop.f32.mrb[45].mxu1  ;;  %vm3224_vm10 = vcmp.lt.f32.partialorder %v18684_v18, 0.0 }
 0xef5   : > { %v3167_v22 = vmul.f32 0.3275911, %v3164_v19  ;;  %v18690_v35 = vmul.f32 0.70710677, %v18687_v20  ;;  %v3206_v40 = vsub.f32 0.0, %v3164_v19 }
 0xef6   : > { %v3154_v26 = vpop.f32.mrb[46].mxu1 }
 0xef7   : > { %v3170_v28 = vadd.f32 1.0, %v3167_v22  ;;  %v3165_v31 = vand.u32 2147483647, %v18690_v35  ;;  %v15928_v32 = vpop.f32.mrb[47].mxu1  ;;  %v18693_v33 = vadd.f32 %v14783_v14, %v3154_v26  ;;  %v3209_v27 = vmul.f32 %v3206_v40, %v3164_v19 }
 0xef8   : > { %v3158_v32 = vmul.f32 0.5, %v18681_v16  ;;  %vm3225_vm12 = vcmp.lt.f32.partialorder %v18690_v35, 0.0 }
 0xef9   : > { %17661 = vrcp.f32 %v3170_v28  ;;  %v3168_v34 = vmul.f32 0.3275911, %v3165_v31  ;;  %v18696_v36 = vmul.f32 0.70710677, %v18693_v33  ;;  %v3207_v42 = vsub.f32 0.0, %v3165_v31 }
 0xefa   : > { %v3212_v44 = vmul.f32 1.442695, %v3209_v27  ;;  %v3159_v27 = vmul.f32 0.5, %v18687_v20  ;;  %v3160_v35 = vmul.f32 0.5, %v18693_v33 }
 0xefb   : > { %v3171_v38 = vadd.f32 1.0, %v3168_v34  ;;  %v3166_v24 = vand.u32 2147483647, %v18696_v36  ;;  %v3210_v45 = vmul.f32 %v3207_v42, %v3165_v31  ;;  %vm3226_vm13 = vcmp.lt.f32.partialorder %v18696_v36, 0.0 }
 0xefd   : > { %17663 = vrcp.f32 %v3171_v38  ;;  %v3169_v39 = vmul.f32 0.3275911, %v3166_v24  ;;  %v3208_v47 = vsub.f32 0.0, %v3166_v24  ;;  %v3214_v49 = vmul.f32 1.442695, %v3210_v45 }
 0xeff   : > { %v3172_v23 = vadd.f32 1.0, %v3169_v39  ;;  %v3211_v55 = vmul.f32 %v3208_v47, %v3166_v24 }
 0xf01   : > { %17665 = vrcp.f32 %v3172_v23  ;;  %v3216_v63 = vmul.f32 1.442695, %v3211_v55 }
 0xf02   : > { %17667 = vpow2.f32 %v3212_v44  ;;  %v14787_v44 = vld [vmem:[%s20396_s6] ss:$0 sm:$0xff] }
 0xf03   : > { %v17662_v41 = vpop.eup %17661  ;;  %17669 = vpow2.f32 %v3214_v49 }
 0xf04   : > { %v3179_v30 = vmul.f32 1.0614054, %v17662_v41  ;;  %17671 = vpow2.f32 %v3216_v63 }
 0xf06   : > { %v3182_v43 = vadd.f32 -1.4531521, %v3179_v30 }
 0xf07   : > { %v17664_v50 = vpop.eup %17663 }
 0xf08   : > { %v3185_v53 = vmul.f32 %v17662_v41, %v3182_v43  ;;  %v3180_v46 = vmul.f32 1.0614054, %v17664_v50 }
 0xf0a   : > { %v3188_v48 = vadd.f32 1.4214138, %v3185_v53  ;;  %v3183_v56 = vadd.f32 -1.4531521, %v3180_v46 }
 0xf0b   : > { %v17666_v51 = vpop.eup %17665 }
 0xf0c   : > { %v3191_v52 = vmul.f32 %v17662_v41, %v3188_v48  ;;  %v3186_v54 = vmul.f32 %v17664_v50, %v3183_v56  ;;  %v3181_v57 = vmul.f32 1.0614054, %v17666_v51  ;;  %v17668_v9 = vpop.eup %17667 }
 0xf0d   : > { %v17670_v29 = vpop.eup %17669 }
 0xf0e   : > { %v3194_v58 = vadd.f32 -0.28449672, %v3191_v52  ;;  %v3189_v59 = vadd.f32 1.4214138, %v3186_v54  ;;  %v3184_v60 = vadd.f32 -1.4531521, %v3181_v57  ;;  %v17672_v24 = vpop.eup %17671 }
 0xf10   : > { %v3197_v61 = vmul.f32 %v17662_v41, %v3194_v58  ;;  %v3192_v62 = vmul.f32 %v17664_v50, %v3189_v59  ;;  %v3187_v0 = vmul.f32 %v17666_v51, %v3184_v60 }
 0xf12   : > { %v3200_v1 = vadd.f32 0.2548296, %v3197_v61  ;;  %v3195_v4 = vadd.f32 -0.28449672, %v3192_v62  ;;  %v3190_v5 = vadd.f32 1.4214138, %v3187_v0 }
 0xf14   : > { %v3203_v7 = vmul.f32 %v17662_v41, %v3200_v1  ;;  %v3198_v8 = vmul.f32 %v17664_v50, %v3195_v4  ;;  %v3193_v11 = vmul.f32 %v17666_v51, %v3190_v5 }
 0xf16   : > { %v3218_v12 = vmul.f32 %v17668_v9, %v3203_v7  ;;  %v3201_v13 = vadd.f32 0.2548296, %v3198_v8  ;;  %v3196_v14 = vadd.f32 -0.28449672, %v3193_v11  ;;  %v14795_v11 = vld [vmem:[%s20404_s8 + $0x20] sm:$0xff] }
 0xf18   : > { %v3221_v15 = vsub.f32 1.0, %v3218_v12  ;;  %v3204_v17 = vmul.f32 %v17664_v50, %v3201_v13  ;;  %v3199_v19 = vmul.f32 %v17666_v51, %v3196_v14  ;;  %v14796_v12 = vld [vmem:[%s20404_s8 + $0x28] sm:$0xff]  ;;  %v14797_v14 = vld [vmem:[%s20404_s8 + $0x30] sm:$0xff] }
 0xf19   : > { %v17013_v13 = vpack.c.bf16 %v14796_v12, %v14795_v11 }
 0xf1a   : > { %v3227_v21 = vsub.f32 0.0, %v3221_v15  ;;  %v3219_v22 = vmul.f32 %v17670_v29, %v3204_v17  ;;  %v3202_v26 = vadd.f32 0.2548296, %v3199_v19 }
 0xf1b   : > { %17014 = vmatpush3.bf16.msra.mxu1 %v17013_v13 }
 0xf1c   : > { %v3230_v28 = vsel %vm3224_vm10, %v3227_v21, %v3221_v15  ;;  %v3222_v31 = vsub.f32 1.0, %v3219_v22  ;;  %v3205_v38 = vmul.f32 %v17666_v51, %v3202_v26  ;;  %17015 = vmatprep.subr.bf16.mxu1 %v18001_v3  ;;  %v14798_v15 = vld [vmem:[%s20404_s8 + $0x38] sm:$0xff]  ;;  %s20427_s8 = smov 80  }
 0xf1d   : > { %v3233_v34 = vadd.f32 1.0, %v3230_v28  ;;  %v17016_v17 = vpack.c.bf16 %v14798_v15, %v14797_v14 }
 0xf1e   : > { %v3228_v39 = vsub.f32 0.0, %v3222_v31  ;;  %v3220_v23 = vmul.f32 %v17672_v24, %v3205_v38  ;;  %v14793_v24 = vld [vmem:[%s20403_s19 + $0x1] ss:$0 sm:$0xff]  ;;  %s20430_s19 = smov 72  }
 0xf1f   : > { %v3236_v40 = vmul.f32 %v3233_v34, %v3158_v32  ;;  %17017 = vmatpush3.bf16.msra.mxu1 %v17016_v17 }
 0xf20   : > { %v3231_v41 = vsel %vm3225_vm12, %v3228_v39, %v3222_v31  ;;  %v3223_v18 = vsub.f32 1.0, %v3220_v23  ;;  %17022 = vmatprep.subr.bf16.mxu1 %v18001_v3 }
 0xf21   : > { %v3234_v42 = vadd.f32 1.0, %v3231_v41  ;;  %15946 = vmatmul.mubr.msk.f32.vlgmr.msra.gmra.mrb[42].mxu0 %vm3254_vm11, %v3236_v40  ;;  %v14794_v40 = vld [vmem:[%s20401_s25 + $0x1] ss:$0 sm:$0xff]  ;;  %s20432_s25 = smov 40  }
 0xf22   : > { %15948 = vmatprep.mubr.msk.f32.mxu0 %vm18002_vm0, %v18003_v6  ;;  %v3229_v30 = vsub.f32 0.0, %v3223_v18 }
 0xf23   : > { %v3237_v16 = vmul.f32 %v3234_v42, %v3159_v27 }
 0xf24   : > { %v3232_v43 = vsel %vm3226_vm13, %v3229_v30, %v3223_v18 }
 0xf25   : > { %15949 = vmatmul.mubr.msk.f32.gmra.mrb[44].mxu0 %vm3254_vm11, %v3237_v16  ;;  %v3235_v50 = vadd.f32 1.0, %v3232_v43 }
 0xf26   : > { %15951 = vmatprep.mubr.msk.f32.mxu0 %vm18002_vm0, %v18003_v6 }
 0xf27   : > { %v3238_v20 = vmul.f32 %v3235_v50, %v3160_v35 }
 0xf29   : > { %15952 = vmatmul.mubr.msk.f32.gmra.mrb[46].mxu0 %vm3254_vm11, %v3238_v20 }
 0xf2a   : > { %15977 = vmatprep.mubr.msk.f32.mxu0 %vm18002_vm0, %v18003_v6 }
 0xff4   : > { %v3330_v45 = vpop.f32.mrb[42].mxu0 }
 0xff5   : > { %v3331_v53 = vadd.f32 %v14787_v44, %v3330_v45  ;;  %v15947_v46 = vpop.f32.mrb[43].mxu0  ;;  %v14805_v45 = vld [vmem:[%s20393_s29 + $0x1] ss:$0 sm:$0xff]  ;;  %s20446_s29 = smov 124  }
 0xff7   : > { %v18716_v36 = vadd.f32 %v3331_v53, %v18631_v2 }
 0xff8   : > { %v3335_v47 = vpop.f32.mrb[44].mxu0 }
 0xff9   : > { %v3336_v48 = vadd.f32 %v14787_v44, %v3335_v47  ;;  %v15950_v33 = vpop.f32.mrb[45].mxu0  ;;  %v3351_v56 = vsel %vm1503_vm3, %v18716_v36, 0.0 }
 0xffa   : > { %3352 = vadd.xlane.f32.xlu1 %v3351_v56 }
 0xffb   : > { %v18721_v49 = vadd.f32 %v3336_v48, %v18636_v10 }
 0xffc   : > { %v3340_v51 = vpop.f32.mrb[46].mxu0 }
 0xffd   : > { %v3354_v52 = vsel %vm1503_vm3, %v18721_v49, 0.0  ;;  %v3341_v54 = vadd.f32 %v14787_v44, %v3340_v51  ;;  %v15953_v55 = vpop.f32.mrb[47].mxu0 }
 0xffe   : > { %3355 = vadd.xlane.f32.xlu0 %v3354_v52 }
 0xfff   : > { %v18726_v2 = vadd.f32 %v3341_v54, %v18641_v25 }
0x1001   : > { %v3357_v57 = vsel %vm1510_vm4, %v18726_v2, 0.0 }
0x1002   : > { %3358 = vadd.xlane.f32.xlu1 %v3357_v57 }
0x1087   : > { %v3353_v58 = vpop.xlane.xlu1 %3352 }
0x1088   : > { %v3360_v59 = vmul.f32 0.03125, %v3353_v58 }
0x108a   : > { %v3363_v60 = vsub.f32 %v18716_v36, %v3360_v59 }
0x108b   : > { %v3356_v10 = vpop.xlane.xlu0 %3355 }
0x108c   : > { %v3361_v61 = vmul.f32 0.03125, %v3356_v10  ;;  %v3366_v62 = vmul.f32 %v3363_v60, %v3363_v60 }
0x108e   : > { %v3364_v63 = vsub.f32 %v18721_v49, %v3361_v61  ;;  %v3369_v0 = vsel %vm1503_vm3, %v3366_v62, 0.0 }
0x108f   : > { %3370 = vadd.xlane.f32.xlu0 %v3369_v0  ;;  %v3359_v25 = vpop.xlane.xlu1 %3358 }
0x1090   : > { %v3367_v1 = vmul.f32 %v3364_v63, %v3364_v63  ;;  %v3362_v4 = vmul.f32 0.03125, %v3359_v25 }
0x1092   : > { %v3372_v5 = vsel %vm1503_vm3, %v3367_v1, 0.0  ;;  %v3365_v7 = vsub.f32 %v18726_v2, %v3362_v4 }
0x1093   : > { %3373 = vadd.xlane.f32.xlu1 %v3372_v5 }
0x1094   : > { %v3368_v8 = vmul.f32 %v3365_v7, %v3365_v7 }
0x1096   : > { %v3375_v9 = vsel %vm1510_vm4, %v3368_v8, 0.0 }
0x1097   : > { %3376 = vadd.xlane.f32.xlu0 %v3375_v9 }
0x111c   : > { %v3371_v29 = vpop.xlane.xlu0 %3370 }
0x111d   : > { %v3378_v19 = vmul.f32 0.03125, %v3371_v29 }
0x111f   : > { %v3381_v21 = vadd.f32 1e-12, %v3378_v19 }
0x1120   : > { %v3374_v22 = vpop.xlane.xlu1 %3373 }
0x1121   : > { %17673 = vrsqrt.f32 %v3381_v21  ;;  %v3379_v26 = vmul.f32 0.03125, %v3374_v22 }
0x1123   : > { %v3382_v28 = vadd.f32 1e-12, %v3379_v26 }
0x1124   : > { %v3377_v31 = vpop.xlane.xlu0 %3376 }
0x1125   : > { %17675 = vrsqrt.f32 %v3382_v28  ;;  %v3380_v32 = vmul.f32 0.03125, %v3377_v31 }
0x1127   : > { %v3383_v34 = vadd.f32 1e-12, %v3380_v32 }
0x1129   : > { %17677 = vrsqrt.f32 %v3383_v34 }
0x112b   : > { %v17674_v38 = vpop.eup %17673 }
0x112c   : > { %v3387_v39 = vmul.f32 %v17674_v38, %v3363_v60 }
0x112e   : > { %v3396_v23 = vmul.f32 %v14793_v24, %v3387_v39 }
0x112f   : > { %v17676_v41 = vpop.eup %17675 }
0x1130   : > { %v3405_v27 = vadd.f32 %v14794_v40, %v3396_v23  ;;  %v3388_v42 = vmul.f32 %v17676_v41, %v3364_v63 }
0x1132   : > { %15963 = vmatmul.mubr.msk.f32.vlgmr.msra.gmra.mrb[48].mxu1 %vm1503_vm3, %v3405_v27  ;;  %v3397_v18 = vmul.f32 %v14793_v24, %v3388_v42 }
0x1133   : > { %15965 = vmatprep.mubr.msk.f32.mxu1 %vm18002_vm0, %v18003_v6  ;;  %v17678_v16 = vpop.eup %17677 }
0x1134   : > { %v3406_v30 = vadd.f32 %v14794_v40, %v3397_v18  ;;  %v3389_v43 = vmul.f32 %v17678_v16, %v3365_v7 }
0x1136   : > { %15966 = vmatmul.mubr.msk.f32.gmra.mrb[50].mxu1 %vm1503_vm3, %v3406_v30  ;;  %v3398_v35 = vmul.f32 %v14793_v24, %v3389_v43 }
0x1137   : > { %15968 = vmatprep.mubr.msk.f32.mxu1 %vm18002_vm0, %v18003_v6 }
0x1138   : > { %v3407_v50 = vadd.f32 %v14794_v40, %v3398_v35 }
0x113a   : > { %15969 = vmatmul.mubr.msk.f32.gmra.mrb[52].mxu1 %vm1503_vm3, %v3407_v50 }
0x113b   : > { %15992 = vmatprep.mubr.msk.f32.mxu1 %vm18002_vm0, %v18003_v6 }
0x1205   : > { %v3503_v20 = vpop.f32.mrb[48].mxu1 }
0x1206   : > { %v15964_v44 = vpop.f32.mrb[49].mxu1  ;;  %v18754_v46 = vadd.f32 %v14805_v45, %v3503_v20 }
0x1209   : > { %v3508_v53 = vpop.f32.mrb[50].mxu1 }
0x120a   : > { %v18756_v47 = vadd.f32 %v14805_v45, %v3508_v53  ;;  %v15967_v48 = vpop.f32.mrb[51].mxu1 }
0x120c   : > { %v18760_v33 = vpack.i.bf16 %v18756_v47, %v18754_v46 }
0x120d   : > { %v3513_v56 = vpop.f32.mrb[52].mxu1 }
0x120e   : > { %17412 = vrot.lane.b32.xlu1 %v18760_v33, %s20422_s22  ;;  %v18764_v51 = vadd.f32 %v14805_v45, %v3513_v56  ;;  %v15970_v52 = vpop.f32.mrb[53].mxu1 }
0x1210   : > { %3524 = vrot.lane.b32.xlu0 %v18764_v51, %s20422_s22 }
0x1212   : > { %17417 = vrot.lane.b32.xlu1 %v18760_v33, %s20423_s23 }
0x1214   : > { %3755 = vrot.lane.b32.xlu0 %v18756_v47, %s20424_s16 }
0x1216   : > { %3763 = vrot.lane.b32.xlu1 %v18764_v51, %s20423_s23 }
0x121a   : > { %3753 = vrot.lane.b32.xlu1 %v18754_v46, %s20424_s16 }
0x121e   : > { %3757 = vrot.lane.b32.xlu1 %v18764_v51, %s20424_s16 }
0x1280   : > { %v17413_v54 = vpop.permute.xlu1 %17412 }
0x1281   : > { %v17415_v55 = vunpack.i.h.bf16 %v17413_v54  ;;  %v17414_v57 = vunpack.i.l.bf16 %v17413_v54 }
0x1282   : > { %v3525_v61 = vpop.permute.xlu0 %3524 }
0x1283   : > { %v17019_v58 = vpack.c.bf16 %v17415_v55, %v17414_v57 }
0x1284   : > { %v17418_v59 = vpop.permute.xlu1 %17417 }
0x1285   : > { %17021 = vmatpush3.bf16.xpose.msk.msra.mxu0 %vm18405_vm6, %v17019_v58  ;;  %v17420_v60 = vunpack.i.h.bf16 %v17418_v59  ;;  %v17419_v10 = vunpack.i.l.bf16 %v17418_v59 }
0x1286   : > { %15975 = vmatprep.subr.mxu0 %v18003_v6  ;;  %v3756_v25 = vpop.permute.xlu0 %3755 }
0x1287   : > { %v17026_v62 = vpack.c.bf16 %v17420_v60, %v17419_v10 }
0x1288   : > { %v3764_v63 = vpop.permute.xlu1 %3763 }
0x128c   : > { %v3754_v0 = vpop.permute.xlu1 %3753 }
0x128d   : > { %15976 = vmatpush3.xpose.msk.msra.mxu0 %vm1677_vm5, %v3525_v61 }
0x128e   : > { %17025 = vmatprep.subr.bf16.mxu0 %v18001_v3 }
0x1290   : > { %15978 = vmatmul.mubr.msk.f32.vlgmr.msra.gmra.mrb[48].mxu0 %vm1677_vm5, %v18754_v46  ;;  %v3758_v1 = vpop.permute.xlu1 %3757 }
0x1291   : > { %17028 = vmatpush3.bf16.xpose.msk.msra.mxu0 %vm18405_vm6, %v17026_v62  ;;  %15980 = vmatprep.mubr.msk.f32.mxu0 %vm18002_vm0, %v18003_v6 }
0x1292   : > { %16005 = vmatprep.subr.mxu0 %v18003_v6 }
0x1294   : > { %15981 = vmatmul.mubr.msk.f32.gmra.mrb[50].mxu0 %vm1677_vm5, %v18756_v47 }
0x1295   : > { %15983 = vmatprep.mubr.msk.f32.mxu0 %vm18002_vm0, %v18003_v6 }
0x1298   : > { %15984 = vmatmul.mubr.msk.f32.gmra.mrb[52].mxu0 %vm1677_vm5, %v18764_v51 }
0x1299   : > { %16006 = vmatpush3.xpose.msk.msra.mxu0 %vm1677_vm5, %v3764_v63  ;;  %16007 = vmatprep.mubr.msk.f32.mxu0 %vm18002_vm0, %v18003_v6 }
0x129a   : > { %16031 = vmatprep.subr.mxu0 %v18003_v6 }
0x129c   : > { %16008 = vmatmul.mubr.msk.f32.vlgmr.msra.gmra.mrb[54].mxu0 %vm1677_vm5, %v3754_v0 }
0x129d   : > { %16010 = vmatprep.mubr.msk.f32.mxu0 %vm18002_vm0, %v18003_v6 }
0x12a0   : > { %16011 = vmatmul.mubr.msk.f32.gmra.mrb[56].mxu0 %vm1677_vm5, %v3756_v25 }
0x12a1   : > { %16013 = vmatprep.mubr.msk.f32.mxu0 %vm18002_vm0, %v18003_v6 }
0x12a4   : > { %16014 = vmatmul.mubr.msk.f32.gmra.mrb[58].mxu0 %vm1677_vm5, %v3758_v1 }
0x12a5   : > { %16033 = vmatprep.mubr.msk.f32.mxu0 %vm18002_vm0, %v18003_v6 }
0x1363   : > { %v3604_v4 = vpop.f32.mrb[48].mxu0 }
0x1364   : > { %v3618_v5 = vmul.f32 0.35355338, %v3604_v4  ;;  %v15979_v7 = vpop.f32.mrb[49].mxu0 }
0x1366   : > { %v3621_v8 = vsel %vm1773_vm7, %v3618_v5, -inf }
0x1367   : > { %3622 = vmax.xlane.f32.xlu0 %v3621_v8  ;;  %v3609_v9 = vpop.f32.mrb[50].mxu0 }
0x1368   : > { %v3619_v11 = vmul.f32 0.35355338, %v3609_v9  ;;  %v15982_v12 = vpop.f32.mrb[51].mxu0 }
0x136a   : > { %v3624_v13 = vsel %vm1773_vm7, %v3619_v11, -inf }
0x136b   : > { %3625 = vmax.xlane.f32.xlu1 %v3624_v13  ;;  %v3614_v14 = vpop.f32.mrb[52].mxu0 }
0x136c   : > { %v3620_v15 = vmul.f32 0.35355338, %v3614_v14  ;;  %v15985_v17 = vpop.f32.mrb[53].mxu0 }
0x136e   : > { %v3627_v29 = vsel %vm1780_vm8, %v3620_v15, -inf }
0x136f   : > { %3628 = vmax.xlane.f32.xlu0 %v3627_v29  ;;  %v3843_v19 = vpop.f32.mrb[54].mxu0 }
0x1370   : > { %v3857_v21 = vmul.f32 0.35355338, %v3843_v19  ;;  %v16009_v22 = vpop.f32.mrb[55].mxu0 }
0x1372   : > { %v3860_v26 = vsel %vm1773_vm7, %v3857_v21, -inf }
0x1373   : > { %3861 = vmax.xlane.f32.xlu0 %v3860_v26  ;;  %v3848_v28 = vpop.f32.mrb[56].mxu0 }
0x1374   : > { %v3858_v31 = vmul.f32 0.35355338, %v3848_v28  ;;  %v16012_v32 = vpop.f32.mrb[57].mxu0 }
0x1376   : > { %v3863_v34 = vsel %vm1773_vm7, %v3858_v31, -inf }
0x1377   : > { %3864 = vmax.xlane.f32.xlu0 %v3863_v34  ;;  %v3853_v38 = vpop.f32.mrb[58].mxu0 }
0x1378   : > { %v3859_v24 = vmul.f32 0.35355338, %v3853_v38  ;;  %v16015_v39 = vpop.f32.mrb[59].mxu0 }
0x137a   : > { %v3866_v40 = vsel %vm1780_vm8, %v3859_v24, -inf }
0x137b   : > { %3867 = vmax.xlane.f32.xlu1 %v3866_v40 }
0x138c   : > { %17422 = vrot.lane.b32.xlu1 %v18760_v33, %s20425_s3 }
0x13f4   : > { %v3623_v23 = vpop.xlane.xlu0 %3622 }
0x13f5   : > { %v3630_v41 = vsub.f32 %v3618_v5, %v3623_v23 }
0x13f7   : > { %v3633_v27 = vmul.f32 1.442695, %v3630_v41 }
0x13f8   : > { %v3626_v42 = vpop.xlane.xlu1 %3625 }
0x13f9   : > { %17679 = vpow2.f32 %v3633_v27  ;;  %v3631_v18 = vsub.f32 %v3619_v11, %v3626_v42 }
0x13fb   : > { %v3635_v16 = vmul.f32 1.442695, %v3631_v18  ;;  %v14800_v18 = vld [vmem:[%s20399_s13 + $0x20] sm:$0xff] }
0x13fc   : > { %v3629_v30 = vpop.xlane.xlu0 %3628 }
0x13fd   : > { %17681 = vpow2.f32 %v3635_v16  ;;  %v3632_v43 = vsub.f32 %v3620_v15, %v3629_v30  ;;  %v14801_v16 = vld [vmem:[%s20399_s13 + $0x28] sm:$0xff] }
0x13fe   : > { %16032 = vmatpush3.msra.mxu0 %v14801_v16 }
0x13ff   : > { %v3637_v35 = vmul.f32 1.442695, %v3632_v43  ;;  %17032 = vmatprep.subr.bf16.mxu0 %v18001_v3 }
0x1400   : > { %v3862_v50 = vpop.xlane.xlu0 %3861 }
0x1401   : > { %17683 = vpow2.f32 %v3637_v35  ;;  %v3869_v20 = vsub.f32 %v3857_v21, %v3862_v50 }
0x1403   : > { %v17680_v44 = vpop.eup %17679  ;;  %v3872_v45 = vmul.f32 1.442695, %v3869_v20 }
0x1404   : > { %v3865_v53 = vpop.xlane.xlu0 %3864  ;;  %v3639_v48 = vsel %vm1773_vm7, %v17680_v44, 0.0 }
0x1405   : > { %17685 = vpow2.f32 %v3872_v45  ;;  %v3870_v56 = vsub.f32 %v3858_v31, %v3865_v53  ;;  %3640 = vadd.xlane.f32.xlu0 %v3639_v48 }
0x1407   : > { %v17682_v52 = vpop.eup %17681  ;;  %v3874_v54 = vmul.f32 1.442695, %v3870_v56 }
0x1408   : > { %v3868_v55 = vpop.xlane.xlu1 %3867  ;;  %v3642_v57 = vsel %vm1773_vm7, %v17682_v52, 0.0 }
0x1409   : > { %17687 = vpow2.f32 %v3874_v54  ;;  %v3871_v58 = vsub.f32 %v3859_v24, %v3868_v55  ;;  %3643 = vadd.xlane.f32.xlu1 %v3642_v57 }
0x140b   : > { %v17684_v59 = vpop.eup %17683  ;;  %v3876_v60 = vmul.f32 1.442695, %v3871_v58 }
0x140c   : > { %v17423_v10 = vpop.permute.xlu1 %17422  ;;  %v3645_v61 = vsel %vm1780_vm8, %v17684_v59, 0.0 }
0x140d   : > { %17689 = vpow2.f32 %v3876_v60  ;;  %v17425_v62 = vunpack.i.h.bf16 %v17423_v10  ;;  %v17424_v63 = vunpack.i.l.bf16 %v17423_v10  ;;  %3646 = vadd.xlane.f32.xlu0 %v3645_v61 }
0x140f   : > { %v17686_v0 = vpop.eup %17685  ;;  %v17023_v25 = vpack.c.bf16 %v17425_v62, %v17424_v63 }
0x1410   : > { %v3878_v1 = vsel %vm1773_vm7, %v17686_v0, 0.0 }
0x1411   : > { %3879 = vadd.xlane.f32.xlu1 %v3878_v1  ;;  %17024 = vmatpush3.bf16.msra.mxu1 %v17023_v25 }
0x1412   : > { %15990 = vmatprep.subr.mxu1 %v18003_v6 }
0x1413   : > { %v17688_v4 = vpop.eup %17687 }
0x1414   : > { %v3881_v5 = vsel %vm1773_vm7, %v17688_v4, 0.0 }
0x1415   : > { %3882 = vadd.xlane.f32.xlu0 %v3881_v5 }
0x1417   : > { %v17690_v7 = vpop.eup %17689 }
0x1418   : > { %v3884_v8 = vsel %vm1780_vm8, %v17690_v7, 0.0 }
0x1419   : > { %3885 = vadd.xlane.f32.xlu0 %v3884_v8 }
0x1422   : > { %17427 = vrot.lane.b32.xlu1 %v18760_v33, %s20426_s5 }
0x1426   : > { %3897 = vrot.lane.b32.xlu1 %v18764_v51, %s20426_s5 }
0x142a   : > { %17432 = vrot.lane.b32.xlu1 %v18760_v33, %s20427_s8 }
0x142e   : > { %4180 = vrot.lane.b32.xlu1 %v18764_v51, %s20427_s8 }
0x142f   : > { %3658 = vrot.lane.b32.xlu0 %v18764_v51, %s20425_s3 }
0x1432   : > { %4172 = vrot.lane.b32.xlu1 %v18756_v47, %s20428_s12 }
0x1433   : > { %4170 = vrot.lane.b32.xlu0 %v18754_v46, %s20428_s12 }
0x1437   : > { %4174 = vrot.lane.b32.xlu0 %v18764_v51, %s20428_s12 }
0x1492   : > { %v3641_v9 = vpop.xlane.xlu0 %3640 }
0x1493   : > { %17691 = vrcp.f32 %v3641_v9 }
0x1496   : > { %v3644_v11 = vpop.xlane.xlu1 %3643 }
0x1497   : > { %17693 = vrcp.f32 %v3644_v11 }
0x149a   : > { %v3647_v12 = vpop.xlane.xlu0 %3646 }
0x149b   : > { %17695 = vrcp.f32 %v3647_v12 }
0x149d   : > { %v17692_v29 = vpop.eup %17691 }
0x149e   : > { %v3880_v13 = vpop.xlane.xlu1 %3879  ;;  %v3651_v22 = vmul.f32 %v17692_v29, %v17680_v44 }
0x149f   : > { %17697 = vrcp.f32 %v3880_v13 }
0x14a1   : > { %v17694_v28 = vpop.eup %17693 }
0x14a2   : > { %v3883_v14 = vpop.xlane.xlu0 %3882  ;;  %v17428_v15 = vpop.permute.xlu1 %17427  ;;  %v3652_v32 = vmul.f32 %v17694_v28, %v17682_v52 }
0x14a3   : > { %v17430_v19 = vunpack.i.h.bf16 %v17428_v15  ;;  %v17429_v21 = vunpack.i.l.bf16 %v17428_v15  ;;  %17699 = vrcp.f32 %v3883_v14 }
0x14a5   : > { %v17030_v31 = vpack.c.bf16 %v17430_v19, %v17429_v21  ;;  %v17696_v34 = vpop.eup %17695 }
0x14a6   : > { %v3886_v17 = vpop.xlane.xlu0 %3885  ;;  %v3898_v38 = vpop.permute.xlu1 %3897  ;;  %v3653_v24 = vmul.f32 %v17696_v34, %v17684_v59 }
0x14a7   : > { %17701 = vrcp.f32 %v3886_v17 }
0x14a9   : > { %v17698_v39 = vpop.eup %17697 }
0x14aa   : > { %v3659_v26 = vpop.permute.xlu0 %3658  ;;  %v3890_v40 = vmul.f32 %v17698_v39, %v17686_v0  ;;  %v17433_v50 = vpop.permute.xlu1 %17432 }
0x14ab   : > { %15991 = vmatpush3.msk.msra.mxu1 %vm1825_vm9, %v3659_v26  ;;  %v17435_v44 = vunpack.i.h.bf16 %v17433_v50  ;;  %v17434_v45 = vunpack.i.l.bf16 %v17433_v50 }
0x14ac   : > { %15993 = vmatmul.mubr.msk.f32.vlgmr.msra.gmra.mrb[54].mxu1 %vm1773_vm7, %v3651_v22  ;;  %17029 = vmatprep.subr.bf16.mxu1 %v18001_v3 }
0x14ad   : > { %17031 = vmatpush3.bf16.msra.mxu1 %v17030_v31  ;;  %15995 = vmatprep.mubr.msk.f32.mxu1 %vm18002_vm0, %v18003_v6  ;;  %v17700_v23 = vpop.eup %17699  ;;  %v17033_v56 = vpack.c.bf16 %v17435_v44, %v17434_v45 }
0x14ae   : > { %16020 = vmatprep.subr.mxu1 %v18003_v6  ;;  %v3891_v41 = vmul.f32 %v17700_v23, %v17688_v4  ;;  %v4181_v59 = vpop.permute.xlu1 %4180  ;;  %v4171_v10 = vpop.permute.xlu0 %4170 }
0x14b0   : > { %15996 = vmatmul.mubr.msk.f32.gmra.mrb[56].mxu1 %vm1773_vm7, %v3652_v32 }
0x14b1   : > { %16021 = vmatpush3.msk.msra.mxu1 %vm1825_vm9, %v3898_v38  ;;  %15998 = vmatprep.mubr.msk.f32.mxu1 %vm18002_vm0, %v18003_v6  ;;  %v17702_v27 = vpop.eup %17701 }
0x14b2   : > { %16042 = vmatprep.subr.mxu1 %v18003_v6  ;;  %v3892_v42 = vmul.f32 %v17702_v27, %v17690_v7  ;;  %v4173_v61 = vpop.permute.xlu1 %4172  ;;  %v4175_v62 = vpop.permute.xlu0 %4174 }
0x14b4   : > { %15999 = vmatmul.mubr.msk.f32.gmra.mrb[58].mxu1 %vm1773_vm7, %v3653_v24 }
0x14b5   : > { %16022 = vmatprep.mubr.msk.f32.mxu1 %vm18002_vm0, %v18003_v6 }
0x14b8   : > { %16023 = vmatmul.mubr.msk.f32.vlgmr.msra.gmra.mrb[60].mxu1 %vm1773_vm7, %v3890_v40 }
0x14b9   : > { %16025 = vmatprep.mubr.msk.f32.mxu1 %vm18002_vm0, %v18003_v6  ;;  %16043 = vmatpush3.msra.mxu1 %v14800_v18 }
0x14ba   : > { %17036 = vmatprep.subr.bf16.mxu1 %v18001_v3 }
0x14bc   : > { %16026 = vmatmul.mubr.msk.f32.gmra.mrb[62].mxu1 %vm1773_vm7, %v3891_v41 }
0x14bd   : > { %16028 = vmatprep.mubr.msk.f32.mxu1 %vm18002_vm0, %v18003_v6 }
0x14c0   : > { %16029 = vmatmul.mubr.msk.f32.gmra.mrb[64].mxu1 %vm1773_vm7, %v3892_v42 }
0x14c1   : > { %16044 = vmatprep.mubr.msk.f32.mxu1 %vm18002_vm0, %v18003_v6 }
0x157f   : > { %v3739_v30 = vpop.f32.mrb[54].mxu1 }
0x1580   : > { %v15994_v43 = vpop.f32.mrb[55].mxu1  ;;  %16045 = vmatmul.mubr.msk.f32.vlgmr.msra.gmra.mrb[66].mxu1 %vm1677_vm5, %v3739_v30 }
0x1581   : > { %16047 = vmatprep.mubr.msk.f32.mxu1 %vm18002_vm0, %v18003_v6 }
0x1583   : > { %v3744_v35 = vpop.f32.mrb[56].mxu1 }
0x1584   : > { %v15997_v20 = vpop.f32.mrb[57].mxu1  ;;  %16048 = vmatmul.mubr.msk.f32.gmra.mrb[68].mxu1 %vm1677_vm5, %v3744_v35 }
0x1585   : > { %16050 = vmatprep.mubr.msk.f32.mxu1 %vm18002_vm0, %v18003_v6 }
0x1587   : > { %v3749_v53 = vpop.f32.mrb[58].mxu1 }
0x1588   : > { %v16000_v48 = vpop.f32.mrb[59].mxu1  ;;  %16051 = vmatmul.mubr.msk.f32.gmra.mrb[70].mxu1 %vm1677_vm5, %v3749_v53 }
0x1589   : > { %16074 = vmatprep.mubr.msk.f32.mxu1 %vm18002_vm0, %v18003_v6 }
0x158b   : > { %v3978_v52 = vpop.f32.mrb[60].mxu1 }
0x158c   : > { %v16024_v54 = vpop.f32.mrb[61].mxu1  ;;  %16034 = vmatmul.mubr.msk.f32.vlgmr.msra.gmra.mrb[60].mxu0 %vm1677_vm5, %v3978_v52 }
0x158d   : > { %17035 = vmatpush3.bf16.xpose.msk.msra.mxu0 %vm18405_vm6, %v17033_v56  ;;  %16036 = vmatprep.mubr.msk.f32.mxu0 %vm18002_vm0, %v18003_v6 }
0x158e   : > { %16057 = vmatprep.subr.mxu0 %v18003_v6 }
0x158f   : > { %v3983_v55 = vpop.f32.mrb[62].mxu1 }
0x1590   : > { %v16027_v57 = vpop.f32.mrb[63].mxu1  ;;  %16037 = vmatmul.mubr.msk.f32.gmra.mrb[62].mxu0 %vm1677_vm5, %v3983_v55 }
0x1591   : > { %16039 = vmatprep.mubr.msk.f32.mxu0 %vm18002_vm0, %v18003_v6 }
0x1593   : > { %v3988_v58 = vpop.f32.mrb[64].mxu1 }
0x1594   : > { %v16030_v60 = vpop.f32.mrb[65].mxu1  ;;  %16040 = vmatmul.mubr.msk.f32.gmra.mrb[64].mxu0 %vm1677_vm5, %v3988_v58 }
0x1595   : > { %16058 = vmatpush3.xpose.msk.msra.mxu0 %vm1677_vm5, %v4181_v59  ;;  %16059 = vmatprep.mubr.msk.f32.mxu0 %vm18002_vm0, %v18003_v6 }
0x1596   : > { %16083 = vmatprep.subr.mxu0 %v18003_v6 }
0x1598   : > { %16060 = vmatmul.mubr.msk.f32.vlgmr.msra.gmra.mrb[66].mxu0 %vm1677_vm5, %v4171_v10 }
0x1599   : > { %16062 = vmatprep.mubr.msk.f32.mxu0 %vm18002_vm0, %v18003_v6 }
0x159c   : > { %16063 = vmatmul.mubr.msk.f32.gmra.mrb[68].mxu0 %vm1677_vm5, %v4173_v61 }
0x159d   : > { %16065 = vmatprep.mubr.msk.f32.mxu0 %vm18002_vm0, %v18003_v6 }
0x15a0   : > { %16066 = vmatmul.mubr.msk.f32.gmra.mrb[70].mxu0 %vm1677_vm5, %v4175_v62 }
0x15a1   : > { %16085 = vmatprep.mubr.msk.f32.mxu0 %vm18002_vm0, %v18003_v6 }
0x1653   : > { %v4156_v63 = vpop.f32.mrb[66].mxu1 }
0x1654   : > { %v16046_v0 = vpop.f32.mrb[67].mxu1 }
0x1657   : > { %v4161_v25 = vpop.f32.mrb[68].mxu1 }
0x1658   : > { %v16049_v1 = vpop.f32.mrb[69].mxu1 }
0x165b   : > { %v4166_v4 = vpop.f32.mrb[70].mxu1 }
0x165c   : > { %v16052_v5 = vpop.f32.mrb[71].mxu1 }
0x165f   : > { %v4067_v7 = vpop.f32.mrb[60].mxu0 }
0x1660   : > { %v18899_v8 = vadd.f32 %v4156_v63, %v4067_v7  ;;  %v16035_v9 = vpop.f32.mrb[61].mxu0 }
0x1661   : > { %v14802_v9 = vld [vmem:[%s20399_s13 + $0x30] sm:$0xff] }
0x1662   : > { %16084 = vmatpush3.msra.mxu0 %v14802_v9 }
0x1663   : > { %v4072_v11 = vpop.f32.mrb[62].mxu0  ;;  %17043 = vmatprep.subr.bf16.mxu0 %v18001_v3 }
0x1664   : > { %v18901_v12 = vadd.f32 %v4161_v25, %v4072_v11  ;;  %v16038_v13 = vpop.f32.mrb[63].mxu0 }
0x1667   : > { %v4077_v14 = vpop.f32.mrb[64].mxu0 }
0x1668   : > { %v18903_v15 = vadd.f32 %v4166_v4, %v4077_v14  ;;  %v16041_v17 = vpop.f32.mrb[65].mxu0 }
0x166b   : > { %v4260_v29 = vpop.f32.mrb[66].mxu0 }
0x166c   : > { %v4274_v19 = vmul.f32 0.35355338, %v4260_v29  ;;  %v16061_v21 = vpop.f32.mrb[67].mxu0 }
0x166e   : > { %v4277_v22 = vsel %vm1773_vm7, %v4274_v19, -inf }
0x166f   : > { %4278 = vmax.xlane.f32.xlu1 %v4277_v22  ;;  %v4265_v26 = vpop.f32.mrb[68].mxu0 }
0x1670   : > { %v4275_v28 = vmul.f32 0.35355338, %v4265_v26  ;;  %v16064_v31 = vpop.f32.mrb[69].mxu0 }
0x1672   : > { %v4280_v32 = vsel %vm1773_vm7, %v4275_v28, -inf }
0x1673   : > { %4281 = vmax.xlane.f32.xlu0 %v4280_v32  ;;  %v4270_v34 = vpop.f32.mrb[70].mxu0 }
0x1674   : > { %v4276_v38 = vmul.f32 0.35355338, %v4270_v34  ;;  %v16067_v24 = vpop.f32.mrb[71].mxu0 }
0x1676   : > { %v4283_v39 = vsel %vm1780_vm8, %v4276_v38, -inf }
0x1677   : > { %4284 = vmax.xlane.f32.xlu0 %v4283_v39 }
0x1680   : > { %17437 = vrot.lane.b32.xlu1 %v18760_v33, %s20429_s17 }
0x16fc   : > { %v4279_v40 = vpop.xlane.xlu1 %4278 }
0x16fd   : > { %v4286_v23 = vsub.f32 %v4274_v19, %v4279_v40 }
0x16ff   : > { %v4289_v41 = vmul.f32 1.442695, %v4286_v23 }
0x1700   : > { %v17438_v27 = vpop.permute.xlu1 %17437  ;;  %v4282_v42 = vpop.xlane.xlu0 %4281 }
0x1701   : > { %17703 = vpow2.f32 %v4289_v41  ;;  %v17440_v18 = vunpack.i.h.bf16 %v17438_v27  ;;  %v17439_v16 = vunpack.i.l.bf16 %v17438_v27  ;;  %v4287_v30 = vsub.f32 %v4275_v28, %v4282_v42 }
0x1703   : > { %v17037_v43 = vpack.c.bf16 %v17440_v18, %v17439_v16  ;;  %v4291_v35 = vmul.f32 1.442695, %v4287_v30 }
0x1704   : > { %v4285_v50 = vpop.xlane.xlu0 %4284 }
0x1705   : > { %17705 = vpow2.f32 %v4291_v35  ;;  %v4288_v20 = vsub.f32 %v4276_v38, %v4285_v50  ;;  %17038 = vmatpush3.bf16.msra.mxu1 %v17037_v43 }
0x1706   : > { %16072 = vmatprep.subr.mxu1 %v18003_v6 }
0x1707   : > { %v4293_v44 = vmul.f32 1.442695, %v4288_v20 }
0x1709   : > { %17707 = vpow2.f32 %v4293_v44 }
0x170b   : > { %v17704_v45 = vpop.eup %17703 }
0x170c   : > { %v4295_v53 = vsel %vm1773_vm7, %v17704_v45, 0.0 }
0x170d   : > { %4296 = vadd.xlane.f32.xlu0 %v4295_v53 }
0x170f   : > { %v17706_v48 = vpop.eup %17705 }
0x1710   : > { %v4298_v56 = vsel %vm1773_vm7, %v17706_v48, 0.0 }
0x1711   : > { %4299 = vadd.xlane.f32.xlu1 %v4298_v56 }
0x1713   : > { %v17708_v52 = vpop.eup %17707 }
0x1714   : > { %v4301_v54 = vsel %vm1780_vm8, %v17708_v52, 0.0 }
0x1715   : > { %4302 = vadd.xlane.f32.xlu0 %v4301_v54 }
0x1722   : > { %17442 = vrot.lane.b32.xlu1 %v18760_v33, %s20430_s19 }
0x1726   : > { %4511 = vrot.lane.b32.xlu1 %v18764_v51, %s20430_s19 }
0x172a   : > { %4501 = vrot.lane.b32.xlu1 %v18754_v46, %s20431_s20 }
0x172b   : > { %4314 = vrot.lane.b32.xlu0 %v18764_v51, %s20429_s17 }
0x172e   : > { %4505 = vrot.lane.b32.xlu1 %v18764_v51, %s20431_s20 }
0x172f   : > { %4503 = vrot.lane.b32.xlu0 %v18756_v47, %s20431_s20 }
0x179a   : > { %v4297_v55 = vpop.xlane.xlu0 %4296 }
0x179b   : > { %17709 = vrcp.f32 %v4297_v55 }
0x179e   : > { %v4300_v57 = vpop.xlane.xlu1 %4299 }
0x179f   : > { %17711 = vrcp.f32 %v4300_v57 }
0x17a2   : > { %v4303_v58 = vpop.xlane.xlu0 %4302  ;;  %v17443_v60 = vpop.permute.xlu1 %17442 }
0x17a3   : > { %17713 = vrcp.f32 %v4303_v58  ;;  %v17445_v46 = vunpack.i.h.bf16 %v17443_v60  ;;  %v17444_v62 = vunpack.i.l.bf16 %v17443_v60  ;;  %v14803_v60 = vld [vmem:[%s20399_s13 + $0x38] sm:$0xff]  ;;  %s20434_s13 = sld [smem:[#allocation6_spill]] }
0x17a5   : > { %v17710_v59 = vpop.eup %17709  ;;  %v17040_v0 = vpack.c.bf16 %v17445_v46, %v17444_v62 }
0x17a6   : > { %v4307_v10 = vmul.f32 %v17710_v59, %v17704_v45  ;;  %v4315_v61 = vpop.permute.xlu0 %4314  ;;  %v4512_v4 = vpop.permute.xlu1 %4511 }
0x17a7   : > { %16073 = vmatpush3.msk.msra.mxu1 %vm1825_vm9, %v4315_v61 }
0x17a8   : > { %16075 = vmatmul.mubr.msk.f32.vlgmr.msra.gmra.mrb[72].mxu1 %vm1773_vm7, %v4307_v10  ;;  %17039 = vmatprep.subr.bf16.mxu1 %v18001_v3 }
0x17a9   : > { %v17712_v63 = vpop.eup %17711  ;;  %16077 = vmatprep.mubr.msk.f32.mxu1 %vm18002_vm0, %v18003_v6 }
0x17aa   : > { %v4308_v47 = vmul.f32 %v17712_v63, %v17706_v48  ;;  %v4502_v5 = vpop.permute.xlu1 %4501  ;;  %v4504_v37 = vpop.permute.xlu0 %4503 }
0x17ac   : > { %16078 = vmatmul.mubr.msk.f32.gmra.mrb[74].mxu1 %vm1773_vm7, %v4308_v47 }
0x17ad   : > { %v17714_v25 = vpop.eup %17713  ;;  %16080 = vmatprep.mubr.msk.f32.mxu1 %vm18002_vm0, %v18003_v6 }
0x17ae   : > { %17042 = vmatpush3.bf16.xpose.msk.msra.mxu1 %vm18405_vm6, %v17040_v0  ;;  %v4309_v1 = vmul.f32 %v17714_v25, %v17708_v52  ;;  %v4506_v7 = vpop.permute.xlu1 %4505  ;;  %vm19381_vm6 = vmpackc.low %vm5450_vm2, %vm5450_vm2 }
0x17af   : > { %16098 = vmatprep.subr.mxu1 %v18003_v6 }
0x17b0   : > { %16081 = vmatmul.mubr.msk.f32.gmra.mrb[76].mxu1 %vm1773_vm7, %v4309_v1 }
0x17b1   : > { %16100 = vmatprep.mubr.msk.f32.mxu1 %vm18002_vm0, %v18003_v6 }
0x17b6   : > { %16099 = vmatpush3.xpose.msk.msra.mxu1 %vm1677_vm5, %v4512_v4 }
0x17b7   : > { %16124 = vmatprep.subr.mxu1 %v18003_v6 }
0x17b9   : > { %16101 = vmatmul.mubr.msk.f32.vlgmr.msra.gmra.mrb[78].mxu1 %vm1677_vm5, %v4502_v5 }
0x17ba   : > { %16103 = vmatprep.mubr.msk.f32.mxu1 %vm18002_vm0, %v18003_v6  ;;  %16125 = vmatpush3.msra.mxu1 %v14803_v60  ;;  %v14869_v60 = vld [vmem:[%s20397_s21 + $0x38] sm:$0xff] }
0x17bb   : > { %17052 = vmatprep.subr.bf16.mxu1 %v18001_v3 }
0x17bd   : > { %16104 = vmatmul.mubr.msk.f32.gmra.mrb[80].mxu1 %vm1677_vm5, %v4504_v37 }
0x17be   : > { %16106 = vmatprep.mubr.msk.f32.mxu1 %vm18002_vm0, %v18003_v6 }
0x17c1   : > { %16107 = vmatmul.mubr.msk.f32.gmra.mrb[82].mxu1 %vm1677_vm5, %v4506_v7 }
0x17c2   : > { %16126 = vmatprep.mubr.msk.f32.mxu1 %vm18002_vm0, %v18003_v6 }
0x187b   : > { %v4395_v11 = vpop.f32.mrb[72].mxu1 }
0x187c   : > { %v16076_v13 = vpop.f32.mrb[73].mxu1  ;;  %16086 = vmatmul.mubr.msk.f32.vlgmr.msra.gmra.mrb[72].mxu0 %vm1677_vm5, %v4395_v11 }
0x187d   : > { %16088 = vmatprep.mubr.msk.f32.mxu0 %vm18002_vm0, %v18003_v6 }
0x187f   : > { %v4400_v14 = vpop.f32.mrb[74].mxu1 }
0x1880   : > { %v16079_v17 = vpop.f32.mrb[75].mxu1  ;;  %16089 = vmatmul.mubr.msk.f32.gmra.mrb[74].mxu0 %vm1677_vm5, %v4400_v14 }
0x1881   : > { %16091 = vmatprep.mubr.msk.f32.mxu0 %vm18002_vm0, %v18003_v6 }
0x1883   : > { %v4405_v29 = vpop.f32.mrb[76].mxu1 }
0x1884   : > { %v16082_v19 = vpop.f32.mrb[77].mxu1  ;;  %16092 = vmatmul.mubr.msk.f32.gmra.mrb[76].mxu0 %vm1677_vm5, %v4405_v29  ;;  %v14861_v29 = vld [vmem:[%s20395_s24 + $0x1] ss:$0 sm:$0xff]  ;;  %s20443_s24 = sld [smem:[#allocation23_spill]] }
0x1885   : > { %16115 = vmatprep.mubr.msk.f32.mxu0 %vm18002_vm0, %v18003_v6 }
0x188c   : > { %v4591_v21 = vpop.f32.mrb[78].mxu1 }
0x188d   : > { %v4605_v22 = vmul.f32 0.35355338, %v4591_v21  ;;  %v16102_v26 = vpop.f32.mrb[79].mxu1 }
0x188f   : > { %v4608_v28 = vsel %vm1773_vm7, %v4605_v22, -inf }
0x1890   : > { %4609 = vmax.xlane.f32.xlu0 %v4608_v28  ;;  %v4596_v31 = vpop.f32.mrb[80].mxu1 }
0x1891   : > { %v4606_v32 = vmul.f32 0.35355338, %v4596_v31  ;;  %v16105_v34 = vpop.f32.mrb[81].mxu1 }
0x1893   : > { %v4611_v38 = vsel %vm1773_vm7, %v4606_v32, -inf }
0x1894   : > { %4612 = vmax.xlane.f32.xlu1 %v4611_v38  ;;  %v4601_v24 = vpop.f32.mrb[82].mxu1 }
0x1895   : > { %v4607_v39 = vmul.f32 0.35355338, %v4601_v24  ;;  %v16108_v40 = vpop.f32.mrb[83].mxu1 }
0x1897   : > { %v4614_v23 = vsel %vm1780_vm8, %v4607_v39, -inf }
0x1898   : > { %4615 = vmax.xlane.f32.xlu0 %v4614_v23 }
0x191d   : > { %v4610_v41 = vpop.xlane.xlu0 %4609 }
0x191e   : > { %v4617_v27 = vsub.f32 %v4605_v22, %v4610_v41 }
0x1920   : > { %v4620_v42 = vmul.f32 1.442695, %v4617_v27 }
0x1921   : > { %v4613_v18 = vpop.xlane.xlu1 %4612 }
0x1922   : > { %17715 = vpow2.f32 %v4620_v42  ;;  %v4618_v16 = vsub.f32 %v4606_v32, %v4613_v18 }
0x1924   : > { %v4622_v30 = vmul.f32 1.442695, %v4618_v16 }
0x1925   : > { %v4616_v43 = vpop.xlane.xlu0 %4615 }
0x1926   : > { %17717 = vpow2.f32 %v4622_v30  ;;  %v4619_v35 = vsub.f32 %v4607_v39, %v4616_v43 }
0x1928   : > { %v4624_v50 = vmul.f32 1.442695, %v4619_v35 }
0x192a   : > { %17719 = vpow2.f32 %v4624_v50 }
0x192c   : > { %v17716_v20 = vpop.eup %17715 }
0x192d   : > { %v4626_v44 = vsel %vm1773_vm7, %v17716_v20, 0.0 }
0x192e   : > { %4627 = vadd.xlane.f32.xlu0 %v4626_v44 }
0x1930   : > { %v17718_v45 = vpop.eup %17717 }
0x1931   : > { %v4629_v53 = vsel %vm1773_vm7, %v17718_v45, 0.0 }
0x1932   : > { %4630 = vadd.xlane.f32.xlu0 %v4629_v53 }
0x1934   : > { %v17720_v48 = vpop.eup %17719 }
0x1935   : > { %v4632_v56 = vsel %vm1780_vm8, %v17720_v48, 0.0 }
0x1936   : > { %4633 = vadd.xlane.f32.xlu1 %v4632_v56 }
0x1947   : > { %4645 = vrot.lane.b32.xlu1 %v18764_v51, %s20432_s25 }
0x1948   : > { %17447 = vrot.lane.b32.xlu0 %v18760_v33, %s20432_s25 }
0x194f   : > { %v4484_v52 = vpop.f32.mrb[72].mxu0 }
0x1950   : > { %v4498_v54 = vadd.f32 %v4484_v52, %v18899_v8  ;;  %v16087_v55 = vpop.f32.mrb[73].mxu0 }
0x1951   : > { %v14866_v55 = vld [vmem:[%s20397_s21 + $0x20] sm:$0xff] }
0x1953   : > { %v4489_v57 = vpop.f32.mrb[74].mxu0 }
0x1954   : > { %v4499_v58 = vadd.f32 %v4489_v57, %v18901_v12  ;;  %v16090_v59 = vpop.f32.mrb[75].mxu0  ;;  %v14867_v57 = vld [vmem:[%s20397_s21 + $0x28] sm:$0xff] }
0x1955   : > { %v14868_v59 = vld [vmem:[%s20397_s21 + $0x30] sm:$0xff] }
0x1957   : > { %v4494_v10 = vpop.f32.mrb[76].mxu0 }
0x1958   : > { %v4500_v61 = vadd.f32 %v4494_v10, %v18903_v15  ;;  %v16093_v46 = vpop.f32.mrb[77].mxu0  ;;  %v17050_v10 = vpack.c.bf16 %v14869_v60, %v14868_v59 }
0x19bb   : > { %v4628_v51 = vpop.xlane.xlu0 %4627 }
0x19bc   : > { %17721 = vrcp.f32 %v4628_v51 }
0x19bf   : > { %v4631_v62 = vpop.xlane.xlu0 %4630 }
0x19c0   : > { %17723 = vrcp.f32 %v4631_v62 }
0x19c3   : > { %v4634_v33 = vpop.xlane.xlu1 %4633  ;;  %v17448_v63 = vpop.permute.xlu0 %17447 }
0x19c4   : > { %v17450_v8 = vunpack.i.h.bf16 %v17448_v63  ;;  %v17449_v47 = vunpack.i.l.bf16 %v17448_v63  ;;  %17725 = vrcp.f32 %v4634_v33 }
0x19c6   : > { %v17044_v0 = vpack.c.bf16 %v17450_v8, %v17449_v47  ;;  %v17722_v12 = vpop.eup %17721 }
0x19c7   : > { %v4638_v25 = vmul.f32 %v17722_v12, %v17716_v20  ;;  %v4646_v1 = vpop.permute.xlu1 %4645 }
0x19c8   : > { %17045 = vmatpush3.bf16.msra.mxu0 %v17044_v0 }
0x19c9   : > { %16113 = vmatprep.subr.mxu0 %v18003_v6 }
0x19ca   : > { %v17724_v4 = vpop.eup %17723 }
0x19cb   : > { %v4639_v15 = vmul.f32 %v17724_v4, %v17718_v45  ;;  %v14865_v4 = vld [vmem:[%s20398_s14 + $0x1] ss:$0 sm:$0xff]  ;;  %s14716_s14 = sshll.u32 %s18323_s2, 3  ;;  %s20309_s2 = smov 124  }
0x19cc   : > { %16114 = vmatpush3.msk.msra.mxu0 %vm1825_vm9, %v4646_v1  ;;  %s1365_s21 = scalar_lea.vmem %s20434_s13, %s14716_s14  ;;  %s20435_s13 = sld [smem:[#allocation24_spill]] }
0x19cd   : > { %16116 = vmatmul.mubr.msk.f32.vlgmr.msra.gmra.mrb[78].mxu0 %vm1773_vm7, %v4638_v25  ;;  %17046 = vmatprep.subr.bf16.mxu0 %v18001_v3  ;;  %v14864_v25 = vld [vmem:[%s20394_s27 + $0x1] ss:$0 sm:$0xff]  ;;  %s20307_s14 = smov 92   ;;  %s20444_s27 = sld [smem:[#allocation11_spill]] }
0x19ce   : > { %16118 = vmatprep.mubr.msk.f32.mxu0 %vm18002_vm0, %v18003_v6  ;;  %v17726_v5 = vpop.eup %17725 }
0x19cf   : > { %v4640_v37 = vmul.f32 %v17726_v5, %v17720_v48 }
0x19d1   : > { %16119 = vmatmul.mubr.msk.f32.gmra.mrb[80].mxu0 %vm1773_vm7, %v4639_v15 }
0x19d2   : > { %16121 = vmatprep.mubr.msk.f32.mxu0 %vm18002_vm0, %v18003_v6 }
0x19d5   : > { %16122 = vmatmul.mubr.msk.f32.gmra.mrb[82].mxu0 %vm1773_vm7, %v4640_v37 }
0x19d6   : > { %16143 = vmatprep.mubr.msk.f32.mxu0 %vm18002_vm0, %v18003_v6 }
0x1aa0   : > { %v4726_v7 = vpop.f32.mrb[78].mxu0 }
0x1aa1   : > { %v16117_v9 = vpop.f32.mrb[79].mxu0  ;;  %16127 = vmatmul.mubr.msk.f32.vlgmr.msra.gmra.mrb[84].mxu1 %vm1677_vm5, %v4726_v7 }
0x1aa2   : > { %16129 = vmatprep.mubr.msk.f32.mxu1 %vm18002_vm0, %v18003_v6 }
0x1aa4   : > { %v4731_v11 = vpop.f32.mrb[80].mxu0 }
0x1aa5   : > { %v16120_v13 = vpop.f32.mrb[81].mxu0  ;;  %16130 = vmatmul.mubr.msk.f32.gmra.mrb[86].mxu1 %vm1677_vm5, %v4731_v11 }
0x1aa6   : > { %16132 = vmatprep.mubr.msk.f32.mxu1 %vm18002_vm0, %v18003_v6 }
0x1aa8   : > { %v4736_v14 = vpop.f32.mrb[82].mxu0 }
0x1aa9   : > { %v16123_v17 = vpop.f32.mrb[83].mxu0  ;;  %16133 = vmatmul.mubr.msk.f32.gmra.mrb[88].mxu1 %vm1677_vm5, %v4736_v14 }
0x1aaa   : > { %16168 = vmatprep.mubr.msk.f32.mxu1 %vm18002_vm0, %v18003_v6 }
0x1b74   : > { %v4815_v19 = vpop.f32.mrb[84].mxu1 }
0x1b75   : > { %v4829_v21 = vadd.f32 %v4815_v19, %v4498_v54  ;;  %v16128_v22 = vpop.f32.mrb[85].mxu1  ;;  %v14875_v19 = vld [vmem:[%s20400_s9 + $0x40] sm:$0xff] }
0x1b77   : > { %v4838_v26 = vadd.f32 %v14861_v29, %v4829_v21  ;;  %v14876_v21 = vld [vmem:[%s20400_s9 + $0x48] sm:$0xff] }
0x1b78   : > { %v4820_v28 = vpop.f32.mrb[86].mxu1  ;;  %v17053_v22 = vpack.c.bf16 %v14876_v21, %v14875_v19 }
0x1b79   : > { %v19000_v31 = vadd.f32 %v4838_v26, %v18716_v36  ;;  %v4830_v32 = vadd.f32 %v4820_v28, %v4499_v58  ;;  %v16131_v34 = vpop.f32.mrb[87].mxu1  ;;  %v17047_v58 = vpack.c.bf16 %v14867_v57, %v14866_v55  ;;  %v14877_v26 = vld [vmem:[%s20400_s9 + $0x50] sm:$0xff]  ;;  %v14878_v28 = vld [vmem:[%s20400_s9 + $0x58] sm:$0xff] }
0x1b7a   : > { %17054 = vmatpush3.bf16.msra.mxu1 %v17053_v22  ;;  %v14879_v34 = vld [vmem:[%s20400_s9 + $0x60] sm:$0xff] }
0x1b7b   : > { %v4839_v38 = vadd.f32 %v14861_v29, %v4830_v32  ;;  %v4848_v24 = vsel %vm1503_vm3, %v19000_v31, 0.0  ;;  %17048 = vmatpush3.bf16.msra.mxu0 %v17047_v58  ;;  %17055 = vmatprep.subr.bf16.mxu1 %v18001_v3  ;;  %v17056_v32 = vpack.c.bf16 %v14878_v28, %v14877_v26 }
0x1b7c   : > { %4849 = vadd.xlane.f32.xlu1 %v4848_v24  ;;  %v4825_v39 = vpop.f32.mrb[88].mxu1  ;;  %17049 = vmatprep.subr.bf16.mxu0 %v18001_v3 }
0x1b7d   : > { %v19005_v40 = vadd.f32 %v4839_v38, %v18721_v49  ;;  %v4831_v23 = vadd.f32 %v4825_v39, %v4500_v61  ;;  %v16134_v41 = vpop.f32.mrb[89].mxu1  ;;  %v14880_v38 = vld [vmem:[%s20400_s9 + $0x68] sm:$0xff]  ;;  %v14881_v39 = vld [vmem:[%s20400_s9 + $0x70] sm:$0xff] }
0x1b7e   : > { %17057 = vmatpush3.bf16.msra.mxu1 %v17056_v32  ;;  %v17059_v24 = vpack.c.bf16 %v14880_v38, %v14879_v34 }
0x1b7f   : > { %v4840_v27 = vadd.f32 %v14861_v29, %v4831_v23  ;;  %v4851_v42 = vsel %vm1503_vm3, %v19005_v40, 0.0  ;;  %17051 = vmatpush3.bf16.msra.mxu0 %v17050_v10  ;;  %17058 = vmatprep.subr.bf16.mxu1 %v18001_v3  ;;  %v14882_v23 = vld [vmem:[%s20400_s9 + $0x78] sm:$0xff]  ;;  %s20433_s9 = sld [smem:[#allocation26_spill]] }
0x1b80   : > { %4852 = vadd.xlane.f32.xlu0 %v4851_v42  ;;  %17064 = vmatprep.subr.bf16.mxu0 %v18001_v3  ;;  %v17062_v41 = vpack.c.bf16 %v14882_v23, %v14881_v39 }
0x1b81   : > { %v19010_v36 = vadd.f32 %v4840_v27, %v18726_v2  ;;  %v14871_v27 = vld [vmem:[%s20392_s30 + $0x1] ss:$0 sm:$0xff]  ;;  %s20447_s30 = sld [smem:[#allocation18_spill]] }
0x1b82   : > { %17060 = vmatpush3.bf16.msra.mxu1 %v17059_v24 }
0x1b83   : > { %v4854_v18 = vsel %vm1510_vm4, %v19010_v36, 0.0  ;;  %17061 = vmatprep.subr.bf16.mxu1 %v18001_v3 }
0x1b84   : > { %4855 = vadd.xlane.f32.xlu0 %v4854_v18 }
0x1b86   : > { %17063 = vmatpush3.bf16.msra.mxu1 %v17062_v41 }
0x1b87   : > { %17070 = vmatprep.subr.bf16.mxu1 %v18001_v3 }
0x1c09   : > { %v4850_v16 = vpop.xlane.xlu1 %4849 }
0x1c0a   : > { %v4857_v30 = vmul.f32 0.03125, %v4850_v16 }
0x1c0c   : > { %v4860_v43 = vsub.f32 %v19000_v31, %v4857_v30 }
0x1c0d   : > { %v4853_v49 = vpop.xlane.xlu0 %4852 }
0x1c0e   : > { %v4858_v35 = vmul.f32 0.03125, %v4853_v49  ;;  %v4863_v50 = vmul.f32 %v4860_v43, %v4860_v43 }
0x1c10   : > { %v4861_v20 = vsub.f32 %v19005_v40, %v4858_v35  ;;  %v4866_v44 = vsel %vm1503_vm3, %v4863_v50, 0.0 }
0x1c11   : > { %4867 = vadd.xlane.f32.xlu1 %v4866_v44  ;;  %v4856_v2 = vpop.xlane.xlu0 %4855 }
0x1c12   : > { %v4859_v45 = vmul.f32 0.03125, %v4856_v2  ;;  %v4864_v53 = vmul.f32 %v4861_v20, %v4861_v20 }
0x1c14   : > { %v4862_v48 = vsub.f32 %v19010_v36, %v4859_v45  ;;  %v4869_v56 = vsel %vm1503_vm3, %v4864_v53, 0.0 }
0x1c15   : > { %4870 = vadd.xlane.f32.xlu0 %v4869_v56 }
0x1c16   : > { %v4865_v52 = vmul.f32 %v4862_v48, %v4862_v48 }
0x1c18   : > { %v4872_v54 = vsel %vm1510_vm4, %v4865_v52, 0.0 }
0x1c19   : > { %4873 = vadd.xlane.f32.xlu1 %v4872_v54 }
0x1c9e   : > { %v4868_v61 = vpop.xlane.xlu1 %4867 }
0x1c9f   : > { %v4875_v46 = vmul.f32 0.03125, %v4868_v61 }
0x1ca1   : > { %v4878_v51 = vadd.f32 1e-12, %v4875_v46 }
0x1ca2   : > { %v4871_v62 = vpop.xlane.xlu0 %4870 }
0x1ca3   : > { %17727 = vrsqrt.f32 %v4878_v51  ;;  %v4876_v33 = vmul.f32 0.03125, %v4871_v62 }
0x1ca5   : > { %v4879_v63 = vadd.f32 1e-12, %v4876_v33 }
0x1ca6   : > { %v4874_v8 = vpop.xlane.xlu1 %4873 }
0x1ca7   : > { %17729 = vrsqrt.f32 %v4879_v63  ;;  %v4877_v47 = vmul.f32 0.03125, %v4874_v8 }
0x1ca9   : > { %v4880_v0 = vadd.f32 1e-12, %v4877_v47 }
0x1cab   : > { %17731 = vrsqrt.f32 %v4880_v0 }
0x1cad   : > { %v17728_v12 = vpop.eup %17727 }
0x1cae   : > { %v4884_v1 = vmul.f32 %v17728_v12, %v4860_v43 }
0x1cb0   : > { %v4893_v15 = vmul.f32 %v14864_v25, %v4884_v1 }
0x1cb1   : > { %v17730_v5 = vpop.eup %17729 }
0x1cb2   : > { %v4902_v37 = vadd.f32 %v14865_v4, %v4893_v15  ;;  %v4885_v7 = vmul.f32 %v17730_v5, %v4861_v20 }
0x1cb4   : > { %16144 = vmatmul.mubr.msk.f32.vlgmr.msra.gmra.mrb[84].mxu0 %vm1503_vm3, %v4902_v37  ;;  %v4894_v9 = vmul.f32 %v14864_v25, %v4885_v7 }
0x1cb5   : > { %v17732_v11 = vpop.eup %17731  ;;  %16146 = vmatprep.mubr.msk.f32.mxu0 %vm18002_vm0, %v18003_v6 }
0x1cb6   : > { %v4903_v13 = vadd.f32 %v14865_v4, %v4894_v9  ;;  %v4886_v14 = vmul.f32 %v17732_v11, %v4862_v48 }
0x1cb8   : > { %16147 = vmatmul.mubr.msk.f32.gmra.mrb[86].mxu0 %vm1503_vm3, %v4903_v13  ;;  %v4895_v17 = vmul.f32 %v14864_v25, %v4886_v14 }
0x1cb9   : > { %16149 = vmatprep.mubr.msk.f32.mxu0 %vm18002_vm0, %v18003_v6 }
0x1cba   : > { %v4904_v29 = vadd.f32 %v14865_v4, %v4895_v17 }
0x1cbc   : > { %16150 = vmatmul.mubr.msk.f32.gmra.mrb[88].mxu0 %vm1503_vm3, %v4904_v29 }
0x1cbd   : > { %16185 = vmatprep.mubr.msk.f32.mxu0 %vm18002_vm0, %v18003_v6 }
0x1d87   : > { %v4993_v42 = vpop.f32.mrb[84].mxu0 }
0x1d88   : > { %v19050_v18 = vadd.f32 %v14871_v27, %v4993_v42  ;;  %v16145_v16 = vpop.f32.mrb[85].mxu0 }
0x1d8a   : > { %v19053_v30 = vmul.f32 0.70710677, %v19050_v18 }
0x1d8b   : > { %v4998_v43 = vpop.f32.mrb[86].mxu0 }
0x1d8c   : > { %v5013_v49 = vand.u32 2147483647, %v19053_v30  ;;  %v19056_v35 = vadd.f32 %v14871_v27, %v4998_v43  ;;  %v16148_v50 = vpop.f32.mrb[87].mxu0  ;;  %vm5073_vm14 = vcmp.lt.f32.partialorder %v19053_v30, 0.0  ;;  %v5361_v30 = vld [vmem:[%s20433_s9 + $0x18] sm:$0xff] }
0x1d8e   : > { %v5016_v20 = vmul.f32 0.3275911, %v5013_v49  ;;  %v19059_v44 = vmul.f32 0.70710677, %v19056_v35  ;;  %v5055_v59 = vsub.f32 0.0, %v5013_v49 }
0x1d8f   : > { %v5003_v2 = vpop.f32.mrb[88].mxu0 }
0x1d90   : > { %v5019_v45 = vadd.f32 1.0, %v5016_v20  ;;  %v5014_v53 = vand.u32 2147483647, %v19059_v44  ;;  %v16151_v48 = vpop.f32.mrb[89].mxu0  ;;  %v19062_v56 = vadd.f32 %v14871_v27, %v5003_v2  ;;  %v5058_v61 = vmul.f32 %v5055_v59, %v5013_v49  ;;  %v5358_v2 = vld [vmem:[%s20433_s9] sm:$0xff] }
0x1d91   : > { %vm5074_vm15 = vcmp.lt.f32.partialorder %v19059_v44, 0.0 }
0x1d92   : > { %17733 = vrcp.f32 %v5019_v45  ;;  %v5017_v52 = vmul.f32 0.3275911, %v5014_v53  ;;  %v19065_v54 = vmul.f32 0.70710677, %v19062_v56  ;;  %v5056_v46 = vsub.f32 0.0, %v5014_v53  ;;  %v5359_v45 = vld [vmem:[%s20433_s9 + $0x8] sm:$0xff] }
0x1d93   : > { %v5061_v63 = vmul.f32 1.442695, %v5058_v61 }
0x1d94   : > { %v5020_v55 = vadd.f32 1.0, %v5017_v52  ;;  %v5015_v57 = vand.u32 2147483647, %v19065_v54  ;;  %v5059_v8 = vmul.f32 %v5056_v46, %v5014_v53  ;;  %v5007_v52 = vmul.f32 0.5, %v19050_v18  ;;  %v5360_v46 = vld [vmem:[%s20433_s9 + $0x10] sm:$0xff] }
0x1d95   : > { %v17074_v18 = vpack.c.bf16 %v5361_v30, %v5360_v46  ;;  %vm5075_vm1 = vcmp.lt.f32.partialorder %v19065_v54, 0.0  ;;  %v19091_v54 = vld [vmem:[%s1365_s21] sm:$0xff]  ;;  %s20436_s21 = sld [smem:[#allocation35_spill]] }
0x1d96   : > { %17735 = vrcp.f32 %v5020_v55  ;;  %v5018_v58 = vmul.f32 0.3275911, %v5015_v57  ;;  %v5057_v12 = vsub.f32 0.0, %v5015_v57  ;;  %v5063_v4 = vmul.f32 1.442695, %v5059_v8 }
0x1d98   : > { %v5021_v60 = vadd.f32 1.0, %v5018_v58  ;;  %v5060_v7 = vmul.f32 %v5057_v12, %v5015_v57 }
0x1d9a   : > { %17737 = vrcp.f32 %v5021_v60  ;;  %v5065_v19 = vmul.f32 1.442695, %v5060_v7  ;;  %v17071_v60 = vpack.c.bf16 %v5359_v45, %v5358_v2 }
0x1d9b   : > { %17739 = vpow2.f32 %v5061_v63  ;;  %v5257_v2 = vld [vmem:[%s20436_s21 + $0x8] sm:$0xff] }
0x1d9c   : > { %v17734_v10 = vpop.eup %17733  ;;  %17741 = vpow2.f32 %v5063_v4 }
0x1d9d   : > { %v5028_v51 = vmul.f32 1.0614054, %v17734_v10  ;;  %17743 = vpow2.f32 %v5065_v19 }
0x1d9f   : > { %v5031_v62 = vadd.f32 -1.4531521, %v5028_v51 }
0x1da0   : > { %v17736_v33 = vpop.eup %17735 }
0x1da1   : > { %v5034_v47 = vmul.f32 %v17734_v10, %v5031_v62  ;;  %v5029_v0 = vmul.f32 1.0614054, %v17736_v33  ;;  %v5008_v62 = vmul.f32 0.5, %v19056_v35  ;;  %v5009_v35 = vmul.f32 0.5, %v19062_v56  ;;  %v14884_v56 = vld [vmem:[%s20396_s6 + $0x1] ss:$0 sm:$0xff] }
0x1da2   : > { %s20437_s6 = sld [smem:[#allocation45_spill]] }
0x1da3   : > { %v5037_v25 = vadd.f32 1.4214138, %v5034_v47  ;;  %v5032_v1 = vadd.f32 -1.4531521, %v5029_v0 }
0x1da4   : > { %v17738_v15 = vpop.eup %17737 }
0x1da5   : > { %v5040_v5 = vmul.f32 %v17734_v10, %v5037_v25  ;;  %v5035_v37 = vmul.f32 %v17736_v33, %v5032_v1  ;;  %v5030_v9 = vmul.f32 1.0614054, %v17738_v15  ;;  %v17740_v38 = vpop.eup %17739 }
0x1da6   : > { %v17742_v16 = vpop.eup %17741 }
0x1da7   : > { %v5043_v11 = vadd.f32 -0.28449672, %v5040_v5  ;;  %v5038_v13 = vadd.f32 1.4214138, %v5035_v37  ;;  %v5033_v14 = vadd.f32 -1.4531521, %v5030_v9  ;;  %v17744_v58 = vpop.eup %17743 }
0x1da9   : > { %v5046_v17 = vmul.f32 %v17734_v10, %v5043_v11  ;;  %v5041_v29 = vmul.f32 %v17736_v33, %v5038_v13  ;;  %v5036_v21 = vmul.f32 %v17738_v15, %v5033_v14 }
0x1dab   : > { %v5049_v22 = vadd.f32 0.2548296, %v5046_v17  ;;  %v5044_v26 = vadd.f32 -0.28449672, %v5041_v29  ;;  %v5039_v28 = vadd.f32 1.4214138, %v5036_v21 }
0x1dad   : > { %v5052_v32 = vmul.f32 %v17734_v10, %v5049_v22  ;;  %v5047_v34 = vmul.f32 %v17736_v33, %v5044_v26  ;;  %v5042_v24 = vmul.f32 %v17738_v15, %v5039_v28 }
0x1daf   : > { %v5067_v39 = vmul.f32 %v17740_v38, %v5052_v32  ;;  %v5050_v23 = vadd.f32 0.2548296, %v5047_v34  ;;  %v5045_v41 = vadd.f32 -0.28449672, %v5042_v24 }
0x1db1   : > { %v5070_v27 = vsub.f32 1.0, %v5067_v39  ;;  %v5053_v42 = vmul.f32 %v17736_v33, %v5050_v23  ;;  %v5048_v43 = vmul.f32 %v17738_v15, %v5045_v41 }
0x1db3   : > { %v5076_v49 = vsub.f32 0.0, %v5070_v27  ;;  %v5068_v50 = vmul.f32 %v17742_v16, %v5053_v42  ;;  %v5051_v20 = vadd.f32 0.2548296, %v5048_v43 }
0x1db5   : > { %v5079_v53 = vsel %vm5073_vm14, %v5076_v49, %v5070_v27  ;;  %v5071_v48 = vsub.f32 1.0, %v5068_v50  ;;  %v5054_v57 = vmul.f32 %v17738_v15, %v5051_v20  ;;  %v14894_v49 = vld [vmem:[%s20435_s13] ss:$0 sm:$0xff] }
0x1db6   : > { %v5082_v55 = vadd.f32 1.0, %v5079_v53  ;;  %v5256_v20 = vld [vmem:[%s20436_s21] sm:$0xff]  ;;  %v5258_v53 = vld [vmem:[%s20436_s21 + $0x10] sm:$0xff] }
0x1db7   : > { %v5077_v59 = vsub.f32 0.0, %v5071_v48  ;;  %v5069_v61 = vmul.f32 %v17744_v58, %v5054_v57  ;;  %v17065_v45 = vpack.c.bf16 %v5257_v2, %v5256_v20 }
0x1db8   : > { %v5085_v10 = vmul.f32 %v5082_v55, %v5007_v52 }
0x1db9   : > { %v5080_v51 = vsel %vm5074_vm15, %v5077_v59, %v5071_v48  ;;  %v5072_v63 = vsub.f32 1.0, %v5069_v61  ;;  %17066 = vmatpush3.bf16.msra.mxu0 %v17065_v45  ;;  %v5259_v48 = vld [vmem:[%s20436_s21 + $0x18] sm:$0xff]  ;;  %s20316_s21 = smov 116  }
0x1dba   : > { %v5083_v33 = vadd.f32 1.0, %v5080_v51  ;;  %16169 = vmatmul.mubr.msk.f32.vlgmr.msra.gmra.mrb[90].mxu1 %vm3254_vm11, %v5085_v10  ;;  %17067 = vmatprep.subr.bf16.mxu0 %v18001_v3  ;;  %v17068_v52 = vpack.c.bf16 %v5259_v48, %v5258_v53 }
0x1dbb   : > { %16171 = vmatprep.mubr.msk.f32.mxu1 %vm18002_vm0, %v18003_v6  ;;  %17072 = vmatpush3.bf16.msra.mxu1 %v17071_v60  ;;  %v5078_v47 = vsub.f32 0.0, %v5072_v63 }
0x1dbc   : > { %v5086_v8 = vmul.f32 %v5083_v33, %v5008_v62  ;;  %17073 = vmatprep.subr.bf16.mxu1 %v18001_v3  ;;  %v14888_v62 = vld [vmem:[%s20437_s6] ss:$0 sm:$0xff]  ;;  %s20439_s6 = sld [smem:[#allocation7_spill]] }
0x1dbd   : > { %v5081_v44 = vsel %vm5075_vm1, %v5078_v47, %v5072_v63  ;;  %17069 = vmatpush3.bf16.msra.mxu0 %v17068_v52 }
0x1dbe   : > { %16172 = vmatmul.mubr.msk.f32.gmra.mrb[92].mxu1 %vm3254_vm11, %v5086_v8  ;;  %v5084_v0 = vadd.f32 1.0, %v5081_v44  ;;  %16205 = vmatprep.subr.mxu0 %v18003_v6 }
0x1dbf   : > { %16174 = vmatprep.mubr.msk.f32.mxu1 %vm18002_vm0, %v18003_v6  ;;  %17075 = vmatpush3.bf16.msra.mxu1 %v17074_v18 }
0x1dc0   : > { %16210 = vmatprep.subr.mxu1 %v18003_v6  ;;  %v5087_v12 = vmul.f32 %v5084_v0, %v5009_v35 }
0x1dc2   : > { %16175 = vmatmul.mubr.msk.f32.gmra.mrb[94].mxu1 %vm3254_vm11, %v5087_v12 }
0x1dc3   : > { %16202 = vmatprep.mubr.msk.f32.mxu1 %vm18002_vm0, %v18003_v6 }
0x1dc6   : > { %16203 = vmatmul.mubr.msk.f32.vlgmr.msra.gmra.mrb[96].mxu1 %vm1503_vm3, %v19091_v54 }
0x1dc7   : > { %16212 = vmatprep.mubr.msk.f32.mxu1 %vm18002_vm0, %v18003_v6 }
0x1e8d   : > { %v5180_v25 = vpop.f32.mrb[90].mxu1 }
0x1e8e   : > { %v5181_v1 = vadd.f32 %v14884_v56, %v5180_v25  ;;  %v16170_v4 = vpop.f32.mrb[91].mxu1 }
0x1e90   : > { %v5194_v15 = vadd.f32 %v5181_v1, %v19000_v31 }
0x1e91   : > { %v5185_v5 = vpop.f32.mrb[92].mxu1 }
0x1e92   : > { %v5186_v37 = vadd.f32 %v14884_v56, %v5185_v5  ;;  %v16173_v7 = vpop.f32.mrb[93].mxu1  ;;  %v5199_v9 = vsel %vm1503_vm3, %v5194_v15, 0.0 }
0x1e93   : > { %5200 = vadd.xlane.f32.xlu0 %v5199_v9 }
0x1e94   : > { %v5195_v11 = vadd.f32 %v5186_v37, %v19005_v40 }
0x1e95   : > { %v5190_v13 = vpop.f32.mrb[94].mxu1 }
0x1e96   : > { %v5202_v14 = vsel %vm1503_vm3, %v5195_v11, 0.0  ;;  %v5191_v17 = vadd.f32 %v14884_v56, %v5190_v13  ;;  %v16176_v29 = vpop.f32.mrb[95].mxu1 }
0x1e97   : > { %5203 = vadd.xlane.f32.xlu1 %v5202_v14 }
0x1e98   : > { %v5196_v19 = vadd.f32 %v5191_v17, %v19010_v36  ;;  %v19151_v17 = vld [vmem:[%s20439_s6] sm:$0xff] }
0x1e99   : > { %v5443_v31 = vpop.f32.mrb[96].mxu1 }
0x1e9a   : > { %v5205_v21 = vsel %vm1510_vm4, %v5196_v19, 0.0  ;;  %v16204_v22 = vpop.f32.mrb[97].mxu1  ;;  %v19108_v50 = vadd.f32 %v14894_v49, %v5443_v31 }
0x1e9b   : > { %5206 = vadd.xlane.f32.xlu0 %v5205_v21 }
0x1f20   : > { %v5201_v26 = vpop.xlane.xlu0 %5200 }
0x1f21   : > { %v5208_v28 = vmul.f32 0.03125, %v5201_v26 }
0x1f23   : > { %v5211_v32 = vsub.f32 %v5194_v15, %v5208_v28 }
0x1f24   : > { %v5204_v34 = vpop.xlane.xlu1 %5203 }
0x1f25   : > { %v5209_v38 = vmul.f32 0.03125, %v5204_v34  ;;  %v5214_v40 = vmul.f32 %v5211_v32, %v5211_v32 }
0x1f27   : > { %v5212_v24 = vsub.f32 %v5195_v11, %v5209_v38  ;;  %v5217_v39 = vsel %vm1503_vm3, %v5214_v40, 0.0 }
0x1f28   : > { %5218 = vadd.xlane.f32.xlu1 %v5217_v39  ;;  %v5207_v23 = vpop.xlane.xlu0 %5206 }
0x1f29   : > { %v5215_v36 = vmul.f32 %v5212_v24, %v5212_v24  ;;  %v5210_v41 = vmul.f32 0.03125, %v5207_v23 }
0x1f2b   : > { %v5220_v27 = vsel %vm1503_vm3, %v5215_v36, 0.0  ;;  %v5213_v42 = vsub.f32 %v5196_v19, %v5210_v41 }
0x1f2c   : > { %5221 = vadd.xlane.f32.xlu0 %v5220_v27 }
0x1f2d   : > { %v5216_v16 = vmul.f32 %v5213_v42, %v5213_v42 }
0x1f2f   : > { %v5223_v43 = vsel %vm1510_vm4, %v5216_v16, 0.0  ;;  %vm5786_vm4 = vcmask 1043456  }
0x1f30   : > { %5224 = vadd.xlane.f32.xlu1 %v5223_v43 }
0x1f41   : > { %5616 = vrot.lane.b32.xlu1 %v19108_v50, %s20307_s14  ;;  %s20438_s14 = sld [smem:[#allocation44_spill]] }
0x1f42   : > { %5448 = vrot.lane.b32.xlu0 %v19108_v50, %s20422_s22 }
0x1f45   : > { %5614 = vrot.lane.b32.xlu1 %v19108_v50, %s20309_s2  ;;  %s20311_s2 = smov 60  }
0x1f47   : > { %v14889_v63 = vld [vmem:[%s20438_s14] ss:$0 sm:$0xff]  ;;  %s20440_s14 = sld [smem:[#allocation25_spill]] }
0x1f4d   : > { %v5363_v20 = vld [vmem:[%s20440_s14] sm:$0xff] }
0x1f4e   : > { %v5782_v2 = vrot.slane %v5363_v20, 4 }
0x1fb5   : > { %v5219_v55 = vpop.xlane.xlu1 %5218 }
0x1fb6   : > { %v5226_v57 = vmul.f32 0.03125, %v5219_v55 }
0x1fb8   : > { %v5229_v58 = vadd.f32 1e-12, %v5226_v57 }
0x1fb9   : > { %v5222_v59 = vpop.xlane.xlu0 %5221 }
0x1fba   : > { %17745 = vrsqrt.f32 %v5229_v58  ;;  %v5227_v60 = vmul.f32 0.03125, %v5222_v59 }
0x1fbc   : > { %v5230_v10 = vadd.f32 1e-12, %v5227_v60 }
0x1fbd   : > { %v5225_v61 = vpop.xlane.xlu1 %5224  ;;  %v5449_v35 = vpop.permute.xlu0 %5448 }
0x1fbe   : > { %17747 = vrsqrt.f32 %v5230_v10  ;;  %v5228_v46 = vmul.f32 0.03125, %v5225_v61 }
0x1fc0   : > { %v5231_v30 = vadd.f32 1e-12, %v5228_v46 }
0x1fc1   : > { %v5617_v15 = vpop.permute.xlu1 %5616 }
0x1fc2   : > { %17749 = vrsqrt.f32 %v5231_v30 }
0x1fc4   : > { %v17746_v51 = vpop.eup %17745 }
0x1fc5   : > { %v5235_v33 = vmul.f32 %v17746_v51, %v5211_v32  ;;  %v5615_v5 = vpop.permute.xlu1 %5614 }
0x1fc7   : > { %v5244_v18 = vmul.f32 %v14888_v62, %v5235_v33 }
0x1fc8   : > { %v17748_v8 = vpop.eup %17747 }
0x1fc9   : > { %v5253_v47 = vadd.f32 %v14889_v63, %v5244_v18  ;;  %v5236_v44 = vmul.f32 %v17748_v8, %v5212_v24 }
0x1fcb   : > { %16186 = vmatmul.mubr.msk.f32.vlgmr.msra.gmra.mrb[90].mxu0 %vm1503_vm3, %v5253_v47  ;;  %v5245_v0 = vmul.f32 %v14888_v62, %v5236_v44 }
0x1fcc   : > { %16188 = vmatprep.mubr.msk.f32.mxu0 %vm18002_vm0, %v18003_v6  ;;  %16206 = vmatpush3.xpose.msk.msra.mxu0 %vm5450_vm2, %v5449_v35  ;;  %v17750_v12 = vpop.eup %17749 }
0x1fcd   : > { %v5254_v56 = vadd.f32 %v14889_v63, %v5245_v0  ;;  %16215 = vmatprep.subr.mxu0 %v18003_v6  ;;  %v5237_v25 = vmul.f32 %v17750_v12, %v5213_v42 }
0x1fcf   : > { %16189 = vmatmul.mubr.msk.f32.gmra.mrb[92].mxu0 %vm1503_vm3, %v5254_v56  ;;  %v5246_v1 = vmul.f32 %v14888_v62, %v5237_v25 }
0x1fd0   : > { %16191 = vmatprep.mubr.msk.f32.mxu0 %vm18002_vm0, %v18003_v6 }
0x1fd1   : > { %v5255_v4 = vadd.f32 %v14889_v63, %v5246_v1 }
0x1fd3   : > { %16192 = vmatmul.mubr.msk.f32.gmra.mrb[94].mxu0 %vm1503_vm3, %v5255_v4 }
0x1fd4   : > { %16207 = vmatprep.mubr.msk.f32.mxu0 %vm18002_vm0, %v18003_v6 }
0x1fd7   : > { %16208 = vmatmul.mubr.msk.f32.vlgmr.msra.gmra.mrb[96].mxu0 %vm5450_vm2, %v19108_v50 }
0x1fd8   : > { %16216 = vmatpush3.xpose.msk.msra.mxu0 %vm5450_vm2, %v5617_v15  ;;  %16217 = vmatprep.mubr.msk.f32.mxu0 %vm18002_vm0, %v18003_v6 }
0x1fd9   : > { %16225 = vmatprep.subr.mxu0 %v18003_v6 }
0x1fdb   : > { %16218 = vmatmul.mubr.msk.f32.vlgmr.msra.gmra.mrb[98].mxu0 %vm5450_vm2, %v5615_v5 }
0x1fdc   : > { %16227 = vmatprep.mubr.msk.f32.mxu0 %vm18002_vm0, %v18003_v6  ;;  %16226 = vmatpush3.msk.msra.mxu0 %vm5786_vm4, %v5782_v2 }
0x1fdd   : > { %16235 = vmatprep.subr.mxu0 %v18003_v6 }
0x209e   : > { %v19144_v37 = vpop.f32.mrb[90].mxu0 }
0x209f   : > { %v16187_v7 = vpop.f32.mrb[91].mxu0 }
0x20a2   : > { %v19146_v9 = vpop.f32.mrb[92].mxu0 }
0x20a3   : > { %v16190_v11 = vpop.f32.mrb[93].mxu0 }
0x20a6   : > { %v19148_v13 = vpop.f32.mrb[94].mxu0 }
0x20a7   : > { %v16193_v14 = vpop.f32.mrb[95].mxu0 }
0x20aa   : > { %v5521_v29 = vpop.f32.mrb[96].mxu0 }
0x20ab   : > { %v5525_v19 = vmul.f32 0.5, %v5521_v29  ;;  %v16209_v21 = vpop.f32.mrb[97].mxu0 }
0x20ad   : > { %v5526_v31 = vadd.f32 %v5525_v19, %v19151_v17  ;;  %v5364_v19 = vld [vmem:[%s20440_s14 + $0x8] sm:$0xff] }
0x20ae   : > { %v5688_v22 = vpop.f32.mrb[98].mxu0  ;;  %v6345_v21 = vrot.slane %v5364_v19, 4 }
0x20af   : > { %v5692_v26 = vmul.f32 0.5, %v5688_v22  ;;  %v16219_v28 = vpop.f32.mrb[99].mxu0  ;;  %v5527_v32 = vsel %vm1677_vm5, %v5526_v31, -inf }
0x20b0   : > { %5528 = vmax.xlane.f32.xlu1 %v5527_v32 }
0x20b1   : > { %v5693_v34 = vadd.f32 %v5692_v26, %v19151_v17 }
0x20b3   : > { %v5694_v38 = vsel %vm1677_vm5, %v5693_v34, -inf }
0x20b4   : > { %5695 = vmax.xlane.f32.xlu0 %v5694_v38 }
0x20c1   : > { %5538 = vrot.lane.b32.xlu1 %v19108_v50, %s20425_s3 }
0x20c5   : > { %5936 = vrot.lane.b32.xlu1 %v19108_v50, %s20423_s23 }
0x20c9   : > { %5934 = vrot.lane.b32.xlu1 %v19108_v50, %s20424_s16 }
0x213d   : > { %v5529_v40 = vpop.xlane.xlu1 %5528 }
0x213e   : > { %v5530_v24 = vsub.f32 %v5526_v31, %v5529_v40 }
0x2140   : > { %v5531_v39 = vmul.f32 1.442695, %v5530_v24 }
0x2141   : > { %v5539_v23 = vpop.permute.xlu1 %5538  ;;  %v5696_v36 = vpop.xlane.xlu0 %5695 }
0x2142   : > { %17751 = vpow2.f32 %v5531_v39  ;;  %v5697_v41 = vsub.f32 %v5693_v34, %v5696_v36  ;;  %16211 = vmatpush3.msra.mxu1 %v5539_v23 }
0x2143   : > { %16220 = vmatprep.subr.mxu1 %v18003_v6 }
0x2144   : > { %v5698_v27 = vmul.f32 1.442695, %v5697_v41 }
0x2145   : > { %v5937_v10 = vpop.permute.xlu1 %5936 }
0x2146   : > { %17753 = vpow2.f32 %v5698_v27 }
0x2149   : > { %v5935_v30 = vpop.permute.xlu1 %5934 }
0x214c   : > { %v17752_v42 = vpop.eup %17751 }
0x214d   : > { %v5533_v16 = vsel %vm1677_vm5, %v17752_v42, 0.0 }
0x214e   : > { %5534 = vadd.xlane.f32.xlu0 %v5533_v16 }
0x2150   : > { %v17754_v43 = vpop.eup %17753 }
0x2151   : > { %v5700_v49 = vsel %vm1677_vm5, %v17754_v43, 0.0 }
0x2152   : > { %5701 = vadd.xlane.f32.xlu0 %v5700_v49 }
0x2168   : > { %5705 = vrot.lane.b32.xlu0 %v19108_v50, %s20311_s2  ;;  %s20313_s2 = smov 84  }
0x21db   : > { %v5535_v45 = vpop.xlane.xlu0 %5534 }
0x21dc   : > { %17755 = vrcp.f32 %v5535_v45 }
0x21df   : > { %v5702_v53 = vpop.xlane.xlu0 %5701 }
0x21e0   : > { %17757 = vrcp.f32 %v5702_v53 }
0x21e3   : > { %v5706_v55 = vpop.permute.xlu0 %5705 }
0x21e6   : > { %v17756_v48 = vpop.eup %17755 }
0x21e7   : > { %v5537_v52 = vmul.f32 %v17756_v48, %v17752_v42 }
0x21e9   : > { %16213 = vmatmul.mubr.msk.f32.vlgmr.msra.gmra.mrb[98].mxu1 %vm1677_vm5, %v5537_v52 }
0x21ea   : > { %v17758_v57 = vpop.eup %17757  ;;  %16221 = vmatpush3.msra.mxu1 %v5706_v55  ;;  %16222 = vmatprep.mubr.msk.f32.mxu1 %vm18002_vm0, %v18003_v6 }
0x21eb   : > { %v5704_v58 = vmul.f32 %v17758_v57, %v17754_v43  ;;  %16230 = vmatprep.subr.mxu1 %v18003_v6 }
0x21ed   : > { %16223 = vmatmul.mubr.msk.f32.vlgmr.msra.gmra.mrb[100].mxu1 %vm1677_vm5, %v5704_v58 }
0x21ee   : > { %16231 = vmatpush3.msk.msra.mxu1 %vm5786_vm4, %v5363_v20  ;;  %16232 = vmatprep.mubr.msk.f32.mxu1 %vm18002_vm0, %v18003_v6 }
0x21ef   : > { %16240 = vmatprep.subr.mxu1 %v18003_v6 }
0x22bc   : > { %v5610_v59 = vpop.f32.mrb[98].mxu1 }
0x22bd   : > { %v16214_v60 = vpop.f32.mrb[99].mxu1  ;;  %16233 = vmatmul.mubr.msk.f32.vlgmr.msra.gmra.mrb[102].mxu1 %vm5450_vm2, %v5610_v59 }
0x22be   : > { %16242 = vmatprep.mubr.msk.f32.mxu1 %vm18002_vm0, %v18003_v6 }
0x22c0   : > { %v5777_v61 = vpop.f32.mrb[100].mxu1 }
0x22c1   : > { %v16224_v46 = vpop.f32.mrb[101].mxu1  ;;  %16228 = vmatmul.mubr.msk.f32.vlgmr.msra.gmra.mrb[100].mxu0 %vm5450_vm2, %v5777_v61 }
0x22c2   : > { %16236 = vmatpush3.xpose.msk.msra.mxu0 %vm5450_vm2, %v5937_v10  ;;  %16237 = vmatprep.mubr.msk.f32.mxu0 %vm18002_vm0, %v18003_v6 }
0x22c3   : > { %16245 = vmatprep.subr.mxu0 %v18003_v6 }
0x22c5   : > { %16238 = vmatmul.mubr.msk.f32.vlgmr.msra.gmra.mrb[102].mxu0 %vm5450_vm2, %v5935_v30 }
0x22c6   : > { %16247 = vmatprep.mubr.msk.f32.mxu0 %vm18002_vm0, %v18003_v6  ;;  %16246 = vmatpush3.msk.msra.mxu0 %vm5786_vm4, %v5364_v19 }
0x22c7   : > { %16255 = vmatprep.subr.mxu0 %v18003_v6 }
0x2390   : > { %v5930_v51 = vpop.f32.mrb[102].mxu1 }
0x2391   : > { %v16234_v62 = vpop.f32.mrb[103].mxu1 }
0x2394   : > { %v5855_v33 = vpop.f32.mrb[100].mxu0 }
0x2395   : > { %v19191_v63 = vadd.f32 %v5930_v51, %v5855_v33  ;;  %v16229_v18 = vpop.f32.mrb[101].mxu0 }
0x2398   : > { %v6008_v8 = vpop.f32.mrb[102].mxu0 }
0x2399   : > { %v6012_v47 = vmul.f32 0.5, %v6008_v8  ;;  %v16239_v44 = vpop.f32.mrb[103].mxu0 }
0x239b   : > { %v6013_v35 = vadd.f32 %v6012_v47, %v19151_v17 }
0x239d   : > { %v6014_v0 = vsel %vm1677_vm5, %v6013_v35, -inf }
0x239e   : > { %6015 = vmax.xlane.f32.xlu1 %v6014_v0  ;;  %v5365_v0 = vld [vmem:[%s20440_s14 + $0x10] sm:$0xff] }
0x23af   : > { %6180 = vrot.lane.b32.xlu1 %v19108_v50, %s20313_s2  ;;  %s20315_s2 = smov 52  }
0x23b3   : > { %6178 = vrot.lane.b32.xlu1 %v19108_v50, %s20316_s21  ;;  %s20321_s21 = smov 108  }
0x242b   : > { %v6016_v12 = vpop.xlane.xlu1 %6015 }
0x242c   : > { %v6017_v56 = vsub.f32 %v6013_v35, %v6016_v12  ;;  %v6833_v12 = vrot.slane %v5365_v0, 4 }
0x242e   : > { %v6018_v25 = vmul.f32 1.442695, %v6017_v56 }
0x242f   : > { %v6181_v11 = vpop.permute.xlu1 %6180 }
0x2430   : > { %17759 = vpow2.f32 %v6018_v25 }
0x2433   : > { %v6179_v29 = vpop.permute.xlu1 %6178 }
0x243a   : > { %v17760_v1 = vpop.eup %17759 }
0x243b   : > { %v6020_v4 = vsel %vm1677_vm5, %v17760_v1, 0.0 }
0x243c   : > { %6021 = vadd.xlane.f32.xlu0 %v6020_v4 }
0x2452   : > { %6025 = vrot.lane.b32.xlu0 %v19108_v50, %s20426_s5 }
0x24c9   : > { %v6022_v15 = vpop.xlane.xlu0 %6021 }
0x24ca   : > { %17761 = vrcp.f32 %v6022_v15 }
0x24cd   : > { %v6026_v5 = vpop.permute.xlu0 %6025 }
0x24ce   : > { %16241 = vmatpush3.msra.mxu1 %v6026_v5 }
0x24cf   : > { %16250 = vmatprep.subr.mxu1 %v18003_v6 }
0x24d4   : > { %v17762_v7 = vpop.eup %17761 }
0x24d5   : > { %v6024_v14 = vmul.f32 %v17762_v7, %v17760_v1 }
0x24d7   : > { %16243 = vmatmul.mubr.msk.f32.vlgmr.msra.gmra.mrb[104].mxu1 %vm1677_vm5, %v6024_v14 }
0x24d8   : > { %16251 = vmatpush3.xpose.msk.msra.mxu1 %vm5450_vm2, %v6181_v11  ;;  %16252 = vmatprep.mubr.msk.f32.mxu1 %vm18002_vm0, %v18003_v6 }
0x24d9   : > { %16260 = vmatprep.subr.mxu1 %v18003_v6 }
0x24db   : > { %16253 = vmatmul.mubr.msk.f32.vlgmr.msra.gmra.mrb[106].mxu1 %vm5450_vm2, %v6179_v29 }
0x24dc   : > { %16262 = vmatprep.mubr.msk.f32.mxu1 %vm18002_vm0, %v18003_v6  ;;  %16261 = vmatpush3.msk.msra.mxu1 %vm5786_vm4, %v6345_v21 }
0x24dd   : > { %16270 = vmatprep.subr.mxu1 %v18003_v6 }
0x25aa   : > { %v6097_v31 = vpop.f32.mrb[104].mxu1 }
0x25ab   : > { %v16244_v22 = vpop.f32.mrb[105].mxu1  ;;  %16248 = vmatmul.mubr.msk.f32.vlgmr.msra.gmra.mrb[104].mxu0 %vm5450_vm2, %v6097_v31 }
0x25ac   : > { %16257 = vmatprep.mubr.msk.f32.mxu0 %vm18002_vm0, %v18003_v6 }
0x25ae   : > { %v6252_v26 = vpop.f32.mrb[106].mxu1 }
0x25af   : > { %v6256_v28 = vmul.f32 0.5, %v6252_v26  ;;  %v16254_v32 = vpop.f32.mrb[107].mxu1 }
0x25b1   : > { %v6257_v34 = vadd.f32 %v6256_v28, %v19151_v17 }
0x25b3   : > { %v6258_v38 = vsel %vm1677_vm5, %v6257_v34, -inf }
0x25b4   : > { %6259 = vmax.xlane.f32.xlu0 %v6258_v38 }
0x25ca   : > { %6269 = vrot.lane.b32.xlu0 %v19108_v50, %s20315_s2  ;;  %s20318_s2 = smov 76  }
0x25ce   : > { %6422 = vrot.lane.b32.xlu0 %v19108_v50, %s20428_s12 }
0x2641   : > { %v6260_v40 = vpop.xlane.xlu0 %6259 }
0x2642   : > { %v6261_v24 = vsub.f32 %v6257_v34, %v6260_v40 }
0x2644   : > { %v6262_v39 = vmul.f32 1.442695, %v6261_v24 }
0x2645   : > { %v6270_v23 = vpop.permute.xlu0 %6269 }
0x2646   : > { %17763 = vpow2.f32 %v6262_v39  ;;  %16256 = vmatpush3.msra.mxu0 %v6270_v23 }
0x2647   : > { %16265 = vmatprep.subr.mxu0 %v18003_v6 }
0x2649   : > { %v6423_v45 = vpop.permute.xlu0 %6422 }
0x2650   : > { %v17764_v36 = vpop.eup %17763 }
0x2651   : > { %v6264_v41 = vsel %vm1677_vm5, %v17764_v36, 0.0 }
0x2652   : > { %6265 = vadd.xlane.f32.xlu1 %v6264_v41 }
0x2663   : > { %6424 = vrot.lane.b32.xlu1 %v19108_v50, %s20427_s8 }
0x267e   : > { %v6173_v27 = vpop.f32.mrb[104].mxu0 }
0x267f   : > { %v6177_v42 = vadd.f32 %v6173_v27, %v19191_v63  ;;  %v16249_v16 = vpop.f32.mrb[105].mxu0 }
0x26df   : > { %v6266_v43 = vpop.xlane.xlu1 %6265 }
0x26e0   : > { %17765 = vrcp.f32 %v6266_v43 }
0x26e3   : > { %v6425_v2 = vpop.permute.xlu1 %6424 }
0x26ea   : > { %v17766_v49 = vpop.eup %17765 }
0x26eb   : > { %v6268_v20 = vmul.f32 %v17766_v49, %v17764_v36 }
0x26ed   : > { %16258 = vmatmul.mubr.msk.f32.vlgmr.msra.gmra.mrb[106].mxu0 %vm1677_vm5, %v6268_v20 }
0x26ee   : > { %16266 = vmatpush3.xpose.msk.msra.mxu0 %vm5450_vm2, %v6425_v2  ;;  %16267 = vmatprep.mubr.msk.f32.mxu0 %vm18002_vm0, %v18003_v6 }
0x26ef   : > { %16275 = vmatprep.subr.mxu0 %v18003_v6 }
0x26f1   : > { %16268 = vmatmul.mubr.msk.f32.vlgmr.msra.gmra.mrb[108].mxu0 %vm5450_vm2, %v6423_v45 }
0x26f2   : > { %16277 = vmatprep.mubr.msk.f32.mxu0 %vm18002_vm0, %v18003_v6  ;;  %16276 = vmatpush3.msk.msra.mxu0 %vm5786_vm4, %v5365_v0 }
0x26f3   : > { %16285 = vmatprep.subr.mxu0 %v18003_v6 }
0x27c0   : > { %v6341_v53 = vpop.f32.mrb[106].mxu0 }
0x27c1   : > { %v16259_v48 = vpop.f32.mrb[107].mxu0  ;;  %16263 = vmatmul.mubr.msk.f32.vlgmr.msra.gmra.mrb[108].mxu1 %vm5450_vm2, %v6341_v53 }
0x27c2   : > { %16272 = vmatprep.mubr.msk.f32.mxu1 %vm18002_vm0, %v18003_v6 }
0x27c4   : > { %v6496_v52 = vpop.f32.mrb[108].mxu0 }
0x27c5   : > { %v6500_v55 = vmul.f32 0.5, %v6496_v52  ;;  %v16269_v57 = vpop.f32.mrb[109].mxu0 }
0x27c7   : > { %v6501_v58 = vadd.f32 %v6500_v55, %v19151_v17 }
0x27c9   : > { %v6502_v59 = vsel %vm1677_vm5, %v6501_v58, -inf }
0x27ca   : > { %6503 = vmax.xlane.f32.xlu1 %v6502_v59 }
0x27db   : > { %6668 = vrot.lane.b32.xlu1 %v19108_v50, %s20318_s2  ;;  %s20320_s2 = smov 44  }
0x27df   : > { %6666 = vrot.lane.b32.xlu1 %v19108_v50, %s20321_s21  ;;  %s20325_s21 = smov 100  }
0x2857   : > { %v6504_v60 = vpop.xlane.xlu1 %6503 }
0x2858   : > { %v6505_v10 = vsub.f32 %v6501_v58, %v6504_v60 }
0x285a   : > { %v6506_v61 = vmul.f32 1.442695, %v6505_v10 }
0x285b   : > { %v6669_v47 = vpop.permute.xlu1 %6668 }
0x285c   : > { %17767 = vpow2.f32 %v6506_v61  ;;  %v5366_v61 = vld [vmem:[%s20440_s14 + $0x18] sm:$0xff] }
0x285f   : > { %v6667_v35 = vpop.permute.xlu1 %6666 }
0x2866   : > { %v17768_v46 = vpop.eup %17767 }
0x2867   : > { %v6508_v30 = vsel %vm1677_vm5, %v17768_v46, 0.0 }
0x2868   : > { %6509 = vadd.xlane.f32.xlu0 %v6508_v30 }
0x287e   : > { %6513 = vrot.lane.b32.xlu0 %v19108_v50, %s20429_s17 }
0x2894   : > { %v6417_v51 = vpop.f32.mrb[108].mxu1 }
0x2895   : > { %v6421_v62 = vadd.f32 %v6417_v51, %v6177_v42  ;;  %v16264_v33 = vpop.f32.mrb[109].mxu1 }
0x28f5   : > { %v6510_v63 = vpop.xlane.xlu0 %6509 }
0x28f6   : > { %17769 = vrcp.f32 %v6510_v63 }
0x28f9   : > { %v6514_v18 = vpop.permute.xlu0 %6513 }
0x28fa   : > { %16271 = vmatpush3.msra.mxu1 %v6514_v18 }
0x28fb   : > { %16280 = vmatprep.subr.mxu1 %v18003_v6 }
0x2900   : > { %v17770_v8 = vpop.eup %17769 }
0x2901   : > { %v6512_v44 = vmul.f32 %v17770_v8, %v17768_v46  ;;  %v7321_v46 = vrot.slane %v5366_v61, 4 }
0x2903   : > { %16273 = vmatmul.mubr.msk.f32.vlgmr.msra.gmra.mrb[110].mxu1 %vm1677_vm5, %v6512_v44 }
0x2904   : > { %16281 = vmatpush3.xpose.msk.msra.mxu1 %vm5450_vm2, %v6669_v47  ;;  %16282 = vmatprep.mubr.msk.f32.mxu1 %vm18002_vm0, %v18003_v6 }
0x2905   : > { %16290 = vmatprep.subr.mxu1 %v18003_v6 }
0x2907   : > { %16283 = vmatmul.mubr.msk.f32.vlgmr.msra.gmra.mrb[112].mxu1 %vm5450_vm2, %v6667_v35 }
0x2908   : > { %16292 = vmatprep.mubr.msk.f32.mxu1 %vm18002_vm0, %v18003_v6  ;;  %16291 = vmatpush3.msk.msra.mxu1 %vm5786_vm4, %v6833_v12 }
0x2909   : > { %16300 = vmatprep.subr.mxu1 %v18003_v6 }
0x29d6   : > { %v6585_v56 = vpop.f32.mrb[110].mxu1 }
0x29d7   : > { %v16274_v25 = vpop.f32.mrb[111].mxu1  ;;  %16278 = vmatmul.mubr.msk.f32.vlgmr.msra.gmra.mrb[110].mxu0 %vm5450_vm2, %v6585_v56 }
0x29d8   : > { %16287 = vmatprep.mubr.msk.f32.mxu0 %vm18002_vm0, %v18003_v6 }
0x29da   : > { %v6740_v1 = vpop.f32.mrb[112].mxu1 }
0x29db   : > { %v6744_v4 = vmul.f32 0.5, %v6740_v1  ;;  %v16284_v15 = vpop.f32.mrb[113].mxu1 }
0x29dd   : > { %v6745_v5 = vadd.f32 %v6744_v4, %v19151_v17 }
0x29df   : > { %v6746_v7 = vsel %vm1677_vm5, %v6745_v5, -inf }
0x29e0   : > { %6747 = vmax.xlane.f32.xlu0 %v6746_v7 }
0x29f6   : > { %6757 = vrot.lane.b32.xlu0 %v19108_v50, %s20320_s2  ;;  %s20323_s2 = smov 68  }
0x29fa   : > { %6910 = vrot.lane.b32.xlu0 %v19108_v50, %s20431_s20 }
0x2a6d   : > { %v6748_v11 = vpop.xlane.xlu0 %6747 }
0x2a6e   : > { %v6749_v14 = vsub.f32 %v6745_v5, %v6748_v11 }
0x2a70   : > { %v6750_v29 = vmul.f32 1.442695, %v6749_v14 }
0x2a71   : > { %v6758_v19 = vpop.permute.xlu0 %6757 }
0x2a72   : > { %17771 = vpow2.f32 %v6750_v29  ;;  %16286 = vmatpush3.msra.mxu0 %v6758_v19 }
0x2a73   : > { %16295 = vmatprep.subr.mxu0 %v18003_v6 }
0x2a75   : > { %v6911_v24 = vpop.permute.xlu0 %6910 }
0x2a7c   : > { %v17772_v21 = vpop.eup %17771 }
0x2a7d   : > { %v6752_v31 = vsel %vm1677_vm5, %v17772_v21, 0.0 }
0x2a7e   : > { %6753 = vadd.xlane.f32.xlu1 %v6752_v31 }
0x2a8f   : > { %6912 = vrot.lane.b32.xlu1 %v19108_v50, %s20430_s19 }
0x2aaa   : > { %v6661_v22 = vpop.f32.mrb[110].mxu0 }
0x2aab   : > { %v6665_v26 = vadd.f32 %v6661_v22, %v6421_v62  ;;  %v16279_v28 = vpop.f32.mrb[111].mxu0 }
0x2b0b   : > { %v6754_v32 = vpop.xlane.xlu1 %6753 }
0x2b0c   : > { %17773 = vrcp.f32 %v6754_v32  ;;  %v14936_v32 = vld [vmem:[%s20443_s24] ss:$0 sm:$0xff] }
0x2b0f   : > { %v6913_v40 = vpop.permute.xlu1 %6912 }
0x2b16   : > { %v17774_v34 = vpop.eup %17773 }
0x2b17   : > { %v6756_v38 = vmul.f32 %v17774_v34, %v17772_v21 }
0x2b19   : > { %16288 = vmatmul.mubr.msk.f32.vlgmr.msra.gmra.mrb[112].mxu0 %vm1677_vm5, %v6756_v38 }
0x2b1a   : > { %16296 = vmatpush3.xpose.msk.msra.mxu0 %vm5450_vm2, %v6913_v40  ;;  %16297 = vmatprep.mubr.msk.f32.mxu0 %vm18002_vm0, %v18003_v6 }
0x2b1b   : > { %16305 = vmatprep.subr.mxu0 %v18003_v6 }
0x2b1d   : > { %16298 = vmatmul.mubr.msk.f32.vlgmr.msra.gmra.mrb[114].mxu0 %vm5450_vm2, %v6911_v24 }
0x2b1e   : > { %16307 = vmatprep.mubr.msk.f32.mxu0 %vm18002_vm0, %v18003_v6  ;;  %16306 = vmatpush3.msk.msra.mxu0 %vm5786_vm4, %v5366_v61 }
0x2b1f   : > { %16315 = vmatprep.subr.mxu0 %v18003_v6 }
0x2bec   : > { %v6829_v39 = vpop.f32.mrb[112].mxu0 }
0x2bed   : > { %v16289_v23 = vpop.f32.mrb[113].mxu0  ;;  %16293 = vmatmul.mubr.msk.f32.vlgmr.msra.gmra.mrb[114].mxu1 %vm5450_vm2, %v6829_v39  ;;  %v14941_v39 = vld [vmem:[%s20444_s27] ss:$0 sm:$0xff] }
0x2bee   : > { %16302 = vmatprep.mubr.msk.f32.mxu1 %vm18002_vm0, %v18003_v6 }
0x2bf0   : > { %v6984_v36 = vpop.f32.mrb[114].mxu0 }
0x2bf1   : > { %v6988_v41 = vmul.f32 0.5, %v6984_v36  ;;  %v16299_v27 = vpop.f32.mrb[115].mxu0 }
0x2bf3   : > { %v6989_v42 = vadd.f32 %v6988_v41, %v19151_v17 }
0x2bf5   : > { %v6990_v16 = vsel %vm1677_vm5, %v6989_v42, -inf }
0x2bf6   : > { %6991 = vmax.xlane.f32.xlu1 %v6990_v16 }
0x2c07   : > { %7156 = vrot.lane.b32.xlu1 %v19108_v50, %s20323_s2  ;;  %s20327_s2 = smov 36  }
0x2c0b   : > { %7154 = vrot.lane.b32.xlu1 %v19108_v50, %s20325_s21  ;;  %s20441_s21 = sld [smem:[#allocation14_spill]] }
0x2c11   : > { %v7440_v5 = vld [vmem:[%s20441_s21] sm:$0xff]  ;;  %v7441_v7 = vld [vmem:[%s20441_s21 + $0x8] sm:$0xff]  ;;  %v7442_v14 = vld [vmem:[%s20441_s21 + $0x10] sm:$0xff] }
0x2c12   : > { %v17083_v11 = vpack.c.bf16 %v7441_v7, %v7440_v5  ;;  %v7443_v29 = vld [vmem:[%s20441_s21 + $0x18] sm:$0xff] }
0x2c13   : > { %v17086_v31 = vpack.c.bf16 %v7443_v29, %v7442_v14 }
0x2c83   : > { %v6992_v43 = vpop.xlane.xlu1 %6991 }
0x2c84   : > { %v6993_v49 = vsub.f32 %v6989_v42, %v6992_v43 }
0x2c86   : > { %v6994_v20 = vmul.f32 1.442695, %v6993_v49 }
0x2c87   : > { %v7157_v59 = vpop.permute.xlu1 %7156 }
0x2c88   : > { %17775 = vpow2.f32 %v6994_v20 }
0x2c8b   : > { %v7155_v10 = vpop.permute.xlu1 %7154 }
0x2c92   : > { %v17776_v2 = vpop.eup %17775 }
0x2c93   : > { %v6996_v45 = vsel %vm1677_vm5, %v17776_v2, 0.0 }
0x2c94   : > { %6997 = vadd.xlane.f32.xlu0 %v6996_v45 }
0x2caa   : > { %7001 = vrot.lane.b32.xlu0 %v19108_v50, %s20432_s25 }
0x2cc0   : > { %v6905_v53 = vpop.f32.mrb[114].mxu1 }
0x2cc1   : > { %v6909_v48 = vadd.f32 %v6905_v53, %v6665_v26  ;;  %v16294_v52 = vpop.f32.mrb[115].mxu1 }
0x2d21   : > { %v6998_v55 = vpop.xlane.xlu0 %6997 }
0x2d22   : > { %17777 = vrcp.f32 %v6998_v55 }
0x2d25   : > { %v7002_v57 = vpop.permute.xlu0 %7001 }
0x2d26   : > { %16301 = vmatpush3.msra.mxu1 %v7002_v57 }
0x2d27   : > { %16310 = vmatprep.subr.mxu1 %v18003_v6 }
0x2d2c   : > { %v17778_v58 = vpop.eup %17777 }
0x2d2d   : > { %v7000_v60 = vmul.f32 %v17778_v58, %v17776_v2 }
0x2d2f   : > { %16303 = vmatmul.mubr.msk.f32.vlgmr.msra.gmra.mrb[116].mxu1 %vm1677_vm5, %v7000_v60 }
0x2d30   : > { %16311 = vmatpush3.xpose.msk.msra.mxu1 %vm5450_vm2, %v7157_v59  ;;  %16312 = vmatprep.mubr.msk.f32.mxu1 %vm18002_vm0, %v18003_v6 }
0x2d31   : > { %16320 = vmatprep.subr.mxu1 %v18003_v6 }
0x2d33   : > { %16313 = vmatmul.mubr.msk.f32.vlgmr.msra.gmra.mrb[118].mxu1 %vm5450_vm2, %v7155_v10 }
0x2d34   : > { %16322 = vmatprep.mubr.msk.f32.mxu1 %vm18002_vm0, %v18003_v6  ;;  %16321 = vmatpush3.msk.msra.mxu1 %vm5786_vm4, %v7321_v46 }
0x2d35   : > { %17082 = vmatprep.subr.bf16.mxu1 %v18001_v3 }
0x2e02   : > { %v7073_v30 = vpop.f32.mrb[116].mxu1 }
0x2e03   : > { %v16304_v51 = vpop.f32.mrb[117].mxu1  ;;  %16308 = vmatmul.mubr.msk.f32.vlgmr.msra.gmra.mrb[116].mxu0 %vm5450_vm2, %v7073_v30 }
0x2e04   : > { %16317 = vmatprep.mubr.msk.f32.mxu0 %vm18002_vm0, %v18003_v6 }
0x2e06   : > { %v7228_v62 = vpop.f32.mrb[118].mxu1 }
0x2e07   : > { %v7232_v33 = vmul.f32 0.5, %v7228_v62  ;;  %v16314_v63 = vpop.f32.mrb[119].mxu1 }
0x2e09   : > { %v7233_v18 = vadd.f32 %v7232_v33, %v19151_v17  ;;  %v14937_v33 = vld [vmem:[%s20447_s30] ss:$0 sm:$0xff]  ;;  %s20465_s30 = sld [smem:[#allocation19_spill]] }
0x2e0b   : > { %v7234_v8 = vsel %vm1677_vm5, %v7233_v18, -inf }
0x2e0c   : > { %7235 = vmax.xlane.f32.xlu0 %v7234_v8 }
0x2e22   : > { %7245 = vrot.lane.b32.xlu0 %v19108_v50, %s20327_s2  ;;  %s20442_s2 = sld [smem:[#allocation34_spill]] }
0x2e28   : > { %v14890_v22 = vld [vmem:[%s20442_s2] ss:$0 sm:$0xff]  ;;  %s20445_s2 = sld [smem:[#allocation16_spill]] }
0x2e29   : > { %v19333_v26 = vadd.f32 %v14890_v22, %v19144_v37  ;;  %v19341_v28 = vadd.f32 %v14890_v22, %v19146_v9  ;;  %v19348_v37 = vadd.f32 %v14890_v22, %v19148_v13 }
0x2e2e   : > { %v7435_v57 = vld [vmem:[%s20445_s2] sm:$0xff]  ;;  %v7436_v58 = vld [vmem:[%s20445_s2 + $0x8] sm:$0xff]  ;;  %v7437_v60 = vld [vmem:[%s20445_s2 + $0x10] sm:$0xff] }
0x2e2f   : > { %v17077_v59 = vpack.c.bf16 %v7436_v58, %v7435_v57  ;;  %v7438_v10 = vld [vmem:[%s20445_s2 + $0x18] sm:$0xff]  ;;  %s20467_s2 = sld [smem:[#allocation10_spill]] }
0x2e30   : > { %v17080_v61 = vpack.c.bf16 %v7438_v10, %v7437_v60 }
0x2e99   : > { %v7236_v47 = vpop.xlane.xlu0 %7235 }
0x2e9a   : > { %v7237_v44 = vsub.f32 %v7233_v18, %v7236_v47  ;;  %v14938_v18 = vld [vmem:[%s20448_s26] ss:$0 sm:$0xff]  ;;  %s20463_s26 = sld [smem:[#allocation28_spill]] }
0x2e9c   : > { %v7238_v35 = vmul.f32 1.442695, %v7237_v44 }
0x2e9d   : > { %v7246_v0 = vpop.permute.xlu0 %7245 }
0x2e9e   : > { %17779 = vpow2.f32 %v7238_v35  ;;  %16316 = vmatpush3.msra.mxu0 %v7246_v0 }
0x2e9f   : > { %17076 = vmatprep.subr.bf16.mxu0 %v18001_v3 }
0x2ea8   : > { %v17780_v12 = vpop.eup %17779 }
0x2ea9   : > { %v7240_v17 = vsel %vm1677_vm5, %v17780_v12, 0.0 }
0x2eaa   : > { %7241 = vadd.xlane.f32.xlu1 %v7240_v17  ;;  %v14939_v17 = vld [vmem:[%s20449_s11] ss:$0 sm:$0xff]  ;;  %s20452_s11 = smov 92  }
0x2ed6   : > { %v7149_v56 = vpop.f32.mrb[116].mxu0 }
0x2ed7   : > { %v7153_v25 = vadd.f32 %v7149_v56, %v6909_v48  ;;  %v16309_v1 = vpop.f32.mrb[117].mxu0 }
0x2f37   : > { %v7242_v50 = vpop.xlane.xlu1 %7241 }
0x2f38   : > { %17781 = vrcp.f32 %v7242_v50 }
0x2f42   : > { %v17782_v4 = vpop.eup %17781 }
0x2f43   : > { %v7244_v15 = vmul.f32 %v17782_v4, %v17780_v12 }
0x2f45   : > { %16318 = vmatmul.mubr.msk.f32.vlgmr.msra.gmra.mrb[118].mxu0 %vm1677_vm5, %v7244_v15 }
0x2f46   : > { %16333 = vmatprep.mubr.msk.f32.mxu0 %vm18002_vm0, %v18003_v6  ;;  %17078 = vmatpush3.bf16.msra.mxu0 %v17077_v59 }
0x2f47   : > { %17079 = vmatprep.subr.bf16.mxu0 %v18001_v3 }
0x2f4a   : > { %17081 = vmatpush3.bf16.msra.mxu0 %v17080_v61 }
0x2f4b   : > { %17088 = vmatprep.subr.bf16.mxu0 %v18001_v3 }
0x3018   : > { %v7317_v19 = vpop.f32.mrb[118].mxu0 }
0x3019   : > { %v16319_v21 = vpop.f32.mrb[119].mxu0  ;;  %16323 = vmatmul.mubr.msk.f32.vlgmr.msra.gmra.mrb[120].mxu1 %vm5450_vm2, %v7317_v19 }
0x301a   : > { %17084 = vmatpush3.bf16.msra.mxu1 %v17083_v11  ;;  %16344 = vmatprep.mubr.msk.f32.mxu1 %vm18002_vm0, %v18003_v6 }
0x301b   : > { %17085 = vmatprep.subr.bf16.mxu1 %v18001_v3 }
0x301e   : > { %17087 = vmatpush3.bf16.msra.mxu1 %v17086_v31 }
0x301f   : > { %17092 = vmatprep.subr.bf16.mxu1 %v18001_v3 }
0x3021   : > { %16345 = vmatmul.mubr.msk.f32.vlgmr.msra.gmra.mrb[122].mxu1 %vm1503_vm3, %v19333_v26 }
0x3022   : > { %16347 = vmatprep.mubr.msk.f32.mxu1 %vm18002_vm0, %v18003_v6 }
0x3025   : > { %16348 = vmatmul.mubr.msk.f32.gmra.mrb[124].mxu1 %vm1503_vm3, %v19341_v28 }
0x3026   : > { %16350 = vmatprep.mubr.msk.f32.mxu1 %vm18002_vm0, %v18003_v6 }
0x3029   : > { %16351 = vmatmul.mubr.msk.f32.gmra.mrb[126].mxu1 %vm1503_vm3, %v19348_v37 }
0x302a   : > { %16368 = vmatprep.mubr.msk.f32.mxu1 %vm18002_vm0, %v18003_v6 }
0x30ec   : > { %v7393_v34 = vpop.f32.mrb[120].mxu1 }
0x30ed   : > { %v7397_v38 = vadd.f32 %v7393_v34, %v7153_v25  ;;  %v16324_v9 = vpop.f32.mrb[121].mxu1 }
0x30ef   : > { %v7404_v40 = vadd.f32 %v14936_v32, %v7397_v38 }
0x30f1   : > { %v7405_v24 = vadd.f32 %v7404_v40, %v19091_v54 }
0x30f3   : > { %v7408_v23 = vsel %vm1503_vm3, %v7405_v24, 0.0 }
0x30f4   : > { %v7610_v36 = vpop.f32.mrb[122].mxu1  ;;  %7409 = vadd.xlane.f32.xlu1 %v7408_v23 }
0x30f5   : > { %v7611_v13 = vadd.f32 %v14941_v39, %v7610_v36  ;;  %v16346_v41 = vpop.f32.mrb[123].mxu1 }
0x30f8   : > { %v7615_v27 = vpop.f32.mrb[124].mxu1 }
0x30f9   : > { %v7616_v42 = vadd.f32 %v14941_v39, %v7615_v27  ;;  %v16349_v16 = vpop.f32.mrb[125].mxu1 }
0x30fb   : > { %v19358_v43 = vpack.i.bf16 %v7616_v42, %v7611_v13  ;;  %v17089_v49 = vpack.c.bf16 %v7616_v42, %v7611_v13 }
0x30fc   : > { %v7620_v20 = vpop.f32.mrb[126].mxu1 }
0x30fd   : > { %v19360_v2 = vadd.f32 %v14941_v39, %v7620_v20  ;;  %v16352_v54 = vpop.f32.mrb[127].mxu1 }
0x30ff   : > { %7807 = vrot.lane.b32.xlu0 %v19360_v2, %s20446_s29 }
0x3171   : > { %v7808_v4 = vpop.permute.xlu0 %7807 }
0x3181   : > { %v7410_v45 = vpop.xlane.xlu1 %7409 }
0x3182   : > { %v7411_v53 = vmul.f32 0.03125, %v7410_v45 }
0x3184   : > { %v7412_v48 = vsub.f32 %v7405_v24, %v7411_v53 }
0x3186   : > { %v7413_v52 = vmul.f32 %v7412_v48, %v7412_v48 }
0x3188   : > { %v7414_v55 = vsel %vm1503_vm3, %v7413_v52, 0.0 }
0x3189   : > { %7415 = vadd.xlane.f32.xlu1 %v7414_v55 }
0x319a   : > { %17452 = vrot.lane.b32.xlu1 %v19358_v43, %s20446_s29 }
0x319e   : > { %8140 = vrot.lane.b32.xlu1 %v19360_v2, %s20424_s16 }
0x3216   : > { %v7416_v46 = vpop.xlane.xlu1 %7415 }
0x3217   : > { %v7417_v30 = vmul.f32 0.03125, %v7416_v46 }
0x3219   : > { %v7418_v51 = vadd.f32 1e-05, %v7417_v30 }
0x321a   : > { %v17453_v35 = vpop.permute.xlu1 %17452 }
0x321b   : > { %17783 = vrsqrt.f32 %v7418_v51  ;;  %v17455_v0 = vunpack.i.h.bf16 %v17453_v35  ;;  %v17454_v12 = vunpack.i.l.bf16 %v17453_v35 }
0x321d   : > { %v17096_v50 = vpack.c.bf16 %v17455_v0, %v17454_v12 }
0x321e   : > { %v8141_v29 = vpop.permute.xlu1 %8140 }
0x3225   : > { %v17784_v62 = vpop.eup %17783 }
0x3226   : > { %v7420_v63 = vmul.f32 %v17784_v62, %v7412_v48 }
0x3228   : > { %v7427_v8 = vmul.f32 %v14937_v33, %v7420_v63 }
0x322a   : > { %v19377_v47 = vadd.f32 %v14938_v18, %v7427_v8 }
0x322c   : > { %16334 = vmatmul.mubr.msk.f32.vlgmr.msra.gmra.mrb[120].mxu0 %vm1503_vm3, %v19377_v47 }
0x322d   : > { %17091 = vmatpush3.bf16.xpose.msk.msra.mxu0 %vm19381_vm6, %v17089_v49  ;;  %16359 = vmatprep.mubr.msk.f32.mxu0 %vm18002_vm0, %v18003_v6 }
0x322e   : > { %16357 = vmatprep.subr.mxu0 %v18003_v6 }
0x3235   : > { %16358 = vmatpush3.xpose.msk.msra.mxu0 %vm5450_vm2, %v19360_v2 }
0x3236   : > { %17095 = vmatprep.subr.bf16.mxu0 %v18001_v3 }
0x32ff   : > { %v7525_v56 = vpop.f32.mrb[120].mxu0 }
0x3300   : > { %v19396_v25 = vadd.f32 %v14939_v17, %v7525_v56  ;;  %v16335_v1 = vpop.f32.mrb[121].mxu0 }
0x3302   : > { %7801 = vrot.lane.b32.xlu0 %v19396_v25, %s20446_s29  ;;  %16360 = vmatmul.mubr.msk.f32.vlgmr.msra.gmra.mrb[122].mxu0 %vm5450_vm2, %v19396_v25 }
0x3303   : > { %17098 = vmatpush3.bf16.xpose.msk.msra.mxu0 %vm19381_vm6, %v17096_v50  ;;  %16377 = vmatprep.mubr.msk.f32.mxu0 %vm18002_vm0, %v18003_v6 }
0x3304   : > { %16375 = vmatprep.subr.mxu0 %v18003_v6 }
0x3306   : > { %17457 = vrot.lane.b32.xlu0 %v19358_v43, %s20424_s16 }
0x330a   : > { %8134 = vrot.lane.b32.xlu0 %v19396_v25, %s20424_s16 }
0x330b   : > { %16376 = vmatpush3.xpose.msk.msra.mxu0 %vm5450_vm2, %v7808_v4 }
0x330c   : > { %17102 = vmatprep.subr.bf16.mxu0 %v18001_v3 }
0x3374   : > { %v7802_v15 = vpop.permute.xlu0 %7801 }
0x3375   : > { %16378 = vmatmul.mubr.msk.f32.vlgmr.msra.gmra.mrb[124].mxu0 %vm5450_vm2, %v7802_v15 }
0x3376   : > { %16405 = vmatprep.mubr.msk.f32.mxu0 %vm18002_vm0, %v18003_v6 }
0x3378   : > { %v17458_v5 = vpop.permute.xlu0 %17457 }
0x3379   : > { %v17460_v7 = vunpack.i.h.bf16 %v17458_v5  ;;  %v17459_v11 = vunpack.i.l.bf16 %v17458_v5 }
0x337b   : > { %v17103_v14 = vpack.c.bf16 %v17460_v7, %v17459_v11  ;;  %v7445_v7 = vld [vmem:[%s20454_s7] sm:$0xff]  ;;  %s20456_s7 = smov 84  }
0x337c   : > { %v8135_v19 = vpop.permute.xlu0 %8134  ;;  %v7983_v11 = vrot.slane %v7445_v7, 4 }
0x337d   : > { %17105 = vmatpush3.bf16.xpose.msk.msra.mxu0 %vm19381_vm6, %v17103_v14 }
0x337e   : > { %16403 = vmatprep.subr.mxu0 %v18003_v6 }
0x3385   : > { %16404 = vmatpush3.xpose.msk.msra.mxu0 %vm5450_vm2, %v8141_v29 }
0x3386   : > { %17109 = vmatprep.subr.bf16.mxu0 %v18001_v3 }
0x3388   : > { %16406 = vmatmul.mubr.msk.f32.vlgmr.msra.gmra.mrb[126].mxu0 %vm5450_vm2, %v8135_v19 }
0x3389   : > { %16428 = vmatprep.mubr.msk.f32.mxu0 %vm18002_vm0, %v18003_v6 }
0x33d5   : > { %v7702_v21 = vpop.f32.mrb[122].mxu0 }
0x33d6   : > { %v7706_v31 = vmul.f32 0.5, %v7702_v21  ;;  %v16361_v22 = vpop.f32.mrb[123].mxu0 }
0x33d8   : > { %v7707_v32 = vsel %vm1773_vm7, %v7706_v31, -inf }
0x33d9   : > { %7708 = vmax.xlane.f32.xlu1 %v7707_v32 }
0x33ea   : > { %17462 = vrot.lane.b32.xlu1 %v19358_v43, %s20422_s22 }
0x33ee   : > { %17467 = vrot.lane.b32.xlu1 %v19358_v43, %s20452_s11 }
0x33f2   : > { %7903 = vrot.lane.b32.xlu1 %v19360_v2, %s20452_s11 }
0x33f6   : > { %17472 = vrot.lane.b32.xlu1 %v19358_v43, %s20453_s1 }
0x33fa   : > { %8392 = vrot.lane.b32.xlu1 %v19396_v25, %s20453_s1 }
0x3448   : > { %v7883_v34 = vpop.f32.mrb[124].mxu0 }
0x3449   : > { %v7887_v38 = vmul.f32 0.5, %v7883_v34  ;;  %v16379_v9 = vpop.f32.mrb[125].mxu0 }
0x344b   : > { %v7888_v40 = vsel %vm1773_vm7, %v7887_v38, -inf }
0x344c   : > { %7889 = vmax.xlane.f32.xlu0 %v7888_v40 }
0x345b   : > { %v8216_v24 = vpop.f32.mrb[126].mxu0 }
0x345c   : > { %v16407_v39 = vpop.f32.mrb[127].mxu0  ;;  %v8220_v61 = vmul.f32 0.5, %v8216_v24 }
0x345e   : > { %v8221_v46 = vsel %vm1773_vm7, %v8220_v61, -inf }
0x3466   : > { %v7709_v23 = vpop.xlane.xlu1 %7708 }
0x3467   : > { %v7710_v36 = vsub.f32 %v7706_v31, %v7709_v23 }
0x3469   : > { %v7711_v13 = vmul.f32 1.442695, %v7710_v36 }
0x346a   : > { %v17463_v41 = vpop.permute.xlu1 %17462 }
0x346b   : > { %17785 = vpow2.f32 %v7711_v13  ;;  %v17465_v27 = vunpack.i.h.bf16 %v17463_v41  ;;  %v17464_v42 = vunpack.i.l.bf16 %v17463_v41  ;;  %v7446_v41 = vld [vmem:[%s20455_s28 + $0x8] sm:$0xff] }
0x346d   : > { %v17093_v16 = vpack.c.bf16 %v17465_v27, %v17464_v42 }
0x346e   : > { %v17468_v49 = vpop.permute.xlu1 %17467 }
0x346f   : > { %17094 = vmatpush3.bf16.msra.mxu1 %v17093_v16  ;;  %v17470_v33 = vunpack.i.h.bf16 %v17468_v49  ;;  %v17469_v63 = vunpack.i.l.bf16 %v17468_v49 }
0x3470   : > { %16366 = vmatprep.subr.mxu1 %v18003_v6 }
0x3471   : > { %v17100_v35 = vpack.c.bf16 %v17470_v33, %v17469_v63 }
0x3472   : > { %v7904_v20 = vpop.permute.xlu1 %7903 }
0x3475   : > { %v17786_v54 = vpop.eup %17785 }
0x3476   : > { %v17473_v45 = vpop.permute.xlu1 %17472  ;;  %v7713_v53 = vsel %vm1773_vm7, %v17786_v54, 0.0 }
0x3477   : > { %v17475_v48 = vunpack.i.h.bf16 %v17473_v45  ;;  %v17474_v52 = vunpack.i.l.bf16 %v17473_v45  ;;  %7714 = vadd.xlane.f32.xlu0 %v7713_v53 }
0x3479   : > { %v17110_v55 = vpack.c.bf16 %v17475_v48, %v17474_v52 }
0x347a   : > { %v8393_v17 = vpop.permute.xlu1 %8392 }
0x347b   : > { %17112 = vmatpush3.bf16.xpose.msk.msra.mxu0 %vm19381_vm6, %v17110_v55 }
0x347c   : > { %16426 = vmatprep.subr.mxu0 %v18003_v6 }
0x34d9   : > { %v7890_v57 = vpop.xlane.xlu0 %7889 }
0x34da   : > { %v7891_v58 = vsub.f32 %v7887_v38, %v7890_v57 }
0x34dc   : > { %v7892_v59 = vmul.f32 1.442695, %v7891_v58 }
0x34de   : > { %17787 = vpow2.f32 %v7892_v59 }
0x34e8   : > { %v17788_v60 = vpop.eup %17787 }
0x34e9   : > { %v7894_v10 = vsel %vm1773_vm7, %v17788_v60, 0.0 }
0x34ea   : > { %7895 = vadd.xlane.f32.xlu0 %v7894_v10 }
0x3500   : > { %7722 = vrot.lane.b32.xlu0 %v19360_v2, %s20422_s22 }
0x3504   : > { %8398 = vrot.lane.b32.xlu0 %v19360_v2, %s20453_s1  ;;  %v7715_v30 = vpop.xlane.xlu0 %7714 }
0x3505   : > { %17789 = vrcp.f32 %v7715_v30 }
0x350f   : > { %v17790_v62 = vpop.eup %17789 }
0x3510   : > { %v7717_v18 = vmul.f32 %v17790_v62, %v17786_v54 }
0x3523   : > { %8222 = vmax.xlane.f32.xlu0 %v8221_v46 }
0x3539   : > { %17477 = vrot.lane.b32.xlu0 %v19358_v43, %s20423_s23 }
0x3577   : > { %v7896_v51 = vpop.xlane.xlu0 %7895 }
0x3578   : > { %17791 = vrcp.f32 %v7896_v51  ;;  %v8573_v51 = vrot.slane %v7446_v41, 4 }
0x357b   : > { %v7723_v8 = vpop.permute.xlu0 %7722 }
0x357c   : > { %16367 = vmatpush3.msk.msra.mxu1 %vm1825_vm9, %v7723_v8 }
0x357d   : > { %16369 = vmatmul.mubr.msk.f32.vlgmr.msra.gmra.mrb[128].mxu1 %vm1773_vm7, %v7717_v18  ;;  %17099 = vmatprep.subr.bf16.mxu1 %v18001_v3 }
0x357e   : > { %17101 = vmatpush3.bf16.msra.mxu1 %v17100_v35  ;;  %16386 = vmatprep.mubr.msk.f32.mxu1 %vm18002_vm0, %v18003_v6 }
0x357f   : > { %v8399_v0 = vpop.permute.xlu0 %8398  ;;  %16384 = vmatprep.subr.mxu1 %v18003_v6 }
0x3580   : > { %16427 = vmatpush3.xpose.msk.msra.mxu0 %vm5450_vm2, %v8399_v0 }
0x3581   : > { %17120 = vmatprep.subr.bf16.mxu0 %v18001_v3 }
0x3582   : > { %v17792_v12 = vpop.eup %17791  ;;  %16385 = vmatpush3.msk.msra.mxu1 %vm1825_vm9, %v7904_v20 }
0x3583   : > { %16429 = vmatmul.mubr.msk.f32.vlgmr.msra.gmra.mrb[128].mxu0 %vm5450_vm2, %v8393_v17  ;;  %v7898_v56 = vmul.f32 %v17792_v12, %v17788_v60  ;;  %16389 = vmatprep.subr.mxu1 %v18003_v6 }
0x3584   : > { %16460 = vmatprep.mubr.msk.f32.mxu0 %vm18002_vm0, %v18003_v6 }
0x3585   : > { %16387 = vmatmul.mubr.msk.f32.vlgmr.msra.gmra.mrb[130].mxu1 %vm1773_vm7, %v7898_v56 }
0x3586   : > { %16391 = vmatprep.mubr.msk.f32.mxu1 %vm18002_vm0, %v18003_v6  ;;  %16390 = vmatpush3.msk.msra.mxu1 %vm5786_vm4, %v7983_v11 }
0x3587   : > { %16394 = vmatprep.subr.mxu1 %v18003_v6 }
0x35b0   : > { %v8223_v1 = vpop.xlane.xlu0 %8222 }
0x35b1   : > { %v8224_v50 = vsub.f32 %v8220_v61, %v8223_v1 }
0x35b3   : > { %v8225_v4 = vmul.f32 1.442695, %v8224_v50 }
0x35b4   : > { %v17478_v21 = vpop.permute.xlu0 %17477 }
0x35b5   : > { %17793 = vpow2.f32 %v8225_v4  ;;  %v17480_v34 = vunpack.i.h.bf16 %v17478_v21  ;;  %v17479_v38 = vunpack.i.l.bf16 %v17478_v21 }
0x35b7   : > { %v17107_v39 = vpack.c.bf16 %v17480_v34, %v17479_v38 }
0x35bf   : > { %v17794_v15 = vpop.eup %17793 }
0x35c0   : > { %v8227_v5 = vsel %vm1773_vm7, %v17794_v15, 0.0 }
0x35c1   : > { %8228 = vadd.xlane.f32.xlu1 %v8227_v5 }
0x35d2   : > { %8236 = vrot.lane.b32.xlu1 %v19360_v2, %s20423_s23 }
0x364e   : > { %v8229_v29 = vpop.xlane.xlu1 %8228 }
0x364f   : > { %17795 = vrcp.f32 %v8229_v29 }
0x3650   : > { %v7797_v14 = vpop.f32.mrb[128].mxu1 }
0x3651   : > { %v16370_v19 = vpop.f32.mrb[129].mxu1 }
0x3652   : > { %v8237_v36 = vpop.permute.xlu1 %8236 }
0x3656   : > { %v8474_v31 = vpop.f32.mrb[128].mxu0 }
0x3657   : > { %v8478_v22 = vmul.f32 0.5, %v8474_v31  ;;  %v16430_v32 = vpop.f32.mrb[129].mxu0 }
0x3658   : > { %v7978_v9 = vpop.f32.mrb[130].mxu1 }
0x3659   : > { %v16388_v40 = vpop.f32.mrb[131].mxu1  ;;  %16392 = vmatmul.mubr.msk.f32.vlgmr.msra.gmra.mrb[132].mxu1 %vm5450_vm2, %v7978_v9  ;;  %v8479_v24 = vsel %vm1773_vm7, %v8478_v22, -inf  ;;  %v17796_v23 = vpop.eup %17795 }
0x365a   : > { %8480 = vmax.xlane.f32.xlu0 %v8479_v24  ;;  %16395 = vmatpush3.msk.msra.mxu1 %vm5786_vm4, %v7445_v7  ;;  %v8231_v13 = vmul.f32 %v17796_v23, %v17794_v15 }
0x365b   : > { %16396 = vmatprep.mubr.msk.f32.mxu1 %vm18002_vm0, %v18003_v6  ;;  %17106 = vmatprep.subr.bf16.mxu1 %v18001_v3 }
0x365d   : > { %16397 = vmatmul.mubr.msk.f32.vlgmr.msra.gmra.mrb[134].mxu1 %vm5450_vm2, %v7797_v14 }
0x365e   : > { %17108 = vmatpush3.bf16.msra.mxu1 %v17107_v39  ;;  %16414 = vmatprep.mubr.msk.f32.mxu1 %vm18002_vm0, %v18003_v6 }
0x365f   : > { %16412 = vmatprep.subr.mxu1 %v18003_v6 }
0x3662   : > { %16413 = vmatpush3.msk.msra.mxu1 %vm1825_vm9, %v8237_v36 }
0x3663   : > { %16415 = vmatmul.mubr.msk.f32.vlgmr.msra.gmra.mrb[136].mxu1 %vm1773_vm7, %v8231_v13  ;;  %16417 = vmatprep.subr.mxu1 %v18003_v6  ;;  %v7447_v13 = vld [vmem:[%s20455_s28 + $0x10] sm:$0xff] }
0x3664   : > { %16419 = vmatprep.mubr.msk.f32.mxu1 %vm18002_vm0, %v18003_v6  ;;  %16418 = vmatpush3.msk.msra.mxu1 %vm5786_vm4, %v7446_v41 }
0x3665   : > { %17113 = vmatprep.subr.bf16.mxu1 %v18001_v3 }
0x3670   : > { %17482 = vrot.lane.b32.xlu0 %v19358_v43, %s20456_s7 }
0x3674   : > { %17487 = vrot.lane.b32.xlu0 %v19358_v43, %s20428_s12 }
0x3678   : > { %8650 = vrot.lane.b32.xlu0 %v19396_v25, %s20428_s12 }
0x36e7   : > { %v8481_v27 = vpop.xlane.xlu0 %8480 }
0x36e8   : > { %v8482_v42 = vsub.f32 %v8478_v22, %v8481_v27 }
0x36ea   : > { %v8483_v16 = vmul.f32 1.442695, %v8482_v42 }
0x36eb   : > { %v17483_v53 = vpop.permute.xlu0 %17482 }
0x36ec   : > { %17797 = vpow2.f32 %v8483_v16  ;;  %v17485_v57 = vunpack.i.h.bf16 %v17483_v53  ;;  %v17484_v58 = vunpack.i.l.bf16 %v17483_v53 }
0x36ee   : > { %v17114_v59 = vpack.c.bf16 %v17485_v57, %v17484_v58 }
0x36ef   : > { %v17488_v8 = vpop.permute.xlu0 %17487 }
0x36f0   : > { %v17490_v35 = vunpack.i.h.bf16 %v17488_v8  ;;  %v17489_v0 = vunpack.i.l.bf16 %v17488_v8 }
0x36f2   : > { %v17117_v12 = vpack.c.bf16 %v17490_v35, %v17489_v0  ;;  %v9089_v0 = vrot.slane %v7447_v13, 4 }
0x36f3   : > { %v8651_v50 = vpop.permute.xlu0 %8650 }
0x36f6   : > { %v17798_v49 = vpop.eup %17797 }
0x36f7   : > { %v8485_v20 = vsel %vm1773_vm7, %v17798_v49, 0.0 }
0x36f8   : > { %8486 = vadd.xlane.f32.xlu1 %v8485_v20 }
0x3709   : > { %8494 = vrot.lane.b32.xlu1 %v19360_v2, %s20456_s7 }
0x370d   : > { %8656 = vrot.lane.b32.xlu1 %v19360_v2, %s20428_s12 }
0x372c   : > { %v8055_v54 = vpop.f32.mrb[132].mxu1 }
0x372d   : > { %v16393_v45 = vpop.f32.mrb[133].mxu1 }
0x3730   : > { %v8130_v48 = vpop.f32.mrb[134].mxu1 }
0x3731   : > { %v8131_v52 = vadd.f32 %v8130_v48, %v8055_v54  ;;  %v16398_v55 = vpop.f32.mrb[135].mxu1 }
0x3736   : > { %v8311_v60 = vpop.f32.mrb[136].mxu1 }
0x3737   : > { %v16416_v10 = vpop.f32.mrb[137].mxu1  ;;  %16420 = vmatmul.mubr.msk.f32.vlgmr.msra.gmra.mrb[138].mxu1 %vm5450_vm2, %v8311_v60 }
0x3738   : > { %17115 = vmatpush3.bf16.msra.mxu1 %v17114_v59  ;;  %16437 = vmatprep.mubr.msk.f32.mxu1 %vm18002_vm0, %v18003_v6 }
0x3739   : > { %16435 = vmatprep.subr.mxu1 %v18003_v6 }
0x3785   : > { %v8487_v61 = vpop.xlane.xlu1 %8486 }
0x3786   : > { %17799 = vrcp.f32 %v8487_v61 }
0x3789   : > { %v8495_v46 = vpop.permute.xlu1 %8494 }
0x378a   : > { %16436 = vmatpush3.msk.msra.mxu1 %vm1825_vm9, %v8495_v46 }
0x378b   : > { %16440 = vmatprep.subr.mxu1 %v18003_v6 }
0x378d   : > { %v8657_v1 = vpop.permute.xlu1 %8656 }
0x3790   : > { %v17800_v30 = vpop.eup %17799 }
0x3791   : > { %v8489_v62 = vmul.f32 %v17800_v30, %v17798_v49 }
0x3793   : > { %16438 = vmatmul.mubr.msk.f32.vlgmr.msra.gmra.mrb[140].mxu1 %vm1773_vm7, %v8489_v62 }
0x3794   : > { %16441 = vmatpush3.msk.msra.mxu1 %vm5786_vm4, %v8573_v51  ;;  %16442 = vmatprep.mubr.msk.f32.mxu1 %vm18002_vm0, %v18003_v6 }
0x3795   : > { %17116 = vmatprep.subr.bf16.mxu1 %v18001_v3 }
0x380a   : > { %v8387_v33 = vpop.f32.mrb[138].mxu1 }
0x380b   : > { %v8391_v63 = vadd.f32 %v8387_v33, %v8131_v52  ;;  %v16421_v18 = vpop.f32.mrb[139].mxu1 }
0x3866   : > { %v8569_v17 = vpop.f32.mrb[140].mxu1 }
0x3867   : > { %v16439_v56 = vpop.f32.mrb[141].mxu1  ;;  %16443 = vmatmul.mubr.msk.f32.vlgmr.msra.gmra.mrb[142].mxu1 %vm5450_vm2, %v8569_v17 }
0x3868   : > { %17119 = vmatpush3.bf16.xpose.msk.msra.mxu1 %vm19381_vm6, %v17117_v12  ;;  %16451 = vmatprep.mubr.msk.f32.mxu1 %vm18002_vm0, %v18003_v6 }
0x3869   : > { %16449 = vmatprep.subr.mxu1 %v18003_v6 }
0x3870   : > { %16450 = vmatpush3.xpose.msk.msra.mxu1 %vm5450_vm2, %v8657_v1 }
0x3871   : > { %17127 = vmatprep.subr.bf16.mxu1 %v18001_v3 }
0x3873   : > { %16452 = vmatmul.mubr.msk.f32.vlgmr.msra.gmra.mrb[144].mxu1 %vm5450_vm2, %v8651_v50 }
0x3874   : > { %16483 = vmatprep.mubr.msk.f32.mxu1 %vm18002_vm0, %v18003_v6 }
0x393a   : > { %v8645_v4 = vpop.f32.mrb[142].mxu1 }
0x393b   : > { %v8649_v15 = vadd.f32 %v8645_v4, %v8391_v63  ;;  %v16444_v5 = vpop.f32.mrb[143].mxu1 }
0x3946   : > { %v8732_v7 = vpop.f32.mrb[144].mxu1 }
0x3947   : > { %v8736_v11 = vmul.f32 0.5, %v8732_v7  ;;  %v16453_v14 = vpop.f32.mrb[145].mxu1 }
0x3949   : > { %v8737_v29 = vsel %vm1773_vm7, %v8736_v11, -inf }
0x394a   : > { %8738 = vmax.xlane.f32.xlu1 %v8737_v29 }
0x395b   : > { %8752 = vrot.lane.b32.xlu1 %v19360_v2, %s20427_s8 }
0x395f   : > { %17497 = vrot.lane.b32.xlu1 %v19358_v43, %s20457_s15 }
0x3963   : > { %8908 = vrot.lane.b32.xlu1 %v19396_v25, %s20457_s15 }
0x39d7   : > { %v8739_v19 = vpop.xlane.xlu1 %8738 }
0x39d8   : > { %v8740_v21 = vsub.f32 %v8736_v11, %v8739_v19 }
0x39da   : > { %v8741_v31 = vmul.f32 1.442695, %v8740_v21 }
0x39db   : > { %v8753_v23 = vpop.permute.xlu1 %8752 }
0x39dc   : > { %17801 = vpow2.f32 %v8741_v31 }
0x39df   : > { %v17498_v41 = vpop.permute.xlu1 %17497 }
0x39e0   : > { %v17500_v27 = vunpack.i.h.bf16 %v17498_v41  ;;  %v17499_v42 = vunpack.i.l.bf16 %v17498_v41 }
0x39e2   : > { %v17124_v16 = vpack.c.bf16 %v17500_v27, %v17499_v42  ;;  %v7448_v42 = vld [vmem:[%s20455_s28 + $0x18] sm:$0xff]  ;;  %s20461_s28 = sld [smem:[#allocation12_spill]] }
0x39e3   : > { %v8909_v45 = vpop.permute.xlu1 %8908 }
0x39e6   : > { %v17802_v22 = vpop.eup %17801 }
0x39e7   : > { %v8743_v32 = vsel %vm1773_vm7, %v17802_v22, 0.0 }
0x39e8   : > { %8744 = vadd.xlane.f32.xlu0 %v8743_v32 }
0x39fe   : > { %17492 = vrot.lane.b32.xlu0 %v19358_v43, %s20427_s8 }
0x3a02   : > { %8914 = vrot.lane.b32.xlu0 %v19360_v2, %s20457_s15 }
0x3a75   : > { %v8745_v34 = vpop.xlane.xlu0 %8744 }
0x3a76   : > { %17803 = vrcp.f32 %v8745_v34 }
0x3a79   : > { %v17493_v38 = vpop.permute.xlu0 %17492 }
0x3a7a   : > { %v17495_v9 = vunpack.i.h.bf16 %v17493_v38  ;;  %v17494_v40 = vunpack.i.l.bf16 %v17493_v38 }
0x3a7c   : > { %v17121_v24 = vpack.c.bf16 %v17495_v9, %v17494_v40 }
0x3a7d   : > { %v8915_v54 = vpop.permute.xlu0 %8914 }
0x3a7e   : > { %17122 = vmatpush3.bf16.msra.mxu0 %v17121_v24 }
0x3a7f   : > { %16458 = vmatprep.subr.mxu0 %v18003_v6 }
0x3a80   : > { %v17804_v39 = vpop.eup %17803 }
0x3a81   : > { %v8747_v36 = vmul.f32 %v17804_v39, %v17802_v22 }
0x3a82   : > { %16459 = vmatpush3.msk.msra.mxu0 %vm1825_vm9, %v8753_v23 }
0x3a83   : > { %16461 = vmatmul.mubr.msk.f32.vlgmr.msra.gmra.mrb[130].mxu0 %vm1773_vm7, %v8747_v36  ;;  %16463 = vmatprep.subr.mxu0 %v18003_v6 }
0x3a84   : > { %16464 = vmatpush3.msk.msra.mxu0 %vm5786_vm4, %v7447_v13  ;;  %16465 = vmatprep.mubr.msk.f32.mxu0 %vm18002_vm0, %v18003_v6 }
0x3a85   : > { %17123 = vmatprep.subr.bf16.mxu0 %v18001_v3 }
0x3b56   : > { %v8827_v49 = vpop.f32.mrb[130].mxu0 }
0x3b57   : > { %v16462_v20 = vpop.f32.mrb[131].mxu0  ;;  %16466 = vmatmul.mubr.msk.f32.vlgmr.msra.gmra.mrb[132].mxu0 %vm5450_vm2, %v8827_v49 }
0x3b58   : > { %17126 = vmatpush3.bf16.xpose.msk.msra.mxu0 %vm19381_vm6, %v17124_v16  ;;  %16474 = vmatprep.mubr.msk.f32.mxu0 %vm18002_vm0, %v18003_v6 }
0x3b59   : > { %16472 = vmatprep.subr.mxu0 %v18003_v6 }
0x3b60   : > { %16473 = vmatpush3.xpose.msk.msra.mxu0 %vm5450_vm2, %v8915_v54 }
0x3b61   : > { %17134 = vmatprep.subr.bf16.mxu0 %v18001_v3 }
0x3b63   : > { %16475 = vmatmul.mubr.msk.f32.vlgmr.msra.gmra.mrb[134].mxu0 %vm5450_vm2, %v8909_v45 }
0x3b64   : > { %16506 = vmatprep.mubr.msk.f32.mxu0 %vm18002_vm0, %v18003_v6 }
0x3c2a   : > { %v8903_v53 = vpop.f32.mrb[132].mxu0 }
0x3c2b   : > { %v8907_v48 = vadd.f32 %v8903_v53, %v8649_v15  ;;  %v16467_v52 = vpop.f32.mrb[133].mxu0 }
0x3c36   : > { %v8990_v55 = vpop.f32.mrb[134].mxu0 }
0x3c37   : > { %v8994_v57 = vmul.f32 0.5, %v8990_v55  ;;  %v16476_v58 = vpop.f32.mrb[135].mxu0 }
0x3c39   : > { %v8995_v59 = vsel %vm1773_vm7, %v8994_v57, -inf }
0x3c3a   : > { %8996 = vmax.xlane.f32.xlu0 %v8995_v59 }
0x3c50   : > { %17502 = vrot.lane.b32.xlu0 %v19358_v43, %s20458_s4 }
0x3c54   : > { %17507 = vrot.lane.b32.xlu0 %v19358_v43, %s20431_s20 }
0x3c58   : > { %9166 = vrot.lane.b32.xlu0 %v19396_v25, %s20431_s20 }
0x3cc7   : > { %v8997_v60 = vpop.xlane.xlu0 %8996 }
0x3cc8   : > { %v8998_v10 = vsub.f32 %v8994_v57, %v8997_v60 }
0x3cca   : > { %v8999_v61 = vmul.f32 1.442695, %v8998_v10 }
0x3ccb   : > { %v17503_v46 = vpop.permute.xlu0 %17502 }
0x3ccc   : > { %17805 = vpow2.f32 %v8999_v61  ;;  %v17505_v30 = vunpack.i.h.bf16 %v17503_v46  ;;  %v17504_v51 = vunpack.i.l.bf16 %v17503_v46 }
0x3cce   : > { %v17128_v62 = vpack.c.bf16 %v17505_v30, %v17504_v51 }
0x3ccf   : > { %v17508_v17 = vpop.permute.xlu0 %17507 }
0x3cd0   : > { %17129 = vmatpush3.bf16.msra.mxu1 %v17128_v62  ;;  %v17510_v56 = vunpack.i.h.bf16 %v17508_v17  ;;  %v17509_v1 = vunpack.i.l.bf16 %v17508_v17  ;;  %v9605_v17 = vrot.slane %v7448_v42, 4 }
0x3cd1   : > { %16481 = vmatprep.subr.mxu1 %v18003_v6 }
0x3cd2   : > { %v17131_v50 = vpack.c.bf16 %v17510_v56, %v17509_v1 }
0x3cd3   : > { %v9167_v7 = vpop.permute.xlu0 %9166 }
0x3cd6   : > { %v17806_v33 = vpop.eup %17805 }
0x3cd7   : > { %v9001_v63 = vsel %vm1773_vm7, %v17806_v33, 0.0 }
0x3cd8   : > { %9002 = vadd.xlane.f32.xlu1 %v9001_v63 }
0x3ce9   : > { %9010 = vrot.lane.b32.xlu1 %v19360_v2, %s20458_s4 }
0x3ced   : > { %9172 = vrot.lane.b32.xlu1 %v19360_v2, %s20431_s20 }
0x3d65   : > { %v9003_v18 = vpop.xlane.xlu1 %9002 }
0x3d66   : > { %17807 = vrcp.f32 %v9003_v18 }
0x3d69   : > { %v9011_v8 = vpop.permute.xlu1 %9010 }
0x3d6a   : > { %16482 = vmatpush3.msk.msra.mxu1 %vm1825_vm9, %v9011_v8 }
0x3d6b   : > { %16486 = vmatprep.subr.mxu1 %v18003_v6 }
0x3d6d   : > { %v9173_v5 = vpop.permute.xlu1 %9172 }
0x3d70   : > { %v17808_v35 = vpop.eup %17807 }
0x3d71   : > { %v9005_v12 = vmul.f32 %v17808_v35, %v17806_v33 }
0x3d73   : > { %16484 = vmatmul.mubr.msk.f32.vlgmr.msra.gmra.mrb[146].mxu1 %vm1773_vm7, %v9005_v12 }
0x3d74   : > { %16487 = vmatpush3.msk.msra.mxu1 %vm5786_vm4, %v9089_v0  ;;  %16488 = vmatprep.mubr.msk.f32.mxu1 %vm18002_vm0, %v18003_v6 }
0x3d75   : > { %17130 = vmatprep.subr.bf16.mxu1 %v18001_v3 }
0x3e46   : > { %v9085_v4 = vpop.f32.mrb[146].mxu1 }
0x3e47   : > { %v16485_v15 = vpop.f32.mrb[147].mxu1  ;;  %16489 = vmatmul.mubr.msk.f32.vlgmr.msra.gmra.mrb[148].mxu1 %vm5450_vm2, %v9085_v4 }
0x3e48   : > { %17133 = vmatpush3.bf16.xpose.msk.msra.mxu1 %vm19381_vm6, %v17131_v50  ;;  %16497 = vmatprep.mubr.msk.f32.mxu1 %vm18002_vm0, %v18003_v6  ;;  %v15009_v50 = vld [vmem:[%s20461_s28] ss:$0 sm:$0xff]  ;;  %s20464_s28 = sld [smem:[#allocation20_spill]] }
0x3e49   : > { %16495 = vmatprep.subr.mxu1 %v18003_v6 }
0x3e50   : > { %16496 = vmatpush3.xpose.msk.msra.mxu1 %vm5450_vm2, %v9173_v5 }
0x3e51   : > { %17141 = vmatprep.subr.bf16.mxu1 %v18001_v3 }
0x3e53   : > { %16498 = vmatmul.mubr.msk.f32.vlgmr.msra.gmra.mrb[150].mxu1 %vm5450_vm2, %v9167_v7 }
0x3e54   : > { %16529 = vmatprep.mubr.msk.f32.mxu1 %vm18002_vm0, %v18003_v6 }
0x3f1a   : > { %v9161_v11 = vpop.f32.mrb[148].mxu1 }
0x3f1b   : > { %v9165_v14 = vadd.f32 %v9161_v11, %v8907_v48  ;;  %v16490_v29 = vpop.f32.mrb[149].mxu1 }
0x3f26   : > { %v9248_v19 = vpop.f32.mrb[150].mxu1 }
0x3f27   : > { %v9252_v21 = vmul.f32 0.5, %v9248_v19  ;;  %v16499_v31 = vpop.f32.mrb[151].mxu1 }
0x3f29   : > { %v9253_v22 = vsel %vm1773_vm7, %v9252_v21, -inf }
0x3f2a   : > { %9254 = vmax.xlane.f32.xlu1 %v9253_v22 }
0x3f3b   : > { %9268 = vrot.lane.b32.xlu1 %v19360_v2, %s20430_s19 }
0x3f3f   : > { %17517 = vrot.lane.b32.xlu1 %v19358_v43, %s20459_s0 }
0x3f43   : > { %9424 = vrot.lane.b32.xlu1 %v19396_v25, %s20459_s0 }
0x3fb7   : > { %v9255_v32 = vpop.xlane.xlu1 %9254 }
0x3fb8   : > { %v9256_v34 = vsub.f32 %v9252_v21, %v9255_v32  ;;  %v9719_v32 = vld [vmem:[%s20462_s18] sm:$0xff] }
0x3fba   : > { %v9257_v38 = vmul.f32 1.442695, %v9256_v34  ;;  %v9720_v34 = vld [vmem:[%s20462_s18 + $0x8] sm:$0xff] }
0x3fbb   : > { %v9269_v41 = vpop.permute.xlu1 %9268 }
0x3fbc   : > { %17809 = vpow2.f32 %v9257_v38  ;;  %v17145_v38 = vpack.c.bf16 %v9720_v34, %v9719_v32  ;;  %v15028_v32 = vld [vmem:[%s20435_s13 + $0x1] ss:$0 sm:$0xff] }
0x3fbf   : > { %v17518_v16 = vpop.permute.xlu1 %17517 }
0x3fc0   : > { %v17520_v49 = vunpack.i.h.bf16 %v17518_v16  ;;  %v17519_v20 = vunpack.i.l.bf16 %v17518_v16 }
0x3fc2   : > { %v17138_v54 = vpack.c.bf16 %v17520_v49, %v17519_v20 }
0x3fc3   : > { %v9425_v52 = vpop.permute.xlu1 %9424 }
0x3fc6   : > { %v17810_v9 = vpop.eup %17809 }
0x3fc7   : > { %v9259_v40 = vsel %vm1773_vm7, %v17810_v9, 0.0 }
0x3fc8   : > { %9260 = vadd.xlane.f32.xlu0 %v9259_v40 }
0x3fde   : > { %17512 = vrot.lane.b32.xlu0 %v19358_v43, %s20430_s19 }
0x3fe2   : > { %9430 = vrot.lane.b32.xlu0 %v19360_v2, %s20459_s0 }
0x4055   : > { %v9261_v24 = vpop.xlane.xlu0 %9260 }
0x4056   : > { %17811 = vrcp.f32 %v9261_v24  ;;  %v9804_v24 = vld [vmem:[%s20463_s26] sm:$0xff] }
0x4059   : > { %v17513_v39 = vpop.permute.xlu0 %17512 }
0x405a   : > { %v17515_v23 = vunpack.i.h.bf16 %v17513_v39  ;;  %v17514_v25 = vunpack.i.l.bf16 %v17513_v39  ;;  %v9805_v39 = vld [vmem:[%s20463_s26 + $0x8] sm:$0xff] }
0x405c   : > { %v17135_v36 = vpack.c.bf16 %v17515_v23, %v17514_v25  ;;  %v9806_v23 = vld [vmem:[%s20463_s26 + $0x10] sm:$0xff]  ;;  %v17151_v25 = vpack.c.bf16 %v9805_v39, %v9804_v24 }
0x405d   : > { %v9431_v48 = vpop.permute.xlu0 %9430 }
0x405e   : > { %17136 = vmatpush3.bf16.msra.mxu0 %v17135_v36  ;;  %v9807_v36 = vld [vmem:[%s20463_s26 + $0x18] sm:$0xff] }
0x405f   : > { %16504 = vmatprep.subr.mxu0 %v18003_v6 }
0x4060   : > { %v17812_v13 = vpop.eup %17811 }
0x4061   : > { %v9263_v27 = vmul.f32 %v17812_v13, %v17810_v9  ;;  %v9722_v9 = vld [vmem:[%s20462_s18 + $0x18] sm:$0xff]  ;;  %v17154_v13 = vpack.c.bf16 %v9807_v36, %v9806_v23  ;;  %v19703_v36 = vld [vmem:[%s20439_s6] sm:$0xff] }
0x4062   : > { %16505 = vmatpush3.msk.msra.mxu0 %vm1825_vm9, %v9269_v41  ;;  %v9808_v41 = vld [vmem:[%s20463_s26 + $0x20] sm:$0xff] }
0x4063   : > { %16507 = vmatmul.mubr.msk.f32.vlgmr.msra.gmra.mrb[136].mxu0 %vm1773_vm7, %v9263_v27  ;;  %16509 = vmatprep.subr.mxu0 %v18003_v6  ;;  %v9809_v27 = vld [vmem:[%s20463_s26 + $0x28] sm:$0xff] }
0x4064   : > { %16510 = vmatpush3.msk.msra.mxu0 %vm5786_vm4, %v7448_v42  ;;  %16511 = vmatprep.mubr.msk.f32.mxu0 %vm18002_vm0, %v18003_v6  ;;  %v17157_v42 = vpack.c.bf16 %v9809_v27, %v9808_v41 }
0x4065   : > { %17137 = vmatprep.subr.bf16.mxu0 %v18001_v3 }
0x4136   : > { %v9343_v45 = vpop.f32.mrb[136].mxu0 }
0x4137   : > { %v16508_v53 = vpop.f32.mrb[137].mxu0  ;;  %16512 = vmatmul.mubr.msk.f32.vlgmr.msra.gmra.mrb[138].mxu0 %vm5450_vm2, %v9343_v45  ;;  %v15010_v45 = vld [vmem:[%s20464_s28] ss:$0 sm:$0xff] }
0x4138   : > { %17140 = vmatpush3.bf16.xpose.msk.msra.mxu0 %vm19381_vm6, %v17138_v54  ;;  %16520 = vmatprep.mubr.msk.f32.mxu0 %vm18002_vm0, %v18003_v6 }
0x4139   : > { %16518 = vmatprep.subr.mxu0 %v18003_v6 }
0x4140   : > { %16519 = vmatpush3.xpose.msk.msra.mxu0 %vm5450_vm2, %v9431_v48  ;;  %v15011_v48 = vld [vmem:[%s20465_s30] ss:$0 sm:$0xff] }
0x4141   : > { %17150 = vmatprep.subr.bf16.mxu0 %v18001_v3 }
0x4143   : > { %16521 = vmatmul.mubr.msk.f32.vlgmr.msra.gmra.mrb[140].mxu0 %vm5450_vm2, %v9425_v52 }
0x4144   : > { %16564 = vmatprep.mubr.msk.f32.mxu0 %vm18002_vm0, %v18003_v6  ;;  %17152 = vmatpush3.bf16.msra.mxu0 %v17151_v25 }
0x4145   : > { %17153 = vmatprep.subr.bf16.mxu0 %v18001_v3 }
0x4148   : > { %17155 = vmatpush3.bf16.msra.mxu0 %v17154_v13 }
0x4149   : > { %17156 = vmatprep.subr.bf16.mxu0 %v18001_v3 }
0x414c   : > { %17158 = vmatpush3.bf16.msra.mxu0 %v17157_v42 }
0x414d   : > { %17159 = vmatprep.subr.bf16.mxu0 %v18001_v3 }
0x420a   : > { %v9419_v55 = vpop.f32.mrb[138].mxu0 }
0x420b   : > { %v9423_v57 = vadd.f32 %v9419_v55, %v9165_v14  ;;  %v16513_v58 = vpop.f32.mrb[139].mxu0 }
0x420c   : > { %v9811_v58 = vld [vmem:[%s20463_s26 + $0x38] sm:$0xff] }
0x4216   : > { %v9506_v59 = vpop.f32.mrb[140].mxu0 }
0x4217   : > { %v9510_v60 = vmul.f32 0.5, %v9506_v59  ;;  %v16522_v10 = vpop.f32.mrb[141].mxu0 }
0x4219   : > { %v9511_v61 = vsel %vm1773_vm7, %v9510_v60, -inf }
0x421a   : > { %9512 = vmax.xlane.f32.xlu0 %v9511_v61 }
0x4230   : > { %17522 = vrot.lane.b32.xlu0 %v19358_v43, %s20460_s10 }
0x42a7   : > { %v9513_v46 = vpop.xlane.xlu0 %9512 }
0x42a8   : > { %v9514_v30 = vsub.f32 %v9510_v60, %v9513_v46 }
0x42aa   : > { %v9515_v51 = vmul.f32 1.442695, %v9514_v30 }
0x42ab   : > { %v17523_v62 = vpop.permute.xlu0 %17522 }
0x42ac   : > { %17813 = vpow2.f32 %v9515_v51  ;;  %v17525_v33 = vunpack.i.h.bf16 %v17523_v62  ;;  %v17524_v63 = vunpack.i.l.bf16 %v17523_v62  ;;  %v15014_v51 = vld [vmem:[%s20467_s2] ss:$0 sm:$0xff]  ;;  %s20469_s2 = sld [smem:[#allocation21_spill]] }
0x42ae   : > { %v17142_v18 = vpack.c.bf16 %v17525_v33, %v17524_v63 }
0x42b0   : > { %17143 = vmatpush3.bf16.msra.mxu1 %v17142_v18 }
0x42b1   : > { %16527 = vmatprep.subr.mxu1 %v18003_v6 }
0x42b6   : > { %v17814_v8 = vpop.eup %17813 }
0x42b7   : > { %v9517_v35 = vsel %vm1773_vm7, %v17814_v8, 0.0 }
0x42b8   : > { %9518 = vadd.xlane.f32.xlu1 %v9517_v35 }
0x42c9   : > { %9526 = vrot.lane.b32.xlu1 %v19360_v2, %s20460_s10 }
0x4345   : > { %v9519_v0 = vpop.xlane.xlu1 %9518 }
0x4346   : > { %17815 = vrcp.f32 %v9519_v0 }
0x4349   : > { %v9527_v43 = vpop.permute.xlu1 %9526 }
0x434a   : > { %16528 = vmatpush3.msk.msra.mxu1 %vm1825_vm9, %v9527_v43 }
0x434b   : > { %16532 = vmatprep.subr.mxu1 %v18003_v6 }
0x4350   : > { %v17816_v12 = vpop.eup %17815 }
0x4351   : > { %v9521_v56 = vmul.f32 %v17816_v12, %v17814_v8 }
0x4353   : > { %16530 = vmatmul.mubr.msk.f32.vlgmr.msra.gmra.mrb[152].mxu1 %vm1773_vm7, %v9521_v56  ;;  %v15018_v56 = vld [vmem:[%s20433_s9 + $0x20] sm:$0xff] }
0x4354   : > { %16533 = vmatpush3.msk.msra.mxu1 %vm5786_vm4, %v9605_v17  ;;  %16534 = vmatprep.mubr.msk.f32.mxu1 %vm18002_vm0, %v18003_v6 }
0x4355   : > { %17144 = vmatprep.subr.bf16.mxu1 %v18001_v3 }
0x4426   : > { %v9601_v2 = vpop.f32.mrb[152].mxu1 }
0x4427   : > { %v16531_v1 = vpop.f32.mrb[153].mxu1  ;;  %16535 = vmatmul.mubr.msk.f32.vlgmr.msra.gmra.mrb[154].mxu1 %vm5450_vm2, %v9601_v2  ;;  %v15019_v2 = vld [vmem:[%s20433_s9 + $0x28] sm:$0xff] }
0x4428   : > { %16545 = vmatprep.mubr.msk.f32.mxu1 %vm18002_vm0, %v18003_v6  ;;  %17146 = vmatpush3.bf16.msra.mxu1 %v17145_v38  ;;  %v17163_v1 = vpack.c.bf16 %v15019_v2, %v15018_v56 }
0x4429   : > { %17147 = vmatprep.subr.bf16.mxu1 %v18001_v3 }
0x44fa   : > { %v9677_v4 = vpop.f32.mrb[154].mxu1 }
0x44fb   : > { %v9681_v15 = vadd.f32 %v9677_v4, %v9423_v57  ;;  %v16536_v5 = vpop.f32.mrb[155].mxu1  ;;  %v9810_v57 = vld [vmem:[%s20463_s26 + $0x30] sm:$0xff]  ;;  %v15021_v4 = vld [vmem:[%s20433_s9 + $0x38] sm:$0xff] }
0x44fc   : > { %v17160_v59 = vpack.c.bf16 %v9811_v58, %v9810_v57 }
0x44fd   : > { %v9688_v7 = vadd.f32 %v15009_v50, %v9681_v15  ;;  %v15020_v50 = vld [vmem:[%s20433_s9 + $0x30] sm:$0xff] }
0x44fe   : > { %17161 = vmatpush3.bf16.msra.mxu0 %v17160_v59  ;;  %v17166_v15 = vpack.c.bf16 %v15021_v4, %v15020_v50 }
0x44ff   : > { %v9689_v11 = vadd.f32 %v9688_v7, %v19377_v47  ;;  %v9721_v47 = vld [vmem:[%s20462_s18 + $0x10] sm:$0xff]  ;;  %s20466_s18 = sld [smem:[#allocation9_spill]]  ;;  %16583 = vmatprep.subr.mxu0 %v18003_v6 }
0x4500   : > { %v17148_v40 = vpack.c.bf16 %v9722_v9, %v9721_v47 }
0x4501   : > { %v9692_v14 = vsel %vm1503_vm3, %v9689_v11, 0.0 }
0x4502   : > { %9693 = vadd.xlane.f32.xlu0 %v9692_v14  ;;  %17149 = vmatpush3.bf16.msra.mxu1 %v17148_v40 }
0x4503   : > { %17162 = vmatprep.subr.bf16.mxu1 %v18001_v3 }
0x4505   : > { %v15012_v60 = vld [vmem:[%s20466_s18] ss:$0 sm:$0xff]  ;;  %s20468_s18 = sld [smem:[#allocation22_spill]] }
0x458f   : > { %v9694_v29 = vpop.xlane.xlu0 %9693 }
0x4590   : > { %v9695_v19 = vmul.f32 0.03125, %v9694_v29  ;;  %v15016_v29 = vld [vmem:[%s20468_s18] ss:$0 sm:$0xff] }
0x4592   : > { %v9696_v21 = vsub.f32 %v9689_v11, %v9695_v19 }
0x4594   : > { %v9697_v31 = vmul.f32 %v9696_v21, %v9696_v21 }
0x4596   : > { %v9698_v22 = vsel %vm1503_vm3, %v9697_v31, 0.0 }
0x4597   : > { %9699 = vadd.xlane.f32.xlu1 %v9698_v22 }
0x4624   : > { %v9700_v16 = vpop.xlane.xlu1 %9699 }
0x4625   : > { %v9701_v49 = vmul.f32 0.03125, %v9700_v16 }
0x4627   : > { %v9702_v20 = vadd.f32 1e-05, %v9701_v49 }
0x4629   : > { %17817 = vrsqrt.f32 %v9702_v20 }
0x4633   : > { %v17818_v54 = vpop.eup %17817 }
0x4634   : > { %v9704_v53 = vmul.f32 %v17818_v54, %v9696_v21  ;;  %v15017_v21 = vld [vmem:[%s20469_s2] ss:$0 sm:$0xff] }
0x4636   : > { %v9711_v52 = vmul.f32 %v15010_v45, %v9704_v53 }
0x4638   : > { %v9718_v55 = vadd.f32 %v15011_v48, %v9711_v52 }
0x463a   : > { %16546 = vmatmul.mubr.msk.f32.vlgmr.msra.gmra.mrb[156].mxu1 %vm1503_vm3, %v9718_v55 }
0x463b   : > { %16575 = vmatprep.mubr.msk.f32.mxu1 %vm18002_vm0, %v18003_v6  ;;  %17164 = vmatpush3.bf16.msra.mxu1 %v17163_v1 }
0x463c   : > { %17165 = vmatprep.subr.bf16.mxu1 %v18001_v3 }
0x463f   : > { %17167 = vmatpush3.bf16.msra.mxu1 %v17166_v15 }
0x4640   : > { %16578 = vmatprep.subr.mxu1 %v18003_v6 }
0x470d   : > { %v9799_v10 = vpop.f32.mrb[156].mxu1 }
0x470e   : > { %v9800_v61 = vadd.f32 %v15012_v60, %v9799_v10  ;;  %v16547_v46 = vpop.f32.mrb[157].mxu1 }
0x4710   : > { %v9803_v30 = vmax.f32 %v9800_v61, 0.0  ;;  %v15023_v61 = vld [vmem:[%s20440_s14 + $0x20] sm:$0xff] }
0x4711   : > { %v10349_v46 = vrot.slane %v15023_v61, 4 }
0x4712   : > { %16565 = vmatmul.mubr.msk.f32.vlgmr.msra.gmra.mrb[142].mxu0 %vm3254_vm11, %v9803_v30 }
0x4713   : > { %16585 = vmatprep.mubr.msk.f32.mxu0 %vm18002_vm0, %v18003_v6 }
0x47e5   : > { %v9888_v62 = vpop.f32.mrb[142].mxu0 }
0x47e6   : > { %v9889_v33 = vadd.f32 %v15014_v51, %v9888_v62  ;;  %v16566_v63 = vpop.f32.mrb[143].mxu0 }
0x47e8   : > { %v9892_v18 = vadd.f32 %v9889_v33, %v9718_v55 }
0x47ea   : > { %v9895_v8 = vsel %vm1503_vm3, %v9892_v18, 0.0 }
0x47eb   : > { %9896 = vadd.xlane.f32.xlu0 %v9895_v8 }
0x4878   : > { %v9897_v35 = vpop.xlane.xlu0 %9896 }
0x4879   : > { %v9898_v0 = vmul.f32 0.03125, %v9897_v35 }
0x487b   : > { %v9899_v43 = vsub.f32 %v9892_v18, %v9898_v0 }
0x487d   : > { %v9900_v12 = vmul.f32 %v9899_v43, %v9899_v43 }
0x487f   : > { %v9901_v17 = vsel %vm1503_vm3, %v9900_v12, 0.0 }
0x4880   : > { %9902 = vadd.xlane.f32.xlu0 %v9901_v17 }
0x490d   : > { %v9903_v5 = vpop.xlane.xlu0 %9902 }
0x490e   : > { %v9904_v7 = vmul.f32 0.03125, %v9903_v5 }
0x4910   : > { %v9905_v11 = vadd.f32 1e-05, %v9904_v7 }
0x4912   : > { %17819 = vrsqrt.f32 %v9905_v11 }
0x491c   : > { %v17820_v14 = vpop.eup %17819 }
0x491d   : > { %v9907_v19 = vmul.f32 %v17820_v14, %v9899_v43 }
0x491f   : > { %v9914_v31 = vmul.f32 %v15016_v29, %v9907_v19 }
0x4921   : > { %v19676_v22 = vadd.f32 %v15017_v21, %v9914_v31 }
0x4923   : > { %16576 = vmatmul.mubr.msk.f32.vlgmr.msra.gmra.mrb[158].mxu1 %vm1503_vm3, %v19676_v22 }
0x4924   : > { %16580 = vmatprep.mubr.msk.f32.mxu1 %vm18002_vm0, %v18003_v6 }
0x49f6   : > { %v10011_v34 = vpop.f32.mrb[158].mxu1 }
0x49f7   : > { %v19683_v38 = vadd.f32 %v15028_v32, %v10011_v34  ;;  %v16577_v47 = vpop.f32.mrb[159].mxu1 }
0x49f9   : > { %10183 = vrot.lane.b32.xlu1 %v19683_v38, %s20452_s11  ;;  %10016 = vrot.lane.b32.xlu0 %v19683_v38, %s20422_s22 }
0x49fd   : > { %10181 = vrot.lane.b32.xlu1 %v19683_v38, %s20446_s29 }
0x4a6b   : > { %v10017_v9 = vpop.permute.xlu0 %10016  ;;  %v10184_v40 = vpop.permute.xlu1 %10183 }
0x4a6c   : > { %16579 = vmatpush3.xpose.msk.msra.mxu1 %vm5450_vm2, %v10017_v9 }
0x4a6d   : > { %16588 = vmatprep.subr.mxu1 %v18003_v6 }
0x4a6f   : > { %16581 = vmatmul.mubr.msk.f32.vlgmr.msra.gmra.mrb[160].mxu1 %vm5450_vm2, %v19683_v38  ;;  %v10182_v24 = vpop.permute.xlu1 %10181 }
0x4a70   : > { %16589 = vmatpush3.xpose.msk.msra.mxu1 %vm5450_vm2, %v10184_v40  ;;  %16590 = vmatprep.mubr.msk.f32.mxu1 %vm18002_vm0, %v18003_v6 }
0x4a71   : > { %16598 = vmatprep.subr.mxu1 %v18003_v6 }
0x4a73   : > { %16591 = vmatmul.mubr.msk.f32.vlgmr.msra.gmra.mrb[162].mxu1 %vm5450_vm2, %v10182_v24 }
0x4a74   : > { %16600 = vmatprep.mubr.msk.f32.mxu1 %vm18002_vm0, %v18003_v6  ;;  %16599 = vmatpush3.msk.msra.mxu1 %vm5786_vm4, %v10349_v46 }
0x4a75   : > { %16608 = vmatprep.subr.mxu1 %v18003_v6 }
0x4b42   : > { %v10088_v39 = vpop.f32.mrb[160].mxu1 }
0x4b43   : > { %v10092_v23 = vmul.f32 0.5, %v10088_v39  ;;  %v16582_v25 = vpop.f32.mrb[161].mxu1 }
0x4b44   : > { %v15024_v25 = vld [vmem:[%s20440_s14 + $0x28] sm:$0xff] }
0x4b45   : > { %v10093_v13 = vadd.f32 %v19703_v36, %v10092_v23 }
0x4b46   : > { %v10255_v41 = vpop.f32.mrb[162].mxu1 }
0x4b47   : > { %v10259_v27 = vmul.f32 0.5, %v10255_v41  ;;  %v16592_v42 = vpop.f32.mrb[163].mxu1  ;;  %v10094_v16 = vsel %vm1677_vm5, %v10093_v13, -inf }
0x4b48   : > { %10095 = vmax.xlane.f32.xlu1 %v10094_v16 }
0x4b49   : > { %v10260_v49 = vadd.f32 %v19703_v36, %v10259_v27 }
0x4b4b   : > { %v10261_v20 = vsel %vm1677_vm5, %v10260_v49, -inf }
0x4b4c   : > { %10262 = vmax.xlane.f32.xlu0 %v10261_v20 }
0x4b59   : > { %10105 = vrot.lane.b32.xlu1 %v19683_v38, %s20425_s3  ;;  %s20470_s3 = smov 60  }
0x4b5d   : > { %10502 = vrot.lane.b32.xlu1 %v19683_v38, %s20423_s23 }
0x4b61   : > { %10500 = vrot.lane.b32.xlu1 %v19683_v38, %s20424_s16 }
0x4bd5   : > { %v10096_v54 = vpop.xlane.xlu1 %10095 }
0x4bd6   : > { %v10097_v45 = vsub.f32 %v10093_v13, %v10096_v54  ;;  %v10911_v13 = vrot.slane %v15024_v25, 4 }
0x4bd8   : > { %v10098_v53 = vmul.f32 1.442695, %v10097_v45 }
0x4bd9   : > { %v10106_v48 = vpop.permute.xlu1 %10105  ;;  %v10263_v52 = vpop.xlane.xlu0 %10262 }
0x4bda   : > { %17821 = vpow2.f32 %v10098_v53  ;;  %v10264_v55 = vsub.f32 %v10260_v49, %v10263_v52  ;;  %16584 = vmatpush3.msra.mxu0 %v10106_v48 }
0x4bdb   : > { %16593 = vmatprep.subr.mxu0 %v18003_v6 }
0x4bdc   : > { %v10265_v57 = vmul.f32 1.442695, %v10264_v55 }
0x4bdd   : > { %v10503_v43 = vpop.permute.xlu1 %10502 }
0x4bde   : > { %17823 = vpow2.f32 %v10265_v57 }
0x4be1   : > { %v10501_v56 = vpop.permute.xlu1 %10500 }
0x4be4   : > { %v17822_v58 = vpop.eup %17821 }
0x4be5   : > { %v10100_v59 = vsel %vm1677_vm5, %v17822_v58, 0.0 }
0x4be6   : > { %10101 = vadd.xlane.f32.xlu0 %v10100_v59 }
0x4be8   : > { %v17824_v60 = vpop.eup %17823 }
0x4be9   : > { %v10267_v10 = vsel %vm1677_vm5, %v17824_v60, 0.0 }
0x4bea   : > { %10268 = vadd.xlane.f32.xlu0 %v10267_v10 }
0x4c00   : > { %10272 = vrot.lane.b32.xlu0 %v19683_v38, %s20470_s3  ;;  %s20474_s3 = sld [smem:[#allocation16_spill]] }
0x4c73   : > { %v10102_v30 = vpop.xlane.xlu0 %10101 }
0x4c74   : > { %17825 = vrcp.f32 %v10102_v30 }
0x4c77   : > { %v10269_v51 = vpop.xlane.xlu0 %10268 }
0x4c78   : > { %17827 = vrcp.f32 %v10269_v51 }
0x4c7b   : > { %v10273_v63 = vpop.permute.xlu0 %10272 }
0x4c7e   : > { %v17826_v62 = vpop.eup %17825 }
0x4c7f   : > { %v10104_v33 = vmul.f32 %v17826_v62, %v17822_v58 }
0x4c81   : > { %16586 = vmatmul.mubr.msk.f32.vlgmr.msra.gmra.mrb[144].mxu0 %vm1677_vm5, %v10104_v33 }
0x4c82   : > { %v17828_v18 = vpop.eup %17827  ;;  %16594 = vmatpush3.msra.mxu0 %v10273_v63  ;;  %16595 = vmatprep.mubr.msk.f32.mxu0 %vm18002_vm0, %v18003_v6 }
0x4c83   : > { %v10271_v8 = vmul.f32 %v17828_v18, %v17824_v60  ;;  %16603 = vmatprep.subr.mxu0 %v18003_v6 }
0x4c85   : > { %16596 = vmatmul.mubr.msk.f32.vlgmr.msra.gmra.mrb[146].mxu0 %vm1677_vm5, %v10271_v8 }
0x4c86   : > { %16604 = vmatpush3.msk.msra.mxu0 %vm5786_vm4, %v15023_v61  ;;  %16605 = vmatprep.mubr.msk.f32.mxu0 %vm18002_vm0, %v18003_v6 }
0x4c87   : > { %16613 = vmatprep.subr.mxu0 %v18003_v6 }
0x4d54   : > { %v10177_v35 = vpop.f32.mrb[144].mxu0 }
0x4d55   : > { %v16587_v0 = vpop.f32.mrb[145].mxu0  ;;  %16606 = vmatmul.mubr.msk.f32.vlgmr.msra.gmra.mrb[148].mxu0 %vm5450_vm2, %v10177_v35 }
0x4d56   : > { %16615 = vmatprep.mubr.msk.f32.mxu0 %vm18002_vm0, %v18003_v6 }
0x4d58   : > { %v10344_v12 = vpop.f32.mrb[146].mxu0 }
0x4d59   : > { %v16597_v17 = vpop.f32.mrb[147].mxu0  ;;  %16601 = vmatmul.mubr.msk.f32.vlgmr.msra.gmra.mrb[164].mxu1 %vm5450_vm2, %v10344_v12 }
0x4d5a   : > { %16609 = vmatpush3.xpose.msk.msra.mxu1 %vm5450_vm2, %v10503_v43  ;;  %16610 = vmatprep.mubr.msk.f32.mxu1 %vm18002_vm0, %v18003_v6 }
0x4d5b   : > { %16618 = vmatprep.subr.mxu1 %v18003_v6 }
0x4d5d   : > { %16611 = vmatmul.mubr.msk.f32.vlgmr.msra.gmra.mrb[166].mxu1 %vm5450_vm2, %v10501_v56 }
0x4d5e   : > { %16620 = vmatprep.mubr.msk.f32.mxu1 %vm18002_vm0, %v18003_v6  ;;  %16619 = vmatpush3.msk.msra.mxu1 %vm5786_vm4, %v15024_v25 }
0x4d5f   : > { %16628 = vmatprep.subr.mxu1 %v18003_v6 }
0x4e28   : > { %v10496_v2 = vpop.f32.mrb[148].mxu0 }
0x4e29   : > { %v16607_v1 = vpop.f32.mrb[149].mxu0 }
0x4e2c   : > { %v10421_v50 = vpop.f32.mrb[164].mxu1 }
0x4e2d   : > { %v19743_v4 = vadd.f32 %v10496_v2, %v10421_v50  ;;  %v16602_v15 = vpop.f32.mrb[165].mxu1 }
0x4e30   : > { %v10574_v5 = vpop.f32.mrb[166].mxu1 }
0x4e31   : > { %v10578_v7 = vmul.f32 0.5, %v10574_v5  ;;  %v16612_v11 = vpop.f32.mrb[167].mxu1 }
0x4e33   : > { %v10579_v14 = vadd.f32 %v19703_v36, %v10578_v7 }
0x4e35   : > { %v10580_v29 = vsel %vm1677_vm5, %v10579_v14, -inf }
0x4e36   : > { %10581 = vmax.xlane.f32.xlu1 %v10580_v29 }
0x4e47   : > { %10746 = vrot.lane.b32.xlu1 %v19683_v38, %s20456_s7 }
0x4e4b   : > { %10744 = vrot.lane.b32.xlu1 %v19683_v38, %s20453_s1 }
0x4ec3   : > { %v10582_v19 = vpop.xlane.xlu1 %10581 }
0x4ec4   : > { %v10583_v21 = vsub.f32 %v10579_v14, %v10582_v19  ;;  %v15025_v19 = vld [vmem:[%s20440_s14 + $0x30] sm:$0xff] }
0x4ec6   : > { %v10584_v31 = vmul.f32 1.442695, %v10583_v21  ;;  %v11399_v21 = vrot.slane %v15025_v19, 4 }
0x4ec7   : > { %v10747_v24 = vpop.permute.xlu1 %10746 }
0x4ec8   : > { %17829 = vpow2.f32 %v10584_v31 }
0x4ecb   : > { %v10745_v23 = vpop.permute.xlu1 %10744 }
0x4ed2   : > { %v17830_v32 = vpop.eup %17829 }
0x4ed3   : > { %v10586_v34 = vsel %vm1677_vm5, %v17830_v32, 0.0 }
0x4ed4   : > { %10587 = vadd.xlane.f32.xlu0 %v10586_v34 }
0x4eea   : > { %10591 = vrot.lane.b32.xlu0 %v19683_v38, %s20426_s5  ;;  %s20471_s5 = smov 52  }
0x4f61   : > { %v10588_v47 = vpop.xlane.xlu0 %10587 }
0x4f62   : > { %17831 = vrcp.f32 %v10588_v47 }
0x4f65   : > { %v10592_v9 = vpop.permute.xlu0 %10591 }
0x4f66   : > { %16614 = vmatpush3.msra.mxu0 %v10592_v9 }
0x4f67   : > { %16623 = vmatprep.subr.mxu0 %v18003_v6 }
0x4f6c   : > { %v17832_v40 = vpop.eup %17831 }
0x4f6d   : > { %v10590_v39 = vmul.f32 %v17832_v40, %v17830_v32 }
0x4f6f   : > { %16616 = vmatmul.mubr.msk.f32.vlgmr.msra.gmra.mrb[150].mxu0 %vm1677_vm5, %v10590_v39 }
0x4f70   : > { %16624 = vmatpush3.xpose.msk.msra.mxu0 %vm5450_vm2, %v10747_v24  ;;  %16625 = vmatprep.mubr.msk.f32.mxu0 %vm18002_vm0, %v18003_v6 }
0x4f71   : > { %16633 = vmatprep.subr.mxu0 %v18003_v6 }
0x4f73   : > { %16626 = vmatmul.mubr.msk.f32.vlgmr.msra.gmra.mrb[152].mxu0 %vm5450_vm2, %v10745_v23 }
0x4f74   : > { %16635 = vmatprep.mubr.msk.f32.mxu0 %vm18002_vm0, %v18003_v6  ;;  %16634 = vmatpush3.msk.msra.mxu0 %vm5786_vm4, %v10911_v13 }
0x4f75   : > { %16643 = vmatprep.subr.mxu0 %v18003_v6 }
0x5042   : > { %v10663_v41 = vpop.f32.mrb[150].mxu0 }
0x5043   : > { %v16617_v27 = vpop.f32.mrb[151].mxu0  ;;  %16621 = vmatmul.mubr.msk.f32.vlgmr.msra.gmra.mrb[168].mxu1 %vm5450_vm2, %v10663_v41 }
0x5044   : > { %16630 = vmatprep.mubr.msk.f32.mxu1 %vm18002_vm0, %v18003_v6 }
0x5046   : > { %v10818_v42 = vpop.f32.mrb[152].mxu0 }
0x5047   : > { %v10822_v16 = vmul.f32 0.5, %v10818_v42  ;;  %v16627_v49 = vpop.f32.mrb[153].mxu0 }
0x5049   : > { %v10823_v20 = vadd.f32 %v19703_v36, %v10822_v16 }
0x504b   : > { %v10824_v54 = vsel %vm1677_vm5, %v10823_v20, -inf }
0x504c   : > { %10825 = vmax.xlane.f32.xlu0 %v10824_v54 }
0x5062   : > { %10835 = vrot.lane.b32.xlu0 %v19683_v38, %s20471_s5  ;;  %s20475_s5 = sld [smem:[#allocation18_spill]] }
0x5066   : > { %10988 = vrot.lane.b32.xlu0 %v19683_v38, %s20428_s12 }
0x50d9   : > { %v10826_v45 = vpop.xlane.xlu0 %10825 }
0x50da   : > { %v10827_v53 = vsub.f32 %v10823_v20, %v10826_v45 }
0x50dc   : > { %v10828_v48 = vmul.f32 1.442695, %v10827_v53 }
0x50dd   : > { %v10836_v52 = vpop.permute.xlu0 %10835 }
0x50de   : > { %17833 = vpow2.f32 %v10828_v48  ;;  %16629 = vmatpush3.msra.mxu1 %v10836_v52 }
0x50df   : > { %16638 = vmatprep.subr.mxu1 %v18003_v6 }
0x50e1   : > { %v10989_v51 = vpop.permute.xlu0 %10988 }
0x50e8   : > { %v17834_v55 = vpop.eup %17833 }
0x50e9   : > { %v10830_v57 = vsel %vm1677_vm5, %v17834_v55, 0.0 }
0x50ea   : > { %10831 = vadd.xlane.f32.xlu1 %v10830_v57 }
0x50fb   : > { %10990 = vrot.lane.b32.xlu1 %v19683_v38, %s20427_s8 }
0x5116   : > { %v10739_v58 = vpop.f32.mrb[168].mxu1 }
0x5117   : > { %v10743_v59 = vadd.f32 %v10739_v58, %v19743_v4  ;;  %v16622_v60 = vpop.f32.mrb[169].mxu1 }
0x5177   : > { %v10832_v10 = vpop.xlane.xlu1 %10831 }
0x5178   : > { %17835 = vrcp.f32 %v10832_v10 }
0x517b   : > { %v10991_v30 = vpop.permute.xlu1 %10990 }
0x5182   : > { %v17836_v61 = vpop.eup %17835 }
0x5183   : > { %v10834_v46 = vmul.f32 %v17836_v61, %v17834_v55 }
0x5185   : > { %16631 = vmatmul.mubr.msk.f32.vlgmr.msra.gmra.mrb[170].mxu1 %vm1677_vm5, %v10834_v46 }
0x5186   : > { %16639 = vmatpush3.xpose.msk.msra.mxu1 %vm5450_vm2, %v10991_v30  ;;  %16640 = vmatprep.mubr.msk.f32.mxu1 %vm18002_vm0, %v18003_v6 }
0x5187   : > { %16648 = vmatprep.subr.mxu1 %v18003_v6 }
0x5189   : > { %16641 = vmatmul.mubr.msk.f32.vlgmr.msra.gmra.mrb[172].mxu1 %vm5450_vm2, %v10989_v51 }
0x518a   : > { %16650 = vmatprep.mubr.msk.f32.mxu1 %vm18002_vm0, %v18003_v6  ;;  %16649 = vmatpush3.msk.msra.mxu1 %vm5786_vm4, %v15025_v19 }
0x518b   : > { %16658 = vmatprep.subr.mxu1 %v18003_v6 }
0x5258   : > { %v10907_v62 = vpop.f32.mrb[170].mxu1 }
0x5259   : > { %v16632_v33 = vpop.f32.mrb[171].mxu1  ;;  %16636 = vmatmul.mubr.msk.f32.vlgmr.msra.gmra.mrb[154].mxu0 %vm5450_vm2, %v10907_v62 }
0x525a   : > { %16645 = vmatprep.mubr.msk.f32.mxu0 %vm18002_vm0, %v18003_v6 }
0x525c   : > { %v11062_v63 = vpop.f32.mrb[172].mxu1 }
0x525d   : > { %v11066_v18 = vmul.f32 0.5, %v11062_v63  ;;  %v16642_v8 = vpop.f32.mrb[173].mxu1 }
0x525f   : > { %v11067_v35 = vadd.f32 %v19703_v36, %v11066_v18 }
0x5261   : > { %v11068_v0 = vsel %vm1677_vm5, %v11067_v35, -inf }
0x5262   : > { %11069 = vmax.xlane.f32.xlu1 %v11068_v0 }
0x5273   : > { %11234 = vrot.lane.b32.xlu1 %v19683_v38, %s20458_s4 }
0x5277   : > { %11232 = vrot.lane.b32.xlu1 %v19683_v38, %s20457_s15 }
0x52ef   : > { %v11070_v43 = vpop.xlane.xlu1 %11069 }
0x52f0   : > { %v11071_v12 = vsub.f32 %v11067_v35, %v11070_v43 }
0x52f2   : > { %v11072_v17 = vmul.f32 1.442695, %v11071_v12 }
0x52f3   : > { %v11235_v11 = vpop.permute.xlu1 %11234 }
0x52f4   : > { %17837 = vpow2.f32 %v11072_v17 }
0x52f7   : > { %v11233_v29 = vpop.permute.xlu1 %11232 }
0x52fe   : > { %v17838_v56 = vpop.eup %17837 }
0x52ff   : > { %v11074_v2 = vsel %vm1677_vm5, %v17838_v56, 0.0 }
0x5300   : > { %11075 = vadd.xlane.f32.xlu0 %v11074_v2 }
0x5316   : > { %11079 = vrot.lane.b32.xlu0 %v19683_v38, %s20429_s17  ;;  %s20472_s17 = smov 44  }
0x532c   : > { %v10983_v1 = vpop.f32.mrb[154].mxu0 }
0x532d   : > { %v10987_v50 = vadd.f32 %v10983_v1, %v10743_v59  ;;  %v16637_v4 = vpop.f32.mrb[155].mxu0 }
0x538d   : > { %v11076_v15 = vpop.xlane.xlu0 %11075 }
0x538e   : > { %17839 = vrcp.f32 %v11076_v15 }
0x5391   : > { %v11080_v5 = vpop.permute.xlu0 %11079 }
0x5392   : > { %16644 = vmatpush3.msra.mxu0 %v11080_v5 }
0x5393   : > { %16653 = vmatprep.subr.mxu0 %v18003_v6 }
0x5398   : > { %v17840_v7 = vpop.eup %17839 }
0x5399   : > { %v11078_v14 = vmul.f32 %v17840_v7, %v17838_v56  ;;  %v15026_v56 = vld [vmem:[%s20440_s14 + $0x38] sm:$0xff] }
0x539a   : > { %v11887_v2 = vrot.slane %v15026_v56, 4 }
0x539b   : > { %16646 = vmatmul.mubr.msk.f32.vlgmr.msra.gmra.mrb[156].mxu0 %vm1677_vm5, %v11078_v14 }
0x539c   : > { %16654 = vmatpush3.xpose.msk.msra.mxu0 %vm5450_vm2, %v11235_v11  ;;  %16655 = vmatprep.mubr.msk.f32.mxu0 %vm18002_vm0, %v18003_v6 }
0x539d   : > { %16663 = vmatprep.subr.mxu0 %v18003_v6 }
0x539f   : > { %16656 = vmatmul.mubr.msk.f32.vlgmr.msra.gmra.mrb[158].mxu0 %vm5450_vm2, %v11233_v29 }
0x53a0   : > { %16665 = vmatprep.mubr.msk.f32.mxu0 %vm18002_vm0, %v18003_v6  ;;  %16664 = vmatpush3.msk.msra.mxu0 %vm5786_vm4, %v11399_v21 }
0x53a1   : > { %16673 = vmatprep.subr.mxu0 %v18003_v6 }
0x546e   : > { %v11151_v31 = vpop.f32.mrb[156].mxu0 }
0x546f   : > { %v16647_v32 = vpop.f32.mrb[157].mxu0  ;;  %16651 = vmatmul.mubr.msk.f32.vlgmr.msra.gmra.mrb[174].mxu1 %vm5450_vm2, %v11151_v31 }
0x5470   : > { %16660 = vmatprep.mubr.msk.f32.mxu1 %vm18002_vm0, %v18003_v6 }
0x5472   : > { %v11306_v34 = vpop.f32.mrb[158].mxu0 }
0x5473   : > { %v11310_v47 = vmul.f32 0.5, %v11306_v34  ;;  %v16657_v9 = vpop.f32.mrb[159].mxu0 }
0x5475   : > { %v11311_v40 = vadd.f32 %v19703_v36, %v11310_v47 }
0x5477   : > { %v11312_v24 = vsel %vm1677_vm5, %v11311_v40, -inf }
0x5478   : > { %11313 = vmax.xlane.f32.xlu0 %v11312_v24  ;;  %v15080_v24 = vld [vmem:[%s20441_s21 + $0x20] sm:$0xff] }
0x548e   : > { %11323 = vrot.lane.b32.xlu0 %v19683_v38, %s20472_s17  ;;  %s20476_s17 = sld [smem:[#allocation17_spill]] }
0x5492   : > { %11476 = vrot.lane.b32.xlu0 %v19683_v38, %s20431_s20 }
0x5505   : > { %v11314_v39 = vpop.xlane.xlu0 %11313 }
0x5506   : > { %v11315_v23 = vsub.f32 %v11311_v40, %v11314_v39  ;;  %v15081_v39 = vld [vmem:[%s20441_s21 + $0x28] sm:$0xff] }
0x5508   : > { %v11316_v25 = vmul.f32 1.442695, %v11315_v23  ;;  %v17175_v23 = vpack.c.bf16 %v15081_v39, %v15080_v24 }
0x5509   : > { %v11324_v13 = vpop.permute.xlu0 %11323 }
0x550a   : > { %17841 = vpow2.f32 %v11316_v25  ;;  %16659 = vmatpush3.msra.mxu1 %v11324_v13  ;;  %v15082_v25 = vld [vmem:[%s20441_s21 + $0x30] sm:$0xff]  ;;  %v15083_v13 = vld [vmem:[%s20441_s21 + $0x38] sm:$0xff] }
0x550b   : > { %16668 = vmatprep.subr.mxu1 %v18003_v6 }
0x550d   : > { %v11477_v48 = vpop.permute.xlu0 %11476 }
0x5514   : > { %v17842_v41 = vpop.eup %17841 }
0x5515   : > { %v11318_v27 = vsel %vm1677_vm5, %v17842_v41, 0.0 }
0x5516   : > { %11319 = vadd.xlane.f32.xlu1 %v11318_v27 }
0x5527   : > { %11478 = vrot.lane.b32.xlu1 %v19683_v38, %s20430_s19 }
0x5542   : > { %v11227_v42 = vpop.f32.mrb[174].mxu1 }
0x5543   : > { %v11231_v16 = vadd.f32 %v11227_v42, %v10987_v50  ;;  %v16652_v49 = vpop.f32.mrb[175].mxu1  ;;  %v17178_v42 = vpack.c.bf16 %v15083_v13, %v15082_v25 }
0x55a3   : > { %v11320_v20 = vpop.xlane.xlu1 %11319 }
0x55a4   : > { %17843 = vrcp.f32 %v11320_v20 }
0x55a7   : > { %v11479_v53 = vpop.permute.xlu1 %11478 }
0x55ae   : > { %v17844_v54 = vpop.eup %17843 }
0x55af   : > { %v11322_v45 = vmul.f32 %v17844_v54, %v17842_v41 }
0x55b1   : > { %16661 = vmatmul.mubr.msk.f32.vlgmr.msra.gmra.mrb[176].mxu1 %vm1677_vm5, %v11322_v45 }
0x55b2   : > { %16669 = vmatpush3.xpose.msk.msra.mxu1 %vm5450_vm2, %v11479_v53  ;;  %16670 = vmatprep.mubr.msk.f32.mxu1 %vm18002_vm0, %v18003_v6  ;;  %v15092_v53 = vld [vmem:[%s20444_s27 + $0x1] ss:$0 sm:$0xff] }
0x55b3   : > { %16678 = vmatprep.subr.mxu1 %v18003_v6 }
0x55b5   : > { %16671 = vmatmul.mubr.msk.f32.vlgmr.msra.gmra.mrb[178].mxu1 %vm5450_vm2, %v11477_v48 }
0x55b6   : > { %16680 = vmatprep.mubr.msk.f32.mxu1 %vm18002_vm0, %v18003_v6  ;;  %16679 = vmatpush3.msk.msra.mxu1 %vm5786_vm4, %v15026_v56 }
0x55b7   : > { %16688 = vmatprep.subr.mxu1 %v18003_v6 }
0x5684   : > { %v11395_v52 = vpop.f32.mrb[176].mxu1 }
0x5685   : > { %v16662_v55 = vpop.f32.mrb[177].mxu1  ;;  %16666 = vmatmul.mubr.msk.f32.vlgmr.msra.gmra.mrb[160].mxu0 %vm5450_vm2, %v11395_v52 }
0x5686   : > { %16675 = vmatprep.mubr.msk.f32.mxu0 %vm18002_vm0, %v18003_v6 }
0x5688   : > { %v11550_v57 = vpop.f32.mrb[178].mxu1 }
0x5689   : > { %v11554_v58 = vmul.f32 0.5, %v11550_v57  ;;  %v16672_v59 = vpop.f32.mrb[179].mxu1 }
0x568b   : > { %v11555_v60 = vadd.f32 %v19703_v36, %v11554_v58 }
0x568d   : > { %v11556_v10 = vsel %vm1677_vm5, %v11555_v60, -inf }
0x568e   : > { %11557 = vmax.xlane.f32.xlu1 %v11556_v10 }
0x569f   : > { %11722 = vrot.lane.b32.xlu1 %v19683_v38, %s20460_s10 }
0x56a3   : > { %11720 = vrot.lane.b32.xlu1 %v19683_v38, %s20459_s0 }
0x571b   : > { %v11558_v61 = vpop.xlane.xlu1 %11557 }
0x571c   : > { %v11559_v46 = vsub.f32 %v11555_v60, %v11558_v61 }
0x571e   : > { %v11560_v30 = vmul.f32 1.442695, %v11559_v46 }
0x571f   : > { %v11723_v43 = vpop.permute.xlu1 %11722 }
0x5720   : > { %17845 = vpow2.f32 %v11560_v30 }
0x5723   : > { %v11721_v17 = vpop.permute.xlu1 %11720 }
0x572a   : > { %v17846_v51 = vpop.eup %17845 }
0x572b   : > { %v11562_v62 = vsel %vm1677_vm5, %v17846_v51, 0.0 }
0x572c   : > { %11563 = vadd.xlane.f32.xlu0 %v11562_v62 }
0x5742   : > { %11567 = vrot.lane.b32.xlu0 %v19683_v38, %s20432_s25  ;;  %s20473_s25 = smov 36  }
0x5758   : > { %v11471_v33 = vpop.f32.mrb[160].mxu0 }
0x5759   : > { %v11475_v63 = vadd.f32 %v11471_v33, %v11231_v16  ;;  %v16667_v18 = vpop.f32.mrb[161].mxu0  ;;  %v15070_v16 = vld [vmem:[%s20443_s24 + $0x1] ss:$0 sm:$0xff] }
0x575a   : > { %v15076_v18 = vld [vmem:[%s20474_s3 + $0x28] sm:$0xff] }
0x57b9   : > { %v11564_v8 = vpop.xlane.xlu0 %11563 }
0x57ba   : > { %17847 = vrcp.f32 %v11564_v8 }
0x57bd   : > { %v11568_v35 = vpop.permute.xlu0 %11567 }
0x57be   : > { %16674 = vmatpush3.msra.mxu0 %v11568_v35  ;;  %v15077_v35 = vld [vmem:[%s20474_s3 + $0x30] sm:$0xff] }
0x57bf   : > { %16683 = vmatprep.subr.mxu0 %v18003_v6 }
0x57c4   : > { %v17848_v0 = vpop.eup %17847 }
0x57c5   : > { %v11566_v12 = vmul.f32 %v17848_v0, %v17846_v51  ;;  %v15078_v0 = vld [vmem:[%s20474_s3 + $0x38] sm:$0xff] }
0x57c7   : > { %16676 = vmatmul.mubr.msk.f32.vlgmr.msra.gmra.mrb[162].mxu0 %vm1677_vm5, %v11566_v12 }
0x57c8   : > { %16684 = vmatpush3.xpose.msk.msra.mxu0 %vm5450_vm2, %v11723_v43  ;;  %16685 = vmatprep.mubr.msk.f32.mxu0 %vm18002_vm0, %v18003_v6  ;;  %v17172_v43 = vpack.c.bf16 %v15078_v0, %v15077_v35 }
0x57c9   : > { %16693 = vmatprep.subr.mxu0 %v18003_v6 }
0x57cb   : > { %16686 = vmatmul.mubr.msk.f32.vlgmr.msra.gmra.mrb[164].mxu0 %vm5450_vm2, %v11721_v17 }
0x57cc   : > { %16695 = vmatprep.mubr.msk.f32.mxu0 %vm18002_vm0, %v18003_v6  ;;  %16694 = vmatpush3.msk.msra.mxu0 %vm5786_vm4, %v11887_v2 }
0x57cd   : > { %17174 = vmatprep.subr.bf16.mxu0 %v18001_v3 }
0x589a   : > { %v11639_v1 = vpop.f32.mrb[162].mxu0 }
0x589b   : > { %v16677_v50 = vpop.f32.mrb[163].mxu0  ;;  %16681 = vmatmul.mubr.msk.f32.vlgmr.msra.gmra.mrb[180].mxu1 %vm5450_vm2, %v11639_v1  ;;  %v15073_v1 = vld [vmem:[%s20475_s5 + $0x1] ss:$0 sm:$0xff] }
0x589c   : > { %16690 = vmatprep.mubr.msk.f32.mxu1 %vm18002_vm0, %v18003_v6 }
0x589e   : > { %v11794_v4 = vpop.f32.mrb[164].mxu0 }
0x589f   : > { %v11798_v15 = vmul.f32 0.5, %v11794_v4  ;;  %v16687_v5 = vpop.f32.mrb[165].mxu0  ;;  %v15074_v4 = vld [vmem:[%s20476_s17 + $0x1] ss:$0 sm:$0xff] }
0x58a1   : > { %v11799_v7 = vadd.f32 %v19703_v36, %v11798_v15 }
0x58a3   : > { %v11800_v11 = vsel %vm1677_vm5, %v11799_v7, -inf }
0x58a4   : > { %11801 = vmax.xlane.f32.xlu0 %v11800_v11 }
0x58ba   : > { %11811 = vrot.lane.b32.xlu0 %v19683_v38, %s20473_s25  ;;  %s20477_s25 = sld [smem:[#allocation13_spill]] }
0x5931   : > { %v11802_v14 = vpop.xlane.xlu0 %11801 }
0x5932   : > { %v11803_v29 = vsub.f32 %v11799_v7, %v11802_v14 }
0x5934   : > { %v11804_v19 = vmul.f32 1.442695, %v11803_v29  ;;  %v15090_v29 = vld [vmem:[%s20477_s25 + $0x1] ss:$0 sm:$0xff] }
0x5935   : > { %v11812_v21 = vpop.permute.xlu0 %11811 }
0x5936   : > { %17849 = vpow2.f32 %v11804_v19  ;;  %16689 = vmatpush3.msra.mxu1 %v11812_v21 }
0x5937   : > { %17168 = vmatprep.subr.bf16.mxu1 %v18001_v3 }
0x5940   : > { %v17850_v31 = vpop.eup %17849 }
0x5941   : > { %v11806_v36 = vsel %vm1677_vm5, %v17850_v31, 0.0 }
0x5942   : > { %11807 = vadd.xlane.f32.xlu1 %v11806_v36 }
0x596e   : > { %v11715_v32 = vpop.f32.mrb[180].mxu1 }
0x596f   : > { %v11719_v34 = vadd.f32 %v11715_v32, %v11475_v63  ;;  %v16682_v47 = vpop.f32.mrb[181].mxu1  ;;  %v15075_v63 = vld [vmem:[%s20474_s3 + $0x20] sm:$0xff] }
0x5970   : > { %v17169_v8 = vpack.c.bf16 %v15076_v18, %v15075_v63 }
0x59cf   : > { %v11808_v38 = vpop.xlane.xlu1 %11807 }
0x59d0   : > { %17851 = vrcp.f32 %v11808_v38 }
0x59da   : > { %v17852_v9 = vpop.eup %17851 }
0x59db   : > { %v11810_v40 = vmul.f32 %v17852_v9, %v17850_v31 }
0x59dd   : > { %16691 = vmatmul.mubr.msk.f32.vlgmr.msra.gmra.mrb[182].mxu1 %vm1677_vm5, %v11810_v40 }
0x59de   : > { %16706 = vmatprep.mubr.msk.f32.mxu1 %vm18002_vm0, %v18003_v6  ;;  %17170 = vmatpush3.bf16.msra.mxu1 %v17169_v8 }
0x59df   : > { %17171 = vmatprep.subr.bf16.mxu1 %v18001_v3 }
0x59e2   : > { %17173 = vmatpush3.bf16.msra.mxu1 %v17172_v43 }
0x59e3   : > { %17180 = vmatprep.subr.bf16.mxu1 %v18001_v3 }
0x5ab0   : > { %v11883_v41 = vpop.f32.mrb[182].mxu1 }
0x5ab1   : > { %v16692_v27 = vpop.f32.mrb[183].mxu1  ;;  %16696 = vmatmul.mubr.msk.f32.vlgmr.msra.gmra.mrb[166].mxu0 %vm5450_vm2, %v11883_v41 }
0x5ab2   : > { %17176 = vmatpush3.bf16.msra.mxu0 %v17175_v23  ;;  %16717 = vmatprep.mubr.msk.f32.mxu0 %vm18002_vm0, %v18003_v6 }
0x5ab3   : > { %17177 = vmatprep.subr.bf16.mxu0 %v18001_v3 }
0x5ab6   : > { %17179 = vmatpush3.bf16.msra.mxu0 %v17178_v42 }
0x5ab7   : > { %17184 = vmatprep.subr.bf16.mxu0 %v18001_v3 }
0x5ab9   : > { %16718 = vmatmul.mubr.msk.f32.vlgmr.msra.gmra.mrb[168].mxu0 %vm1503_vm3, %v19333_v26 }
0x5aba   : > { %16720 = vmatprep.mubr.msk.f32.mxu0 %vm18002_vm0, %v18003_v6 }
0x5abd   : > { %16721 = vmatmul.mubr.msk.f32.gmra.mrb[170].mxu0 %vm1503_vm3, %v19341_v28 }
0x5abe   : > { %16723 = vmatprep.mubr.msk.f32.mxu0 %vm18002_vm0, %v18003_v6 }
0x5ac1   : > { %16724 = vmatmul.mubr.msk.f32.gmra.mrb[172].mxu0 %vm1503_vm3, %v19348_v37 }
0x5ac2   : > { %16741 = vmatprep.mubr.msk.f32.mxu0 %vm18002_vm0, %v18003_v6 }
0x5b84   : > { %v11959_v49 = vpop.f32.mrb[166].mxu0 }
0x5b85   : > { %v11963_v20 = vadd.f32 %v11959_v49, %v11719_v34  ;;  %v16697_v54 = vpop.f32.mrb[167].mxu0 }
0x5b87   : > { %v11970_v26 = vadd.f32 %v15070_v16, %v11963_v20 }
0x5b89   : > { %v11971_v45 = vadd.f32 %v11970_v26, %v19676_v22 }
0x5b8b   : > { %v11976_v48 = vsel %vm1503_vm3, %v11971_v45, 0.0 }
0x5b8c   : > { %v12175_v28 = vpop.f32.mrb[168].mxu0  ;;  %11977 = vadd.xlane.f32.xlu1 %v11976_v48 }
0x5b8d   : > { %v12176_v52 = vadd.f32 %v15092_v53, %v12175_v28  ;;  %v16719_v55 = vpop.f32.mrb[169].mxu0 }
0x5b90   : > { %v12180_v57 = vpop.f32.mrb[170].mxu0 }
0x5b91   : > { %v12181_v37 = vadd.f32 %v15092_v53, %v12180_v57  ;;  %v16722_v58 = vpop.f32.mrb[171].mxu0 }
0x5b93   : > { %v19900_v59 = vpack.i.bf16 %v12181_v37, %v12176_v52  ;;  %v17181_v60 = vpack.c.bf16 %v12181_v37, %v12176_v52 }
0x5b94   : > { %v12185_v10 = vpop.f32.mrb[172].mxu0 }
0x5b95   : > { %v19902_v61 = vadd.f32 %v15092_v53, %v12185_v10  ;;  %v16725_v22 = vpop.f32.mrb[173].mxu0 }
0x5b97   : > { %12372 = vrot.lane.b32.xlu0 %v19902_v61, %s20446_s29 }
0x5c09   : > { %v12373_v32 = vpop.permute.xlu0 %12372 }
0x5c19   : > { %v11978_v46 = vpop.xlane.xlu1 %11977 }
0x5c1a   : > { %v11979_v30 = vmul.f32 0.03125, %v11978_v46 }
0x5c1c   : > { %v11980_v51 = vsub.f32 %v11971_v45, %v11979_v30 }
0x5c1e   : > { %v11981_v62 = vmul.f32 %v11980_v51, %v11980_v51 }
0x5c20   : > { %v11982_v33 = vsel %vm1503_vm3, %v11981_v62, 0.0 }
0x5c21   : > { %11983 = vadd.xlane.f32.xlu1 %v11982_v33 }
0x5c32   : > { %17527 = vrot.lane.b32.xlu1 %v19900_v59, %s20446_s29 }
0x5c36   : > { %12705 = vrot.lane.b32.xlu1 %v19902_v61, %s20424_s16 }
0x5cae   : > { %v11984_v12 = vpop.xlane.xlu1 %11983 }
0x5caf   : > { %v11985_v17 = vmul.f32 0.03125, %v11984_v12 }
0x5cb1   : > { %v11986_v56 = vadd.f32 1e-05, %v11985_v17 }
0x5cb2   : > { %v17528_v7 = vpop.permute.xlu1 %17527 }
0x5cb3   : > { %17853 = vrsqrt.f32 %v11986_v56  ;;  %v17530_v11 = vunpack.i.h.bf16 %v17528_v7  ;;  %v17529_v14 = vunpack.i.l.bf16 %v17528_v7 }
0x5cb5   : > { %v17188_v36 = vpack.c.bf16 %v17530_v11, %v17529_v14 }
0x5cb6   : > { %v12706_v24 = vpop.permute.xlu1 %12705 }
0x5cbd   : > { %v17854_v2 = vpop.eup %17853 }
0x5cbe   : > { %v11988_v50 = vmul.f32 %v17854_v2, %v11980_v51 }
0x5cc0   : > { %v11995_v15 = vmul.f32 %v15073_v1, %v11988_v50 }
0x5cc2   : > { %v19919_v5 = vadd.f32 %v15074_v4, %v11995_v15 }
0x5cc4   : > { %16707 = vmatmul.mubr.msk.f32.vlgmr.msra.gmra.mrb[184].mxu1 %vm1503_vm3, %v19919_v5 }
0x5cc5   : > { %17183 = vmatpush3.bf16.xpose.msk.msra.mxu1 %vm19381_vm6, %v17181_v60  ;;  %16732 = vmatprep.mubr.msk.f32.mxu1 %vm18002_vm0, %v18003_v6 }
0x5cc6   : > { %16730 = vmatprep.subr.mxu1 %v18003_v6 }
0x5ccd   : > { %16731 = vmatpush3.xpose.msk.msra.mxu1 %vm5450_vm2, %v19902_v61 }
0x5cce   : > { %17187 = vmatprep.subr.bf16.mxu1 %v18001_v3 }
0x5d97   : > { %v12099_v19 = vpop.f32.mrb[184].mxu1 }
0x5d98   : > { %v19932_v21 = vadd.f32 %v15090_v29, %v12099_v19  ;;  %v16708_v31 = vpop.f32.mrb[185].mxu1 }
0x5d9a   : > { %12366 = vrot.lane.b32.xlu0 %v19932_v21, %s20446_s29  ;;  %16733 = vmatmul.mubr.msk.f32.vlgmr.msra.gmra.mrb[186].mxu1 %vm5450_vm2, %v19932_v21  ;;  %s20478_s29 = sld [smem:[#allocation15_spill]] }
0x5d9b   : > { %17190 = vmatpush3.bf16.xpose.msk.msra.mxu1 %vm19381_vm6, %v17188_v36  ;;  %16750 = vmatprep.mubr.msk.f32.mxu1 %vm18002_vm0, %v18003_v6 }
0x5d9c   : > { %16748 = vmatprep.subr.mxu1 %v18003_v6 }
0x5d9e   : > { %17532 = vrot.lane.b32.xlu0 %v19900_v59, %s20424_s16 }
0x5da2   : > { %12699 = vrot.lane.b32.xlu0 %v19932_v21, %s20424_s16 }
0x5da3   : > { %16749 = vmatpush3.xpose.msk.msra.mxu1 %vm5450_vm2, %v12373_v32  ;;  %v15085_v32 = vld [vmem:[%s20478_s29 + $0x20] sm:$0xff] }
0x5da4   : > { %17194 = vmatprep.subr.bf16.mxu1 %v18001_v3 }
0x5e0c   : > { %v12367_v34 = vpop.permute.xlu0 %12366 }
0x5e0d   : > { %16751 = vmatmul.mubr.msk.f32.vlgmr.msra.gmra.mrb[188].mxu1 %vm5450_vm2, %v12367_v34  ;;  %v12548_v34 = vrot.slane %v15085_v32, 4 }
0x5e0e   : > { %16778 = vmatprep.mubr.msk.f32.mxu1 %vm18002_vm0, %v18003_v6 }
0x5e10   : > { %v17533_v47 = vpop.permute.xlu0 %17532 }
0x5e11   : > { %v17535_v38 = vunpack.i.h.bf16 %v17533_v47  ;;  %v17534_v9 = vunpack.i.l.bf16 %v17533_v47 }
0x5e13   : > { %v17195_v40 = vpack.c.bf16 %v17535_v38, %v17534_v9 }
0x5e14   : > { %v12700_v39 = vpop.permute.xlu0 %12699 }
0x5e15   : > { %17197 = vmatpush3.bf16.xpose.msk.msra.mxu1 %vm19381_vm6, %v17195_v40 }
0x5e16   : > { %16776 = vmatprep.subr.mxu1 %v18003_v6 }
0x5e1d   : > { %16777 = vmatpush3.xpose.msk.msra.mxu1 %vm5450_vm2, %v12706_v24 }
0x5e1e   : > { %17201 = vmatprep.subr.bf16.mxu1 %v18001_v3 }
0x5e20   : > { %16779 = vmatmul.mubr.msk.f32.vlgmr.msra.gmra.mrb[190].mxu1 %vm5450_vm2, %v12700_v39 }
0x5e21   : > { %16801 = vmatprep.mubr.msk.f32.mxu1 %vm18002_vm0, %v18003_v6 }
0x5e6d   : > { %v12267_v23 = vpop.f32.mrb[186].mxu1 }
0x5e6e   : > { %v12271_v25 = vmul.f32 0.5, %v12267_v23  ;;  %v16734_v13 = vpop.f32.mrb[187].mxu1 }
0x5e70   : > { %v12272_v41 = vsel %vm1773_vm7, %v12271_v25, -inf }
0x5e71   : > { %12273 = vmax.xlane.f32.xlu1 %v12272_v41 }
0x5e82   : > { %17537 = vrot.lane.b32.xlu1 %v19900_v59, %s20422_s22 }
0x5e86   : > { %17542 = vrot.lane.b32.xlu1 %v19900_v59, %s20452_s11 }
0x5e8a   : > { %12468 = vrot.lane.b32.xlu1 %v19902_v61, %s20452_s11 }
0x5e8e   : > { %17547 = vrot.lane.b32.xlu1 %v19900_v59, %s20453_s1 }
0x5e92   : > { %12957 = vrot.lane.b32.xlu1 %v19932_v21, %s20453_s1 }
0x5ee0   : > { %v12448_v27 = vpop.f32.mrb[188].mxu1 }
0x5ee1   : > { %v12452_v42 = vmul.f32 0.5, %v12448_v27  ;;  %v16752_v16 = vpop.f32.mrb[189].mxu1 }
0x5ee3   : > { %v12453_v49 = vsel %vm1773_vm7, %v12452_v42, -inf }
0x5ee4   : > { %12454 = vmax.xlane.f32.xlu0 %v12453_v49 }
0x5ef3   : > { %v12781_v20 = vpop.f32.mrb[190].mxu1 }
0x5ef4   : > { %v16780_v54 = vpop.f32.mrb[191].mxu1  ;;  %v12785_v8 = vmul.f32 0.5, %v12781_v20 }
0x5ef6   : > { %v12786_v35 = vsel %vm1773_vm7, %v12785_v8, -inf }
0x5efe   : > { %v12274_v26 = vpop.xlane.xlu1 %12273 }
0x5eff   : > { %v12275_v45 = vsub.f32 %v12271_v25, %v12274_v26  ;;  %v15086_v26 = vld [vmem:[%s20478_s29 + $0x28] sm:$0xff] }
0x5f01   : > { %v12276_v53 = vmul.f32 1.442695, %v12275_v45 }
0x5f02   : > { %v17538_v48 = vpop.permute.xlu1 %17537 }
0x5f03   : > { %17855 = vpow2.f32 %v12276_v53  ;;  %v17540_v28 = vunpack.i.h.bf16 %v17538_v48  ;;  %v17539_v52 = vunpack.i.l.bf16 %v17538_v48 }
0x5f05   : > { %v17185_v55 = vpack.c.bf16 %v17540_v28, %v17539_v52 }
0x5f06   : > { %v17543_v57 = vpop.permute.xlu1 %17542 }
0x5f07   : > { %17186 = vmatpush3.bf16.msra.mxu0 %v17185_v55  ;;  %v17545_v17 = vunpack.i.h.bf16 %v17543_v57  ;;  %v17544_v56 = vunpack.i.l.bf16 %v17543_v57 }
0x5f08   : > { %16739 = vmatprep.subr.mxu0 %v18003_v6 }
0x5f09   : > { %v17192_v50 = vpack.c.bf16 %v17545_v17, %v17544_v56 }
0x5f0a   : > { %v12469_v37 = vpop.permute.xlu1 %12468 }
0x5f0d   : > { %v17856_v58 = vpop.eup %17855 }
0x5f0e   : > { %v17548_v60 = vpop.permute.xlu1 %17547  ;;  %v12278_v10 = vsel %vm1773_vm7, %v17856_v58, 0.0 }
0x5f0f   : > { %v17550_v22 = vunpack.i.h.bf16 %v17548_v60  ;;  %v17549_v46 = vunpack.i.l.bf16 %v17548_v60  ;;  %12279 = vadd.xlane.f32.xlu0 %v12278_v10 }
0x5f11   : > { %v17202_v30 = vpack.c.bf16 %v17550_v22, %v17549_v46 }
0x5f12   : > { %v12958_v7 = vpop.permute.xlu1 %12957 }
0x5f13   : > { %17204 = vmatpush3.bf16.xpose.msk.msra.mxu1 %vm19381_vm6, %v17202_v30 }
0x5f14   : > { %16799 = vmatprep.subr.mxu1 %v18003_v6 }
0x5f71   : > { %v12455_v51 = vpop.xlane.xlu0 %12454 }
0x5f72   : > { %v12456_v62 = vsub.f32 %v12452_v42, %v12455_v51 }
0x5f74   : > { %v12457_v33 = vmul.f32 1.442695, %v12456_v62 }
0x5f76   : > { %17857 = vpow2.f32 %v12457_v33 }
0x5f80   : > { %v17858_v63 = vpop.eup %17857 }
0x5f81   : > { %v12459_v18 = vsel %vm1773_vm7, %v17858_v63, 0.0 }
0x5f82   : > { %12460 = vadd.xlane.f32.xlu0 %v12459_v18 }
0x5f98   : > { %12287 = vrot.lane.b32.xlu0 %v19902_v61, %s20422_s22 }
0x5f9c   : > { %12963 = vrot.lane.b32.xlu0 %v19902_v61, %s20453_s1  ;;  %v12280_v0 = vpop.xlane.xlu0 %12279  ;;  %s20487_s1 = sld [smem:[#allocation50_spill]] }
0x5f9d   : > { %17859 = vrcp.f32 %v12280_v0 }
0x5fa7   : > { %v17860_v12 = vpop.eup %17859 }
0x5fa8   : > { %v12282_v2 = vmul.f32 %v17860_v12, %v17856_v58 }
0x5fbb   : > { %12787 = vmax.xlane.f32.xlu0 %v12786_v35 }
0x5fd1   : > { %17552 = vrot.lane.b32.xlu0 %v19900_v59, %s20423_s23 }
0x600f   : > { %v12461_v43 = vpop.xlane.xlu0 %12460 }
0x6010   : > { %17861 = vrcp.f32 %v12461_v43 }
0x6013   : > { %v12288_v1 = vpop.permute.xlu0 %12287 }
0x6014   : > { %16740 = vmatpush3.msk.msra.mxu0 %vm1825_vm9, %v12288_v1 }
0x6015   : > { %16742 = vmatmul.mubr.msk.f32.vlgmr.msra.gmra.mrb[174].mxu0 %vm1773_vm7, %v12282_v2  ;;  %17191 = vmatprep.subr.bf16.mxu0 %v18001_v3 }
0x6016   : > { %17193 = vmatpush3.bf16.msra.mxu0 %v17192_v50  ;;  %16759 = vmatprep.mubr.msk.f32.mxu0 %vm18002_vm0, %v18003_v6 }
0x6017   : > { %v12964_v4 = vpop.permute.xlu0 %12963  ;;  %16757 = vmatprep.subr.mxu0 %v18003_v6 }
0x6018   : > { %16800 = vmatpush3.xpose.msk.msra.mxu1 %vm5450_vm2, %v12964_v4 }
0x6019   : > { %17212 = vmatprep.subr.bf16.mxu1 %v18001_v3 }
0x601a   : > { %v17862_v15 = vpop.eup %17861  ;;  %16758 = vmatpush3.msk.msra.mxu0 %vm1825_vm9, %v12469_v37 }
0x601b   : > { %v12463_v11 = vmul.f32 %v17862_v15, %v17858_v63  ;;  %16802 = vmatmul.mubr.msk.f32.vlgmr.msra.gmra.mrb[192].mxu1 %vm5450_vm2, %v12958_v7  ;;  %16762 = vmatprep.subr.mxu0 %v18003_v6 }
0x601c   : > { %16833 = vmatprep.mubr.msk.f32.mxu1 %vm18002_vm0, %v18003_v6 }
0x601d   : > { %16760 = vmatmul.mubr.msk.f32.vlgmr.msra.gmra.mrb[176].mxu0 %vm1773_vm7, %v12463_v11 }
0x601e   : > { %16764 = vmatprep.mubr.msk.f32.mxu0 %vm18002_vm0, %v18003_v6  ;;  %16763 = vmatpush3.msk.msra.mxu0 %vm5786_vm4, %v12548_v34 }
0x601f   : > { %16767 = vmatprep.subr.mxu0 %v18003_v6 }
0x6048   : > { %v12788_v14 = vpop.xlane.xlu0 %12787 }
0x6049   : > { %v12789_v29 = vsub.f32 %v12785_v8, %v12788_v14  ;;  %v13138_v8 = vrot.slane %v15086_v26, 4 }
0x604b   : > { %v12790_v19 = vmul.f32 1.442695, %v12789_v29 }
0x604c   : > { %v17553_v40 = vpop.permute.xlu0 %17552 }
0x604d   : > { %17863 = vpow2.f32 %v12790_v19  ;;  %v17555_v25 = vunpack.i.h.bf16 %v17553_v40  ;;  %v17554_v13 = vunpack.i.l.bf16 %v17553_v40 }
0x604f   : > { %v17199_v16 = vpack.c.bf16 %v17555_v25, %v17554_v13 }
0x6057   : > { %v17864_v31 = vpop.eup %17863 }
0x6058   : > { %v12792_v36 = vsel %vm1773_vm7, %v17864_v31, 0.0 }
0x6059   : > { %12793 = vadd.xlane.f32.xlu1 %v12792_v36 }
0x606a   : > { %12801 = vrot.lane.b32.xlu1 %v19902_v61, %s20423_s23 }
0x60e6   : > { %v12794_v38 = vpop.xlane.xlu1 %12793 }
0x60e7   : > { %17865 = vrcp.f32 %v12794_v38 }
0x60e8   : > { %v12362_v47 = vpop.f32.mrb[174].mxu0 }
0x60e9   : > { %v16743_v9 = vpop.f32.mrb[175].mxu0 }
0x60ea   : > { %v12802_v54 = vpop.permute.xlu1 %12801 }
0x60ee   : > { %v13039_v24 = vpop.f32.mrb[192].mxu1 }
0x60ef   : > { %v13043_v39 = vmul.f32 0.5, %v13039_v24  ;;  %v16803_v23 = vpop.f32.mrb[193].mxu1 }
0x60f0   : > { %v12543_v41 = vpop.f32.mrb[176].mxu0 }
0x60f1   : > { %v16761_v27 = vpop.f32.mrb[177].mxu0  ;;  %16765 = vmatmul.mubr.msk.f32.vlgmr.msra.gmra.mrb[178].mxu0 %vm5450_vm2, %v12543_v41  ;;  %v13044_v42 = vsel %vm1773_vm7, %v13043_v39, -inf  ;;  %v17866_v49 = vpop.eup %17865 }
0x60f2   : > { %13045 = vmax.xlane.f32.xlu0 %v13044_v42  ;;  %16768 = vmatpush3.msk.msra.mxu0 %vm5786_vm4, %v15085_v32  ;;  %v12796_v20 = vmul.f32 %v17866_v49, %v17864_v31 }
0x60f3   : > { %16769 = vmatprep.mubr.msk.f32.mxu0 %vm18002_vm0, %v18003_v6  ;;  %17198 = vmatprep.subr.bf16.mxu0 %v18001_v3 }
0x60f5   : > { %16770 = vmatmul.mubr.msk.f32.vlgmr.msra.gmra.mrb[180].mxu0 %vm5450_vm2, %v12362_v47 }
0x60f6   : > { %17200 = vmatpush3.bf16.msra.mxu0 %v17199_v16  ;;  %16787 = vmatprep.mubr.msk.f32.mxu0 %vm18002_vm0, %v18003_v6  ;;  %v15087_v16 = vld [vmem:[%s20478_s29 + $0x30] sm:$0xff] }
0x60f7   : > { %16785 = vmatprep.subr.mxu0 %v18003_v6 }
0x60fa   : > { %16786 = vmatpush3.msk.msra.mxu0 %vm1825_vm9, %v12802_v54 }
0x60fb   : > { %16788 = vmatmul.mubr.msk.f32.vlgmr.msra.gmra.mrb[182].mxu0 %vm1773_vm7, %v12796_v20  ;;  %16790 = vmatprep.subr.mxu0 %v18003_v6 }
0x60fc   : > { %16792 = vmatprep.mubr.msk.f32.mxu0 %vm18002_vm0, %v18003_v6  ;;  %16791 = vmatpush3.msk.msra.mxu0 %vm5786_vm4, %v15086_v26 }
0x60fd   : > { %17205 = vmatprep.subr.bf16.mxu0 %v18001_v3 }
0x6108   : > { %17557 = vrot.lane.b32.xlu0 %v19900_v59, %s20456_s7 }
0x610c   : > { %17562 = vrot.lane.b32.xlu0 %v19900_v59, %s20428_s12 }
0x6110   : > { %13215 = vrot.lane.b32.xlu0 %v19932_v21, %s20428_s12 }
0x617f   : > { %v13046_v45 = vpop.xlane.xlu0 %13045 }
0x6180   : > { %v13047_v53 = vsub.f32 %v13043_v39, %v13046_v45 }
0x6182   : > { %v13048_v48 = vmul.f32 1.442695, %v13047_v53 }
0x6183   : > { %v17558_v37 = vpop.permute.xlu0 %17557 }
0x6184   : > { %17867 = vpow2.f32 %v13048_v48  ;;  %v17560_v22 = vunpack.i.h.bf16 %v17558_v37  ;;  %v17559_v46 = vunpack.i.l.bf16 %v17558_v37 }
0x6186   : > { %v17206_v30 = vpack.c.bf16 %v17560_v22, %v17559_v46 }
0x6187   : > { %v17563_v17 = vpop.permute.xlu0 %17562 }
0x6188   : > { %v17565_v56 = vunpack.i.h.bf16 %v17563_v17  ;;  %v17564_v2 = vunpack.i.l.bf16 %v17563_v17 }
0x618a   : > { %v17209_v1 = vpack.c.bf16 %v17565_v56, %v17564_v2 }
0x618b   : > { %v13216_v7 = vpop.permute.xlu0 %13215 }
0x618e   : > { %v17868_v28 = vpop.eup %17867 }
0x618f   : > { %v13050_v52 = vsel %vm1773_vm7, %v17868_v28, 0.0 }
0x6190   : > { %13051 = vadd.xlane.f32.xlu1 %v13050_v52 }
0x61a1   : > { %13059 = vrot.lane.b32.xlu1 %v19902_v61, %s20456_s7 }
0x61a5   : > { %13221 = vrot.lane.b32.xlu1 %v19902_v61, %s20428_s12  ;;  %s20481_s12 = sld [smem:[#allocation9_spill]] }
0x61c4   : > { %v12620_v55 = vpop.f32.mrb[178].mxu0 }
0x61c5   : > { %v16766_v57 = vpop.f32.mrb[179].mxu0 }
0x61c8   : > { %v12695_v58 = vpop.f32.mrb[180].mxu0 }
0x61c9   : > { %v12696_v60 = vadd.f32 %v12695_v58, %v12620_v55  ;;  %v16771_v10 = vpop.f32.mrb[181].mxu0 }
0x61ce   : > { %v12876_v51 = vpop.f32.mrb[182].mxu0 }
0x61cf   : > { %v16789_v62 = vpop.f32.mrb[183].mxu0  ;;  %16793 = vmatmul.mubr.msk.f32.vlgmr.msra.gmra.mrb[184].mxu0 %vm5450_vm2, %v12876_v51 }
0x61d0   : > { %17207 = vmatpush3.bf16.msra.mxu0 %v17206_v30  ;;  %16810 = vmatprep.mubr.msk.f32.mxu0 %vm18002_vm0, %v18003_v6 }
0x61d1   : > { %16808 = vmatprep.subr.mxu0 %v18003_v6 }
0x621d   : > { %v13052_v33 = vpop.xlane.xlu1 %13051 }
0x621e   : > { %17869 = vrcp.f32 %v13052_v33 }
0x6221   : > { %v13060_v63 = vpop.permute.xlu1 %13059 }
0x6222   : > { %16809 = vmatpush3.msk.msra.mxu0 %vm1825_vm9, %v13060_v63 }
0x6223   : > { %16813 = vmatprep.subr.mxu0 %v18003_v6 }
0x6225   : > { %v13222_v15 = vpop.permute.xlu1 %13221 }
0x6228   : > { %v17870_v18 = vpop.eup %17869 }
0x6229   : > { %v13054_v35 = vmul.f32 %v17870_v18, %v17868_v28 }
0x622b   : > { %16811 = vmatmul.mubr.msk.f32.vlgmr.msra.gmra.mrb[186].mxu0 %vm1773_vm7, %v13054_v35 }
0x622c   : > { %16814 = vmatpush3.msk.msra.mxu0 %vm5786_vm4, %v13138_v8  ;;  %16815 = vmatprep.mubr.msk.f32.mxu0 %vm18002_vm0, %v18003_v6 }
0x622d   : > { %17208 = vmatprep.subr.bf16.mxu0 %v18001_v3 }
0x62a2   : > { %v12952_v0 = vpop.f32.mrb[184].mxu0 }
0x62a3   : > { %v12956_v43 = vadd.f32 %v12952_v0, %v12696_v60  ;;  %v16794_v12 = vpop.f32.mrb[185].mxu0 }
0x62a4   : > { %v13654_v12 = vrot.slane %v15087_v16, 4 }
0x62fe   : > { %v13134_v50 = vpop.f32.mrb[186].mxu0 }
0x62ff   : > { %v16812_v4 = vpop.f32.mrb[187].mxu0  ;;  %16816 = vmatmul.mubr.msk.f32.vlgmr.msra.gmra.mrb[188].mxu0 %vm5450_vm2, %v13134_v50 }
0x6300   : > { %17211 = vmatpush3.bf16.xpose.msk.msra.mxu0 %vm19381_vm6, %v17209_v1  ;;  %16824 = vmatprep.mubr.msk.f32.mxu0 %vm18002_vm0, %v18003_v6 }
0x6301   : > { %16822 = vmatprep.subr.mxu0 %v18003_v6 }
0x6308   : > { %16823 = vmatpush3.xpose.msk.msra.mxu0 %vm5450_vm2, %v13222_v15 }
0x6309   : > { %17219 = vmatprep.subr.bf16.mxu0 %v18001_v3 }
0x630b   : > { %16825 = vmatmul.mubr.msk.f32.vlgmr.msra.gmra.mrb[190].mxu0 %vm5450_vm2, %v13216_v7 }
0x630c   : > { %16856 = vmatprep.mubr.msk.f32.mxu0 %vm18002_vm0, %v18003_v6 }
0x63d2   : > { %v13210_v11 = vpop.f32.mrb[188].mxu0 }
0x63d3   : > { %v13214_v14 = vadd.f32 %v13210_v11, %v12956_v43  ;;  %v16817_v29 = vpop.f32.mrb[189].mxu0 }
0x63de   : > { %v13297_v19 = vpop.f32.mrb[190].mxu0 }
0x63df   : > { %v13301_v31 = vmul.f32 0.5, %v13297_v19  ;;  %v16826_v36 = vpop.f32.mrb[191].mxu0 }
0x63e1   : > { %v13302_v32 = vsel %vm1773_vm7, %v13301_v31, -inf }
0x63e2   : > { %13303 = vmax.xlane.f32.xlu1 %v13302_v32 }
0x63f3   : > { %13317 = vrot.lane.b32.xlu1 %v19902_v61, %s20427_s8 }
0x63f7   : > { %17572 = vrot.lane.b32.xlu1 %v19900_v59, %s20457_s15 }
0x63fb   : > { %13473 = vrot.lane.b32.xlu1 %v19932_v21, %s20457_s15 }
0x646f   : > { %v13304_v34 = vpop.xlane.xlu1 %13303 }
0x6470   : > { %v13305_v47 = vsub.f32 %v13301_v31, %v13304_v34 }
0x6472   : > { %v13306_v38 = vmul.f32 1.442695, %v13305_v47 }
0x6473   : > { %v13318_v27 = vpop.permute.xlu1 %13317 }
0x6474   : > { %17871 = vpow2.f32 %v13306_v38 }
0x6477   : > { %v17573_v49 = vpop.permute.xlu1 %17572 }
0x6478   : > { %v17575_v20 = vunpack.i.h.bf16 %v17573_v49  ;;  %v17574_v54 = vunpack.i.l.bf16 %v17573_v49 }
0x647a   : > { %v17216_v26 = vpack.c.bf16 %v17575_v20, %v17574_v54 }
0x647b   : > { %v13474_v28 = vpop.permute.xlu1 %13473 }
0x647e   : > { %v17872_v9 = vpop.eup %17871 }
0x647f   : > { %v13308_v40 = vsel %vm1773_vm7, %v17872_v9, 0.0 }
0x6480   : > { %13309 = vadd.xlane.f32.xlu0 %v13308_v40 }
0x6496   : > { %17567 = vrot.lane.b32.xlu0 %v19900_v59, %s20427_s8  ;;  %s20479_s8 = sld [smem:[#allocation12_spill]] }
0x649a   : > { %13479 = vrot.lane.b32.xlu0 %v19902_v61, %s20457_s15  ;;  %s20485_s15 = sld [smem:[#allocation29_spill]] }
0x650d   : > { %v13310_v24 = vpop.xlane.xlu0 %13309 }
0x650e   : > { %17873 = vrcp.f32 %v13310_v24 }
0x6511   : > { %v17568_v39 = vpop.permute.xlu0 %17567 }
0x6512   : > { %v17570_v23 = vunpack.i.h.bf16 %v17568_v39  ;;  %v17569_v25 = vunpack.i.l.bf16 %v17568_v39 }
0x6514   : > { %v17213_v13 = vpack.c.bf16 %v17570_v23, %v17569_v25 }
0x6515   : > { %v13480_v48 = vpop.permute.xlu0 %13479 }
0x6516   : > { %17214 = vmatpush3.bf16.msra.mxu1 %v17213_v13 }
0x6517   : > { %16831 = vmatprep.subr.mxu1 %v18003_v6 }
0x6518   : > { %v17874_v41 = vpop.eup %17873 }
0x6519   : > { %v13312_v42 = vmul.f32 %v17874_v41, %v17872_v9 }
0x651a   : > { %16832 = vmatpush3.msk.msra.mxu1 %vm1825_vm9, %v13318_v27 }
0x651b   : > { %16834 = vmatmul.mubr.msk.f32.vlgmr.msra.gmra.mrb[194].mxu1 %vm1773_vm7, %v13312_v42  ;;  %16836 = vmatprep.subr.mxu1 %v18003_v6 }
0x651c   : > { %16837 = vmatpush3.msk.msra.mxu1 %vm5786_vm4, %v15087_v16  ;;  %16838 = vmatprep.mubr.msk.f32.mxu1 %vm18002_vm0, %v18003_v6  ;;  %v15088_v16 = vld [vmem:[%s20478_s29 + $0x38] sm:$0xff] }
0x651d   : > { %17215 = vmatprep.subr.bf16.mxu1 %v18001_v3 }
0x65ee   : > { %v13392_v45 = vpop.f32.mrb[194].mxu1 }
0x65ef   : > { %v16835_v53 = vpop.f32.mrb[195].mxu1  ;;  %16839 = vmatmul.mubr.msk.f32.vlgmr.msra.gmra.mrb[196].mxu1 %vm5450_vm2, %v13392_v45 }
0x65f0   : > { %17218 = vmatpush3.bf16.xpose.msk.msra.mxu1 %vm19381_vm6, %v17216_v26  ;;  %16847 = vmatprep.mubr.msk.f32.mxu1 %vm18002_vm0, %v18003_v6 }
0x65f1   : > { %16845 = vmatprep.subr.mxu1 %v18003_v6 }
0x65f8   : > { %16846 = vmatpush3.xpose.msk.msra.mxu1 %vm5450_vm2, %v13480_v48 }
0x65f9   : > { %17226 = vmatprep.subr.bf16.mxu1 %v18001_v3 }
0x65fb   : > { %16848 = vmatmul.mubr.msk.f32.vlgmr.msra.gmra.mrb[198].mxu1 %vm5450_vm2, %v13474_v28 }
0x65fc   : > { %16879 = vmatprep.mubr.msk.f32.mxu1 %vm18002_vm0, %v18003_v6 }
0x66c2   : > { %v13468_v52 = vpop.f32.mrb[196].mxu1 }
0x66c3   : > { %v13472_v55 = vadd.f32 %v13468_v52, %v13214_v14  ;;  %v16840_v57 = vpop.f32.mrb[197].mxu1 }
0x66ce   : > { %v13555_v37 = vpop.f32.mrb[198].mxu1 }
0x66cf   : > { %v13559_v58 = vmul.f32 0.5, %v13555_v37  ;;  %v16849_v60 = vpop.f32.mrb[199].mxu1 }
0x66d1   : > { %v13560_v10 = vsel %vm1773_vm7, %v13559_v58, -inf }
0x66d2   : > { %13561 = vmax.xlane.f32.xlu0 %v13560_v10 }
0x66e8   : > { %17577 = vrot.lane.b32.xlu0 %v19900_v59, %s20458_s4 }
0x66ec   : > { %17582 = vrot.lane.b32.xlu0 %v19900_v59, %s20431_s20 }
0x66f0   : > { %13731 = vrot.lane.b32.xlu0 %v19932_v21, %s20431_s20 }
0x675f   : > { %v13562_v22 = vpop.xlane.xlu0 %13561 }
0x6760   : > { %v13563_v46 = vsub.f32 %v13559_v58, %v13562_v22 }
0x6762   : > { %v13564_v30 = vmul.f32 1.442695, %v13563_v46 }
0x6763   : > { %v17578_v51 = vpop.permute.xlu0 %17577 }
0x6764   : > { %17875 = vpow2.f32 %v13564_v30  ;;  %v17580_v62 = vunpack.i.h.bf16 %v17578_v51  ;;  %v17579_v33 = vunpack.i.l.bf16 %v17578_v51 }
0x6766   : > { %v17220_v63 = vpack.c.bf16 %v17580_v62, %v17579_v33 }
0x6767   : > { %v17583_v56 = vpop.permute.xlu0 %17582 }
0x6768   : > { %17221 = vmatpush3.bf16.msra.mxu0 %v17220_v63  ;;  %v17585_v2 = vunpack.i.h.bf16 %v17583_v56  ;;  %v17584_v1 = vunpack.i.l.bf16 %v17583_v56 }
0x6769   : > { %16854 = vmatprep.subr.mxu0 %v18003_v6 }
0x676a   : > { %v17223_v50 = vpack.c.bf16 %v17585_v2, %v17584_v1 }
0x676b   : > { %v13732_v11 = vpop.permute.xlu0 %13731 }
0x676e   : > { %v17876_v18 = vpop.eup %17875 }
0x676f   : > { %v13566_v8 = vsel %vm1773_vm7, %v17876_v18, 0.0 }
0x6770   : > { %13567 = vadd.xlane.f32.xlu1 %v13566_v8 }
0x6781   : > { %13575 = vrot.lane.b32.xlu1 %v19902_v61, %s20458_s4  ;;  %s20483_s4 = sld [smem:[#allocation30_spill]] }
0x6785   : > { %13737 = vrot.lane.b32.xlu1 %v19902_v61, %s20431_s20  ;;  %s20482_s20 = sld [smem:[#allocation10_spill]] }
0x67fd   : > { %v13568_v35 = vpop.xlane.xlu1 %13567 }
0x67fe   : > { %17877 = vrcp.f32 %v13568_v35 }
0x6801   : > { %v13576_v0 = vpop.permute.xlu1 %13575 }
0x6802   : > { %16855 = vmatpush3.msk.msra.mxu0 %vm1825_vm9, %v13576_v0  ;;  %v14170_v0 = vrot.slane %v15088_v16, 4 }
0x6803   : > { %16859 = vmatprep.subr.mxu0 %v18003_v6 }
0x6805   : > { %v13738_v7 = vpop.permute.xlu1 %13737 }
0x6808   : > { %v17878_v43 = vpop.eup %17877 }
0x6809   : > { %v13570_v17 = vmul.f32 %v17878_v43, %v17876_v18 }
0x680b   : > { %16857 = vmatmul.mubr.msk.f32.vlgmr.msra.gmra.mrb[192].mxu0 %vm1773_vm7, %v13570_v17  ;;  %v15160_v17 = vld [vmem:[%s20479_s8 + $0x1] ss:$0 sm:$0xff] }
0x680c   : > { %16860 = vmatpush3.msk.msra.mxu0 %vm5786_vm4, %v13654_v12  ;;  %16861 = vmatprep.mubr.msk.f32.mxu0 %vm18002_vm0, %v18003_v6 }
0x680d   : > { %17222 = vmatprep.subr.bf16.mxu0 %v18001_v3 }
0x68de   : > { %v13650_v4 = vpop.f32.mrb[192].mxu0 }
0x68df   : > { %v16858_v15 = vpop.f32.mrb[193].mxu0  ;;  %16862 = vmatmul.mubr.msk.f32.vlgmr.msra.gmra.mrb[194].mxu0 %vm5450_vm2, %v13650_v4 }
0x68e0   : > { %17225 = vmatpush3.bf16.xpose.msk.msra.mxu0 %vm19381_vm6, %v17223_v50  ;;  %16870 = vmatprep.mubr.msk.f32.mxu0 %vm18002_vm0, %v18003_v6 }
0x68e1   : > { %16868 = vmatprep.subr.mxu0 %v18003_v6 }
0x68e8   : > { %16869 = vmatpush3.xpose.msk.msra.mxu0 %vm5450_vm2, %v13738_v7 }
0x68e9   : > { %17233 = vmatprep.subr.bf16.mxu0 %v18001_v3 }
0x68eb   : > { %16871 = vmatmul.mubr.msk.f32.vlgmr.msra.gmra.mrb[196].mxu0 %vm5450_vm2, %v13732_v11 }
0x68ec   : > { %16902 = vmatprep.mubr.msk.f32.mxu0 %vm18002_vm0, %v18003_v6 }
0x69b2   : > { %v13726_v14 = vpop.f32.mrb[194].mxu0 }
0x69b3   : > { %v13730_v29 = vadd.f32 %v13726_v14, %v13472_v55  ;;  %v16863_v19 = vpop.f32.mrb[195].mxu0 }
0x69be   : > { %v13813_v31 = vpop.f32.mrb[196].mxu0 }
0x69bf   : > { %v13817_v36 = vmul.f32 0.5, %v13813_v31  ;;  %v16872_v32 = vpop.f32.mrb[197].mxu0 }
0x69c1   : > { %v13818_v34 = vsel %vm1773_vm7, %v13817_v36, -inf }
0x69c2   : > { %13819 = vmax.xlane.f32.xlu1 %v13818_v34 }
0x69d3   : > { %13833 = vrot.lane.b32.xlu1 %v19902_v61, %s20430_s19 }
0x69d7   : > { %17592 = vrot.lane.b32.xlu1 %v19900_v59, %s20459_s0 }
0x69db   : > { %13989 = vrot.lane.b32.xlu1 %v19932_v21, %s20459_s0 }
0x6a4f   : > { %v13820_v47 = vpop.xlane.xlu1 %13819 }
0x6a50   : > { %v13821_v38 = vsub.f32 %v13817_v36, %v13820_v47 }
0x6a52   : > { %v13822_v9 = vmul.f32 1.442695, %v13821_v38  ;;  %v15172_v38 = vld [vmem:[%s20463_s26 + $0x40] sm:$0xff] }
0x6a53   : > { %v13834_v27 = vpop.permute.xlu1 %13833 }
0x6a54   : > { %17879 = vpow2.f32 %v13822_v9  ;;  %v15173_v9 = vld [vmem:[%s20463_s26 + $0x48] sm:$0xff] }
0x6a57   : > { %v17593_v49 = vpop.permute.xlu1 %17592 }
0x6a58   : > { %v17595_v20 = vunpack.i.h.bf16 %v17593_v49  ;;  %v17594_v54 = vunpack.i.l.bf16 %v17593_v49  ;;  %v15163_v49 = vld [vmem:[%s20464_s28 + $0x1] ss:$0 sm:$0xff] }
0x6a5a   : > { %v17230_v26 = vpack.c.bf16 %v17595_v20, %v17594_v54  ;;  %v15164_v54 = vld [vmem:[%s20465_s30 + $0x1] ss:$0 sm:$0xff] }
0x6a5b   : > { %v13990_v28 = vpop.permute.xlu1 %13989 }
0x6a5e   : > { %v17880_v40 = vpop.eup %17879 }
0x6a5f   : > { %v13824_v24 = vsel %vm1773_vm7, %v17880_v40, 0.0 }
0x6a60   : > { %13825 = vadd.xlane.f32.xlu0 %v13824_v24  ;;  %v17243_v24 = vpack.c.bf16 %v15173_v9, %v15172_v38 }
0x6a76   : > { %17587 = vrot.lane.b32.xlu0 %v19900_v59, %s20430_s19  ;;  %s20480_s19 = sld [smem:[#allocation27_spill]] }
0x6a7a   : > { %13995 = vrot.lane.b32.xlu0 %v19902_v61, %s20459_s0  ;;  %s20486_s0 = sld [smem:[#allocation55_spill]] }
0x6a7c   : > { %v15165_v31 = vld [vmem:[%s20480_s19 + $0x20] sm:$0xff]  ;;  %v15166_v36 = vld [vmem:[%s20480_s19 + $0x28] sm:$0xff]  ;;  %v15168_v34 = vld [vmem:[%s20480_s19 + $0x38] sm:$0xff] }
0x6a7d   : > { %v17237_v32 = vpack.c.bf16 %v15166_v36, %v15165_v31 }
0x6a80   : > { %s15190_s11 = sshll.u32 %s20486_s0, 7 }
0x6a81   : > { %s20213_s17 = scalar_lea.hbm %s20487_s1, %s15190_s11 }
0x6aed   : > { %v13826_v39 = vpop.xlane.xlu0 %13825 }
0x6aee   : > { %17881 = vrcp.f32 %v13826_v39  ;;  %v15175_v39 = vld [vmem:[%s20463_s26 + $0x58] sm:$0xff] }
0x6af1   : > { %v17588_v23 = vpop.permute.xlu0 %17587 }
0x6af2   : > { %v17590_v25 = vunpack.i.h.bf16 %v17588_v23  ;;  %v17589_v21 = vunpack.i.l.bf16 %v17588_v23 }
0x6af4   : > { %v17227_v13 = vpack.c.bf16 %v17590_v25, %v17589_v21  ;;  %v15176_v25 = vld [vmem:[%s20463_s26 + $0x60] sm:$0xff]  ;;  %v15177_v21 = vld [vmem:[%s20463_s26 + $0x68] sm:$0xff] }
0x6af5   : > { %v13996_v48 = vpop.permute.xlu0 %13995 }
0x6af6   : > { %17228 = vmatpush3.bf16.msra.mxu1 %v17227_v13  ;;  %v17249_v13 = vpack.c.bf16 %v15177_v21, %v15176_v25 }
0x6af7   : > { %16877 = vmatprep.subr.mxu1 %v18003_v6 }
0x6af8   : > { %v17882_v41 = vpop.eup %17881 }
0x6af9   : > { %v13828_v42 = vmul.f32 %v17882_v41, %v17880_v40  ;;  %v15174_v40 = vld [vmem:[%s20463_s26 + $0x50] sm:$0xff] }
0x6afa   : > { %16878 = vmatpush3.msk.msra.mxu1 %vm1825_vm9, %v13834_v27  ;;  %v17246_v23 = vpack.c.bf16 %v15175_v39, %v15174_v40 }
0x6afb   : > { %16880 = vmatmul.mubr.msk.f32.vlgmr.msra.gmra.mrb[200].mxu1 %vm1773_vm7, %v13828_v42  ;;  %16882 = vmatprep.subr.mxu1 %v18003_v6 }
0x6afc   : > { %16883 = vmatpush3.msk.msra.mxu1 %vm5786_vm4, %v15088_v16  ;;  %16884 = vmatprep.mubr.msk.f32.mxu1 %vm18002_vm0, %v18003_v6 }
0x6afd   : > { %17229 = vmatprep.subr.bf16.mxu1 %v18001_v3 }
0x6bce   : > { %v13908_v45 = vpop.f32.mrb[200].mxu1 }
0x6bcf   : > { %v16881_v53 = vpop.f32.mrb[201].mxu1  ;;  %16885 = vmatmul.mubr.msk.f32.vlgmr.msra.gmra.mrb[202].mxu1 %vm5450_vm2, %v13908_v45 }
0x6bd0   : > { %17232 = vmatpush3.bf16.xpose.msk.msra.mxu1 %vm19381_vm6, %v17230_v26  ;;  %16893 = vmatprep.mubr.msk.f32.mxu1 %vm18002_vm0, %v18003_v6  ;;  %v15178_v53 = vld [vmem:[%s20463_s26 + $0x70] sm:$0xff] }
0x6bd1   : > { %16891 = vmatprep.subr.mxu1 %v18003_v6 }
0x6bd8   : > { %16892 = vmatpush3.xpose.msk.msra.mxu1 %vm5450_vm2, %v13996_v48  ;;  %v15179_v48 = vld [vmem:[%s20463_s26 + $0x78] sm:$0xff] }
0x6bd9   : > { %17242 = vmatprep.subr.bf16.mxu1 %v18001_v3 }
0x6bdb   : > { %16894 = vmatmul.mubr.msk.f32.vlgmr.msra.gmra.mrb[204].mxu1 %vm5450_vm2, %v13990_v28  ;;  %v17252_v28 = vpack.c.bf16 %v15179_v48, %v15178_v53 }
0x6bdc   : > { %16937 = vmatprep.mubr.msk.f32.mxu1 %vm18002_vm0, %v18003_v6  ;;  %17244 = vmatpush3.bf16.msra.mxu1 %v17243_v24 }
0x6bdd   : > { %17245 = vmatprep.subr.bf16.mxu1 %v18001_v3 }
0x6be0   : > { %17247 = vmatpush3.bf16.msra.mxu1 %v17246_v23 }
0x6be1   : > { %17248 = vmatprep.subr.bf16.mxu1 %v18001_v3 }
0x6be4   : > { %17250 = vmatpush3.bf16.msra.mxu1 %v17249_v13 }
0x6be5   : > { %17251 = vmatprep.subr.bf16.mxu1 %v18001_v3 }
0x6be8   : > { %17253 = vmatpush3.bf16.msra.mxu1 %v17252_v28 }
0x6ca2   : > { %v13984_v52 = vpop.f32.mrb[202].mxu1 }
0x6ca3   : > { %v13988_v55 = vadd.f32 %v13984_v52, %v13730_v29  ;;  %v16886_v44 = vpop.f32.mrb[203].mxu1  ;;  %v15170_v52 = vld [vmem:[%s20481_s12 + $0x1] ss:$0 sm:$0xff]  ;;  %s18027_s12 = smov [#allocation2]  }
0x6cae   : > { %v14071_v57 = vpop.f32.mrb[204].mxu1 }
0x6caf   : > { %v14075_v37 = vmul.f32 0.5, %v14071_v57  ;;  %v16895_v58 = vpop.f32.mrb[205].mxu1 }
0x6cb0   : > { %v15181_v58 = vld [vmem:[%s20482_s20 + $0x1] ss:$0 sm:$0xff]  ;;  %s17896_s20 = sshll.u32 %s18027_s12, 4  ;;  %s17897_s20 = int_to_ptr.vmem [resolvable:$false] %s17896_s20 }
0x6cb1   : > { %v14076_v60 = vsel %vm1773_vm7, %v14075_v37, -inf }
0x6cb2   : > { %14077 = vmax.xlane.f32.xlu0 %v14076_v60 }
0x6cc8   : > { %17597 = vrot.lane.b32.xlu0 %v19900_v59, %s20460_s10 }
0x6d3f   : > { %v14078_v10 = vpop.xlane.xlu0 %14077 }
0x6d40   : > { %v14079_v22 = vsub.f32 %v14075_v37, %v14078_v10 }
0x6d42   : > { %v14080_v46 = vmul.f32 1.442695, %v14079_v22 }
0x6d43   : > { %v17598_v30 = vpop.permute.xlu0 %17597 }
0x6d44   : > { %17883 = vpow2.f32 %v14080_v46  ;;  %v17600_v51 = vunpack.i.h.bf16 %v17598_v30  ;;  %v17599_v62 = vunpack.i.l.bf16 %v17598_v30 }
0x6d46   : > { %v17234_v33 = vpack.c.bf16 %v17600_v51, %v17599_v62 }
0x6d48   : > { %17235 = vmatpush3.bf16.msra.mxu0 %v17234_v33 }
0x6d49   : > { %16900 = vmatprep.subr.mxu0 %v18003_v6 }
0x6d4e   : > { %v17884_v63 = vpop.eup %17883 }
0x6d4f   : > { %v14082_v18 = vsel %vm1773_vm7, %v17884_v63, 0.0 }
0x6d50   : > { %14083 = vadd.xlane.f32.xlu1 %v14082_v18  ;;  %v14495_v18 = vld [vmem:[%s20483_s4] sm:$0xff] }
0x6d61   : > { %14091 = vrot.lane.b32.xlu1 %v19902_v61, %s20460_s10  ;;  %s20484_s10 = sld [smem:[#allocation52_spill]] }
0x6d67   : > { %s1354_s16 = sand.u32 1, %s20484_s10   ;;  %s17898_s10 = scalar_lea.vmem %s17897_s20, 256 }
0x6d68   : > { %s14714_s22 = sshll.u32 %s1354_s16, 3  ;;  %s14581_s25 = scalar_lea.sflag [#allocation3], %s1354_s16 }
0x6d69   : > { %s1356_s7 = scalar_lea.vmem [#allocation2], %s14714_s22 }
0x6d6a   : > { %s14594_s5 = sshll.u32 %s1356_s7, 4  ;;  %s20215_s5 = int_to_ptr.vmem [resolvable:$true] %s14594_s5 }
0x6d6b   : > { %s17892_s8 = scalar_lea.vmem %s20215_s5, 128  ;;  %p17899_p0 = scmp.lt.s32.totalorder %s20215_s5, %s17897_s20 }
0x6d6c   : > { %p17893_p11 = scmp.ne.s32.totalorder %s20215_s5, %s17892_s8  ;;  %p17900_p1 = scmp.lt.s32.totalorder %s17898_s10, %s17892_s8 }
0x6d6e   : > { %p17894_p12 = pnand %p17893_p11, %p18301_p5  ;;  %p17901_p2 = por %p17900_p1, %p17899_p0 }
0x6d70   : > { %p17895_p13 = pneg %p17894_p12 }
0x6d72   : > { %p17902_p3 = pnand %p17901_p2, %p17895_p13 }
0x6ddd   : > { %v14084_v8 = vpop.xlane.xlu1 %14083 }
0x6dde   : > { %17885 = vrcp.f32 %v14084_v8  ;;  %v14496_v8 = vld [vmem:[%s20483_s4 + $0x8] sm:$0xff] }
0x6de1   : > { %v14092_v59 = vpop.permute.xlu1 %14091 }
0x6de2   : > { %16901 = vmatpush3.msk.msra.mxu0 %vm1825_vm9, %v14092_v59  ;;  %v17255_v59 = vpack.c.bf16 %v14496_v8, %v14495_v18 }
0x6de3   : > { %16905 = vmatprep.subr.mxu0 %v18003_v6 }
0x6de8   : > { %v17886_v35 = vpop.eup %17885 }
0x6de9   : > { %v14086_v43 = vmul.f32 %v17886_v35, %v17884_v63  ;;  %v14497_v35 = vld [vmem:[%s20483_s4 + $0x10] sm:$0xff] }
0x6deb   : > { %16903 = vmatmul.mubr.msk.f32.vlgmr.msra.gmra.mrb[198].mxu0 %vm1773_vm7, %v14086_v43 }
0x6dec   : > { %16906 = vmatpush3.msk.msra.mxu0 %vm5786_vm4, %v14170_v0  ;;  %16907 = vmatprep.mubr.msk.f32.mxu0 %vm18002_vm0, %v18003_v6  ;;  %v14498_v0 = vld [vmem:[%s20483_s4 + $0x18] sm:$0xff] }
0x6ded   : > { %17236 = vmatprep.subr.bf16.mxu0 %v18001_v3  ;;  %v17258_v43 = vpack.c.bf16 %v14498_v0, %v14497_v35 }
0x6ebe   : > { %v14166_v61 = vpop.f32.mrb[198].mxu0 }
0x6ebf   : > { %v16904_v12 = vpop.f32.mrb[199].mxu0  ;;  %16908 = vmatmul.mubr.msk.f32.vlgmr.msra.gmra.mrb[200].mxu0 %vm5450_vm2, %v14166_v61 }
0x6ec0   : > { %16918 = vmatprep.mubr.msk.f32.mxu0 %vm18002_vm0, %v18003_v6  ;;  %17238 = vmatpush3.bf16.msra.mxu0 %v17237_v32 }
0x6ec1   : > { %17239 = vmatprep.subr.bf16.mxu0 %v18001_v3 }
0x6f92   : > { %v14242_v56 = vpop.f32.mrb[200].mxu0 }
0x6f93   : > { %v14246_v2 = vadd.f32 %v14242_v56, %v13988_v55  ;;  %v16909_v1 = vpop.f32.mrb[201].mxu0 }
0x6f95   : > { %v14253_v50 = vadd.f32 %v15160_v17, %v14246_v2  ;;  %v15185_v2 = vld [vmem:[%s20468_s18 + $0x1] ss:$0 sm:$0xff] }
0x6f97   : > { %v14254_v4 = vadd.f32 %v14253_v50, %v19919_v5  ;;  %v15167_v5 = vld [vmem:[%s20480_s19 + $0x30] sm:$0xff]  ;;  %v15186_v50 = vld [vmem:[%s20469_s2 + $0x1] ss:$0 sm:$0xff] }
0x6f98   : > { %v17240_v47 = vpack.c.bf16 %v15168_v34, %v15167_v5 }
0x6f99   : > { %v14259_v15 = vsel %vm1503_vm3, %v14254_v4, 0.0 }
0x6f9a   : > { %14260 = vadd.xlane.f32.xlu0 %v14259_v15  ;;  %17241 = vmatpush3.bf16.msra.mxu0 %v17240_v47 }
0x6f9b   : > { %17254 = vmatprep.subr.bf16.mxu0 %v18001_v3 }
0x7027   : > { %v14261_v7 = vpop.xlane.xlu0 %14260 }
0x7028   : > { %v14262_v11 = vmul.f32 0.03125, %v14261_v7 }
0x702a   : > { %v14263_v14 = vsub.f32 %v14254_v4, %v14262_v11 }
0x702c   : > { %v14264_v29 = vmul.f32 %v14263_v14, %v14263_v14 }
0x702e   : > { %v14265_v19 = vsel %vm1503_vm3, %v14264_v29, 0.0 }
0x702f   : > { %14266 = vadd.xlane.f32.xlu1 %v14265_v19 }
0x70bc   : > { %v14267_v41 = vpop.xlane.xlu1 %14266 }
0x70bd   : > { %v14268_v27 = vmul.f32 0.03125, %v14267_v41 }
0x70bf   : > { %v14269_v42 = vadd.f32 1e-05, %v14268_v27 }
0x70c1   : > { %17887 = vrsqrt.f32 %v14269_v42 }
0x70cb   : > { %v17888_v16 = vpop.eup %17887 }
0x70cc   : > { %v14271_v20 = vmul.f32 %v17888_v16, %v14263_v14 }
0x70ce   : > { %v14278_v26 = vmul.f32 %v15163_v49, %v14271_v20 }
0x70d0   : > { %v14285_v45 = vadd.f32 %v15164_v54, %v14278_v26 }
0x70d2   : > { %16919 = vmatmul.mubr.msk.f32.vlgmr.msra.gmra.mrb[202].mxu0 %vm1503_vm3, %v14285_v45 }
0x70d3   : > { %16948 = vmatprep.mubr.msk.f32.mxu0 %vm18002_vm0, %v18003_v6  ;;  %17256 = vmatpush3.bf16.msra.mxu0 %v17255_v59 }
0x70d4   : > { %17257 = vmatprep.subr.bf16.mxu0 %v18001_v3  ;;  %v15187_v3 = vld [vmem:[%s20485_s15] ss:$0 sm:$0xff] }
0x70d7   : > { %17259 = vmatpush3.bf16.msra.mxu0 %v17258_v43 }
0x71a5   : > { %v14368_v55 = vpop.f32.mrb[202].mxu0 }
0x71a6   : > { %v14369_v44 = vadd.f32 %v15170_v52, %v14368_v55  ;;  %v16920_v57 = vpop.f32.mrb[203].mxu0 }
0x71a8   : > { %v14372_v37 = vmax.f32 %v14369_v44, 0.0 }
0x71aa   : > { %16938 = vmatmul.mubr.msk.f32.vlgmr.msra.gmra.mrb[206].mxu1 %vm3254_vm11, %v14372_v37 }
0x727d   : > { %v14459_v60 = vpop.f32.mrb[206].mxu1 }
0x727e   : > { %v14460_v10 = vadd.f32 %v15181_v58, %v14459_v60  ;;  %v16939_v22 = vpop.f32.mrb[207].mxu1 }
0x7280   : > { %v14463_v6 = vadd.f32 %v14460_v10, %v14285_v45 }
0x7282   : > { %v14468_v46 = vsel %vm1503_vm3, %v14463_v6, 0.0 }
0x7283   : > { %14469 = vadd.xlane.f32.xlu0 %v14468_v46 }
0x7310   : > { %v14470_v30 = vpop.xlane.xlu0 %14469 }
0x7311   : > { %v14471_v51 = vmul.f32 0.03125, %v14470_v30 }
0x7313   : > { %v14472_v62 = vsub.f32 %v14463_v6, %v14471_v51 }
0x7315   : > { %v14473_v33 = vmul.f32 %v14472_v62, %v14472_v62 }
0x7317   : > { %v14474_v63 = vsel %vm1503_vm3, %v14473_v33, 0.0 }
0x7318   : > { %14475 = vadd.xlane.f32.xlu0 %v14474_v63 }
0x73a5   : > { %v14476_v61 = vpop.xlane.xlu0 %14475 }
0x73a6   : > { %v14477_v12 = vmul.f32 0.03125, %v14476_v61 }
0x73a8   : > { %v14478_v17 = vadd.f32 1e-05, %v14477_v12 }
0x73aa   : > { %17889 = vrsqrt.f32 %v14478_v17 }
0x73b4   : > { %v17890_v56 = vpop.eup %17889 }
0x73b5   : > { %v14480_v1 = vmul.f32 %v17890_v56, %v14472_v62 }
0x73b7   : > { %v14487_v4 = vmul.f32 %v15185_v2, %v14480_v1 }
0x73b9   : > { %v14494_v15 = vadd.f32 %v15186_v50, %v14487_v4 }
0x73bb   : > { %16949 = vmatmul.mubr.msk.f32.vlgmr.msra.gmra.mrb[204].mxu0 %vm1503_vm3, %v14494_v15 }
0x748e   : > { %v14575_v7 = vpop.f32.mrb[204].mxu0 }
0x748f   : > { %v14576_v11 = vadd.f32 %v15187_v3, %v14575_v7  ;;  %v16950_v14 = vpop.f32.mrb[205].mxu0 }
0x7491   : > { %14579 = vst [vmem:[%s1356_s7] sm:$0xff] %v14576_v11 }
0x7492   : > { %17905 = shalt.err (!%p17902_p3)
}
0x7493   : > { %s17906_s15 = scalar_lea.hbm %s20213_s17, 128  ;;  %s17910_s0 = scalar_lea.hbm %s20487_s1, 256 }
0x7494   : > { %p17907_p4 = scmp.ne.s32.totalorder %s20213_s17, %s17906_s15  ;;  %p17911_p9 = scmp.lt.u32.totalorder %s20213_s17, %s20487_s1 }
0x7495   : > { %p17912_p10 = scmp.lt.u32.totalorder %s17910_s0, %s17906_s15  ;;  %p17914_p12 = scmp.lt.u32.totalorder %s17906_s15, %s20213_s17 }
0x7496   : > { %p17908_p7 = pnand %p17907_p4, %p18301_p5 }
0x7497   : > { %p17913_p11 = por %p17912_p10, %p17911_p9 }
0x7498   : > { %p17909_p8 = pneg %p17908_p7 }
0x7499   : > { %p17915_p0 = por %p17914_p12, %p17913_p11 }
0x749b   : > { %p17916_p13 = pnand %p17915_p0, %p17909_p8 }
0x749d   : > { %17919 = shalt.err (!%p17916_p13)
}
0x749e   : > { %17261 = dma.vmem_to_hbm [thread:$0]  (%p18301_p5), %s20215_s5, 128, %s20213_s17, %s14581_s25  }
0x749f PF: > { %s20489_s16 = sld [smem:[#allocation54_spill]]  ;;  %s20490_s22 = sld [smem:[#allocation51_spill]] }
0x74a5   : > { %p17267_p1 = scmp.ge.s32.totalorder %s20489_s16, 2  ;;  %s14606_s7 = sand.u32 1, %s20490_s22  }
0x74a6   : > { %s14607_s8 = scalar_lea.sflag [#allocation3], %s14606_s7 }
0x74a7   : > { %p17264_p2 = pnand %p17267_p1, %p18305_p6 }
0x74a9   : > { %17937 = dma.done.wait (!%p17264_p2), %s14607_s8, 128  }
0x74aa   : > { %17939 = vsyncadd (!%p17264_p2), %s14607_s8, 4294967168  ;;  %s20492_s15 = sld [smem:[#allocation56_spill]]  ;;  %s20493_s7 = sld [smem:[#allocation52_spill]] }
0x74ab   : > { %s20494_s10 = sld [smem:[#allocation53_spill]]  ;;  %s20495_s11 = sld [smem:[#allocation57_spill]] }
0x74b0   : > { %p101_p3 = scmp.ge.s32.totalorder %s20492_s15, 4  }
0x74b2   :  { %103 = sbr.rel (!%p101_p3) target bundleno = 98 (0x62), region = 315 }
0x74b9   :  { %14612 = vsyncpa [#allocation3], 1 }
0x74ba   :  { %14614 = vsyncpa [#allocation3 + $0x1], 1 }

</bundles_post_ra>
